<compile_context>
chip_gen: v6e
topology: v6e:2x2x1
jax: 0.10.0
libtpu: 0.0.40
codegen_flags: <defaults>
</compile_context>

<pallas_src>
import functools

import jax
import jax.numpy as jnp
from jax import lax
from jax.experimental import pallas as pl
from jax.experimental.pallas import tpu as pltpu


# ---------------------------------------------------------------------------
# Pallas kernel: single-pass matmul + fused shift (+ optional ReLU)
# ---------------------------------------------------------------------------
def _matmul_bias_act_kernel(x_ref, w_ref, b_ref, o_ref, *, relu):
    y = jnp.dot(x_ref[...], w_ref[...], preferred_element_type=jnp.float32)
    y = y + b_ref[...]
    if relu:
        y = jnp.maximum(y, 0.0)
    o_ref[...] = y.astype(o_ref.dtype)


def _round_up(x, m):
    return (x + m - 1) // m * m


def matmul_bias_act(x, w, shift, relu, tm=512):
    """y = relu_opt(x @ w + shift) via a single-K-pass Pallas matmul.

    x: (M, K) f32, w: (K, N) f32, shift: (N,) f32.  MXU inputs in bf16,
    accumulation + epilogue in f32.  K and N are full-dim blocks (no padding
    copies); only M is padded up to the tile size.
    """
    M, K = x.shape
    _, N = w.shape

    xb = x.astype(jnp.bfloat16)
    wb = w.astype(jnp.bfloat16)
    if M <= 1024:                      # single M tile for the small layers
        tm = _round_up(M, 8)
    Mp = _round_up(M, tm)
    if Mp != M:
        xb = jnp.pad(xb, ((0, Mp - M), (0, 0)))
    b2 = shift.reshape(1, N).astype(jnp.float32)

    out = pl.pallas_call(
        functools.partial(_matmul_bias_act_kernel, relu=relu),
        out_shape=jax.ShapeDtypeStruct((Mp, N), jnp.float32),
        grid_spec=pltpu.PrefetchScalarGridSpec(
            num_scalar_prefetch=0,
            grid=(Mp // tm,),
            in_specs=[
                pl.BlockSpec((tm, K), lambda i: (i, 0)),
                pl.BlockSpec((K, N), lambda i: (0, 0)),   # weights stay resident
                pl.BlockSpec((1, N), lambda i: (0, 0)),
            ],
            out_specs=pl.BlockSpec((tm, N), lambda i: (i, 0)),
        ),
        compiler_params=pltpu.CompilerParams(
            dimension_semantics=("parallel",),
            vmem_limit_bytes=32 * 1024 * 1024,
        ),
    )(xb, wb, b2)
    return out[:M] if Mp != M else out


# ---------------------------------------------------------------------------
# Conv / pooling glue (NHWC, plain JAX layout ops; matmul runs in Pallas)
# ---------------------------------------------------------------------------
def conv2d_nhwc(x, w, b, pad=(0, 0), relu=False, bn=None):
    """PyTorch-semantics Conv2d (+ optional eval-BatchNorm + ReLU), NHWC.

    x: (N, H, W, Cin); w: (Cout, Cin, kh, kw) PyTorch layout; b: (Cout,).
    Eval-mode BN (running_mean=0, running_var=1) is folded into the weight
    (scale) and shift, so the Pallas epilogue only adds + (optional) ReLU.
    """
    cout, cin, kh, kw = w.shape
    ph, pw = pad
    if ph or pw:
        x = jnp.pad(x, ((0, 0), (ph, ph), (pw, pw), (0, 0)))
    n, h, wd, _ = x.shape
    ho, wo = h - kh + 1, wd - kw + 1

    if kh == 1 and kw == 1:
        patches = x.reshape(n * ho * wo, cin)
    else:
        taps = [x[:, dy:dy + ho, dx:dx + wo, :]
                for dy in range(kh) for dx in range(kw)]
        patches = jnp.concatenate(taps, axis=-1).reshape(
            n * ho * wo, kh * kw * cin)

    wmat = jnp.transpose(w, (2, 3, 1, 0)).reshape(kh * kw * cin, cout)
    if bn is not None:
        gamma, beta = bn                   # running_mean=0, running_var=1
        wmat = wmat * gamma[None, :]
        shift = gamma * b + beta
    else:
        shift = b

    y = matmul_bias_act(patches, wmat, shift, relu)
    return y.reshape(n, ho, wo, cout)


def maxpool2d_nhwc(x, kh, kw, sh, sw):
    return lax.reduce_window(x, jnp.array(-jnp.inf, x.dtype), lax.max,
                             (1, kh, kw, 1), (1, sh, sw, 1), "VALID")


def avgpool2d_nhwc(x, kh, kw, sh, sw):
    s = lax.reduce_window(x, jnp.array(0.0, x.dtype), lax.add,
                          (1, kh, kw, 1), (1, sh, sw, 1), "VALID")
    return s * (1.0 / float(kh * kw))


def maxpool3d_nhwc(x, stride_c, sh, sw):
    # nn.MaxPool3d(kernel=(1,3,3)) applied to an NCHW tensor: channel-axis
    # window 1 with stride stride_c (pure subsample), then 3x3 spatial max
    # pool with strides (sh, sw).
    x = x[..., ::stride_c]
    return maxpool2d_nhwc(x, 3, 3, sh, sw)


def small_basic_block(x, p, out_bn=None, out_relu=False):
    x = conv2d_nhwc(x, p["w1"], p["b1"], relu=True)
    x = conv2d_nhwc(x, p["w2"], p["b2"], pad=(1, 0), relu=True)
    x = conv2d_nhwc(x, p["w3"], p["b3"], pad=(0, 1), relu=True)
    # the backbone's BatchNorm+ReLU following the block is fused into the
    # final 1x1 conv's weight/shift
    x = conv2d_nhwc(x, p["w4"], p["b4"], relu=out_relu, bn=out_bn)
    return x


# ---------------------------------------------------------------------------
# Deterministic parameter initialization (shapes from LPRNet.__init__)
# ---------------------------------------------------------------------------
def init_conv(key, cout, cin, kh, kw):
    k1, k2 = jax.random.split(key)
    fan = cin * kh * kw
    w = jax.random.normal(k1, (cout, cin, kh, kw), jnp.float32) / jnp.sqrt(fan)
    b = 0.05 * jax.random.normal(k2, (cout,), jnp.float32)
    return w, b


def init_bn(key, c):
    k1, k2 = jax.random.split(key)
    gamma = 1.0 + 0.1 * jax.random.normal(k1, (c,), jnp.float32)
    beta = 0.05 * jax.random.normal(k2, (c,), jnp.float32)
    return gamma, beta


def init_sbb(key, cin, cout):
    cm = cout // 4
    ks = jax.random.split(key, 4)
    w1, b1 = init_conv(ks[0], cm, cin, 1, 1)
    w2, b2 = init_conv(ks[1], cm, cm, 3, 1)
    w3, b3 = init_conv(ks[2], cm, cm, 1, 3)
    w4, b4 = init_conv(ks[3], cout, cm, 1, 1)
    return dict(w1=w1, b1=b1, w2=w2, b2=b2, w3=w3, b3=b3, w4=w4, b4=b4)


def init_lprnet(key, class_num):
    ks = jax.random.split(key, 13)
    p = {}
    p["conv0"] = init_conv(ks[0], 64, 3, 3, 3)
    p["bn0"] = init_bn(ks[1], 64)
    p["sbb1"] = init_sbb(ks[2], 64, 128)
    p["bn1"] = init_bn(ks[3], 128)
    p["sbb2"] = init_sbb(ks[4], 64, 256)
    p["bn2"] = init_bn(ks[5], 256)
    p["sbb3"] = init_sbb(ks[6], 256, 256)
    p["bn3"] = init_bn(ks[7], 256)
    p["conv16"] = init_conv(ks[8], 256, 64, 1, 4)
    p["bn16"] = init_bn(ks[9], 256)
    p["conv20"] = init_conv(ks[10], class_num, 256, 13, 1)
    p["bn20"] = init_bn(ks[11], class_num)
    p["container"] = init_conv(ks[12], class_num, 64 + 128 + 256 + class_num, 1, 1)
    return p


# ---------------------------------------------------------------------------
# LPRNet forward (out_indices = (2, 6, 13, 22), inference / eval mode)
# ---------------------------------------------------------------------------
def lprnet_forward(x_nchw, p):
    x = jnp.transpose(x_nchw, (0, 2, 3, 1))      # single NCHW -> NHWC at entry
    fms = []
    # layers 0-2: Conv(3->64, 3x3) + BN + ReLU
    w, b = p["conv0"]
    x = conv2d_nhwc(x, w, b, relu=True, bn=p["bn0"])
    fms.append(x)                                # out index 2
    # layer 3: MaxPool3d (1,3,3) stride (1,1,1)
    x = maxpool3d_nhwc(x, 1, 1, 1)
    # layers 4-6: SmallBasicBlock(64,128) + BN + ReLU
    x = small_basic_block(x, p["sbb1"], out_bn=p["bn1"], out_relu=True)
    fms.append(x)                                # out index 6
    # layer 7: MaxPool3d (1,3,3) stride (2,1,2)
    x = maxpool3d_nhwc(x, 2, 1, 2)
    # layers 8-10: SmallBasicBlock(64,256) + BN + ReLU
    x = small_basic_block(x, p["sbb2"], out_bn=p["bn2"], out_relu=True)
    # layers 11-13: SmallBasicBlock(256,256) + BN + ReLU
    x = small_basic_block(x, p["sbb3"], out_bn=p["bn3"], out_relu=True)
    fms.append(x)                                # out index 13
    # layer 14: MaxPool3d (1,3,3) stride (4,1,2)
    x = maxpool3d_nhwc(x, 4, 1, 2)
    # layers 15 / 19: Dropout -> identity in eval mode
    # TODO(synk): training-mode RNG dropout not implemented (eval identity).
    # layers 16-18: Conv(64->256, (1,4)) + BN + ReLU
    w, b = p["conv16"]
    x = conv2d_nhwc(x, w, b, relu=True, bn=p["bn16"])
    # layers 20-22: Conv(256->class_num, (13,1)) + BN + ReLU
    w, b = p["conv20"]
    x = conv2d_nhwc(x, w, b, relu=True, bn=p["bn20"])
    fms.append(x)                                # out index 22

    # Global context: pool, then feature_map / mean(feature_map^2).
    # The per-branch 1/mean(.^2) is constant over each branch's channel range,
    # so it is folded into the container conv's weight rows — no extra
    # normalization pass over the activations.
    pooled = [
        avgpool2d_nhwc(fms[0], 5, 5, 5, 5),
        avgpool2d_nhwc(fms[1], 5, 5, 5, 5),
        avgpool2d_nhwc(fms[2], 4, 10, 4, 2),
        fms[3],
    ]
    inv_ms = [1.0 / jnp.mean(jnp.square(fm)) for fm in pooled]
    inv_vec = jnp.concatenate(
        [jnp.broadcast_to(s, (fm.shape[-1],)) for s, fm in zip(inv_ms, pooled)])

    xcat = jnp.concatenate(pooled, axis=-1)      # (N, 4, 18, 64+128+256+C)
    n, hh, ww, cc = xcat.shape
    w, b = p["container"]
    wmat = jnp.transpose(w, (2, 3, 1, 0)).reshape(cc, -1) * inv_vec[:, None]
    y = matmul_bias_act(xcat.reshape(n * hh * ww, cc), wmat, b, relu=False)
    y = y.reshape(n, hh, ww, -1)

    # logits = mean over height; return (N, class_num, W) to match PyTorch
    return jnp.transpose(jnp.mean(y, axis=1), (0, 2, 1))


if __name__ == "__main__":
    class_num = 37
    key = jax.random.PRNGKey(0)
    kx, kp = jax.random.split(key)
    # LPRNet's architecture hard-codes the input geometry: H=24, W=94 is the
    # smallest standard shape for which all four global-context branches share
    # the (4, 18) spatial grid required by the channel concat.
    x = jax.random.normal(kx, (2, 3, 24, 94), jnp.float32)
    params = init_lprnet(kp, class_num)

    fwd = jax.jit(lambda inp: lprnet_forward(inp, params))
    logits = fwd(x)
    jax.block_until_ready(logits)
    assert logits.shape == (2, class_num, 18), logits.shape
    assert bool(jnp.all(jnp.isfinite(logits)))
    print("KERNEL_OK")
</pallas_src>

<mosaic_0001>
module attributes {stable_mosaic.version = 11 : i64} {
  func.func @_matmul_bias_act_kernel(%arg0: i32, %arg1: memref<512x27xbf16, #tpu.memory_space<vmem>>, %arg2: memref<27x64xbf16, #tpu.memory_space<vmem>>, %arg3: memref<1x64xf32, #tpu.memory_space<vmem>>, %arg4: memref<512x64xf32, #tpu.memory_space<vmem>>) attributes {dimension_semantics = [#tpu.dimension_semantics<parallel>], iteration_bounds = array<i64: 8>, scalar_prefetch = 0 : i64, scratch_operands = 0 : i64, tpu.core_type = #tpu.core_type<tc>, window_params = [{transform_indices = @transform_0, window_bounds = array<i64: 512, 27>}, {pipeline_mode = #tpu.pipeline_mode<synchronous>, transform_indices = @transform_1, window_bounds = array<i64: 27, 64>}, {pipeline_mode = #tpu.pipeline_mode<synchronous>, transform_indices = @transform_2, window_bounds = array<i64: 1, 64>}, {transform_indices = @transform_3, window_bounds = array<i64: 512, 64>}]} {
    %c0 = arith.constant 0 : index
    %c0_0 = arith.constant 0 : index
    %0 = vector.load %arg1[%c0, %c0_0] : memref<512x27xbf16, #tpu.memory_space<vmem>>, vector<512x27xbf16>
    %c0_1 = arith.constant 0 : index
    %c0_2 = arith.constant 0 : index
    %1 = vector.load %arg2[%c0_1, %c0_2] : memref<27x64xbf16, #tpu.memory_space<vmem>>, vector<27x64xbf16>
    %cst = arith.constant dense<0.000000e+00> : vector<512x64xf32>
    %2 = tpu.matmul %0, %1, %cst {dimension_numbers = #tpu.dot_dimension_numbers<[1], [0], [0], [1], [0, 0, 1, 1], [], []>} : vector<512x27xbf16>, vector<27x64xbf16>, vector<512x64xf32> -> vector<512x64xf32>
    %c0_3 = arith.constant 0 : index
    %c0_4 = arith.constant 0 : index
    %3 = vector.load %arg3[%c0_3, %c0_4] : memref<1x64xf32, #tpu.memory_space<vmem>>, vector<1x64xf32>
    %4 = vector.broadcast %3 : vector<1x64xf32> to vector<512x64xf32>
    %5 = arith.addf %2, %4 : vector<512x64xf32>
    %cst_5 = arith.constant 0.000000e+00 : f32
    %6 = vector.broadcast %cst_5 : f32 to vector<512x64xf32>
    %7 = arith.maximumf %5, %6 : vector<512x64xf32>
    %c0_6 = arith.constant 0 : index
    %c0_7 = arith.constant 0 : index
    %8 = vector.load %arg4[%c0_6, %c0_7] : memref<512x64xf32, #tpu.memory_space<vmem>>, vector<512x64xf32>
    tpu.vector_store %arg4[%c0_6, %c0_7], %7 {strides = array<i32>} : memref<512x64xf32, #tpu.memory_space<vmem>>, vector<512x64xf32>,
    return
  }
  func.func @transform_0(%arg0: i32) -> (i32, i32) {
    %c0_i32 = arith.constant 0 : i32
    %c0_i32_0 = arith.constant 0 : i32
    return %arg0, %c0_i32 : i32, i32
  }
  func.func @transform_1(%arg0: i32) -> (i32, i32) {
    %c0_i32 = arith.constant 0 : i32
    %c0_i32_0 = arith.constant 0 : i32
    %c0_i32_1 = arith.constant 0 : i32
    return %c0_i32, %c0_i32_0 : i32, i32
  }
  func.func @transform_2(%arg0: i32) -> (i32, i32) {
    %c0_i32 = arith.constant 0 : i32
    %c0_i32_0 = arith.constant 0 : i32
    %c0_i32_1 = arith.constant 0 : i32
    return %c0_i32, %c0_i32_0 : i32, i32
  }
  func.func @transform_3(%arg0: i32) -> (i32, i32) {
    %c0_i32 = arith.constant 0 : i32
    %c0_i32_0 = arith.constant 0 : i32
    return %arg0, %c0_i32 : i32, i32
  }
}

module attributes {stable_mosaic.version = 11 : i64} {
  func.func @_matmul_bias_act_kernel(%arg0: i32, %arg1: memref<512x64xbf16, #tpu.memory_space<vmem>>, %arg2: memref<64x32xbf16, #tpu.memory_space<vmem>>, %arg3: memref<1x32xf32, #tpu.memory_space<vmem>>, %arg4: memref<512x32xf32, #tpu.memory_space<vmem>>) attributes {dimension_semantics = [#tpu.dimension_semantics<parallel>], iteration_bounds = array<i64: 8>, scalar_prefetch = 0 : i64, scratch_operands = 0 : i64, tpu.core_type = #tpu.core_type<tc>, window_params = [{transform_indices = @transform_0, window_bounds = array<i64: 512, 64>}, {pipeline_mode = #tpu.pipeline_mode<synchronous>, transform_indices = @transform_1, window_bounds = array<i64: 64, 32>}, {pipeline_mode = #tpu.pipeline_mode<synchronous>, transform_indices = @transform_2, window_bounds = array<i64: 1, 32>}, {transform_indices = @transform_3, window_bounds = array<i64: 512, 32>}]} {
    %c0 = arith.constant 0 : index
    %c0_0 = arith.constant 0 : index
    %0 = vector.load %arg1[%c0, %c0_0] : memref<512x64xbf16, #tpu.memory_space<vmem>>, vector<512x64xbf16>
    %c0_1 = arith.constant 0 : index
    %c0_2 = arith.constant 0 : index
    %1 = vector.load %arg2[%c0_1, %c0_2] : memref<64x32xbf16, #tpu.memory_space<vmem>>, vector<64x32xbf16>
    %cst = arith.constant dense<0.000000e+00> : vector<512x32xf32>
    %2 = tpu.matmul %0, %1, %cst {dimension_numbers = #tpu.dot_dimension_numbers<[1], [0], [0], [1], [0, 0, 1, 1], [], []>} : vector<512x64xbf16>, vector<64x32xbf16>, vector<512x32xf32> -> vector<512x32xf32>
    %c0_3 = arith.constant 0 : index
    %c0_4 = arith.constant 0 : index
    %3 = vector.load %arg3[%c0_3, %c0_4] : memref<1x32xf32, #tpu.memory_space<vmem>>, vector<1x32xf32>
    %4 = vector.broadcast %3 : vector<1x32xf32> to vector<512x32xf32>
    %5 = arith.addf %2, %4 : vector<512x32xf32>
    %cst_5 = arith.constant 0.000000e+00 : f32
    %6 = vector.broadcast %cst_5 : f32 to vector<512x32xf32>
    %7 = arith.maximumf %5, %6 : vector<512x32xf32>
    %c0_6 = arith.constant 0 : index
    %c0_7 = arith.constant 0 : index
    %8 = vector.load %arg4[%c0_6, %c0_7] : memref<512x32xf32, #tpu.memory_space<vmem>>, vector<512x32xf32>
    tpu.vector_store %arg4[%c0_6, %c0_7], %7 {strides = array<i32>} : memref<512x32xf32, #tpu.memory_space<vmem>>, vector<512x32xf32>,
    return
  }
  func.func @transform_0(%arg0: i32) -> (i32, i32) {
    %c0_i32 = arith.constant 0 : i32
    %c0_i32_0 = arith.constant 0 : i32
    return %arg0, %c0_i32 : i32, i32
  }
  func.func @transform_1(%arg0: i32) -> (i32, i32) {
    %c0_i32 = arith.constant 0 : i32
    %c0_i32_0 = arith.constant 0 : i32
    %c0_i32_1 = arith.constant 0 : i32
    return %c0_i32, %c0_i32_0 : i32, i32
  }
  func.func @transform_2(%arg0: i32) -> (i32, i32) {
    %c0_i32 = arith.constant 0 : i32
    %c0_i32_0 = arith.constant 0 : i32
    %c0_i32_1 = arith.constant 0 : i32
    return %c0_i32, %c0_i32_0 : i32, i32
  }
  func.func @transform_3(%arg0: i32) -> (i32, i32) {
    %c0_i32 = arith.constant 0 : i32
    %c0_i32_0 = arith.constant 0 : i32
    return %arg0, %c0_i32 : i32, i32
  }
}

module attributes {stable_mosaic.version = 11 : i64} {
  func.func @_matmul_bias_act_kernel(%arg0: i32, %arg1: memref<512x96xbf16, #tpu.memory_space<vmem>>, %arg2: memref<96x32xbf16, #tpu.memory_space<vmem>>, %arg3: memref<1x32xf32, #tpu.memory_space<vmem>>, %arg4: memref<512x32xf32, #tpu.memory_space<vmem>>) attributes {dimension_semantics = [#tpu.dimension_semantics<parallel>], iteration_bounds = array<i64: 8>, scalar_prefetch = 0 : i64, scratch_operands = 0 : i64, tpu.core_type = #tpu.core_type<tc>, window_params = [{transform_indices = @transform_0, window_bounds = array<i64: 512, 96>}, {pipeline_mode = #tpu.pipeline_mode<synchronous>, transform_indices = @transform_1, window_bounds = array<i64: 96, 32>}, {pipeline_mode = #tpu.pipeline_mode<synchronous>, transform_indices = @transform_2, window_bounds = array<i64: 1, 32>}, {transform_indices = @transform_3, window_bounds = array<i64: 512, 32>}]} {
    %c0 = arith.constant 0 : index
    %c0_0 = arith.constant 0 : index
    %0 = vector.load %arg1[%c0, %c0_0] : memref<512x96xbf16, #tpu.memory_space<vmem>>, vector<512x96xbf16>
    %c0_1 = arith.constant 0 : index
    %c0_2 = arith.constant 0 : index
    %1 = vector.load %arg2[%c0_1, %c0_2] : memref<96x32xbf16, #tpu.memory_space<vmem>>, vector<96x32xbf16>
    %cst = arith.constant dense<0.000000e+00> : vector<512x32xf32>
    %2 = tpu.matmul %0, %1, %cst {dimension_numbers = #tpu.dot_dimension_numbers<[1], [0], [0], [1], [0, 0, 1, 1], [], []>} : vector<512x96xbf16>, vector<96x32xbf16>, vector<512x32xf32> -> vector<512x32xf32>
    %c0_3 = arith.constant 0 : index
    %c0_4 = arith.constant 0 : index
    %3 = vector.load %arg3[%c0_3, %c0_4] : memref<1x32xf32, #tpu.memory_space<vmem>>, vector<1x32xf32>
    %4 = vector.broadcast %3 : vector<1x32xf32> to vector<512x32xf32>
    %5 = arith.addf %2, %4 : vector<512x32xf32>
    %cst_5 = arith.constant 0.000000e+00 : f32
    %6 = vector.broadcast %cst_5 : f32 to vector<512x32xf32>
    %7 = arith.maximumf %5, %6 : vector<512x32xf32>
    %c0_6 = arith.constant 0 : index
    %c0_7 = arith.constant 0 : index
    %8 = vector.load %arg4[%c0_6, %c0_7] : memref<512x32xf32, #tpu.memory_space<vmem>>, vector<512x32xf32>
    tpu.vector_store %arg4[%c0_6, %c0_7], %7 {strides = array<i32>} : memref<512x32xf32, #tpu.memory_space<vmem>>, vector<512x32xf32>,
    return
  }
  func.func @transform_0(%arg0: i32) -> (i32, i32) {
    %c0_i32 = arith.constant 0 : i32
    %c0_i32_0 = arith.constant 0 : i32
    return %arg0, %c0_i32 : i32, i32
  }
  func.func @transform_1(%arg0: i32) -> (i32, i32) {
    %c0_i32 = arith.constant 0 : i32
    %c0_i32_0 = arith.constant 0 : i32
    %c0_i32_1 = arith.constant 0 : i32
    return %c0_i32, %c0_i32_0 : i32, i32
  }
  func.func @transform_2(%arg0: i32) -> (i32, i32) {
    %c0_i32 = arith.constant 0 : i32
    %c0_i32_0 = arith.constant 0 : i32
    %c0_i32_1 = arith.constant 0 : i32
    return %c0_i32, %c0_i32_0 : i32, i32
  }
  func.func @transform_3(%arg0: i32) -> (i32, i32) {
    %c0_i32 = arith.constant 0 : i32
    %c0_i32_0 = arith.constant 0 : i32
    return %arg0, %c0_i32 : i32, i32
  }
}

module attributes {stable_mosaic.version = 11 : i64} {
  func.func @_matmul_bias_act_kernel(%arg0: i32, %arg1: memref<512x32xbf16, #tpu.memory_space<vmem>>, %arg2: memref<32x128xbf16, #tpu.memory_space<vmem>>, %arg3: memref<1x128xf32, #tpu.memory_space<vmem>>, %arg4: memref<512x128xf32, #tpu.memory_space<vmem>>) attributes {dimension_semantics = [#tpu.dimension_semantics<parallel>], iteration_bounds = array<i64: 8>, scalar_prefetch = 0 : i64, scratch_operands = 0 : i64, tpu.core_type = #tpu.core_type<tc>, window_params = [{transform_indices = @transform_0, window_bounds = array<i64: 512, 32>}, {pipeline_mode = #tpu.pipeline_mode<synchronous>, transform_indices = @transform_1, window_bounds = array<i64: 32, 128>}, {pipeline_mode = #tpu.pipeline_mode<synchronous>, transform_indices = @transform_2, window_bounds = array<i64: 1, 128>}, {transform_indices = @transform_3, window_bounds = array<i64: 512, 128>}]} {
    %c0 = arith.constant 0 : index
    %c0_0 = arith.constant 0 : index
    %0 = vector.load %arg1[%c0, %c0_0] : memref<512x32xbf16, #tpu.memory_space<vmem>>, vector<512x32xbf16>
    %c0_1 = arith.constant 0 : index
    %c0_2 = arith.constant 0 : index
    %1 = vector.load %arg2[%c0_1, %c0_2] : memref<32x128xbf16, #tpu.memory_space<vmem>>, vector<32x128xbf16>
    %cst = arith.constant dense<0.000000e+00> : vector<512x128xf32>
    %2 = tpu.matmul %0, %1, %cst {dimension_numbers = #tpu.dot_dimension_numbers<[1], [0], [0], [1], [0, 0, 1, 1], [], []>} : vector<512x32xbf16>, vector<32x128xbf16>, vector<512x128xf32> -> vector<512x128xf32>
    %c0_3 = arith.constant 0 : index
    %c0_4 = arith.constant 0 : index
    %3 = vector.load %arg3[%c0_3, %c0_4] : memref<1x128xf32, #tpu.memory_space<vmem>>, vector<1x128xf32>
    %4 = vector.broadcast %3 : vector<1x128xf32> to vector<512x128xf32>
    %5 = arith.addf %2, %4 : vector<512x128xf32>
    %cst_5 = arith.constant 0.000000e+00 : f32
    %6 = vector.broadcast %cst_5 : f32 to vector<512x128xf32>
    %7 = arith.maximumf %5, %6 : vector<512x128xf32>
    %c0_6 = arith.constant 0 : index
    %c0_7 = arith.constant 0 : index
    %8 = vector.load %arg4[%c0_6, %c0_7] : memref<512x128xf32, #tpu.memory_space<vmem>>, vector<512x128xf32>
    tpu.vector_store %arg4[%c0_6, %c0_7], %7 {strides = array<i32>} : memref<512x128xf32, #tpu.memory_space<vmem>>, vector<512x128xf32>,
    return
  }
  func.func @transform_0(%arg0: i32) -> (i32, i32) {
    %c0_i32 = arith.constant 0 : i32
    %c0_i32_0 = arith.constant 0 : i32
    return %arg0, %c0_i32 : i32, i32
  }
  func.func @transform_1(%arg0: i32) -> (i32, i32) {
    %c0_i32 = arith.constant 0 : i32
    %c0_i32_0 = arith.constant 0 : i32
    %c0_i32_1 = arith.constant 0 : i32
    return %c0_i32, %c0_i32_0 : i32, i32
  }
  func.func @transform_2(%arg0: i32) -> (i32, i32) {
    %c0_i32 = arith.constant 0 : i32
    %c0_i32_0 = arith.constant 0 : i32
    %c0_i32_1 = arith.constant 0 : i32
    return %c0_i32, %c0_i32_0 : i32, i32
  }
  func.func @transform_3(%arg0: i32) -> (i32, i32) {
    %c0_i32 = arith.constant 0 : i32
    %c0_i32_0 = arith.constant 0 : i32
    return %arg0, %c0_i32 : i32, i32
  }
}

module attributes {stable_mosaic.version = 11 : i64} {
  func.func @_matmul_bias_act_kernel(%arg0: i32, %arg1: memref<512x64xbf16, #tpu.memory_space<vmem>>, %arg2: memref<64x64xbf16, #tpu.memory_space<vmem>>, %arg3: memref<1x64xf32, #tpu.memory_space<vmem>>, %arg4: memref<512x64xf32, #tpu.memory_space<vmem>>) attributes {dimension_semantics = [#tpu.dimension_semantics<parallel>], iteration_bounds = array<i64: 4>, scalar_prefetch = 0 : i64, scratch_operands = 0 : i64, tpu.core_type = #tpu.core_type<tc>, window_params = [{transform_indices = @transform_0, window_bounds = array<i64: 512, 64>}, {pipeline_mode = #tpu.pipeline_mode<synchronous>, transform_indices = @transform_1, window_bounds = array<i64: 64, 64>}, {pipeline_mode = #tpu.pipeline_mode<synchronous>, transform_indices = @transform_2, window_bounds = array<i64: 1, 64>}, {transform_indices = @transform_3, window_bounds = array<i64: 512, 64>}]} {
    %c0 = arith.constant 0 : index
    %c0_0 = arith.constant 0 : index
    %0 = vector.load %arg1[%c0, %c0_0] : memref<512x64xbf16, #tpu.memory_space<vmem>>, vector<512x64xbf16>
    %c0_1 = arith.constant 0 : index
    %c0_2 = arith.constant 0 : index
    %1 = vector.load %arg2[%c0_1, %c0_2] : memref<64x64xbf16, #tpu.memory_space<vmem>>, vector<64x64xbf16>
    %cst = arith.constant dense<0.000000e+00> : vector<512x64xf32>
    %2 = tpu.matmul %0, %1, %cst {dimension_numbers = #tpu.dot_dimension_numbers<[1], [0], [0], [1], [0, 0, 1, 1], [], []>} : vector<512x64xbf16>, vector<64x64xbf16>, vector<512x64xf32> -> vector<512x64xf32>
    %c0_3 = arith.constant 0 : index
    %c0_4 = arith.constant 0 : index
    %3 = vector.load %arg3[%c0_3, %c0_4] : memref<1x64xf32, #tpu.memory_space<vmem>>, vector<1x64xf32>
    %4 = vector.broadcast %3 : vector<1x64xf32> to vector<512x64xf32>
    %5 = arith.addf %2, %4 : vector<512x64xf32>
    %cst_5 = arith.constant 0.000000e+00 : f32
    %6 = vector.broadcast %cst_5 : f32 to vector<512x64xf32>
    %7 = arith.maximumf %5, %6 : vector<512x64xf32>
    %c0_6 = arith.constant 0 : index
    %c0_7 = arith.constant 0 : index
    %8 = vector.load %arg4[%c0_6, %c0_7] : memref<512x64xf32, #tpu.memory_space<vmem>>, vector<512x64xf32>
    tpu.vector_store %arg4[%c0_6, %c0_7], %7 {strides = array<i32>} : memref<512x64xf32, #tpu.memory_space<vmem>>, vector<512x64xf32>,
    return
  }
  func.func @transform_0(%arg0: i32) -> (i32, i32) {
    %c0_i32 = arith.constant 0 : i32
    %c0_i32_0 = arith.constant 0 : i32
    return %arg0, %c0_i32 : i32, i32
  }
  func.func @transform_1(%arg0: i32) -> (i32, i32) {
    %c0_i32 = arith.constant 0 : i32
    %c0_i32_0 = arith.constant 0 : i32
    %c0_i32_1 = arith.constant 0 : i32
    return %c0_i32, %c0_i32_0 : i32, i32
  }
  func.func @transform_2(%arg0: i32) -> (i32, i32) {
    %c0_i32 = arith.constant 0 : i32
    %c0_i32_0 = arith.constant 0 : i32
    %c0_i32_1 = arith.constant 0 : i32
    return %c0_i32, %c0_i32_0 : i32, i32
  }
  func.func @transform_3(%arg0: i32) -> (i32, i32) {
    %c0_i32 = arith.constant 0 : i32
    %c0_i32_0 = arith.constant 0 : i32
    return %arg0, %c0_i32 : i32, i32
  }
}

module attributes {stable_mosaic.version = 11 : i64} {
  func.func @_matmul_bias_act_kernel(%arg0: i32, %arg1: memref<512x192xbf16, #tpu.memory_space<vmem>>, %arg2: memref<192x64xbf16, #tpu.memory_space<vmem>>, %arg3: memref<1x64xf32, #tpu.memory_space<vmem>>, %arg4: memref<512x64xf32, #tpu.memory_space<vmem>>) attributes {dimension_semantics = [#tpu.dimension_semantics<parallel>], iteration_bounds = array<i64: 4>, scalar_prefetch = 0 : i64, scratch_operands = 0 : i64, tpu.core_type = #tpu.core_type<tc>, window_params = [{transform_indices = @transform_0, window_bounds = array<i64: 512, 192>}, {pipeline_mode = #tpu.pipeline_mode<synchronous>, transform_indices = @transform_1, window_bounds = array<i64: 192, 64>}, {pipeline_mode = #tpu.pipeline_mode<synchronous>, transform_indices = @transform_2, window_bounds = array<i64: 1, 64>}, {transform_indices = @transform_3, window_bounds = array<i64: 512, 64>}]} {
    %c0 = arith.constant 0 : index
    %c0_0 = arith.constant 0 : index
    %0 = vector.load %arg1[%c0, %c0_0] : memref<512x192xbf16, #tpu.memory_space<vmem>>, vector<512x192xbf16>
    %c0_1 = arith.constant 0 : index
    %c0_2 = arith.constant 0 : index
    %1 = vector.load %arg2[%c0_1, %c0_2] : memref<192x64xbf16, #tpu.memory_space<vmem>>, vector<192x64xbf16>
    %cst = arith.constant dense<0.000000e+00> : vector<512x64xf32>
    %2 = tpu.matmul %0, %1, %cst {dimension_numbers = #tpu.dot_dimension_numbers<[1], [0], [0], [1], [0, 0, 1, 1], [], []>} : vector<512x192xbf16>, vector<192x64xbf16>, vector<512x64xf32> -> vector<512x64xf32>
    %c0_3 = arith.constant 0 : index
    %c0_4 = arith.constant 0 : index
    %3 = vector.load %arg3[%c0_3, %c0_4] : memref<1x64xf32, #tpu.memory_space<vmem>>, vector<1x64xf32>
    %4 = vector.broadcast %3 : vector<1x64xf32> to vector<512x64xf32>
    %5 = arith.addf %2, %4 : vector<512x64xf32>
    %cst_5 = arith.constant 0.000000e+00 : f32
    %6 = vector.broadcast %cst_5 : f32 to vector<512x64xf32>
    %7 = arith.maximumf %5, %6 : vector<512x64xf32>
    %c0_6 = arith.constant 0 : index
    %c0_7 = arith.constant 0 : index
    %8 = vector.load %arg4[%c0_6, %c0_7] : memref<512x64xf32, #tpu.memory_space<vmem>>, vector<512x64xf32>
    tpu.vector_store %arg4[%c0_6, %c0_7], %7 {strides = array<i32>} : memref<512x64xf32, #tpu.memory_space<vmem>>, vector<512x64xf32>,
    return
  }
  func.func @transform_0(%arg0: i32) -> (i32, i32) {
    %c0_i32 = arith.constant 0 : i32
    %c0_i32_0 = arith.constant 0 : i32
    return %arg0, %c0_i32 : i32, i32
  }
  func.func @transform_1(%arg0: i32) -> (i32, i32) {
    %c0_i32 = arith.constant 0 : i32
    %c0_i32_0 = arith.constant 0 : i32
    %c0_i32_1 = arith.constant 0 : i32
    return %c0_i32, %c0_i32_0 : i32, i32
  }
  func.func @transform_2(%arg0: i32) -> (i32, i32) {
    %c0_i32 = arith.constant 0 : i32
    %c0_i32_0 = arith.constant 0 : i32
    %c0_i32_1 = arith.constant 0 : i32
    return %c0_i32, %c0_i32_0 : i32, i32
  }
  func.func @transform_3(%arg0: i32) -> (i32, i32) {
    %c0_i32 = arith.constant 0 : i32
    %c0_i32_0 = arith.constant 0 : i32
    return %arg0, %c0_i32 : i32, i32
  }
}

module attributes {stable_mosaic.version = 11 : i64} {
  func.func @_matmul_bias_act_kernel(%arg0: i32, %arg1: memref<512x64xbf16, #tpu.memory_space<vmem>>, %arg2: memref<64x256xbf16, #tpu.memory_space<vmem>>, %arg3: memref<1x256xf32, #tpu.memory_space<vmem>>, %arg4: memref<512x256xf32, #tpu.memory_space<vmem>>) attributes {dimension_semantics = [#tpu.dimension_semantics<parallel>], iteration_bounds = array<i64: 4>, scalar_prefetch = 0 : i64, scratch_operands = 0 : i64, tpu.core_type = #tpu.core_type<tc>, window_params = [{transform_indices = @transform_0, window_bounds = array<i64: 512, 64>}, {pipeline_mode = #tpu.pipeline_mode<synchronous>, transform_indices = @transform_1, window_bounds = array<i64: 64, 256>}, {pipeline_mode = #tpu.pipeline_mode<synchronous>, transform_indices = @transform_2, window_bounds = array<i64: 1, 256>}, {transform_indices = @transform_3, window_bounds = array<i64: 512, 256>}]} {
    %c0 = arith.constant 0 : index
    %c0_0 = arith.constant 0 : index
    %0 = vector.load %arg1[%c0, %c0_0] : memref<512x64xbf16, #tpu.memory_space<vmem>>, vector<512x64xbf16>
    %c0_1 = arith.constant 0 : index
    %c0_2 = arith.constant 0 : index
    %1 = vector.load %arg2[%c0_1, %c0_2] : memref<64x256xbf16, #tpu.memory_space<vmem>>, vector<64x256xbf16>
    %cst = arith.constant dense<0.000000e+00> : vector<512x256xf32>
    %2 = tpu.matmul %0, %1, %cst {dimension_numbers = #tpu.dot_dimension_numbers<[1], [0], [0], [1], [0, 0, 1, 1], [], []>} : vector<512x64xbf16>, vector<64x256xbf16>, vector<512x256xf32> -> vector<512x256xf32>
    %c0_3 = arith.constant 0 : index
    %c0_4 = arith.constant 0 : index
    %3 = vector.load %arg3[%c0_3, %c0_4] : memref<1x256xf32, #tpu.memory_space<vmem>>, vector<1x256xf32>
    %4 = vector.broadcast %3 : vector<1x256xf32> to vector<512x256xf32>
    %5 = arith.addf %2, %4 : vector<512x256xf32>
    %cst_5 = arith.constant 0.000000e+00 : f32
    %6 = vector.broadcast %cst_5 : f32 to vector<512x256xf32>
    %7 = arith.maximumf %5, %6 : vector<512x256xf32>
    %c0_6 = arith.constant 0 : index
    %c0_7 = arith.constant 0 : index
    %8 = vector.load %arg4[%c0_6, %c0_7] : memref<512x256xf32, #tpu.memory_space<vmem>>, vector<512x256xf32>
    tpu.vector_store %arg4[%c0_6, %c0_7], %7 {strides = array<i32>} : memref<512x256xf32, #tpu.memory_space<vmem>>, vector<512x256xf32>,
    return
  }
  func.func @transform_0(%arg0: i32) -> (i32, i32) {
    %c0_i32 = arith.constant 0 : i32
    %c0_i32_0 = arith.constant 0 : i32
    return %arg0, %c0_i32 : i32, i32
  }
  func.func @transform_1(%arg0: i32) -> (i32, i32) {
    %c0_i32 = arith.constant 0 : i32
    %c0_i32_0 = arith.constant 0 : i32
    %c0_i32_1 = arith.constant 0 : i32
    return %c0_i32, %c0_i32_0 : i32, i32
  }
  func.func @transform_2(%arg0: i32) -> (i32, i32) {
    %c0_i32 = arith.constant 0 : i32
    %c0_i32_0 = arith.constant 0 : i32
    %c0_i32_1 = arith.constant 0 : i32
    return %c0_i32, %c0_i32_0 : i32, i32
  }
  func.func @transform_3(%arg0: i32) -> (i32, i32) {
    %c0_i32 = arith.constant 0 : i32
    %c0_i32_0 = arith.constant 0 : i32
    return %arg0, %c0_i32 : i32, i32
  }
}

module attributes {stable_mosaic.version = 11 : i64} {
  func.func @_matmul_bias_act_kernel(%arg0: i32, %arg1: memref<512x256xbf16, #tpu.memory_space<vmem>>, %arg2: memref<256x64xbf16, #tpu.memory_space<vmem>>, %arg3: memref<1x64xf32, #tpu.memory_space<vmem>>, %arg4: memref<512x64xf32, #tpu.memory_space<vmem>>) attributes {dimension_semantics = [#tpu.dimension_semantics<parallel>], iteration_bounds = array<i64: 4>, scalar_prefetch = 0 : i64, scratch_operands = 0 : i64, tpu.core_type = #tpu.core_type<tc>, window_params = [{transform_indices = @transform_0, window_bounds = array<i64: 512, 256>}, {pipeline_mode = #tpu.pipeline_mode<synchronous>, transform_indices = @transform_1, window_bounds = array<i64: 256, 64>}, {pipeline_mode = #tpu.pipeline_mode<synchronous>, transform_indices = @transform_2, window_bounds = array<i64: 1, 64>}, {transform_indices = @transform_3, window_bounds = array<i64: 512, 64>}]} {
    %c0 = arith.constant 0 : index
    %c0_0 = arith.constant 0 : index
    %0 = vector.load %arg1[%c0, %c0_0] : memref<512x256xbf16, #tpu.memory_space<vmem>>, vector<512x256xbf16>
    %c0_1 = arith.constant 0 : index
    %c0_2 = arith.constant 0 : index
    %1 = vector.load %arg2[%c0_1, %c0_2] : memref<256x64xbf16, #tpu.memory_space<vmem>>, vector<256x64xbf16>
    %cst = arith.constant dense<0.000000e+00> : vector<512x64xf32>
    %2 = tpu.matmul %0, %1, %cst {dimension_numbers = #tpu.dot_dimension_numbers<[1], [0], [0], [1], [0, 0, 1, 1], [], []>} : vector<512x256xbf16>, vector<256x64xbf16>, vector<512x64xf32> -> vector<512x64xf32>
    %c0_3 = arith.constant 0 : index
    %c0_4 = arith.constant 0 : index
    %3 = vector.load %arg3[%c0_3, %c0_4] : memref<1x64xf32, #tpu.memory_space<vmem>>, vector<1x64xf32>
    %4 = vector.broadcast %3 : vector<1x64xf32> to vector<512x64xf32>
    %5 = arith.addf %2, %4 : vector<512x64xf32>
    %cst_5 = arith.constant 0.000000e+00 : f32
    %6 = vector.broadcast %cst_5 : f32 to vector<512x64xf32>
    %7 = arith.maximumf %5, %6 : vector<512x64xf32>
    %c0_6 = arith.constant 0 : index
    %c0_7 = arith.constant 0 : index
    %8 = vector.load %arg4[%c0_6, %c0_7] : memref<512x64xf32, #tpu.memory_space<vmem>>, vector<512x64xf32>
    tpu.vector_store %arg4[%c0_6, %c0_7], %7 {strides = array<i32>} : memref<512x64xf32, #tpu.memory_space<vmem>>, vector<512x64xf32>,
    return
  }
  func.func @transform_0(%arg0: i32) -> (i32, i32) {
    %c0_i32 = arith.constant 0 : i32
    %c0_i32_0 = arith.constant 0 : i32
    return %arg0, %c0_i32 : i32, i32
  }
  func.func @transform_1(%arg0: i32) -> (i32, i32) {
    %c0_i32 = arith.constant 0 : i32
    %c0_i32_0 = arith.constant 0 : i32
    %c0_i32_1 = arith.constant 0 : i32
    return %c0_i32, %c0_i32_0 : i32, i32
  }
  func.func @transform_2(%arg0: i32) -> (i32, i32) {
    %c0_i32 = arith.constant 0 : i32
    %c0_i32_0 = arith.constant 0 : i32
    %c0_i32_1 = arith.constant 0 : i32
    return %c0_i32, %c0_i32_0 : i32, i32
  }
  func.func @transform_3(%arg0: i32) -> (i32, i32) {
    %c0_i32 = arith.constant 0 : i32
    %c0_i32_0 = arith.constant 0 : i32
    return %arg0, %c0_i32 : i32, i32
  }
}

module attributes {stable_mosaic.version = 11 : i64} {
  func.func @_matmul_bias_act_kernel(%arg0: i32, %arg1: memref<576x256xbf16, #tpu.memory_space<vmem>>, %arg2: memref<256x256xbf16, #tpu.memory_space<vmem>>, %arg3: memref<1x256xf32, #tpu.memory_space<vmem>>, %arg4: memref<576x256xf32, #tpu.memory_space<vmem>>) attributes {dimension_semantics = [#tpu.dimension_semantics<parallel>], iteration_bounds = array<i64: 1>, scalar_prefetch = 0 : i64, scratch_operands = 0 : i64, tpu.core_type = #tpu.core_type<tc>, window_params = [{transform_indices = @transform_0, window_bounds = array<i64: 576, 256>}, {pipeline_mode = #tpu.pipeline_mode<synchronous>, transform_indices = @transform_1, window_bounds = array<i64: 256, 256>}, {pipeline_mode = #tpu.pipeline_mode<synchronous>, transform_indices = @transform_2, window_bounds = array<i64: 1, 256>}, {transform_indices = @transform_3, window_bounds = array<i64: 576, 256>}]} {
    %c0 = arith.constant 0 : index
    %c0_0 = arith.constant 0 : index
    %0 = vector.load %arg1[%c0, %c0_0] : memref<576x256xbf16, #tpu.memory_space<vmem>>, vector<576x256xbf16>
    %c0_1 = arith.constant 0 : index
    %c0_2 = arith.constant 0 : index
    %1 = vector.load %arg2[%c0_1, %c0_2] : memref<256x256xbf16, #tpu.memory_space<vmem>>, vector<256x256xbf16>
    %cst = arith.constant dense<0.000000e+00> : vector<576x256xf32>
    %2 = tpu.matmul %0, %1, %cst {dimension_numbers = #tpu.dot_dimension_numbers<[1], [0], [0], [1], [0, 0, 1, 1], [], []>} : vector<576x256xbf16>, vector<256x256xbf16>, vector<576x256xf32> -> vector<576x256xf32>
    %c0_3 = arith.constant 0 : index
    %c0_4 = arith.constant 0 : index
    %3 = vector.load %arg3[%c0_3, %c0_4] : memref<1x256xf32, #tpu.memory_space<vmem>>, vector<1x256xf32>
    %4 = vector.broadcast %3 : vector<1x256xf32> to vector<576x256xf32>
    %5 = arith.addf %2, %4 : vector<576x256xf32>
    %cst_5 = arith.constant 0.000000e+00 : f32
    %6 = vector.broadcast %cst_5 : f32 to vector<576x256xf32>
    %7 = arith.maximumf %5, %6 : vector<576x256xf32>
    %c0_6 = arith.constant 0 : index
    %c0_7 = arith.constant 0 : index
    %8 = vector.load %arg4[%c0_6, %c0_7] : memref<576x256xf32, #tpu.memory_space<vmem>>, vector<576x256xf32>
    tpu.vector_store %arg4[%c0_6, %c0_7], %7 {strides = array<i32>} : memref<576x256xf32, #tpu.memory_space<vmem>>, vector<576x256xf32>,
    return
  }
  func.func @transform_0(%arg0: i32) -> (i32, i32) {
    %c0_i32 = arith.constant 0 : i32
    %c0_i32_0 = arith.constant 0 : i32
    return %arg0, %c0_i32 : i32, i32
  }
  func.func @transform_1(%arg0: i32) -> (i32, i32) {
    %c0_i32 = arith.constant 0 : i32
    %c0_i32_0 = arith.constant 0 : i32
    %c0_i32_1 = arith.constant 0 : i32
    return %c0_i32, %c0_i32_0 : i32, i32
  }
  func.func @transform_2(%arg0: i32) -> (i32, i32) {
    %c0_i32 = arith.constant 0 : i32
    %c0_i32_0 = arith.constant 0 : i32
    %c0_i32_1 = arith.constant 0 : i32
    return %c0_i32, %c0_i32_0 : i32, i32
  }
  func.func @transform_3(%arg0: i32) -> (i32, i32) {
    %c0_i32 = arith.constant 0 : i32
    %c0_i32_0 = arith.constant 0 : i32
    return %arg0, %c0_i32 : i32, i32
  }
}

module attributes {stable_mosaic.version = 11 : i64} {
  func.func @_matmul_bias_act_kernel(%arg0: i32, %arg1: memref<144x3328xbf16, #tpu.memory_space<vmem>>, %arg2: memref<3328x37xbf16, #tpu.memory_space<vmem>>, %arg3: memref<1x37xf32, #tpu.memory_space<vmem>>, %arg4: memref<144x37xf32, #tpu.memory_space<vmem>>) attributes {dimension_semantics = [#tpu.dimension_semantics<parallel>], iteration_bounds = array<i64: 1>, scalar_prefetch = 0 : i64, scratch_operands = 0 : i64, tpu.core_type = #tpu.core_type<tc>, window_params = [{transform_indices = @transform_0, window_bounds = array<i64: 144, 3328>}, {pipeline_mode = #tpu.pipeline_mode<synchronous>, transform_indices = @transform_1, window_bounds = array<i64: 3328, 37>}, {pipeline_mode = #tpu.pipeline_mode<synchronous>, transform_indices = @transform_2, window_bounds = array<i64: 1, 37>}, {transform_indices = @transform_3, window_bounds = array<i64: 144, 37>}]} {
    %c0 = arith.constant 0 : index
    %c0_0 = arith.constant 0 : index
    %0 = vector.load %arg1[%c0, %c0_0] : memref<144x3328xbf16, #tpu.memory_space<vmem>>, vector<144x3328xbf16>
    %c0_1 = arith.constant 0 : index
    %c0_2 = arith.constant 0 : index
    %1 = vector.load %arg2[%c0_1, %c0_2] : memref<3328x37xbf16, #tpu.memory_space<vmem>>, vector<3328x37xbf16>
    %cst = arith.constant dense<0.000000e+00> : vector<144x37xf32>
    %2 = tpu.matmul %0, %1, %cst {dimension_numbers = #tpu.dot_dimension_numbers<[1], [0], [0], [1], [0, 0, 1, 1], [], []>} : vector<144x3328xbf16>, vector<3328x37xbf16>, vector<144x37xf32> -> vector<144x37xf32>
    %c0_3 = arith.constant 0 : index
    %c0_4 = arith.constant 0 : index
    %3 = vector.load %arg3[%c0_3, %c0_4] : memref<1x37xf32, #tpu.memory_space<vmem>>, vector<1x37xf32>
    %4 = vector.broadcast %3 : vector<1x37xf32> to vector<144x37xf32>
    %5 = arith.addf %2, %4 : vector<144x37xf32>
    %cst_5 = arith.constant 0.000000e+00 : f32
    %6 = vector.broadcast %cst_5 : f32 to vector<144x37xf32>
    %7 = arith.maximumf %5, %6 : vector<144x37xf32>
    %c0_6 = arith.constant 0 : index
    %c0_7 = arith.constant 0 : index
    %8 = vector.load %arg4[%c0_6, %c0_7] : memref<144x37xf32, #tpu.memory_space<vmem>>, vector<144x37xf32>
    tpu.vector_store %arg4[%c0_6, %c0_7], %7 {strides = array<i32>} : memref<144x37xf32, #tpu.memory_space<vmem>>, vector<144x37xf32>,
    return
  }
  func.func @transform_0(%arg0: i32) -> (i32, i32) {
    %c0_i32 = arith.constant 0 : i32
    %c0_i32_0 = arith.constant 0 : i32
    return %arg0, %c0_i32 : i32, i32
  }
  func.func @transform_1(%arg0: i32) -> (i32, i32) {
    %c0_i32 = arith.constant 0 : i32
    %c0_i32_0 = arith.constant 0 : i32
    %c0_i32_1 = arith.constant 0 : i32
    return %c0_i32, %c0_i32_0 : i32, i32
  }
  func.func @transform_2(%arg0: i32) -> (i32, i32) {
    %c0_i32 = arith.constant 0 : i32
    %c0_i32_0 = arith.constant 0 : i32
    %c0_i32_1 = arith.constant 0 : i32
    return %c0_i32, %c0_i32_0 : i32, i32
  }
  func.func @transform_3(%arg0: i32) -> (i32, i32) {
    %c0_i32 = arith.constant 0 : i32
    %c0_i32_0 = arith.constant 0 : i32
    return %arg0, %c0_i32 : i32, i32
  }
}

module attributes {stable_mosaic.version = 11 : i64} {
  func.func @_matmul_bias_act_kernel(%arg0: i32, %arg1: memref<144x485xbf16, #tpu.memory_space<vmem>>, %arg2: memref<485x37xbf16, #tpu.memory_space<vmem>>, %arg3: memref<1x37xf32, #tpu.memory_space<vmem>>, %arg4: memref<144x37xf32, #tpu.memory_space<vmem>>) attributes {dimension_semantics = [#tpu.dimension_semantics<parallel>], iteration_bounds = array<i64: 1>, scalar_prefetch = 0 : i64, scratch_operands = 0 : i64, tpu.core_type = #tpu.core_type<tc>, window_params = [{transform_indices = @transform_0, window_bounds = array<i64: 144, 485>}, {pipeline_mode = #tpu.pipeline_mode<synchronous>, transform_indices = @transform_1, window_bounds = array<i64: 485, 37>}, {pipeline_mode = #tpu.pipeline_mode<synchronous>, transform_indices = @transform_2, window_bounds = array<i64: 1, 37>}, {transform_indices = @transform_3, window_bounds = array<i64: 144, 37>}]} {
    %c0 = arith.constant 0 : index
    %c0_0 = arith.constant 0 : index
    %0 = vector.load %arg1[%c0, %c0_0] : memref<144x485xbf16, #tpu.memory_space<vmem>>, vector<144x485xbf16>
    %c0_1 = arith.constant 0 : index
    %c0_2 = arith.constant 0 : index
    %1 = vector.load %arg2[%c0_1, %c0_2] : memref<485x37xbf16, #tpu.memory_space<vmem>>, vector<485x37xbf16>
    %cst = arith.constant dense<0.000000e+00> : vector<144x37xf32>
    %2 = tpu.matmul %0, %1, %cst {dimension_numbers = #tpu.dot_dimension_numbers<[1], [0], [0], [1], [0, 0, 1, 1], [], []>} : vector<144x485xbf16>, vector<485x37xbf16>, vector<144x37xf32> -> vector<144x37xf32>
    %c0_3 = arith.constant 0 : index
    %c0_4 = arith.constant 0 : index
    %3 = vector.load %arg3[%c0_3, %c0_4] : memref<1x37xf32, #tpu.memory_space<vmem>>, vector<1x37xf32>
    %4 = vector.broadcast %3 : vector<1x37xf32> to vector<144x37xf32>
    %5 = arith.addf %2, %4 : vector<144x37xf32>
    %c0_5 = arith.constant 0 : index
    %c0_6 = arith.constant 0 : index
    %6 = vector.load %arg4[%c0_5, %c0_6] : memref<144x37xf32, #tpu.memory_space<vmem>>, vector<144x37xf32>
    tpu.vector_store %arg4[%c0_5, %c0_6], %5 {strides = array<i32>} : memref<144x37xf32, #tpu.memory_space<vmem>>, vector<144x37xf32>,
    return
  }
  func.func @transform_0(%arg0: i32) -> (i32, i32) {
    %c0_i32 = arith.constant 0 : i32
    %c0_i32_0 = arith.constant 0 : i32
    return %arg0, %c0_i32 : i32, i32
  }
  func.func @transform_1(%arg0: i32) -> (i32, i32) {
    %c0_i32 = arith.constant 0 : i32
    %c0_i32_0 = arith.constant 0 : i32
    %c0_i32_1 = arith.constant 0 : i32
    return %c0_i32, %c0_i32_0 : i32, i32
  }
  func.func @transform_2(%arg0: i32) -> (i32, i32) {
    %c0_i32 = arith.constant 0 : i32
    %c0_i32_0 = arith.constant 0 : i32
    %c0_i32_1 = arith.constant 0 : i32
    return %c0_i32, %c0_i32_0 : i32, i32
  }
  func.func @transform_3(%arg0: i32) -> (i32, i32) {
    %c0_i32 = arith.constant 0 : i32
    %c0_i32_0 = arith.constant 0 : i32
    return %arg0, %c0_i32 : i32, i32
  }
}

</mosaic_0001>

<bundles_post_ra>
// kernel: _lambda_.16
= control target key start
LH: loop header
LB: loop body
LE: loop exit
PB: predicated region body
PF: predicated region fallthrough
CT: control target
= control target key end

     0   :  { %s1255_s12 = smov 0   ;;  %s1547_s0 = inlined_call_operand.vmem [shape: bf16[4096,27], index: 0, kind: input, shape index: {}]   ;;  %s1548_s1 = inlined_call_operand.vmem [shape: bf16[27,64], index: 1, kind: input, shape index: {}]   ;;  %s1549_s2 = inlined_call_operand.vmem [shape: f32[1,64], index: 2, kind: input, shape index: {}]   ;;  %s1550_s3 = inlined_call_operand.vmem [shape: f32[4096,64], index: 3, kind: output, shape index: {}]  }
   0x1 LB: > { %s999_s13 = sadd.s32 4294967295, %s1232_s12   ;;  %p1003_p0 = scmp.ge.s32.totalorder %s1232_s12, 1  ;;  %s1232_s12 = sphi %s1255_s12, %s13_s12  }
   0x2   : > { %p138_p1 = scmp.lt.s32.totalorder %s1232_s12, 9 }
   0x4   : > { %p139_p2 = pnand %p1003_p0, %p138_p1 }
   0x5   : > { %s1004_s16 = sshll.u32 (!%p139_p2), %s999_s13, 6 }
   0x6   : > { %142 = sbr.rel (%p139_p2) target bundleno = 284 (0x11c), region = 32  ;;  %p163_p3 = scmp.lt.s32.totalorder (!%p139_p2), %s1004_s16, 511 }
   0xb   : > { %v1192_v0 = vld [vmem:[%s1548_s1 + $0x8] sm:$0x3f]   ;;  %vm518_vm0 = vcmask 1044480   ;;  %vm519_vm1 = vcmask 1045504   ;;  %v1234_v1 = vmov 65535   ;;  %v1193_v5 = vld [vmem:[%s1548_s1] sm:$0xff]  }
   0xc   : > { %v520_v2 = vsel %vm518_vm0, 4294967295, %v1234_v1  ;;  %s1552_s16 = smov (!%p163_p3, %s1004_s16), 511  ;;  %vm421_vm2 = vcmask 220160   ;;  %v1344_v38 = vld [vmem:[%s1549_s2] ss:$0 sm:$0xff]  ;;  %vm878_vm3 = vcmask 523264  }
   0xd   : > { %v521_v3 = vsel %vm519_vm1, %v520_v2, 0  ;;  %s1005_s19 = sshll.u32 %s1552_s16, 2  ;;  %s1007_s25 = sshll.u32 %s1552_s16, 3 }
   0xe   : > { %v523_v4 = vand.u32 %v1192_v0, %v521_v3  ;;  %s1275_s22 = scalar_lea.vmem %s1547_s0, %s1005_s19  ;;  %s1352_s28 = scalar_lea.vmem %s1550_s3, %s1007_s25 }
   0xf   : > { %v1194_v6 = vld [vmem:[%s1275_s22] sm:$0xff]   ;;  %v1196_v8 = vld [vmem:[%s1275_s22 + $0x8] sm:$0xff]   ;;  %v1198_v10 = vld [vmem:[%s1275_s22 + $0x10] sm:$0xff]  }
  0x10   : > { %1111 = vmatprep.subr.bf16.mxu0 %v523_v4  ;;  %1179 = vmatprep.subr.bf16.mxu1 %v523_v4  ;;  %v1195_v7 = vld [vmem:[%s1275_s22 + $0x80] sm:$0xff]   ;;  %v1197_v9 = vld [vmem:[%s1275_s22 + $0x88] sm:$0xff]   ;;  %v1199_v11 = vld [vmem:[%s1275_s22 + $0x90] sm:$0xff]  }
  0x11   : > { %1112 = vmatpush3.bf16.msra.mxu0 %v523_v4  ;;  %1181 = vmatpush3.bf16.msra.mxu1 %v523_v4  ;;  %v1200_v12 = vld [vmem:[%s1275_s22 + $0x18] sm:$0xff]   ;;  %v1202_v14 = vld [vmem:[%s1275_s22 + $0x20] sm:$0xff]   ;;  %v1204_v16 = vld [vmem:[%s1275_s22 + $0x28] sm:$0xff]  }
  0x12   : > { %1113 = vmatprep.subr.bf16.mxu0 %v1193_v5  ;;  %1180 = vmatprep.subr.bf16.mxu1 %v1193_v5  ;;  %v1201_v13 = vld [vmem:[%s1275_s22 + $0x98] sm:$0xff]   ;;  %v1203_v15 = vld [vmem:[%s1275_s22 + $0xa0] sm:$0xff]   ;;  %v1205_v17 = vld [vmem:[%s1275_s22 + $0xa8] sm:$0xff]  }
  0x13   : > { %1115 = vmatprep.mubr.msk.bf16.mxu0 %vm421_vm2, %v1194_v6  ;;  %1147 = vmatprep.mubr.msk.bf16.mxu1 %vm421_vm2, %v1195_v7  ;;  %v1206_v18 = vld [vmem:[%s1275_s22 + $0x30] sm:$0xff]   ;;  %v1208_v20 = vld [vmem:[%s1275_s22 + $0x38] sm:$0xff]   ;;  %v1210_v22 = vld [vmem:[%s1275_s22 + $0x40] sm:$0xff]  }
  0x14   : > { %v1207_v19 = vld [vmem:[%s1275_s22 + $0xb0] sm:$0xff]   ;;  %v1209_v21 = vld [vmem:[%s1275_s22 + $0xb8] sm:$0xff]   ;;  %v1211_v23 = vld [vmem:[%s1275_s22 + $0xc0] sm:$0xff]  }
  0x15   : > { %1114 = vmatpush3.bf16.msra.mxu0 %v1193_v5  ;;  %1182 = vmatpush3.bf16.msra.mxu1 %v1193_v5  ;;  %v1212_v24 = vld [vmem:[%s1275_s22 + $0x48] sm:$0xff]   ;;  %v1214_v26 = vld [vmem:[%s1275_s22 + $0x50] sm:$0xff]   ;;  %v1216_v28 = vld [vmem:[%s1275_s22 + $0x58] sm:$0xff]  }
  0x16   : > { %v1213_v25 = vld [vmem:[%s1275_s22 + $0xc8] sm:$0xff]   ;;  %v1215_v27 = vld [vmem:[%s1275_s22 + $0xd0] sm:$0xff]   ;;  %v1217_v29 = vld [vmem:[%s1275_s22 + $0xd8] sm:$0xff]  }
  0x17   : > { %v1218_v30 = vld [vmem:[%s1275_s22 + $0x60] sm:$0xff]   ;;  %v1220_v32 = vld [vmem:[%s1275_s22 + $0x68] sm:$0xff]   ;;  %v1222_v34 = vld [vmem:[%s1275_s22 + $0x70] sm:$0xff]  }
  0x18   : > { %1116 = vmatmul.mubr.msk.bf16.vlgmr.msra.gmra.mxu0 %vm421_vm2, %v1196_v8  ;;  %1148 = vmatmul.mubr.msk.bf16.vlgmr.msra.gmra.mxu1 %vm421_vm2, %v1197_v9  ;;  %v1219_v31 = vld [vmem:[%s1275_s22 + $0xe0] sm:$0xff]   ;;  %v1221_v33 = vld [vmem:[%s1275_s22 + $0xe8] sm:$0xff]   ;;  %v1223_v35 = vld [vmem:[%s1275_s22 + $0xf0] sm:$0xff]  }
  0x19   : > { %1119 = vmatprep.mubr.msk.bf16.mxu0 %vm421_vm2, %v1198_v10  ;;  %1151 = vmatprep.mubr.msk.bf16.mxu1 %vm421_vm2, %v1199_v11  ;;  %v1224_v36 = vld [vmem:[%s1275_s22 + $0x78] sm:$0xff]  }
  0x1a   : > { %v1225_v37 = vld [vmem:[%s1275_s22 + $0xf8] sm:$0xff]  }
  0x20   : > { %1120 = vmatmul.mubr.msk.bf16.gmra.mxu0 %vm421_vm2, %v1200_v12  ;;  %1152 = vmatmul.mubr.msk.bf16.gmra.mxu1 %vm421_vm2, %v1201_v13 }
  0x21   : > { %1123 = vmatprep.mubr.msk.bf16.mxu0 %vm421_vm2, %v1202_v14  ;;  %1155 = vmatprep.mubr.msk.bf16.mxu1 %vm421_vm2, %v1203_v15 }
  0x28   : > { %1124 = vmatmul.mubr.msk.bf16.gmra.mxu0 %vm421_vm2, %v1204_v16  ;;  %1156 = vmatmul.mubr.msk.bf16.gmra.mxu1 %vm421_vm2, %v1205_v17 }
  0x29   : > { %1127 = vmatprep.mubr.msk.bf16.mxu0 %vm421_vm2, %v1206_v18  ;;  %1159 = vmatprep.mubr.msk.bf16.mxu1 %vm421_vm2, %v1207_v19 }
  0x30   : > { %1128 = vmatmul.mubr.msk.bf16.gmra.mxu0 %vm421_vm2, %v1208_v20  ;;  %1160 = vmatmul.mubr.msk.bf16.gmra.mxu1 %vm421_vm2, %v1209_v21 }
  0x31   : > { %1131 = vmatprep.mubr.msk.bf16.mxu0 %vm421_vm2, %v1210_v22  ;;  %1163 = vmatprep.mubr.msk.bf16.mxu1 %vm421_vm2, %v1211_v23 }
  0x38   : > { %1132 = vmatmul.mubr.msk.bf16.gmra.mxu0 %vm421_vm2, %v1212_v24  ;;  %1164 = vmatmul.mubr.msk.bf16.gmra.mxu1 %vm421_vm2, %v1213_v25 }
  0x39   : > { %1135 = vmatprep.mubr.msk.bf16.mxu0 %vm421_vm2, %v1214_v26  ;;  %1167 = vmatprep.mubr.msk.bf16.mxu1 %vm421_vm2, %v1215_v27 }
  0x40   : > { %1136 = vmatmul.mubr.msk.bf16.gmra.mxu0 %vm421_vm2, %v1216_v28  ;;  %1168 = vmatmul.mubr.msk.bf16.gmra.mxu1 %vm421_vm2, %v1217_v29 }
  0x41   : > { %1139 = vmatprep.mubr.msk.bf16.mxu0 %vm421_vm2, %v1218_v30  ;;  %1171 = vmatprep.mubr.msk.bf16.mxu1 %vm421_vm2, %v1219_v31 }
  0x48   : > { %1140 = vmatmul.mubr.msk.bf16.gmra.mxu0 %vm421_vm2, %v1220_v32  ;;  %1172 = vmatmul.mubr.msk.bf16.gmra.mxu1 %vm421_vm2, %v1221_v33 }
  0x49   : > { %1143 = vmatprep.mubr.msk.bf16.mxu0 %vm421_vm2, %v1222_v34  ;;  %1175 = vmatprep.mubr.msk.bf16.mxu1 %vm421_vm2, %v1223_v35 }
  0x50   : > { %1144 = vmatmul.mubr.msk.bf16.gmra.mxu0 %vm421_vm2, %v1224_v36  ;;  %1176 = vmatmul.mubr.msk.bf16.gmra.mxu1 %vm421_vm2, %v1225_v37 }
  0xd8   : > { %v1117_v39 = vpop.f32.mrf.mxu0  ;;  %v1149_v40 = vpop.f32.mrf.mxu1 }
  0xd9   : > { %v568_v41 = vadd.f32 %v1117_v39, %v1344_v38  ;;  %v696_v42 = vadd.f32 %v1149_v40, %v1344_v38 }
  0xda   : > { %v559_v43 = vpop.f32.mrf.mxu0  ;;  %v687_v44 = vpop.f32.mrf.mxu1 }
  0xdb   : > { %v816_v45 = vmax.f32 %v568_v41, 0.0  ;;  %v848_v46 = vmax.f32 %v696_v42, 0.0  ;;  %v560_v47 = vadd.f32 %v1344_v38, %v559_v43  ;;  %v688_v48 = vadd.f32 %v1344_v38, %v687_v44 }
  0xdc   : > { %v1118_v49 = vpop.f32.mrf.mxu0  ;;  %v1150_v50 = vpop.f32.mrf.mxu1 }
  0xdd   : > { %881 = vst.msk [vmem:[%s1352_s28 + $0x10] sm:$0xff] %vm878_vm3, %v816_v45  ;;  %913 = vst.msk [vmem:[%s1352_s28 + $0x110] sm:$0xff] %vm878_vm3, %v848_v46  ;;  %v814_v51 = vmax.f32 %v560_v47, 0.0  ;;  %v846_v52 = vmax.f32 %v688_v48, 0.0  ;;  %v571_v53 = vadd.f32 %v1118_v49, %v1344_v38  ;;  %v699_v54 = vadd.f32 %v1150_v50, %v1344_v38 }
  0xde   : > { %v562_v55 = vpop.f32.mrf.mxu0  ;;  %v690_v56 = vpop.f32.mrf.mxu1 }
  0xdf   : > { %879 = vst.msk [vmem:[%s1352_s28] sm:$0xff] %vm878_vm3, %v814_v51  ;;  %911 = vst.msk [vmem:[%s1352_s28 + $0x100] sm:$0xff] %vm878_vm3, %v846_v52  ;;  %v817_v57 = vmax.f32 %v571_v53, 0.0  ;;  %v849_v58 = vmax.f32 %v699_v54, 0.0  ;;  %v563_v59 = vadd.f32 %v1344_v38, %v562_v55  ;;  %v691_v60 = vadd.f32 %v1344_v38, %v690_v56 }
  0xe0   : > { %v1121_v61 = vpop.f32.mrf.mxu0  ;;  %v1153_v62 = vpop.f32.mrf.mxu1 }
  0xe1   : > { %882 = vst.msk [vmem:[%s1352_s28 + $0x18] sm:$0xff] %vm878_vm3, %v817_v57  ;;  %914 = vst.msk [vmem:[%s1352_s28 + $0x118] sm:$0xff] %vm878_vm3, %v849_v58  ;;  %v815_v63 = vmax.f32 %v563_v59, 0.0  ;;  %v847_v0 = vmax.f32 %v691_v60, 0.0  ;;  %v584_v1 = vadd.f32 %v1121_v61, %v1344_v38  ;;  %v712_v2 = vadd.f32 %v1153_v62, %v1344_v38 }
  0xe2   : > { %v575_v3 = vpop.f32.mrf.mxu0  ;;  %v703_v4 = vpop.f32.mrf.mxu1 }
  0xe3   : > { %880 = vst.msk [vmem:[%s1352_s28 + $0x8] sm:$0xff] %vm878_vm3, %v815_v63  ;;  %912 = vst.msk [vmem:[%s1352_s28 + $0x108] sm:$0xff] %vm878_vm3, %v847_v0  ;;  %v820_v5 = vmax.f32 %v584_v1, 0.0  ;;  %v852_v6 = vmax.f32 %v712_v2, 0.0  ;;  %v576_v7 = vadd.f32 %v1344_v38, %v575_v3  ;;  %v704_v8 = vadd.f32 %v1344_v38, %v703_v4 }
  0xe4   : > { %v1122_v9 = vpop.f32.mrf.mxu0  ;;  %v1154_v10 = vpop.f32.mrf.mxu1 }
  0xe5   : > { %885 = vst.msk [vmem:[%s1352_s28 + $0x30] sm:$0xff] %vm878_vm3, %v820_v5  ;;  %917 = vst.msk [vmem:[%s1352_s28 + $0x130] sm:$0xff] %vm878_vm3, %v852_v6  ;;  %v818_v11 = vmax.f32 %v576_v7, 0.0  ;;  %v850_v12 = vmax.f32 %v704_v8, 0.0  ;;  %v587_v13 = vadd.f32 %v1122_v9, %v1344_v38  ;;  %v715_v14 = vadd.f32 %v1154_v10, %v1344_v38 }
  0xe6   : > { %v578_v15 = vpop.f32.mrf.mxu0  ;;  %v706_v16 = vpop.f32.mrf.mxu1 }
  0xe7   : > { %883 = vst.msk [vmem:[%s1352_s28 + $0x20] sm:$0xff] %vm878_vm3, %v818_v11  ;;  %915 = vst.msk [vmem:[%s1352_s28 + $0x120] sm:$0xff] %vm878_vm3, %v850_v12  ;;  %v821_v17 = vmax.f32 %v587_v13, 0.0  ;;  %v853_v18 = vmax.f32 %v715_v14, 0.0  ;;  %v579_v19 = vadd.f32 %v1344_v38, %v578_v15  ;;  %v707_v20 = vadd.f32 %v1344_v38, %v706_v16 }
  0xe8   : > { %v1125_v21 = vpop.f32.mrf.mxu0  ;;  %v1157_v22 = vpop.f32.mrf.mxu1 }
  0xe9   : > { %886 = vst.msk [vmem:[%s1352_s28 + $0x38] sm:$0xff] %vm878_vm3, %v821_v17  ;;  %918 = vst.msk [vmem:[%s1352_s28 + $0x138] sm:$0xff] %vm878_vm3, %v853_v18  ;;  %v819_v23 = vmax.f32 %v579_v19, 0.0  ;;  %v851_v24 = vmax.f32 %v707_v20, 0.0  ;;  %v600_v25 = vadd.f32 %v1125_v21, %v1344_v38  ;;  %v728_v26 = vadd.f32 %v1157_v22, %v1344_v38 }
  0xea   : > { %v591_v27 = vpop.f32.mrf.mxu0  ;;  %v719_v28 = vpop.f32.mrf.mxu1 }
  0xeb   : > { %884 = vst.msk [vmem:[%s1352_s28 + $0x28] sm:$0xff] %vm878_vm3, %v819_v23  ;;  %916 = vst.msk [vmem:[%s1352_s28 + $0x128] sm:$0xff] %vm878_vm3, %v851_v24  ;;  %v824_v29 = vmax.f32 %v600_v25, 0.0  ;;  %v856_v30 = vmax.f32 %v728_v26, 0.0  ;;  %v592_v31 = vadd.f32 %v1344_v38, %v591_v27  ;;  %v720_v32 = vadd.f32 %v1344_v38, %v719_v28 }
  0xec   : > { %v1126_v33 = vpop.f32.mrf.mxu0  ;;  %v1158_v34 = vpop.f32.mrf.mxu1 }
  0xed   : > { %889 = vst.msk [vmem:[%s1352_s28 + $0x50] sm:$0xff] %vm878_vm3, %v824_v29  ;;  %921 = vst.msk [vmem:[%s1352_s28 + $0x150] sm:$0xff] %vm878_vm3, %v856_v30  ;;  %v822_v35 = vmax.f32 %v592_v31, 0.0  ;;  %v854_v36 = vmax.f32 %v720_v32, 0.0  ;;  %v603_v37 = vadd.f32 %v1126_v33, %v1344_v38  ;;  %v731_v39 = vadd.f32 %v1158_v34, %v1344_v38 }
  0xee   : > { %v594_v40 = vpop.f32.mrf.mxu0  ;;  %v722_v41 = vpop.f32.mrf.mxu1 }
  0xef   : > { %887 = vst.msk [vmem:[%s1352_s28 + $0x40] sm:$0xff] %vm878_vm3, %v822_v35  ;;  %919 = vst.msk [vmem:[%s1352_s28 + $0x140] sm:$0xff] %vm878_vm3, %v854_v36  ;;  %v825_v42 = vmax.f32 %v603_v37, 0.0  ;;  %v857_v43 = vmax.f32 %v731_v39, 0.0  ;;  %v595_v44 = vadd.f32 %v1344_v38, %v594_v40  ;;  %v723_v45 = vadd.f32 %v1344_v38, %v722_v41 }
  0xf0   : > { %v1129_v46 = vpop.f32.mrf.mxu0  ;;  %v1161_v47 = vpop.f32.mrf.mxu1 }
  0xf1   : > { %890 = vst.msk [vmem:[%s1352_s28 + $0x58] sm:$0xff] %vm878_vm3, %v825_v42  ;;  %922 = vst.msk [vmem:[%s1352_s28 + $0x158] sm:$0xff] %vm878_vm3, %v857_v43  ;;  %v823_v48 = vmax.f32 %v595_v44, 0.0  ;;  %v855_v49 = vmax.f32 %v723_v45, 0.0  ;;  %v616_v50 = vadd.f32 %v1129_v46, %v1344_v38  ;;  %v744_v51 = vadd.f32 %v1161_v47, %v1344_v38 }
  0xf2   : > { %v607_v52 = vpop.f32.mrf.mxu0  ;;  %v735_v53 = vpop.f32.mrf.mxu1 }
  0xf3   : > { %888 = vst.msk [vmem:[%s1352_s28 + $0x48] sm:$0xff] %vm878_vm3, %v823_v48  ;;  %920 = vst.msk [vmem:[%s1352_s28 + $0x148] sm:$0xff] %vm878_vm3, %v855_v49  ;;  %v828_v54 = vmax.f32 %v616_v50, 0.0  ;;  %v860_v55 = vmax.f32 %v744_v51, 0.0  ;;  %v608_v56 = vadd.f32 %v1344_v38, %v607_v52  ;;  %v736_v57 = vadd.f32 %v1344_v38, %v735_v53 }
  0xf4   : > { %v1130_v58 = vpop.f32.mrf.mxu0  ;;  %v1162_v59 = vpop.f32.mrf.mxu1 }
  0xf5   : > { %893 = vst.msk [vmem:[%s1352_s28 + $0x70] sm:$0xff] %vm878_vm3, %v828_v54  ;;  %925 = vst.msk [vmem:[%s1352_s28 + $0x170] sm:$0xff] %vm878_vm3, %v860_v55  ;;  %v826_v60 = vmax.f32 %v608_v56, 0.0  ;;  %v858_v61 = vmax.f32 %v736_v57, 0.0  ;;  %v619_v62 = vadd.f32 %v1130_v58, %v1344_v38  ;;  %v747_v63 = vadd.f32 %v1162_v59, %v1344_v38 }
  0xf6   : > { %v610_v0 = vpop.f32.mrf.mxu0  ;;  %v738_v1 = vpop.f32.mrf.mxu1 }
  0xf7   : > { %891 = vst.msk [vmem:[%s1352_s28 + $0x60] sm:$0xff] %vm878_vm3, %v826_v60  ;;  %923 = vst.msk [vmem:[%s1352_s28 + $0x160] sm:$0xff] %vm878_vm3, %v858_v61  ;;  %v829_v2 = vmax.f32 %v619_v62, 0.0  ;;  %v861_v3 = vmax.f32 %v747_v63, 0.0  ;;  %v611_v4 = vadd.f32 %v1344_v38, %v610_v0  ;;  %v739_v5 = vadd.f32 %v1344_v38, %v738_v1 }
  0xf8   : > { %v1133_v6 = vpop.f32.mrf.mxu0  ;;  %v1165_v7 = vpop.f32.mrf.mxu1 }
  0xf9   : > { %894 = vst.msk [vmem:[%s1352_s28 + $0x78] sm:$0xff] %vm878_vm3, %v829_v2  ;;  %926 = vst.msk [vmem:[%s1352_s28 + $0x178] sm:$0xff] %vm878_vm3, %v861_v3  ;;  %v827_v8 = vmax.f32 %v611_v4, 0.0  ;;  %v859_v9 = vmax.f32 %v739_v5, 0.0  ;;  %v632_v10 = vadd.f32 %v1133_v6, %v1344_v38  ;;  %v760_v11 = vadd.f32 %v1165_v7, %v1344_v38 }
  0xfa   : > { %v623_v12 = vpop.f32.mrf.mxu0  ;;  %v751_v13 = vpop.f32.mrf.mxu1 }
  0xfb   : > { %892 = vst.msk [vmem:[%s1352_s28 + $0x68] sm:$0xff] %vm878_vm3, %v827_v8  ;;  %924 = vst.msk [vmem:[%s1352_s28 + $0x168] sm:$0xff] %vm878_vm3, %v859_v9  ;;  %v832_v14 = vmax.f32 %v632_v10, 0.0  ;;  %v864_v15 = vmax.f32 %v760_v11, 0.0  ;;  %v624_v16 = vadd.f32 %v1344_v38, %v623_v12  ;;  %v752_v17 = vadd.f32 %v1344_v38, %v751_v13 }
  0xfc   : > { %v1134_v18 = vpop.f32.mrf.mxu0  ;;  %v1166_v19 = vpop.f32.mrf.mxu1 }
  0xfd   : > { %897 = vst.msk [vmem:[%s1352_s28 + $0x90] sm:$0xff] %vm878_vm3, %v832_v14  ;;  %929 = vst.msk [vmem:[%s1352_s28 + $0x190] sm:$0xff] %vm878_vm3, %v864_v15  ;;  %v830_v20 = vmax.f32 %v624_v16, 0.0  ;;  %v862_v21 = vmax.f32 %v752_v17, 0.0  ;;  %v635_v22 = vadd.f32 %v1134_v18, %v1344_v38  ;;  %v763_v23 = vadd.f32 %v1166_v19, %v1344_v38 }
  0xfe   : > { %v626_v24 = vpop.f32.mrf.mxu0  ;;  %v754_v25 = vpop.f32.mrf.mxu1 }
  0xff   : > { %895 = vst.msk [vmem:[%s1352_s28 + $0x80] sm:$0xff] %vm878_vm3, %v830_v20  ;;  %927 = vst.msk [vmem:[%s1352_s28 + $0x180] sm:$0xff] %vm878_vm3, %v862_v21  ;;  %v833_v26 = vmax.f32 %v635_v22, 0.0  ;;  %v865_v27 = vmax.f32 %v763_v23, 0.0  ;;  %v627_v28 = vadd.f32 %v1344_v38, %v626_v24  ;;  %v755_v29 = vadd.f32 %v1344_v38, %v754_v25 }
 0x100   : > { %v1137_v30 = vpop.f32.mrf.mxu0  ;;  %v1169_v31 = vpop.f32.mrf.mxu1 }
 0x101   : > { %898 = vst.msk [vmem:[%s1352_s28 + $0x98] sm:$0xff] %vm878_vm3, %v833_v26  ;;  %930 = vst.msk [vmem:[%s1352_s28 + $0x198] sm:$0xff] %vm878_vm3, %v865_v27  ;;  %v831_v32 = vmax.f32 %v627_v28, 0.0  ;;  %v863_v33 = vmax.f32 %v755_v29, 0.0  ;;  %v648_v34 = vadd.f32 %v1137_v30, %v1344_v38  ;;  %v776_v35 = vadd.f32 %v1169_v31, %v1344_v38 }
 0x102   : > { %v639_v36 = vpop.f32.mrf.mxu0  ;;  %v767_v37 = vpop.f32.mrf.mxu1 }
 0x103   : > { %896 = vst.msk [vmem:[%s1352_s28 + $0x88] sm:$0xff] %vm878_vm3, %v831_v32  ;;  %928 = vst.msk [vmem:[%s1352_s28 + $0x188] sm:$0xff] %vm878_vm3, %v863_v33  ;;  %v836_v39 = vmax.f32 %v648_v34, 0.0  ;;  %v868_v40 = vmax.f32 %v776_v35, 0.0  ;;  %v640_v41 = vadd.f32 %v1344_v38, %v639_v36  ;;  %v768_v42 = vadd.f32 %v1344_v38, %v767_v37 }
 0x104   : > { %v1138_v43 = vpop.f32.mrf.mxu0  ;;  %v1170_v44 = vpop.f32.mrf.mxu1 }
 0x105   : > { %901 = vst.msk [vmem:[%s1352_s28 + $0xb0] sm:$0xff] %vm878_vm3, %v836_v39  ;;  %933 = vst.msk [vmem:[%s1352_s28 + $0x1b0] sm:$0xff] %vm878_vm3, %v868_v40  ;;  %v834_v45 = vmax.f32 %v640_v41, 0.0  ;;  %v866_v46 = vmax.f32 %v768_v42, 0.0  ;;  %v651_v47 = vadd.f32 %v1138_v43, %v1344_v38  ;;  %v779_v48 = vadd.f32 %v1170_v44, %v1344_v38 }
 0x106   : > { %v642_v49 = vpop.f32.mrf.mxu0  ;;  %v770_v50 = vpop.f32.mrf.mxu1 }
 0x107   : > { %899 = vst.msk [vmem:[%s1352_s28 + $0xa0] sm:$0xff] %vm878_vm3, %v834_v45  ;;  %931 = vst.msk [vmem:[%s1352_s28 + $0x1a0] sm:$0xff] %vm878_vm3, %v866_v46  ;;  %v837_v51 = vmax.f32 %v651_v47, 0.0  ;;  %v869_v52 = vmax.f32 %v779_v48, 0.0  ;;  %v643_v53 = vadd.f32 %v1344_v38, %v642_v49  ;;  %v771_v54 = vadd.f32 %v1344_v38, %v770_v50 }
 0x108   : > { %v1141_v55 = vpop.f32.mrf.mxu0  ;;  %v1173_v56 = vpop.f32.mrf.mxu1 }
 0x109   : > { %902 = vst.msk [vmem:[%s1352_s28 + $0xb8] sm:$0xff] %vm878_vm3, %v837_v51  ;;  %934 = vst.msk [vmem:[%s1352_s28 + $0x1b8] sm:$0xff] %vm878_vm3, %v869_v52  ;;  %v835_v57 = vmax.f32 %v643_v53, 0.0  ;;  %v867_v58 = vmax.f32 %v771_v54, 0.0  ;;  %v664_v59 = vadd.f32 %v1141_v55, %v1344_v38  ;;  %v792_v60 = vadd.f32 %v1173_v56, %v1344_v38 }
 0x10a   : > { %v655_v61 = vpop.f32.mrf.mxu0  ;;  %v783_v62 = vpop.f32.mrf.mxu1 }
 0x10b   : > { %900 = vst.msk [vmem:[%s1352_s28 + $0xa8] sm:$0xff] %vm878_vm3, %v835_v57  ;;  %932 = vst.msk [vmem:[%s1352_s28 + $0x1a8] sm:$0xff] %vm878_vm3, %v867_v58  ;;  %v840_v63 = vmax.f32 %v664_v59, 0.0  ;;  %v872_v0 = vmax.f32 %v792_v60, 0.0  ;;  %v656_v1 = vadd.f32 %v1344_v38, %v655_v61  ;;  %v784_v2 = vadd.f32 %v1344_v38, %v783_v62 }
 0x10c   : > { %v1142_v3 = vpop.f32.mrf.mxu0  ;;  %v1174_v4 = vpop.f32.mrf.mxu1 }
 0x10d   : > { %905 = vst.msk [vmem:[%s1352_s28 + $0xd0] sm:$0xff] %vm878_vm3, %v840_v63  ;;  %937 = vst.msk [vmem:[%s1352_s28 + $0x1d0] sm:$0xff] %vm878_vm3, %v872_v0  ;;  %v838_v5 = vmax.f32 %v656_v1, 0.0  ;;  %v870_v6 = vmax.f32 %v784_v2, 0.0  ;;  %v667_v7 = vadd.f32 %v1142_v3, %v1344_v38  ;;  %v795_v8 = vadd.f32 %v1174_v4, %v1344_v38 }
 0x10e   : > { %v658_v9 = vpop.f32.mrf.mxu0  ;;  %v786_v10 = vpop.f32.mrf.mxu1 }
 0x10f   : > { %903 = vst.msk [vmem:[%s1352_s28 + $0xc0] sm:$0xff] %vm878_vm3, %v838_v5  ;;  %935 = vst.msk [vmem:[%s1352_s28 + $0x1c0] sm:$0xff] %vm878_vm3, %v870_v6  ;;  %v841_v11 = vmax.f32 %v667_v7, 0.0  ;;  %v873_v12 = vmax.f32 %v795_v8, 0.0  ;;  %v659_v13 = vadd.f32 %v1344_v38, %v658_v9  ;;  %v787_v14 = vadd.f32 %v1344_v38, %v786_v10 }
 0x110   : > { %v1145_v15 = vpop.f32.mrf.mxu0  ;;  %v1177_v16 = vpop.f32.mrf.mxu1 }
 0x111   : > { %906 = vst.msk [vmem:[%s1352_s28 + $0xd8] sm:$0xff] %vm878_vm3, %v841_v11  ;;  %938 = vst.msk [vmem:[%s1352_s28 + $0x1d8] sm:$0xff] %vm878_vm3, %v873_v12  ;;  %v839_v17 = vmax.f32 %v659_v13, 0.0  ;;  %v871_v18 = vmax.f32 %v787_v14, 0.0  ;;  %v680_v19 = vadd.f32 %v1145_v15, %v1344_v38  ;;  %v808_v20 = vadd.f32 %v1177_v16, %v1344_v38 }
 0x112   : > { %v671_v21 = vpop.f32.mrf.mxu0  ;;  %v799_v22 = vpop.f32.mrf.mxu1 }
 0x113   : > { %904 = vst.msk [vmem:[%s1352_s28 + $0xc8] sm:$0xff] %vm878_vm3, %v839_v17  ;;  %936 = vst.msk [vmem:[%s1352_s28 + $0x1c8] sm:$0xff] %vm878_vm3, %v871_v18  ;;  %v844_v23 = vmax.f32 %v680_v19, 0.0  ;;  %v876_v24 = vmax.f32 %v808_v20, 0.0  ;;  %v672_v25 = vadd.f32 %v1344_v38, %v671_v21  ;;  %v800_v26 = vadd.f32 %v1344_v38, %v799_v22 }
 0x114   : > { %v1146_v27 = vpop.f32.mrf.mxu0  ;;  %v1178_v28 = vpop.f32.mrf.mxu1 }
 0x115   : > { %909 = vst.msk [vmem:[%s1352_s28 + $0xf0] sm:$0xff] %vm878_vm3, %v844_v23  ;;  %941 = vst.msk [vmem:[%s1352_s28 + $0x1f0] sm:$0xff] %vm878_vm3, %v876_v24  ;;  %v842_v29 = vmax.f32 %v672_v25, 0.0  ;;  %v874_v30 = vmax.f32 %v800_v26, 0.0  ;;  %v683_v31 = vadd.f32 %v1146_v27, %v1344_v38  ;;  %v811_v32 = vadd.f32 %v1178_v28, %v1344_v38 }
 0x116   : > { %v674_v33 = vpop.f32.mrf.mxu0  ;;  %v802_v34 = vpop.f32.mrf.mxu1 }
 0x117   : > { %907 = vst.msk [vmem:[%s1352_s28 + $0xe0] sm:$0xff] %vm878_vm3, %v842_v29  ;;  %939 = vst.msk [vmem:[%s1352_s28 + $0x1e0] sm:$0xff] %vm878_vm3, %v874_v30  ;;  %v845_v35 = vmax.f32 %v683_v31, 0.0  ;;  %v877_v36 = vmax.f32 %v811_v32, 0.0  ;;  %v675_v37 = vadd.f32 %v1344_v38, %v674_v33  ;;  %v803_v39 = vadd.f32 %v1344_v38, %v802_v34 }
 0x119   : > { %910 = vst.msk [vmem:[%s1352_s28 + $0xf8] sm:$0xff] %vm878_vm3, %v845_v35  ;;  %942 = vst.msk [vmem:[%s1352_s28 + $0x1f8] sm:$0xff] %vm878_vm3, %v877_v36  ;;  %v843_v40 = vmax.f32 %v675_v37, 0.0  ;;  %v875_v41 = vmax.f32 %v803_v39, 0.0 }
 0x11b   : > { %908 = vst.msk [vmem:[%s1352_s28 + $0xe8] sm:$0xff] %vm878_vm3, %v843_v40  ;;  %940 = vst.msk [vmem:[%s1352_s28 + $0x1e8] sm:$0xff] %vm878_vm3, %v875_v41 }
 0x11c PF: > { %s13_s12 = sadd.s32 1, %s1232_s12  }
 0x11d   : > { %p10_p4 = scmp.ge.s32.totalorder %s13_s12, 10  }
 0x11f   :  { %12 = sbr.rel (!%p10_p4) target bundleno = 1 (0x1), region = 62 }

// kernel: _lambda_.17
= control target key start
LH: loop header
LB: loop body
LE: loop exit
PB: predicated region body
PF: predicated region fallthrough
CT: control target
= control target key end

     0   :  { %s1277_s12 = smov 0   ;;  %s1575_s0 = inlined_call_operand.vmem [shape: bf16[4096,64], index: 0, kind: input, shape index: {}]   ;;  %s1576_s1 = inlined_call_operand.vmem [shape: bf16[64,32], index: 1, kind: input, shape index: {}]   ;;  %s1577_s2 = inlined_call_operand.vmem [shape: f32[1,32], index: 2, kind: input, shape index: {}]   ;;  %s1578_s3 = inlined_call_operand.vmem [shape: f32[4096,32], index: 3, kind: output, shape index: {}]  }
   0x1 LB: > { %s1009_s13 = sadd.s32 4294967295, %s1255_s12   ;;  %p1013_p0 = scmp.ge.s32.totalorder %s1255_s12, 1  ;;  %s1255_s12 = sphi %s1277_s12, %s13_s12  }
   0x2   : > { %p138_p1 = scmp.lt.s32.totalorder %s1255_s12, 9 }
   0x4   : > { %p139_p2 = pnand %p1013_p0, %p138_p1 }
   0x5   : > { %s1014_s16 = sshll.u32 (!%p139_p2), %s1009_s13, 6 }
   0x6   : > { %142 = sbr.rel (%p139_p2) target bundleno = 288 (0x120), region = 32  ;;  %p163_p3 = scmp.lt.s32.totalorder (!%p139_p2), %s1014_s16, 511 }
   0xb   : > { %v1213_v0 = vld [vmem:[%s1576_s1 + $0x18] sm:$0xff]   ;;  %v1214_v1 = vld [vmem:[%s1576_s1 + $0x10] sm:$0xff]   ;;  %s1580_s16 = smov (!%p163_p3, %s1014_s16), 511  ;;  %v1215_v2 = vld [vmem:[%s1576_s1 + $0x8] sm:$0xff]   ;;  %vm438_vm0 = vcmask 523264   ;;  %vm888_vm1 = vcmask 261120  }
   0xc   : > { %1125 = vmatprep.subr.bf16.mxu0 %v1213_v0  ;;  %1197 = vmatprep.subr.bf16.mxu1 %v1213_v0  ;;  %s1015_s21 = sshll.u32 %s1580_s16, 2  ;;  %v1216_v3 = vld [vmem:[%s1576_s1] sm:$0xff]   ;;  %s1017_s29 = sshll.u32 %s1580_s16, 3 }
   0xd   : > { %1126 = vmatpush3.bf16.msra.mxu0 %v1213_v0  ;;  %1201 = vmatpush3.bf16.msra.mxu1 %v1213_v0  ;;  %s1303_s26 = scalar_lea.vmem %s1575_s0, %s1015_s21  ;;  %v1372_v36 = vld [vmem:[%s1577_s2] ss:$0 sm:$0xff]  ;;  %s1380_s5 = scalar_lea.vmem %s1578_s3, %s1017_s29 }
   0xe   : > { %1127 = vmatprep.subr.bf16.mxu0 %v1214_v1  ;;  %1198 = vmatprep.subr.bf16.mxu1 %v1214_v1  ;;  %v1217_v4 = vld [vmem:[%s1303_s26] sm:$0xff]   ;;  %v1219_v6 = vld [vmem:[%s1303_s26 + $0x8] sm:$0xff]   ;;  %v1221_v8 = vld [vmem:[%s1303_s26 + $0x10] sm:$0xff]  }
   0xf   : > { %v1218_v5 = vld [vmem:[%s1303_s26 + $0x80] sm:$0xff]   ;;  %1133 = vmatprep.mubr.msk.bf16.mxu0 %vm438_vm0, %v1217_v4  ;;  %v1220_v7 = vld [vmem:[%s1303_s26 + $0x88] sm:$0xff]   ;;  %v1222_v9 = vld [vmem:[%s1303_s26 + $0x90] sm:$0xff]  }
  0x10   : > { %1165 = vmatprep.mubr.msk.bf16.mxu1 %vm438_vm0, %v1218_v5  ;;  %v1223_v10 = vld [vmem:[%s1303_s26 + $0x18] sm:$0xff]   ;;  %v1225_v12 = vld [vmem:[%s1303_s26 + $0x20] sm:$0xff]   ;;  %v1227_v14 = vld [vmem:[%s1303_s26 + $0x28] sm:$0xff]  }
  0x11   : > { %1128 = vmatpush3.bf16.msra.mxu0 %v1214_v1  ;;  %1202 = vmatpush3.bf16.msra.mxu1 %v1214_v1  ;;  %v1224_v11 = vld [vmem:[%s1303_s26 + $0x98] sm:$0xff]   ;;  %v1226_v13 = vld [vmem:[%s1303_s26 + $0xa0] sm:$0xff]   ;;  %v1228_v15 = vld [vmem:[%s1303_s26 + $0xa8] sm:$0xff]  }
  0x12   : > { %1129 = vmatprep.subr.bf16.mxu0 %v1215_v2  ;;  %1199 = vmatprep.subr.bf16.mxu1 %v1215_v2  ;;  %v1229_v16 = vld [vmem:[%s1303_s26 + $0x30] sm:$0xff]   ;;  %v1231_v18 = vld [vmem:[%s1303_s26 + $0x38] sm:$0xff]   ;;  %v1233_v20 = vld [vmem:[%s1303_s26 + $0x40] sm:$0xff]  }
  0x13   : > { %v1230_v17 = vld [vmem:[%s1303_s26 + $0xb0] sm:$0xff]   ;;  %v1232_v19 = vld [vmem:[%s1303_s26 + $0xb8] sm:$0xff]   ;;  %v1234_v21 = vld [vmem:[%s1303_s26 + $0xc0] sm:$0xff]  }
  0x14   : > { %v1235_v22 = vld [vmem:[%s1303_s26 + $0x48] sm:$0xff]   ;;  %v1237_v24 = vld [vmem:[%s1303_s26 + $0x50] sm:$0xff]   ;;  %v1239_v26 = vld [vmem:[%s1303_s26 + $0x58] sm:$0xff]  }
  0x15   : > { %1130 = vmatpush3.bf16.msra.mxu0 %v1215_v2  ;;  %1203 = vmatpush3.bf16.msra.mxu1 %v1215_v2  ;;  %v1236_v23 = vld [vmem:[%s1303_s26 + $0xc8] sm:$0xff]   ;;  %v1238_v25 = vld [vmem:[%s1303_s26 + $0xd0] sm:$0xff]   ;;  %v1240_v27 = vld [vmem:[%s1303_s26 + $0xd8] sm:$0xff]  }
  0x16   : > { %1131 = vmatprep.subr.bf16.mxu0 %v1216_v3  ;;  %1200 = vmatprep.subr.bf16.mxu1 %v1216_v3  ;;  %v1241_v28 = vld [vmem:[%s1303_s26 + $0x60] sm:$0xff]   ;;  %v1243_v30 = vld [vmem:[%s1303_s26 + $0x68] sm:$0xff]   ;;  %v1245_v32 = vld [vmem:[%s1303_s26 + $0x70] sm:$0xff]  }
  0x17   : > { %v1242_v29 = vld [vmem:[%s1303_s26 + $0xe0] sm:$0xff]   ;;  %v1244_v31 = vld [vmem:[%s1303_s26 + $0xe8] sm:$0xff]   ;;  %v1246_v33 = vld [vmem:[%s1303_s26 + $0xf0] sm:$0xff]  }
  0x18   : > { %v1247_v34 = vld [vmem:[%s1303_s26 + $0x78] sm:$0xff]  }
  0x19   : > { %1132 = vmatpush3.bf16.msra.mxu0 %v1216_v3  ;;  %1204 = vmatpush3.bf16.msra.mxu1 %v1216_v3  ;;  %v1248_v35 = vld [vmem:[%s1303_s26 + $0xf8] sm:$0xff]  }
  0x1c   : > { %1134 = vmatmul.mubr.msk.bf16.vlgmr.msra.gmra.mxu0 %vm438_vm0, %v1219_v6  ;;  %1166 = vmatmul.mubr.msk.bf16.vlgmr.msra.gmra.mxu1 %vm438_vm0, %v1220_v7 }
  0x1d   : > { %1137 = vmatprep.mubr.msk.bf16.mxu0 %vm438_vm0, %v1221_v8  ;;  %1169 = vmatprep.mubr.msk.bf16.mxu1 %vm438_vm0, %v1222_v9 }
  0x24   : > { %1138 = vmatmul.mubr.msk.bf16.gmra.mxu0 %vm438_vm0, %v1223_v10  ;;  %1170 = vmatmul.mubr.msk.bf16.gmra.mxu1 %vm438_vm0, %v1224_v11 }
  0x25   : > { %1141 = vmatprep.mubr.msk.bf16.mxu0 %vm438_vm0, %v1225_v12  ;;  %1173 = vmatprep.mubr.msk.bf16.mxu1 %vm438_vm0, %v1226_v13 }
  0x2c   : > { %1142 = vmatmul.mubr.msk.bf16.gmra.mxu0 %vm438_vm0, %v1227_v14  ;;  %1174 = vmatmul.mubr.msk.bf16.gmra.mxu1 %vm438_vm0, %v1228_v15 }
  0x2d   : > { %1145 = vmatprep.mubr.msk.bf16.mxu0 %vm438_vm0, %v1229_v16  ;;  %1177 = vmatprep.mubr.msk.bf16.mxu1 %vm438_vm0, %v1230_v17 }
  0x34   : > { %1146 = vmatmul.mubr.msk.bf16.gmra.mxu0 %vm438_vm0, %v1231_v18  ;;  %1178 = vmatmul.mubr.msk.bf16.gmra.mxu1 %vm438_vm0, %v1232_v19 }
  0x35   : > { %1149 = vmatprep.mubr.msk.bf16.mxu0 %vm438_vm0, %v1233_v20  ;;  %1181 = vmatprep.mubr.msk.bf16.mxu1 %vm438_vm0, %v1234_v21 }
  0x3c   : > { %1150 = vmatmul.mubr.msk.bf16.gmra.mxu0 %vm438_vm0, %v1235_v22  ;;  %1182 = vmatmul.mubr.msk.bf16.gmra.mxu1 %vm438_vm0, %v1236_v23 }
  0x3d   : > { %1153 = vmatprep.mubr.msk.bf16.mxu0 %vm438_vm0, %v1237_v24  ;;  %1185 = vmatprep.mubr.msk.bf16.mxu1 %vm438_vm0, %v1238_v25 }
  0x44   : > { %1154 = vmatmul.mubr.msk.bf16.gmra.mxu0 %vm438_vm0, %v1239_v26  ;;  %1186 = vmatmul.mubr.msk.bf16.gmra.mxu1 %vm438_vm0, %v1240_v27 }
  0x45   : > { %1157 = vmatprep.mubr.msk.bf16.mxu0 %vm438_vm0, %v1241_v28  ;;  %1189 = vmatprep.mubr.msk.bf16.mxu1 %vm438_vm0, %v1242_v29 }
  0x4c   : > { %1158 = vmatmul.mubr.msk.bf16.gmra.mxu0 %vm438_vm0, %v1243_v30  ;;  %1190 = vmatmul.mubr.msk.bf16.gmra.mxu1 %vm438_vm0, %v1244_v31 }
  0x4d   : > { %1161 = vmatprep.mubr.msk.bf16.mxu0 %vm438_vm0, %v1245_v32  ;;  %1193 = vmatprep.mubr.msk.bf16.mxu1 %vm438_vm0, %v1246_v33 }
  0x54   : > { %1162 = vmatmul.mubr.msk.bf16.gmra.mxu0 %vm438_vm0, %v1247_v34  ;;  %1194 = vmatmul.mubr.msk.bf16.gmra.mxu1 %vm438_vm0, %v1248_v35 }
  0xdc   : > { %v1135_v37 = vpop.f32.mrf.mxu0  ;;  %v1167_v38 = vpop.f32.mrf.mxu1 }
  0xdd   : > { %v578_v39 = vadd.f32 %v1135_v37, %v1372_v36  ;;  %v706_v40 = vadd.f32 %v1167_v38, %v1372_v36 }
  0xde   : > { %v569_v41 = vpop.f32.mrf.mxu0  ;;  %v697_v42 = vpop.f32.mrf.mxu1 }
  0xdf   : > { %v826_v43 = vmax.f32 %v578_v39, 0.0  ;;  %v858_v44 = vmax.f32 %v706_v40, 0.0  ;;  %v570_v45 = vadd.f32 %v1372_v36, %v569_v41  ;;  %v698_v46 = vadd.f32 %v1372_v36, %v697_v42 }
  0xe0   : > { %v1136_v47 = vpop.f32.mrf.mxu0  ;;  %v1168_v48 = vpop.f32.mrf.mxu1 }
  0xe1   : > { %891 = vst.msk [vmem:[%s1380_s5 + $0x10] sm:$0xff] %vm888_vm1, %v826_v43  ;;  %923 = vst.msk [vmem:[%s1380_s5 + $0x110] sm:$0xff] %vm888_vm1, %v858_v44  ;;  %v824_v49 = vmax.f32 %v570_v45, 0.0  ;;  %v856_v50 = vmax.f32 %v698_v46, 0.0  ;;  %v581_v51 = vadd.f32 %v1136_v47, %v1372_v36  ;;  %v709_v52 = vadd.f32 %v1168_v48, %v1372_v36 }
  0xe2   : > { %v572_v53 = vpop.f32.mrf.mxu0  ;;  %v700_v54 = vpop.f32.mrf.mxu1 }
  0xe3   : > { %889 = vst.msk [vmem:[%s1380_s5] sm:$0xff] %vm888_vm1, %v824_v49  ;;  %921 = vst.msk [vmem:[%s1380_s5 + $0x100] sm:$0xff] %vm888_vm1, %v856_v50  ;;  %v827_v55 = vmax.f32 %v581_v51, 0.0  ;;  %v859_v56 = vmax.f32 %v709_v52, 0.0  ;;  %v573_v57 = vadd.f32 %v1372_v36, %v572_v53  ;;  %v701_v58 = vadd.f32 %v1372_v36, %v700_v54 }
  0xe4   : > { %v1139_v59 = vpop.f32.mrf.mxu0  ;;  %v1171_v60 = vpop.f32.mrf.mxu1 }
  0xe5   : > { %892 = vst.msk [vmem:[%s1380_s5 + $0x18] sm:$0xff] %vm888_vm1, %v827_v55  ;;  %924 = vst.msk [vmem:[%s1380_s5 + $0x118] sm:$0xff] %vm888_vm1, %v859_v56  ;;  %v825_v61 = vmax.f32 %v573_v57, 0.0  ;;  %v857_v62 = vmax.f32 %v701_v58, 0.0  ;;  %v594_v63 = vadd.f32 %v1139_v59, %v1372_v36  ;;  %v722_v0 = vadd.f32 %v1171_v60, %v1372_v36 }
  0xe6   : > { %v585_v1 = vpop.f32.mrf.mxu0  ;;  %v713_v2 = vpop.f32.mrf.mxu1 }
  0xe7   : > { %890 = vst.msk [vmem:[%s1380_s5 + $0x8] sm:$0xff] %vm888_vm1, %v825_v61  ;;  %922 = vst.msk [vmem:[%s1380_s5 + $0x108] sm:$0xff] %vm888_vm1, %v857_v62  ;;  %v830_v3 = vmax.f32 %v594_v63, 0.0  ;;  %v862_v4 = vmax.f32 %v722_v0, 0.0  ;;  %v586_v5 = vadd.f32 %v1372_v36, %v585_v1  ;;  %v714_v6 = vadd.f32 %v1372_v36, %v713_v2 }
  0xe8   : > { %v1140_v7 = vpop.f32.mrf.mxu0  ;;  %v1172_v8 = vpop.f32.mrf.mxu1 }
  0xe9   : > { %895 = vst.msk [vmem:[%s1380_s5 + $0x30] sm:$0xff] %vm888_vm1, %v830_v3  ;;  %927 = vst.msk [vmem:[%s1380_s5 + $0x130] sm:$0xff] %vm888_vm1, %v862_v4  ;;  %v828_v9 = vmax.f32 %v586_v5, 0.0  ;;  %v860_v10 = vmax.f32 %v714_v6, 0.0  ;;  %v597_v11 = vadd.f32 %v1140_v7, %v1372_v36  ;;  %v725_v12 = vadd.f32 %v1172_v8, %v1372_v36 }
  0xea   : > { %v588_v13 = vpop.f32.mrf.mxu0  ;;  %v716_v14 = vpop.f32.mrf.mxu1 }
  0xeb   : > { %893 = vst.msk [vmem:[%s1380_s5 + $0x20] sm:$0xff] %vm888_vm1, %v828_v9  ;;  %925 = vst.msk [vmem:[%s1380_s5 + $0x120] sm:$0xff] %vm888_vm1, %v860_v10  ;;  %v831_v15 = vmax.f32 %v597_v11, 0.0  ;;  %v863_v16 = vmax.f32 %v725_v12, 0.0  ;;  %v589_v17 = vadd.f32 %v1372_v36, %v588_v13  ;;  %v717_v18 = vadd.f32 %v1372_v36, %v716_v14 }
  0xec   : > { %v1143_v19 = vpop.f32.mrf.mxu0  ;;  %v1175_v20 = vpop.f32.mrf.mxu1 }
  0xed   : > { %896 = vst.msk [vmem:[%s1380_s5 + $0x38] sm:$0xff] %vm888_vm1, %v831_v15  ;;  %928 = vst.msk [vmem:[%s1380_s5 + $0x138] sm:$0xff] %vm888_vm1, %v863_v16  ;;  %v829_v21 = vmax.f32 %v589_v17, 0.0  ;;  %v861_v22 = vmax.f32 %v717_v18, 0.0  ;;  %v610_v23 = vadd.f32 %v1143_v19, %v1372_v36  ;;  %v738_v24 = vadd.f32 %v1175_v20, %v1372_v36 }
  0xee   : > { %v601_v25 = vpop.f32.mrf.mxu0  ;;  %v729_v26 = vpop.f32.mrf.mxu1 }
  0xef   : > { %894 = vst.msk [vmem:[%s1380_s5 + $0x28] sm:$0xff] %vm888_vm1, %v829_v21  ;;  %926 = vst.msk [vmem:[%s1380_s5 + $0x128] sm:$0xff] %vm888_vm1, %v861_v22  ;;  %v834_v27 = vmax.f32 %v610_v23, 0.0  ;;  %v866_v28 = vmax.f32 %v738_v24, 0.0  ;;  %v602_v29 = vadd.f32 %v1372_v36, %v601_v25  ;;  %v730_v30 = vadd.f32 %v1372_v36, %v729_v26 }
  0xf0   : > { %v1144_v31 = vpop.f32.mrf.mxu0  ;;  %v1176_v32 = vpop.f32.mrf.mxu1 }
  0xf1   : > { %899 = vst.msk [vmem:[%s1380_s5 + $0x50] sm:$0xff] %vm888_vm1, %v834_v27  ;;  %931 = vst.msk [vmem:[%s1380_s5 + $0x150] sm:$0xff] %vm888_vm1, %v866_v28  ;;  %v832_v33 = vmax.f32 %v602_v29, 0.0  ;;  %v864_v34 = vmax.f32 %v730_v30, 0.0  ;;  %v613_v35 = vadd.f32 %v1144_v31, %v1372_v36  ;;  %v741_v37 = vadd.f32 %v1176_v32, %v1372_v36 }
  0xf2   : > { %v604_v38 = vpop.f32.mrf.mxu0  ;;  %v732_v39 = vpop.f32.mrf.mxu1 }
  0xf3   : > { %897 = vst.msk [vmem:[%s1380_s5 + $0x40] sm:$0xff] %vm888_vm1, %v832_v33  ;;  %929 = vst.msk [vmem:[%s1380_s5 + $0x140] sm:$0xff] %vm888_vm1, %v864_v34  ;;  %v835_v40 = vmax.f32 %v613_v35, 0.0  ;;  %v867_v41 = vmax.f32 %v741_v37, 0.0  ;;  %v605_v42 = vadd.f32 %v1372_v36, %v604_v38  ;;  %v733_v43 = vadd.f32 %v1372_v36, %v732_v39 }
  0xf4   : > { %v1147_v44 = vpop.f32.mrf.mxu0  ;;  %v1179_v45 = vpop.f32.mrf.mxu1 }
  0xf5   : > { %900 = vst.msk [vmem:[%s1380_s5 + $0x58] sm:$0xff] %vm888_vm1, %v835_v40  ;;  %932 = vst.msk [vmem:[%s1380_s5 + $0x158] sm:$0xff] %vm888_vm1, %v867_v41  ;;  %v833_v46 = vmax.f32 %v605_v42, 0.0  ;;  %v865_v47 = vmax.f32 %v733_v43, 0.0  ;;  %v626_v48 = vadd.f32 %v1147_v44, %v1372_v36  ;;  %v754_v49 = vadd.f32 %v1179_v45, %v1372_v36 }
  0xf6   : > { %v617_v50 = vpop.f32.mrf.mxu0  ;;  %v745_v51 = vpop.f32.mrf.mxu1 }
  0xf7   : > { %898 = vst.msk [vmem:[%s1380_s5 + $0x48] sm:$0xff] %vm888_vm1, %v833_v46  ;;  %930 = vst.msk [vmem:[%s1380_s5 + $0x148] sm:$0xff] %vm888_vm1, %v865_v47  ;;  %v838_v52 = vmax.f32 %v626_v48, 0.0  ;;  %v870_v53 = vmax.f32 %v754_v49, 0.0  ;;  %v618_v54 = vadd.f32 %v1372_v36, %v617_v50  ;;  %v746_v55 = vadd.f32 %v1372_v36, %v745_v51 }
  0xf8   : > { %v1148_v56 = vpop.f32.mrf.mxu0  ;;  %v1180_v57 = vpop.f32.mrf.mxu1 }
  0xf9   : > { %903 = vst.msk [vmem:[%s1380_s5 + $0x70] sm:$0xff] %vm888_vm1, %v838_v52  ;;  %935 = vst.msk [vmem:[%s1380_s5 + $0x170] sm:$0xff] %vm888_vm1, %v870_v53  ;;  %v836_v58 = vmax.f32 %v618_v54, 0.0  ;;  %v868_v59 = vmax.f32 %v746_v55, 0.0  ;;  %v629_v60 = vadd.f32 %v1148_v56, %v1372_v36  ;;  %v757_v61 = vadd.f32 %v1180_v57, %v1372_v36 }
  0xfa   : > { %v620_v62 = vpop.f32.mrf.mxu0  ;;  %v748_v63 = vpop.f32.mrf.mxu1 }
  0xfb   : > { %901 = vst.msk [vmem:[%s1380_s5 + $0x60] sm:$0xff] %vm888_vm1, %v836_v58  ;;  %933 = vst.msk [vmem:[%s1380_s5 + $0x160] sm:$0xff] %vm888_vm1, %v868_v59  ;;  %v839_v0 = vmax.f32 %v629_v60, 0.0  ;;  %v871_v1 = vmax.f32 %v757_v61, 0.0  ;;  %v621_v2 = vadd.f32 %v1372_v36, %v620_v62  ;;  %v749_v3 = vadd.f32 %v1372_v36, %v748_v63 }
  0xfc   : > { %v1151_v4 = vpop.f32.mrf.mxu0  ;;  %v1183_v5 = vpop.f32.mrf.mxu1 }
  0xfd   : > { %904 = vst.msk [vmem:[%s1380_s5 + $0x78] sm:$0xff] %vm888_vm1, %v839_v0  ;;  %936 = vst.msk [vmem:[%s1380_s5 + $0x178] sm:$0xff] %vm888_vm1, %v871_v1  ;;  %v837_v6 = vmax.f32 %v621_v2, 0.0  ;;  %v869_v7 = vmax.f32 %v749_v3, 0.0  ;;  %v642_v8 = vadd.f32 %v1151_v4, %v1372_v36  ;;  %v770_v9 = vadd.f32 %v1183_v5, %v1372_v36 }
  0xfe   : > { %v633_v10 = vpop.f32.mrf.mxu0  ;;  %v761_v11 = vpop.f32.mrf.mxu1 }
  0xff   : > { %902 = vst.msk [vmem:[%s1380_s5 + $0x68] sm:$0xff] %vm888_vm1, %v837_v6  ;;  %934 = vst.msk [vmem:[%s1380_s5 + $0x168] sm:$0xff] %vm888_vm1, %v869_v7  ;;  %v842_v12 = vmax.f32 %v642_v8, 0.0  ;;  %v874_v13 = vmax.f32 %v770_v9, 0.0  ;;  %v634_v14 = vadd.f32 %v1372_v36, %v633_v10  ;;  %v762_v15 = vadd.f32 %v1372_v36, %v761_v11 }
 0x100   : > { %v1152_v16 = vpop.f32.mrf.mxu0  ;;  %v1184_v17 = vpop.f32.mrf.mxu1 }
 0x101   : > { %907 = vst.msk [vmem:[%s1380_s5 + $0x90] sm:$0xff] %vm888_vm1, %v842_v12  ;;  %939 = vst.msk [vmem:[%s1380_s5 + $0x190] sm:$0xff] %vm888_vm1, %v874_v13  ;;  %v840_v18 = vmax.f32 %v634_v14, 0.0  ;;  %v872_v19 = vmax.f32 %v762_v15, 0.0  ;;  %v645_v20 = vadd.f32 %v1152_v16, %v1372_v36  ;;  %v773_v21 = vadd.f32 %v1184_v17, %v1372_v36 }
 0x102   : > { %v636_v22 = vpop.f32.mrf.mxu0  ;;  %v764_v23 = vpop.f32.mrf.mxu1 }
 0x103   : > { %905 = vst.msk [vmem:[%s1380_s5 + $0x80] sm:$0xff] %vm888_vm1, %v840_v18  ;;  %937 = vst.msk [vmem:[%s1380_s5 + $0x180] sm:$0xff] %vm888_vm1, %v872_v19  ;;  %v843_v24 = vmax.f32 %v645_v20, 0.0  ;;  %v875_v25 = vmax.f32 %v773_v21, 0.0  ;;  %v637_v26 = vadd.f32 %v1372_v36, %v636_v22  ;;  %v765_v27 = vadd.f32 %v1372_v36, %v764_v23 }
 0x104   : > { %v1155_v28 = vpop.f32.mrf.mxu0  ;;  %v1187_v29 = vpop.f32.mrf.mxu1 }
 0x105   : > { %908 = vst.msk [vmem:[%s1380_s5 + $0x98] sm:$0xff] %vm888_vm1, %v843_v24  ;;  %940 = vst.msk [vmem:[%s1380_s5 + $0x198] sm:$0xff] %vm888_vm1, %v875_v25  ;;  %v841_v30 = vmax.f32 %v637_v26, 0.0  ;;  %v873_v31 = vmax.f32 %v765_v27, 0.0  ;;  %v658_v32 = vadd.f32 %v1155_v28, %v1372_v36  ;;  %v786_v33 = vadd.f32 %v1187_v29, %v1372_v36 }
 0x106   : > { %v649_v34 = vpop.f32.mrf.mxu0  ;;  %v777_v35 = vpop.f32.mrf.mxu1 }
 0x107   : > { %906 = vst.msk [vmem:[%s1380_s5 + $0x88] sm:$0xff] %vm888_vm1, %v841_v30  ;;  %938 = vst.msk [vmem:[%s1380_s5 + $0x188] sm:$0xff] %vm888_vm1, %v873_v31  ;;  %v846_v37 = vmax.f32 %v658_v32, 0.0  ;;  %v878_v38 = vmax.f32 %v786_v33, 0.0  ;;  %v650_v39 = vadd.f32 %v1372_v36, %v649_v34  ;;  %v778_v40 = vadd.f32 %v1372_v36, %v777_v35 }
 0x108   : > { %v1156_v41 = vpop.f32.mrf.mxu0  ;;  %v1188_v42 = vpop.f32.mrf.mxu1 }
 0x109   : > { %911 = vst.msk [vmem:[%s1380_s5 + $0xb0] sm:$0xff] %vm888_vm1, %v846_v37  ;;  %943 = vst.msk [vmem:[%s1380_s5 + $0x1b0] sm:$0xff] %vm888_vm1, %v878_v38  ;;  %v844_v43 = vmax.f32 %v650_v39, 0.0  ;;  %v876_v44 = vmax.f32 %v778_v40, 0.0  ;;  %v661_v45 = vadd.f32 %v1156_v41, %v1372_v36  ;;  %v789_v46 = vadd.f32 %v1188_v42, %v1372_v36 }
 0x10a   : > { %v652_v47 = vpop.f32.mrf.mxu0  ;;  %v780_v48 = vpop.f32.mrf.mxu1 }
 0x10b   : > { %909 = vst.msk [vmem:[%s1380_s5 + $0xa0] sm:$0xff] %vm888_vm1, %v844_v43  ;;  %941 = vst.msk [vmem:[%s1380_s5 + $0x1a0] sm:$0xff] %vm888_vm1, %v876_v44  ;;  %v847_v49 = vmax.f32 %v661_v45, 0.0  ;;  %v879_v50 = vmax.f32 %v789_v46, 0.0  ;;  %v653_v51 = vadd.f32 %v1372_v36, %v652_v47  ;;  %v781_v52 = vadd.f32 %v1372_v36, %v780_v48 }
 0x10c   : > { %v1159_v53 = vpop.f32.mrf.mxu0  ;;  %v1191_v54 = vpop.f32.mrf.mxu1 }
 0x10d   : > { %912 = vst.msk [vmem:[%s1380_s5 + $0xb8] sm:$0xff] %vm888_vm1, %v847_v49  ;;  %944 = vst.msk [vmem:[%s1380_s5 + $0x1b8] sm:$0xff] %vm888_vm1, %v879_v50  ;;  %v845_v55 = vmax.f32 %v653_v51, 0.0  ;;  %v877_v56 = vmax.f32 %v781_v52, 0.0  ;;  %v674_v57 = vadd.f32 %v1159_v53, %v1372_v36  ;;  %v802_v58 = vadd.f32 %v1191_v54, %v1372_v36 }
 0x10e   : > { %v665_v59 = vpop.f32.mrf.mxu0  ;;  %v793_v60 = vpop.f32.mrf.mxu1 }
 0x10f   : > { %910 = vst.msk [vmem:[%s1380_s5 + $0xa8] sm:$0xff] %vm888_vm1, %v845_v55  ;;  %942 = vst.msk [vmem:[%s1380_s5 + $0x1a8] sm:$0xff] %vm888_vm1, %v877_v56  ;;  %v850_v61 = vmax.f32 %v674_v57, 0.0  ;;  %v882_v62 = vmax.f32 %v802_v58, 0.0  ;;  %v666_v63 = vadd.f32 %v1372_v36, %v665_v59  ;;  %v794_v0 = vadd.f32 %v1372_v36, %v793_v60 }
 0x110   : > { %v1160_v1 = vpop.f32.mrf.mxu0  ;;  %v1192_v2 = vpop.f32.mrf.mxu1 }
 0x111   : > { %915 = vst.msk [vmem:[%s1380_s5 + $0xd0] sm:$0xff] %vm888_vm1, %v850_v61  ;;  %947 = vst.msk [vmem:[%s1380_s5 + $0x1d0] sm:$0xff] %vm888_vm1, %v882_v62  ;;  %v848_v3 = vmax.f32 %v666_v63, 0.0  ;;  %v880_v4 = vmax.f32 %v794_v0, 0.0  ;;  %v677_v5 = vadd.f32 %v1160_v1, %v1372_v36  ;;  %v805_v6 = vadd.f32 %v1192_v2, %v1372_v36 }
 0x112   : > { %v668_v7 = vpop.f32.mrf.mxu0  ;;  %v796_v8 = vpop.f32.mrf.mxu1 }
 0x113   : > { %913 = vst.msk [vmem:[%s1380_s5 + $0xc0] sm:$0xff] %vm888_vm1, %v848_v3  ;;  %945 = vst.msk [vmem:[%s1380_s5 + $0x1c0] sm:$0xff] %vm888_vm1, %v880_v4  ;;  %v851_v9 = vmax.f32 %v677_v5, 0.0  ;;  %v883_v10 = vmax.f32 %v805_v6, 0.0  ;;  %v669_v11 = vadd.f32 %v1372_v36, %v668_v7  ;;  %v797_v12 = vadd.f32 %v1372_v36, %v796_v8 }
 0x114   : > { %v1163_v13 = vpop.f32.mrf.mxu0  ;;  %v1195_v14 = vpop.f32.mrf.mxu1 }
 0x115   : > { %916 = vst.msk [vmem:[%s1380_s5 + $0xd8] sm:$0xff] %vm888_vm1, %v851_v9  ;;  %948 = vst.msk [vmem:[%s1380_s5 + $0x1d8] sm:$0xff] %vm888_vm1, %v883_v10  ;;  %v849_v15 = vmax.f32 %v669_v11, 0.0  ;;  %v881_v16 = vmax.f32 %v797_v12, 0.0  ;;  %v690_v17 = vadd.f32 %v1163_v13, %v1372_v36  ;;  %v818_v18 = vadd.f32 %v1195_v14, %v1372_v36 }
 0x116   : > { %v681_v19 = vpop.f32.mrf.mxu0  ;;  %v809_v20 = vpop.f32.mrf.mxu1 }
 0x117   : > { %914 = vst.msk [vmem:[%s1380_s5 + $0xc8] sm:$0xff] %vm888_vm1, %v849_v15  ;;  %946 = vst.msk [vmem:[%s1380_s5 + $0x1c8] sm:$0xff] %vm888_vm1, %v881_v16  ;;  %v854_v21 = vmax.f32 %v690_v17, 0.0  ;;  %v886_v22 = vmax.f32 %v818_v18, 0.0  ;;  %v682_v23 = vadd.f32 %v1372_v36, %v681_v19  ;;  %v810_v24 = vadd.f32 %v1372_v36, %v809_v20 }
 0x118   : > { %v1164_v25 = vpop.f32.mrf.mxu0  ;;  %v1196_v26 = vpop.f32.mrf.mxu1 }
 0x119   : > { %919 = vst.msk [vmem:[%s1380_s5 + $0xf0] sm:$0xff] %vm888_vm1, %v854_v21  ;;  %951 = vst.msk [vmem:[%s1380_s5 + $0x1f0] sm:$0xff] %vm888_vm1, %v886_v22  ;;  %v852_v27 = vmax.f32 %v682_v23, 0.0  ;;  %v884_v28 = vmax.f32 %v810_v24, 0.0  ;;  %v693_v29 = vadd.f32 %v1164_v25, %v1372_v36  ;;  %v821_v30 = vadd.f32 %v1196_v26, %v1372_v36 }
 0x11a   : > { %v684_v31 = vpop.f32.mrf.mxu0  ;;  %v812_v32 = vpop.f32.mrf.mxu1 }
 0x11b   : > { %917 = vst.msk [vmem:[%s1380_s5 + $0xe0] sm:$0xff] %vm888_vm1, %v852_v27  ;;  %949 = vst.msk [vmem:[%s1380_s5 + $0x1e0] sm:$0xff] %vm888_vm1, %v884_v28  ;;  %v855_v33 = vmax.f32 %v693_v29, 0.0  ;;  %v887_v34 = vmax.f32 %v821_v30, 0.0  ;;  %v685_v35 = vadd.f32 %v1372_v36, %v684_v31  ;;  %v813_v37 = vadd.f32 %v1372_v36, %v812_v32 }
 0x11d   : > { %920 = vst.msk [vmem:[%s1380_s5 + $0xf8] sm:$0xff] %vm888_vm1, %v855_v33  ;;  %952 = vst.msk [vmem:[%s1380_s5 + $0x1f8] sm:$0xff] %vm888_vm1, %v887_v34  ;;  %v853_v38 = vmax.f32 %v685_v35, 0.0  ;;  %v885_v39 = vmax.f32 %v813_v37, 0.0 }
 0x11f   : > { %918 = vst.msk [vmem:[%s1380_s5 + $0xe8] sm:$0xff] %vm888_vm1, %v853_v38  ;;  %950 = vst.msk [vmem:[%s1380_s5 + $0x1e8] sm:$0xff] %vm888_vm1, %v885_v39 }
 0x120 PF: > { %s13_s12 = sadd.s32 1, %s1255_s12  }
 0x121   : > { %p10_p4 = scmp.ge.s32.totalorder %s13_s12, 10  }
 0x123   :  { %12 = sbr.rel (!%p10_p4) target bundleno = 1 (0x1), region = 62 }

// kernel: _lambda_.18
= control target key start
LH: loop header
LB: loop body
LE: loop exit
PB: predicated region body
PF: predicated region fallthrough
CT: control target
= control target key end

     0   :  { %s1307_s12 = smov 0   ;;  %s1611_s0 = inlined_call_operand.vmem [shape: bf16[4096,96], index: 0, kind: input, shape index: {}]   ;;  %s1612_s1 = inlined_call_operand.vmem [shape: bf16[96,32], index: 1, kind: input, shape index: {}]   ;;  %s1613_s2 = inlined_call_operand.vmem [shape: f32[1,32], index: 2, kind: input, shape index: {}]   ;;  %s1614_s3 = inlined_call_operand.vmem [shape: f32[4096,32], index: 3, kind: output, shape index: {}]  }
   0x1 LB: > { %s1025_s13 = sadd.s32 4294967295, %s1285_s12   ;;  %p1029_p0 = scmp.ge.s32.totalorder %s1285_s12, 1  ;;  %s1285_s12 = sphi %s1307_s12, %s13_s12  }
   0x2   : > { %p138_p1 = scmp.lt.s32.totalorder %s1285_s12, 9 }
   0x4   : > { %p139_p2 = pnand %p1029_p0, %p138_p1 }
   0x5   : > { %s1030_s16 = sshll.u32 (!%p139_p2), %s1025_s13, 6 }
   0x6   : > { %142 = sbr.rel (%p139_p2) target bundleno = 296 (0x128), region = 32  ;;  %p163_p3 = scmp.lt.s32.totalorder (!%p139_p2), %s1030_s16, 511 }
   0xb   : > { %v1241_v0 = vld [vmem:[%s1612_s1 + $0x28] sm:$0xff]   ;;  %v1242_v1 = vld [vmem:[%s1612_s1 + $0x20] sm:$0xff]   ;;  %s1616_s16 = smov (!%p163_p3, %s1030_s16), 511  ;;  %v1243_v2 = vld [vmem:[%s1612_s1 + $0x18] sm:$0xff]   ;;  %vm454_vm0 = vcmask 785408   ;;  %vm904_vm1 = vcmask 261120  }
   0xc   : > { %1145 = vmatprep.subr.bf16.mxu0 %v1241_v0  ;;  %1221 = vmatprep.subr.bf16.mxu1 %v1241_v0  ;;  %s1031_s21 = sshll.u32 %s1616_s16, 2  ;;  %v1244_v3 = vld [vmem:[%s1612_s1 + $0x10] sm:$0xff]   ;;  %v1245_v6 = vld [vmem:[%s1612_s1 + $0x8] sm:$0xff]   ;;  %v1246_v7 = vld [vmem:[%s1612_s1] sm:$0xff]   ;;  %s1033_s6 = sshll.u32 %s1616_s16, 3 }
   0xd   : > { %1146 = vmatpush3.bf16.msra.mxu0 %v1241_v0  ;;  %1227 = vmatpush3.bf16.msra.mxu1 %v1241_v0  ;;  %s1333_s26 = scalar_lea.vmem %s1611_s0, %s1031_s21  ;;  %v1408_v38 = vld [vmem:[%s1613_s2] ss:$0 sm:$0xff]  ;;  %s1416_s9 = scalar_lea.vmem %s1614_s3, %s1033_s6 }
   0xe   : > { %1147 = vmatprep.subr.bf16.mxu0 %v1242_v1  ;;  %1222 = vmatprep.subr.bf16.mxu1 %v1242_v1  ;;  %v1247_v4 = vld [vmem:[%s1333_s26] sm:$0xff]   ;;  %v1249_v8 = vld [vmem:[%s1333_s26 + $0x8] sm:$0xff]   ;;  %v1251_v10 = vld [vmem:[%s1333_s26 + $0x10] sm:$0xff]  }
   0xf   : > { %v1248_v5 = vld [vmem:[%s1333_s26 + $0x80] sm:$0xff]   ;;  %1157 = vmatprep.mubr.msk.bf16.mxu0 %vm454_vm0, %v1247_v4  ;;  %v1250_v9 = vld [vmem:[%s1333_s26 + $0x88] sm:$0xff]   ;;  %v1252_v11 = vld [vmem:[%s1333_s26 + $0x90] sm:$0xff]  }
  0x10   : > { %1189 = vmatprep.mubr.msk.bf16.mxu1 %vm454_vm0, %v1248_v5  ;;  %v1253_v12 = vld [vmem:[%s1333_s26 + $0x18] sm:$0xff]   ;;  %v1255_v14 = vld [vmem:[%s1333_s26 + $0x20] sm:$0xff]   ;;  %v1257_v16 = vld [vmem:[%s1333_s26 + $0x28] sm:$0xff]  }
  0x11   : > { %1148 = vmatpush3.bf16.msra.mxu0 %v1242_v1  ;;  %1228 = vmatpush3.bf16.msra.mxu1 %v1242_v1  ;;  %v1254_v13 = vld [vmem:[%s1333_s26 + $0x98] sm:$0xff]   ;;  %v1256_v15 = vld [vmem:[%s1333_s26 + $0xa0] sm:$0xff]   ;;  %v1258_v17 = vld [vmem:[%s1333_s26 + $0xa8] sm:$0xff]  }
  0x12   : > { %1149 = vmatprep.subr.bf16.mxu0 %v1243_v2  ;;  %1223 = vmatprep.subr.bf16.mxu1 %v1243_v2  ;;  %v1259_v18 = vld [vmem:[%s1333_s26 + $0x30] sm:$0xff]   ;;  %v1261_v20 = vld [vmem:[%s1333_s26 + $0x38] sm:$0xff]   ;;  %v1263_v22 = vld [vmem:[%s1333_s26 + $0x40] sm:$0xff]  }
  0x13   : > { %v1260_v19 = vld [vmem:[%s1333_s26 + $0xb0] sm:$0xff]   ;;  %v1262_v21 = vld [vmem:[%s1333_s26 + $0xb8] sm:$0xff]   ;;  %v1264_v23 = vld [vmem:[%s1333_s26 + $0xc0] sm:$0xff]  }
  0x14   : > { %v1265_v24 = vld [vmem:[%s1333_s26 + $0x48] sm:$0xff]   ;;  %v1267_v26 = vld [vmem:[%s1333_s26 + $0x50] sm:$0xff]   ;;  %v1269_v28 = vld [vmem:[%s1333_s26 + $0x58] sm:$0xff]  }
  0x15   : > { %1150 = vmatpush3.bf16.msra.mxu0 %v1243_v2  ;;  %1229 = vmatpush3.bf16.msra.mxu1 %v1243_v2  ;;  %v1266_v25 = vld [vmem:[%s1333_s26 + $0xc8] sm:$0xff]   ;;  %v1268_v27 = vld [vmem:[%s1333_s26 + $0xd0] sm:$0xff]   ;;  %v1270_v29 = vld [vmem:[%s1333_s26 + $0xd8] sm:$0xff]  }
  0x16   : > { %1151 = vmatprep.subr.bf16.mxu0 %v1244_v3  ;;  %1224 = vmatprep.subr.bf16.mxu1 %v1244_v3  ;;  %v1271_v30 = vld [vmem:[%s1333_s26 + $0x60] sm:$0xff]   ;;  %v1273_v32 = vld [vmem:[%s1333_s26 + $0x68] sm:$0xff]   ;;  %v1275_v34 = vld [vmem:[%s1333_s26 + $0x70] sm:$0xff]  }
  0x17   : > { %v1272_v31 = vld [vmem:[%s1333_s26 + $0xe0] sm:$0xff]   ;;  %v1274_v33 = vld [vmem:[%s1333_s26 + $0xe8] sm:$0xff]   ;;  %v1276_v35 = vld [vmem:[%s1333_s26 + $0xf0] sm:$0xff]  }
  0x18   : > { %v1277_v36 = vld [vmem:[%s1333_s26 + $0x78] sm:$0xff]  }
  0x19   : > { %1152 = vmatpush3.bf16.msra.mxu0 %v1244_v3  ;;  %1230 = vmatpush3.bf16.msra.mxu1 %v1244_v3  ;;  %v1278_v37 = vld [vmem:[%s1333_s26 + $0xf8] sm:$0xff]  }
  0x1a   : > { %1153 = vmatprep.subr.bf16.mxu0 %v1245_v6  ;;  %1225 = vmatprep.subr.bf16.mxu1 %v1245_v6 }
  0x1d   : > { %1154 = vmatpush3.bf16.msra.mxu0 %v1245_v6  ;;  %1231 = vmatpush3.bf16.msra.mxu1 %v1245_v6 }
  0x1e   : > { %1155 = vmatprep.subr.bf16.mxu0 %v1246_v7  ;;  %1226 = vmatprep.subr.bf16.mxu1 %v1246_v7 }
  0x21   : > { %1156 = vmatpush3.bf16.msra.mxu0 %v1246_v7  ;;  %1232 = vmatpush3.bf16.msra.mxu1 %v1246_v7 }
  0x24   : > { %1158 = vmatmul.mubr.msk.bf16.vlgmr.msra.gmra.mxu0 %vm454_vm0, %v1249_v8  ;;  %1190 = vmatmul.mubr.msk.bf16.vlgmr.msra.gmra.mxu1 %vm454_vm0, %v1250_v9 }
  0x25   : > { %1161 = vmatprep.mubr.msk.bf16.mxu0 %vm454_vm0, %v1251_v10  ;;  %1193 = vmatprep.mubr.msk.bf16.mxu1 %vm454_vm0, %v1252_v11 }
  0x2c   : > { %1162 = vmatmul.mubr.msk.bf16.gmra.mxu0 %vm454_vm0, %v1253_v12  ;;  %1194 = vmatmul.mubr.msk.bf16.gmra.mxu1 %vm454_vm0, %v1254_v13 }
  0x2d   : > { %1165 = vmatprep.mubr.msk.bf16.mxu0 %vm454_vm0, %v1255_v14  ;;  %1197 = vmatprep.mubr.msk.bf16.mxu1 %vm454_vm0, %v1256_v15 }
  0x34   : > { %1166 = vmatmul.mubr.msk.bf16.gmra.mxu0 %vm454_vm0, %v1257_v16  ;;  %1198 = vmatmul.mubr.msk.bf16.gmra.mxu1 %vm454_vm0, %v1258_v17 }
  0x35   : > { %1169 = vmatprep.mubr.msk.bf16.mxu0 %vm454_vm0, %v1259_v18  ;;  %1201 = vmatprep.mubr.msk.bf16.mxu1 %vm454_vm0, %v1260_v19 }
  0x3c   : > { %1170 = vmatmul.mubr.msk.bf16.gmra.mxu0 %vm454_vm0, %v1261_v20  ;;  %1202 = vmatmul.mubr.msk.bf16.gmra.mxu1 %vm454_vm0, %v1262_v21 }
  0x3d   : > { %1173 = vmatprep.mubr.msk.bf16.mxu0 %vm454_vm0, %v1263_v22  ;;  %1205 = vmatprep.mubr.msk.bf16.mxu1 %vm454_vm0, %v1264_v23 }
  0x44   : > { %1174 = vmatmul.mubr.msk.bf16.gmra.mxu0 %vm454_vm0, %v1265_v24  ;;  %1206 = vmatmul.mubr.msk.bf16.gmra.mxu1 %vm454_vm0, %v1266_v25 }
  0x45   : > { %1177 = vmatprep.mubr.msk.bf16.mxu0 %vm454_vm0, %v1267_v26  ;;  %1209 = vmatprep.mubr.msk.bf16.mxu1 %vm454_vm0, %v1268_v27 }
  0x4c   : > { %1178 = vmatmul.mubr.msk.bf16.gmra.mxu0 %vm454_vm0, %v1269_v28  ;;  %1210 = vmatmul.mubr.msk.bf16.gmra.mxu1 %vm454_vm0, %v1270_v29 }
  0x4d   : > { %1181 = vmatprep.mubr.msk.bf16.mxu0 %vm454_vm0, %v1271_v30  ;;  %1213 = vmatprep.mubr.msk.bf16.mxu1 %vm454_vm0, %v1272_v31 }
  0x54   : > { %1182 = vmatmul.mubr.msk.bf16.gmra.mxu0 %vm454_vm0, %v1273_v32  ;;  %1214 = vmatmul.mubr.msk.bf16.gmra.mxu1 %vm454_vm0, %v1274_v33 }
  0x55   : > { %1185 = vmatprep.mubr.msk.bf16.mxu0 %vm454_vm0, %v1275_v34  ;;  %1217 = vmatprep.mubr.msk.bf16.mxu1 %vm454_vm0, %v1276_v35 }
  0x5c   : > { %1186 = vmatmul.mubr.msk.bf16.gmra.mxu0 %vm454_vm0, %v1277_v36  ;;  %1218 = vmatmul.mubr.msk.bf16.gmra.mxu1 %vm454_vm0, %v1278_v37 }
  0xe4   : > { %v1159_v39 = vpop.f32.mrf.mxu0  ;;  %v1191_v40 = vpop.f32.mrf.mxu1 }
  0xe5   : > { %v594_v41 = vadd.f32 %v1159_v39, %v1408_v38  ;;  %v722_v42 = vadd.f32 %v1191_v40, %v1408_v38 }
  0xe6   : > { %v585_v43 = vpop.f32.mrf.mxu0  ;;  %v713_v44 = vpop.f32.mrf.mxu1 }
  0xe7   : > { %v842_v45 = vmax.f32 %v594_v41, 0.0  ;;  %v874_v46 = vmax.f32 %v722_v42, 0.0  ;;  %v586_v47 = vadd.f32 %v1408_v38, %v585_v43  ;;  %v714_v48 = vadd.f32 %v1408_v38, %v713_v44 }
  0xe8   : > { %v1160_v49 = vpop.f32.mrf.mxu0  ;;  %v1192_v50 = vpop.f32.mrf.mxu1 }
  0xe9   : > { %907 = vst.msk [vmem:[%s1416_s9 + $0x10] sm:$0xff] %vm904_vm1, %v842_v45  ;;  %939 = vst.msk [vmem:[%s1416_s9 + $0x110] sm:$0xff] %vm904_vm1, %v874_v46  ;;  %v840_v51 = vmax.f32 %v586_v47, 0.0  ;;  %v872_v52 = vmax.f32 %v714_v48, 0.0  ;;  %v597_v53 = vadd.f32 %v1160_v49, %v1408_v38  ;;  %v725_v54 = vadd.f32 %v1192_v50, %v1408_v38 }
  0xea   : > { %v588_v55 = vpop.f32.mrf.mxu0  ;;  %v716_v56 = vpop.f32.mrf.mxu1 }
  0xeb   : > { %905 = vst.msk [vmem:[%s1416_s9] sm:$0xff] %vm904_vm1, %v840_v51  ;;  %937 = vst.msk [vmem:[%s1416_s9 + $0x100] sm:$0xff] %vm904_vm1, %v872_v52  ;;  %v843_v57 = vmax.f32 %v597_v53, 0.0  ;;  %v875_v58 = vmax.f32 %v725_v54, 0.0  ;;  %v589_v59 = vadd.f32 %v1408_v38, %v588_v55  ;;  %v717_v60 = vadd.f32 %v1408_v38, %v716_v56 }
  0xec   : > { %v1163_v61 = vpop.f32.mrf.mxu0  ;;  %v1195_v62 = vpop.f32.mrf.mxu1 }
  0xed   : > { %908 = vst.msk [vmem:[%s1416_s9 + $0x18] sm:$0xff] %vm904_vm1, %v843_v57  ;;  %940 = vst.msk [vmem:[%s1416_s9 + $0x118] sm:$0xff] %vm904_vm1, %v875_v58  ;;  %v841_v63 = vmax.f32 %v589_v59, 0.0  ;;  %v873_v0 = vmax.f32 %v717_v60, 0.0  ;;  %v610_v1 = vadd.f32 %v1163_v61, %v1408_v38  ;;  %v738_v2 = vadd.f32 %v1195_v62, %v1408_v38 }
  0xee   : > { %v601_v3 = vpop.f32.mrf.mxu0  ;;  %v729_v4 = vpop.f32.mrf.mxu1 }
  0xef   : > { %906 = vst.msk [vmem:[%s1416_s9 + $0x8] sm:$0xff] %vm904_vm1, %v841_v63  ;;  %938 = vst.msk [vmem:[%s1416_s9 + $0x108] sm:$0xff] %vm904_vm1, %v873_v0  ;;  %v846_v5 = vmax.f32 %v610_v1, 0.0  ;;  %v878_v6 = vmax.f32 %v738_v2, 0.0  ;;  %v602_v7 = vadd.f32 %v1408_v38, %v601_v3  ;;  %v730_v8 = vadd.f32 %v1408_v38, %v729_v4 }
  0xf0   : > { %v1164_v9 = vpop.f32.mrf.mxu0  ;;  %v1196_v10 = vpop.f32.mrf.mxu1 }
  0xf1   : > { %911 = vst.msk [vmem:[%s1416_s9 + $0x30] sm:$0xff] %vm904_vm1, %v846_v5  ;;  %943 = vst.msk [vmem:[%s1416_s9 + $0x130] sm:$0xff] %vm904_vm1, %v878_v6  ;;  %v844_v11 = vmax.f32 %v602_v7, 0.0  ;;  %v876_v12 = vmax.f32 %v730_v8, 0.0  ;;  %v613_v13 = vadd.f32 %v1164_v9, %v1408_v38  ;;  %v741_v14 = vadd.f32 %v1196_v10, %v1408_v38 }
  0xf2   : > { %v604_v15 = vpop.f32.mrf.mxu0  ;;  %v732_v16 = vpop.f32.mrf.mxu1 }
  0xf3   : > { %909 = vst.msk [vmem:[%s1416_s9 + $0x20] sm:$0xff] %vm904_vm1, %v844_v11  ;;  %941 = vst.msk [vmem:[%s1416_s9 + $0x120] sm:$0xff] %vm904_vm1, %v876_v12  ;;  %v847_v17 = vmax.f32 %v613_v13, 0.0  ;;  %v879_v18 = vmax.f32 %v741_v14, 0.0  ;;  %v605_v19 = vadd.f32 %v1408_v38, %v604_v15  ;;  %v733_v20 = vadd.f32 %v1408_v38, %v732_v16 }
  0xf4   : > { %v1167_v21 = vpop.f32.mrf.mxu0  ;;  %v1199_v22 = vpop.f32.mrf.mxu1 }
  0xf5   : > { %912 = vst.msk [vmem:[%s1416_s9 + $0x38] sm:$0xff] %vm904_vm1, %v847_v17  ;;  %944 = vst.msk [vmem:[%s1416_s9 + $0x138] sm:$0xff] %vm904_vm1, %v879_v18  ;;  %v845_v23 = vmax.f32 %v605_v19, 0.0  ;;  %v877_v24 = vmax.f32 %v733_v20, 0.0  ;;  %v626_v25 = vadd.f32 %v1167_v21, %v1408_v38  ;;  %v754_v26 = vadd.f32 %v1199_v22, %v1408_v38 }
  0xf6   : > { %v617_v27 = vpop.f32.mrf.mxu0  ;;  %v745_v28 = vpop.f32.mrf.mxu1 }
  0xf7   : > { %910 = vst.msk [vmem:[%s1416_s9 + $0x28] sm:$0xff] %vm904_vm1, %v845_v23  ;;  %942 = vst.msk [vmem:[%s1416_s9 + $0x128] sm:$0xff] %vm904_vm1, %v877_v24  ;;  %v850_v29 = vmax.f32 %v626_v25, 0.0  ;;  %v882_v30 = vmax.f32 %v754_v26, 0.0  ;;  %v618_v31 = vadd.f32 %v1408_v38, %v617_v27  ;;  %v746_v32 = vadd.f32 %v1408_v38, %v745_v28 }
  0xf8   : > { %v1168_v33 = vpop.f32.mrf.mxu0  ;;  %v1200_v34 = vpop.f32.mrf.mxu1 }
  0xf9   : > { %915 = vst.msk [vmem:[%s1416_s9 + $0x50] sm:$0xff] %vm904_vm1, %v850_v29  ;;  %947 = vst.msk [vmem:[%s1416_s9 + $0x150] sm:$0xff] %vm904_vm1, %v882_v30  ;;  %v848_v35 = vmax.f32 %v618_v31, 0.0  ;;  %v880_v36 = vmax.f32 %v746_v32, 0.0  ;;  %v629_v37 = vadd.f32 %v1168_v33, %v1408_v38  ;;  %v757_v39 = vadd.f32 %v1200_v34, %v1408_v38 }
  0xfa   : > { %v620_v40 = vpop.f32.mrf.mxu0  ;;  %v748_v41 = vpop.f32.mrf.mxu1 }
  0xfb   : > { %913 = vst.msk [vmem:[%s1416_s9 + $0x40] sm:$0xff] %vm904_vm1, %v848_v35  ;;  %945 = vst.msk [vmem:[%s1416_s9 + $0x140] sm:$0xff] %vm904_vm1, %v880_v36  ;;  %v851_v42 = vmax.f32 %v629_v37, 0.0  ;;  %v883_v43 = vmax.f32 %v757_v39, 0.0  ;;  %v621_v44 = vadd.f32 %v1408_v38, %v620_v40  ;;  %v749_v45 = vadd.f32 %v1408_v38, %v748_v41 }
  0xfc   : > { %v1171_v46 = vpop.f32.mrf.mxu0  ;;  %v1203_v47 = vpop.f32.mrf.mxu1 }
  0xfd   : > { %916 = vst.msk [vmem:[%s1416_s9 + $0x58] sm:$0xff] %vm904_vm1, %v851_v42  ;;  %948 = vst.msk [vmem:[%s1416_s9 + $0x158] sm:$0xff] %vm904_vm1, %v883_v43  ;;  %v849_v48 = vmax.f32 %v621_v44, 0.0  ;;  %v881_v49 = vmax.f32 %v749_v45, 0.0  ;;  %v642_v50 = vadd.f32 %v1171_v46, %v1408_v38  ;;  %v770_v51 = vadd.f32 %v1203_v47, %v1408_v38 }
  0xfe   : > { %v633_v52 = vpop.f32.mrf.mxu0  ;;  %v761_v53 = vpop.f32.mrf.mxu1 }
  0xff   : > { %914 = vst.msk [vmem:[%s1416_s9 + $0x48] sm:$0xff] %vm904_vm1, %v849_v48  ;;  %946 = vst.msk [vmem:[%s1416_s9 + $0x148] sm:$0xff] %vm904_vm1, %v881_v49  ;;  %v854_v54 = vmax.f32 %v642_v50, 0.0  ;;  %v886_v55 = vmax.f32 %v770_v51, 0.0  ;;  %v634_v56 = vadd.f32 %v1408_v38, %v633_v52  ;;  %v762_v57 = vadd.f32 %v1408_v38, %v761_v53 }
 0x100   : > { %v1172_v58 = vpop.f32.mrf.mxu0  ;;  %v1204_v59 = vpop.f32.mrf.mxu1 }
 0x101   : > { %919 = vst.msk [vmem:[%s1416_s9 + $0x70] sm:$0xff] %vm904_vm1, %v854_v54  ;;  %951 = vst.msk [vmem:[%s1416_s9 + $0x170] sm:$0xff] %vm904_vm1, %v886_v55  ;;  %v852_v60 = vmax.f32 %v634_v56, 0.0  ;;  %v884_v61 = vmax.f32 %v762_v57, 0.0  ;;  %v645_v62 = vadd.f32 %v1172_v58, %v1408_v38  ;;  %v773_v63 = vadd.f32 %v1204_v59, %v1408_v38 }
 0x102   : > { %v636_v0 = vpop.f32.mrf.mxu0  ;;  %v764_v1 = vpop.f32.mrf.mxu1 }
 0x103   : > { %917 = vst.msk [vmem:[%s1416_s9 + $0x60] sm:$0xff] %vm904_vm1, %v852_v60  ;;  %949 = vst.msk [vmem:[%s1416_s9 + $0x160] sm:$0xff] %vm904_vm1, %v884_v61  ;;  %v855_v2 = vmax.f32 %v645_v62, 0.0  ;;  %v887_v3 = vmax.f32 %v773_v63, 0.0  ;;  %v637_v4 = vadd.f32 %v1408_v38, %v636_v0  ;;  %v765_v5 = vadd.f32 %v1408_v38, %v764_v1 }
 0x104   : > { %v1175_v6 = vpop.f32.mrf.mxu0  ;;  %v1207_v7 = vpop.f32.mrf.mxu1 }
 0x105   : > { %920 = vst.msk [vmem:[%s1416_s9 + $0x78] sm:$0xff] %vm904_vm1, %v855_v2  ;;  %952 = vst.msk [vmem:[%s1416_s9 + $0x178] sm:$0xff] %vm904_vm1, %v887_v3  ;;  %v853_v8 = vmax.f32 %v637_v4, 0.0  ;;  %v885_v9 = vmax.f32 %v765_v5, 0.0  ;;  %v658_v10 = vadd.f32 %v1175_v6, %v1408_v38  ;;  %v786_v11 = vadd.f32 %v1207_v7, %v1408_v38 }
 0x106   : > { %v649_v12 = vpop.f32.mrf.mxu0  ;;  %v777_v13 = vpop.f32.mrf.mxu1 }
 0x107   : > { %918 = vst.msk [vmem:[%s1416_s9 + $0x68] sm:$0xff] %vm904_vm1, %v853_v8  ;;  %950 = vst.msk [vmem:[%s1416_s9 + $0x168] sm:$0xff] %vm904_vm1, %v885_v9  ;;  %v858_v14 = vmax.f32 %v658_v10, 0.0  ;;  %v890_v15 = vmax.f32 %v786_v11, 0.0  ;;  %v650_v16 = vadd.f32 %v1408_v38, %v649_v12  ;;  %v778_v17 = vadd.f32 %v1408_v38, %v777_v13 }
 0x108   : > { %v1176_v18 = vpop.f32.mrf.mxu0  ;;  %v1208_v19 = vpop.f32.mrf.mxu1 }
 0x109   : > { %923 = vst.msk [vmem:[%s1416_s9 + $0x90] sm:$0xff] %vm904_vm1, %v858_v14  ;;  %955 = vst.msk [vmem:[%s1416_s9 + $0x190] sm:$0xff] %vm904_vm1, %v890_v15  ;;  %v856_v20 = vmax.f32 %v650_v16, 0.0  ;;  %v888_v21 = vmax.f32 %v778_v17, 0.0  ;;  %v661_v22 = vadd.f32 %v1176_v18, %v1408_v38  ;;  %v789_v23 = vadd.f32 %v1208_v19, %v1408_v38 }
 0x10a   : > { %v652_v24 = vpop.f32.mrf.mxu0  ;;  %v780_v25 = vpop.f32.mrf.mxu1 }
 0x10b   : > { %921 = vst.msk [vmem:[%s1416_s9 + $0x80] sm:$0xff] %vm904_vm1, %v856_v20  ;;  %953 = vst.msk [vmem:[%s1416_s9 + $0x180] sm:$0xff] %vm904_vm1, %v888_v21  ;;  %v859_v26 = vmax.f32 %v661_v22, 0.0  ;;  %v891_v27 = vmax.f32 %v789_v23, 0.0  ;;  %v653_v28 = vadd.f32 %v1408_v38, %v652_v24  ;;  %v781_v29 = vadd.f32 %v1408_v38, %v780_v25 }
 0x10c   : > { %v1179_v30 = vpop.f32.mrf.mxu0  ;;  %v1211_v31 = vpop.f32.mrf.mxu1 }
 0x10d   : > { %924 = vst.msk [vmem:[%s1416_s9 + $0x98] sm:$0xff] %vm904_vm1, %v859_v26  ;;  %956 = vst.msk [vmem:[%s1416_s9 + $0x198] sm:$0xff] %vm904_vm1, %v891_v27  ;;  %v857_v32 = vmax.f32 %v653_v28, 0.0  ;;  %v889_v33 = vmax.f32 %v781_v29, 0.0  ;;  %v674_v34 = vadd.f32 %v1179_v30, %v1408_v38  ;;  %v802_v35 = vadd.f32 %v1211_v31, %v1408_v38 }
 0x10e   : > { %v665_v36 = vpop.f32.mrf.mxu0  ;;  %v793_v37 = vpop.f32.mrf.mxu1 }
 0x10f   : > { %922 = vst.msk [vmem:[%s1416_s9 + $0x88] sm:$0xff] %vm904_vm1, %v857_v32  ;;  %954 = vst.msk [vmem:[%s1416_s9 + $0x188] sm:$0xff] %vm904_vm1, %v889_v33  ;;  %v862_v39 = vmax.f32 %v674_v34, 0.0  ;;  %v894_v40 = vmax.f32 %v802_v35, 0.0  ;;  %v666_v41 = vadd.f32 %v1408_v38, %v665_v36  ;;  %v794_v42 = vadd.f32 %v1408_v38, %v793_v37 }
 0x110   : > { %v1180_v43 = vpop.f32.mrf.mxu0  ;;  %v1212_v44 = vpop.f32.mrf.mxu1 }
 0x111   : > { %927 = vst.msk [vmem:[%s1416_s9 + $0xb0] sm:$0xff] %vm904_vm1, %v862_v39  ;;  %959 = vst.msk [vmem:[%s1416_s9 + $0x1b0] sm:$0xff] %vm904_vm1, %v894_v40  ;;  %v860_v45 = vmax.f32 %v666_v41, 0.0  ;;  %v892_v46 = vmax.f32 %v794_v42, 0.0  ;;  %v677_v47 = vadd.f32 %v1180_v43, %v1408_v38  ;;  %v805_v48 = vadd.f32 %v1212_v44, %v1408_v38 }
 0x112   : > { %v668_v49 = vpop.f32.mrf.mxu0  ;;  %v796_v50 = vpop.f32.mrf.mxu1 }
 0x113   : > { %925 = vst.msk [vmem:[%s1416_s9 + $0xa0] sm:$0xff] %vm904_vm1, %v860_v45  ;;  %957 = vst.msk [vmem:[%s1416_s9 + $0x1a0] sm:$0xff] %vm904_vm1, %v892_v46  ;;  %v863_v51 = vmax.f32 %v677_v47, 0.0  ;;  %v895_v52 = vmax.f32 %v805_v48, 0.0  ;;  %v669_v53 = vadd.f32 %v1408_v38, %v668_v49  ;;  %v797_v54 = vadd.f32 %v1408_v38, %v796_v50 }
 0x114   : > { %v1183_v55 = vpop.f32.mrf.mxu0  ;;  %v1215_v56 = vpop.f32.mrf.mxu1 }
 0x115   : > { %928 = vst.msk [vmem:[%s1416_s9 + $0xb8] sm:$0xff] %vm904_vm1, %v863_v51  ;;  %960 = vst.msk [vmem:[%s1416_s9 + $0x1b8] sm:$0xff] %vm904_vm1, %v895_v52  ;;  %v861_v57 = vmax.f32 %v669_v53, 0.0  ;;  %v893_v58 = vmax.f32 %v797_v54, 0.0  ;;  %v690_v59 = vadd.f32 %v1183_v55, %v1408_v38  ;;  %v818_v60 = vadd.f32 %v1215_v56, %v1408_v38 }
 0x116   : > { %v681_v61 = vpop.f32.mrf.mxu0  ;;  %v809_v62 = vpop.f32.mrf.mxu1 }
 0x117   : > { %926 = vst.msk [vmem:[%s1416_s9 + $0xa8] sm:$0xff] %vm904_vm1, %v861_v57  ;;  %958 = vst.msk [vmem:[%s1416_s9 + $0x1a8] sm:$0xff] %vm904_vm1, %v893_v58  ;;  %v866_v63 = vmax.f32 %v690_v59, 0.0  ;;  %v898_v0 = vmax.f32 %v818_v60, 0.0  ;;  %v682_v1 = vadd.f32 %v1408_v38, %v681_v61  ;;  %v810_v2 = vadd.f32 %v1408_v38, %v809_v62 }
 0x118   : > { %v1184_v3 = vpop.f32.mrf.mxu0  ;;  %v1216_v4 = vpop.f32.mrf.mxu1 }
 0x119   : > { %931 = vst.msk [vmem:[%s1416_s9 + $0xd0] sm:$0xff] %vm904_vm1, %v866_v63  ;;  %963 = vst.msk [vmem:[%s1416_s9 + $0x1d0] sm:$0xff] %vm904_vm1, %v898_v0  ;;  %v864_v5 = vmax.f32 %v682_v1, 0.0  ;;  %v896_v6 = vmax.f32 %v810_v2, 0.0  ;;  %v693_v7 = vadd.f32 %v1184_v3, %v1408_v38  ;;  %v821_v8 = vadd.f32 %v1216_v4, %v1408_v38 }
 0x11a   : > { %v684_v9 = vpop.f32.mrf.mxu0  ;;  %v812_v10 = vpop.f32.mrf.mxu1 }
 0x11b   : > { %929 = vst.msk [vmem:[%s1416_s9 + $0xc0] sm:$0xff] %vm904_vm1, %v864_v5  ;;  %961 = vst.msk [vmem:[%s1416_s9 + $0x1c0] sm:$0xff] %vm904_vm1, %v896_v6  ;;  %v867_v11 = vmax.f32 %v693_v7, 0.0  ;;  %v899_v12 = vmax.f32 %v821_v8, 0.0  ;;  %v685_v13 = vadd.f32 %v1408_v38, %v684_v9  ;;  %v813_v14 = vadd.f32 %v1408_v38, %v812_v10 }
 0x11c   : > { %v1187_v15 = vpop.f32.mrf.mxu0  ;;  %v1219_v16 = vpop.f32.mrf.mxu1 }
 0x11d   : > { %932 = vst.msk [vmem:[%s1416_s9 + $0xd8] sm:$0xff] %vm904_vm1, %v867_v11  ;;  %964 = vst.msk [vmem:[%s1416_s9 + $0x1d8] sm:$0xff] %vm904_vm1, %v899_v12  ;;  %v865_v17 = vmax.f32 %v685_v13, 0.0  ;;  %v897_v18 = vmax.f32 %v813_v14, 0.0  ;;  %v706_v19 = vadd.f32 %v1187_v15, %v1408_v38  ;;  %v834_v20 = vadd.f32 %v1219_v16, %v1408_v38 }
 0x11e   : > { %v697_v21 = vpop.f32.mrf.mxu0  ;;  %v825_v22 = vpop.f32.mrf.mxu1 }
 0x11f   : > { %930 = vst.msk [vmem:[%s1416_s9 + $0xc8] sm:$0xff] %vm904_vm1, %v865_v17  ;;  %962 = vst.msk [vmem:[%s1416_s9 + $0x1c8] sm:$0xff] %vm904_vm1, %v897_v18  ;;  %v870_v23 = vmax.f32 %v706_v19, 0.0  ;;  %v902_v24 = vmax.f32 %v834_v20, 0.0  ;;  %v698_v25 = vadd.f32 %v1408_v38, %v697_v21  ;;  %v826_v26 = vadd.f32 %v1408_v38, %v825_v22 }
 0x120   : > { %v1188_v27 = vpop.f32.mrf.mxu0  ;;  %v1220_v28 = vpop.f32.mrf.mxu1 }
 0x121   : > { %935 = vst.msk [vmem:[%s1416_s9 + $0xf0] sm:$0xff] %vm904_vm1, %v870_v23  ;;  %967 = vst.msk [vmem:[%s1416_s9 + $0x1f0] sm:$0xff] %vm904_vm1, %v902_v24  ;;  %v868_v29 = vmax.f32 %v698_v25, 0.0  ;;  %v900_v30 = vmax.f32 %v826_v26, 0.0  ;;  %v709_v31 = vadd.f32 %v1188_v27, %v1408_v38  ;;  %v837_v32 = vadd.f32 %v1220_v28, %v1408_v38 }
 0x122   : > { %v700_v33 = vpop.f32.mrf.mxu0  ;;  %v828_v34 = vpop.f32.mrf.mxu1 }
 0x123   : > { %933 = vst.msk [vmem:[%s1416_s9 + $0xe0] sm:$0xff] %vm904_vm1, %v868_v29  ;;  %965 = vst.msk [vmem:[%s1416_s9 + $0x1e0] sm:$0xff] %vm904_vm1, %v900_v30  ;;  %v871_v35 = vmax.f32 %v709_v31, 0.0  ;;  %v903_v36 = vmax.f32 %v837_v32, 0.0  ;;  %v701_v37 = vadd.f32 %v1408_v38, %v700_v33  ;;  %v829_v39 = vadd.f32 %v1408_v38, %v828_v34 }
 0x125   : > { %936 = vst.msk [vmem:[%s1416_s9 + $0xf8] sm:$0xff] %vm904_vm1, %v871_v35  ;;  %968 = vst.msk [vmem:[%s1416_s9 + $0x1f8] sm:$0xff] %vm904_vm1, %v903_v36  ;;  %v869_v40 = vmax.f32 %v701_v37, 0.0  ;;  %v901_v41 = vmax.f32 %v829_v39, 0.0 }
 0x127   : > { %934 = vst.msk [vmem:[%s1416_s9 + $0xe8] sm:$0xff] %vm904_vm1, %v869_v40  ;;  %966 = vst.msk [vmem:[%s1416_s9 + $0x1e8] sm:$0xff] %vm904_vm1, %v901_v41 }
 0x128 PF: > { %s13_s12 = sadd.s32 1, %s1285_s12  }
 0x129   : > { %p10_p4 = scmp.ge.s32.totalorder %s13_s12, 10  }
 0x12b   :  { %12 = sbr.rel (!%p10_p4) target bundleno = 1 (0x1), region = 62 }

// kernel: _lambda_.20
= control target key start
LH: loop header
LB: loop body
LE: loop exit
PB: predicated region body
PF: predicated region fallthrough
CT: control target
= control target key end

     0   :  { %s1246_s12 = smov 0   ;;  %s1474_s0 = inlined_call_operand.vmem [shape: bf16[4096,32], index: 0, kind: input, shape index: {}]   ;;  %s1475_s1 = inlined_call_operand.vmem [shape: bf16[32,128], index: 1, kind: input, shape index: {}]   ;;  %s1476_s2 = inlined_call_operand.vmem [shape: f32[1,128], index: 2, kind: input, shape index: {}]   ;;  %s1477_s3 = inlined_call_operand.vmem [shape: f32[4096,128], index: 3, kind: output, shape index: {}]  }
   0x1 LB: > { %s992_s13 = sadd.s32 4294967295, %s1224_s12   ;;  %p996_p0 = scmp.ge.s32.totalorder %s1224_s12, 1  ;;  %s1224_s12 = sphi %s1246_s12, %s13_s12  }
   0x2   : > { %p138_p1 = scmp.lt.s32.totalorder %s1224_s12, 9 }
   0x4   : > { %p139_p2 = pnand %p996_p0, %p138_p1 }
   0x5   : > { %s997_s16 = sshll.u32 (!%p139_p2), %s992_s13, 6 }
   0x6   : > { %142 = sbr.rel (%p139_p2) target bundleno = 280 (0x118), region = 32  ;;  %p163_p3 = scmp.lt.s32.totalorder (!%p139_p2), %s997_s16, 511 }
   0xb   : > { %v1184_v0 = vld [vmem:[%s1475_s1 + $0x8] sm:$0xff]   ;;  %v1185_v1 = vld [vmem:[%s1475_s1] sm:$0xff]   ;;  %s1479_s16 = smov (!%p163_p3, %s997_s16), 511  ;;  %vm422_vm0 = vcmask 261120  }
   0xc   : > { %1104 = vmatprep.subr.bf16.mxu0 %v1184_v0  ;;  %1172 = vmatprep.subr.bf16.mxu1 %v1184_v0  ;;  %s998_s19 = sshll.u32 %s1479_s16, 2  ;;  %v1335_v34 = vld [vmem:[%s1476_s2] ss:$0 sm:$0xff]  ;;  %s1000_s25 = sshll.u32 %s1479_s16, 3 }
   0xd   : > { %1105 = vmatpush3.bf16.msra.mxu0 %v1184_v0  ;;  %1174 = vmatpush3.bf16.msra.mxu1 %v1184_v0  ;;  %s1266_s22 = scalar_lea.vmem %s1474_s0, %s998_s19  ;;  %s1342_s28 = scalar_lea.vmem %s1477_s3, %s1000_s25 }
   0xe   : > { %1106 = vmatprep.subr.bf16.mxu0 %v1185_v1  ;;  %1173 = vmatprep.subr.bf16.mxu1 %v1185_v1  ;;  %v1186_v2 = vld [vmem:[%s1266_s22] sm:$0xff]   ;;  %v1188_v4 = vld [vmem:[%s1266_s22 + $0x8] sm:$0xff]   ;;  %v1190_v6 = vld [vmem:[%s1266_s22 + $0x10] sm:$0xff]  }
   0xf   : > { %v1187_v3 = vld [vmem:[%s1266_s22 + $0x80] sm:$0xff]   ;;  %1108 = vmatprep.mubr.msk.bf16.mxu0 %vm422_vm0, %v1186_v2  ;;  %v1189_v5 = vld [vmem:[%s1266_s22 + $0x88] sm:$0xff]   ;;  %v1191_v7 = vld [vmem:[%s1266_s22 + $0x90] sm:$0xff]  }
  0x10   : > { %1140 = vmatprep.mubr.msk.bf16.mxu1 %vm422_vm0, %v1187_v3  ;;  %v1192_v8 = vld [vmem:[%s1266_s22 + $0x18] sm:$0xff]   ;;  %v1194_v10 = vld [vmem:[%s1266_s22 + $0x20] sm:$0xff]   ;;  %v1196_v12 = vld [vmem:[%s1266_s22 + $0x28] sm:$0xff]  }
  0x11   : > { %1107 = vmatpush3.bf16.msra.mxu0 %v1185_v1  ;;  %1175 = vmatpush3.bf16.msra.mxu1 %v1185_v1  ;;  %v1193_v9 = vld [vmem:[%s1266_s22 + $0x98] sm:$0xff]   ;;  %v1195_v11 = vld [vmem:[%s1266_s22 + $0xa0] sm:$0xff]   ;;  %v1197_v13 = vld [vmem:[%s1266_s22 + $0xa8] sm:$0xff]  }
  0x12   : > { %v1198_v14 = vld [vmem:[%s1266_s22 + $0x30] sm:$0xff]   ;;  %v1200_v16 = vld [vmem:[%s1266_s22 + $0x38] sm:$0xff]   ;;  %v1202_v18 = vld [vmem:[%s1266_s22 + $0x40] sm:$0xff]  }
  0x13   : > { %v1199_v15 = vld [vmem:[%s1266_s22 + $0xb0] sm:$0xff]   ;;  %v1201_v17 = vld [vmem:[%s1266_s22 + $0xb8] sm:$0xff]   ;;  %v1203_v19 = vld [vmem:[%s1266_s22 + $0xc0] sm:$0xff]  }
  0x14   : > { %1109 = vmatmul.mubr.msk.bf16.vlgmr.msra.gmra.mxu0 %vm422_vm0, %v1188_v4  ;;  %1141 = vmatmul.mubr.msk.bf16.vlgmr.msra.gmra.mxu1 %vm422_vm0, %v1189_v5  ;;  %v1204_v20 = vld [vmem:[%s1266_s22 + $0x48] sm:$0xff]   ;;  %v1206_v22 = vld [vmem:[%s1266_s22 + $0x50] sm:$0xff]   ;;  %v1208_v24 = vld [vmem:[%s1266_s22 + $0x58] sm:$0xff]  }
  0x15   : > { %1112 = vmatprep.mubr.msk.bf16.mxu0 %vm422_vm0, %v1190_v6  ;;  %1144 = vmatprep.mubr.msk.bf16.mxu1 %vm422_vm0, %v1191_v7  ;;  %v1205_v21 = vld [vmem:[%s1266_s22 + $0xc8] sm:$0xff]   ;;  %v1207_v23 = vld [vmem:[%s1266_s22 + $0xd0] sm:$0xff]   ;;  %v1209_v25 = vld [vmem:[%s1266_s22 + $0xd8] sm:$0xff]  }
  0x16   : > { %v1210_v26 = vld [vmem:[%s1266_s22 + $0x60] sm:$0xff]   ;;  %v1212_v28 = vld [vmem:[%s1266_s22 + $0x68] sm:$0xff]   ;;  %v1214_v30 = vld [vmem:[%s1266_s22 + $0x70] sm:$0xff]  }
  0x17   : > { %v1211_v27 = vld [vmem:[%s1266_s22 + $0xe0] sm:$0xff]   ;;  %v1213_v29 = vld [vmem:[%s1266_s22 + $0xe8] sm:$0xff]   ;;  %v1215_v31 = vld [vmem:[%s1266_s22 + $0xf0] sm:$0xff]  }
  0x18   : > { %v1216_v32 = vld [vmem:[%s1266_s22 + $0x78] sm:$0xff]  }
  0x19   : > { %v1217_v33 = vld [vmem:[%s1266_s22 + $0xf8] sm:$0xff]  }
  0x1c   : > { %1113 = vmatmul.mubr.msk.bf16.gmra.mxu0 %vm422_vm0, %v1192_v8  ;;  %1145 = vmatmul.mubr.msk.bf16.gmra.mxu1 %vm422_vm0, %v1193_v9 }
  0x1d   : > { %1116 = vmatprep.mubr.msk.bf16.mxu0 %vm422_vm0, %v1194_v10  ;;  %1148 = vmatprep.mubr.msk.bf16.mxu1 %vm422_vm0, %v1195_v11 }
  0x24   : > { %1117 = vmatmul.mubr.msk.bf16.gmra.mxu0 %vm422_vm0, %v1196_v12  ;;  %1149 = vmatmul.mubr.msk.bf16.gmra.mxu1 %vm422_vm0, %v1197_v13 }
  0x25   : > { %1120 = vmatprep.mubr.msk.bf16.mxu0 %vm422_vm0, %v1198_v14  ;;  %1152 = vmatprep.mubr.msk.bf16.mxu1 %vm422_vm0, %v1199_v15 }
  0x2c   : > { %1121 = vmatmul.mubr.msk.bf16.gmra.mxu0 %vm422_vm0, %v1200_v16  ;;  %1153 = vmatmul.mubr.msk.bf16.gmra.mxu1 %vm422_vm0, %v1201_v17 }
  0x2d   : > { %1124 = vmatprep.mubr.msk.bf16.mxu0 %vm422_vm0, %v1202_v18  ;;  %1156 = vmatprep.mubr.msk.bf16.mxu1 %vm422_vm0, %v1203_v19 }
  0x34   : > { %1125 = vmatmul.mubr.msk.bf16.gmra.mxu0 %vm422_vm0, %v1204_v20  ;;  %1157 = vmatmul.mubr.msk.bf16.gmra.mxu1 %vm422_vm0, %v1205_v21 }
  0x35   : > { %1128 = vmatprep.mubr.msk.bf16.mxu0 %vm422_vm0, %v1206_v22  ;;  %1160 = vmatprep.mubr.msk.bf16.mxu1 %vm422_vm0, %v1207_v23 }
  0x3c   : > { %1129 = vmatmul.mubr.msk.bf16.gmra.mxu0 %vm422_vm0, %v1208_v24  ;;  %1161 = vmatmul.mubr.msk.bf16.gmra.mxu1 %vm422_vm0, %v1209_v25 }
  0x3d   : > { %1132 = vmatprep.mubr.msk.bf16.mxu0 %vm422_vm0, %v1210_v26  ;;  %1164 = vmatprep.mubr.msk.bf16.mxu1 %vm422_vm0, %v1211_v27 }
  0x44   : > { %1133 = vmatmul.mubr.msk.bf16.gmra.mxu0 %vm422_vm0, %v1212_v28  ;;  %1165 = vmatmul.mubr.msk.bf16.gmra.mxu1 %vm422_vm0, %v1213_v29 }
  0x45   : > { %1136 = vmatprep.mubr.msk.bf16.mxu0 %vm422_vm0, %v1214_v30  ;;  %1168 = vmatprep.mubr.msk.bf16.mxu1 %vm422_vm0, %v1215_v31 }
  0x4c   : > { %1137 = vmatmul.mubr.msk.bf16.gmra.mxu0 %vm422_vm0, %v1216_v32  ;;  %1169 = vmatmul.mubr.msk.bf16.gmra.mxu1 %vm422_vm0, %v1217_v33 }
  0xd4   : > { %v1110_v35 = vpop.f32.mrf.mxu0  ;;  %v1142_v37 = vpop.f32.mrf.mxu1 }
  0xd5   : > { %v562_v36 = vadd.f32 %v1110_v35, %v1335_v34  ;;  %v690_v38 = vadd.f32 %v1142_v37, %v1335_v34 }
  0xd6   : > { %v553_v39 = vpop.f32.mrf.mxu0  ;;  %v681_v42 = vpop.f32.mrf.mxu1 }
  0xd7   : > { %v810_v40 = vmax.f32 %v562_v36, 0.0  ;;  %v554_v41 = vadd.f32 %v1335_v34, %v553_v39  ;;  %v842_v43 = vmax.f32 %v690_v38, 0.0  ;;  %v682_v44 = vadd.f32 %v1335_v34, %v681_v42 }
  0xd8   : > { %v1111_v45 = vpop.f32.mrf.mxu0  ;;  %v1143_v48 = vpop.f32.mrf.mxu1 }
  0xd9   : > { %874 = vst [vmem:[%s1342_s28 + $0x10] sm:$0xff] %v810_v40  ;;  %v808_v46 = vmax.f32 %v554_v41, 0.0  ;;  %v565_v47 = vadd.f32 %v1111_v45, %v1335_v34  ;;  %906 = vst [vmem:[%s1342_s28 + $0x110] sm:$0xff] %v842_v43  ;;  %v840_v49 = vmax.f32 %v682_v44, 0.0  ;;  %v693_v50 = vadd.f32 %v1143_v48, %v1335_v34 }
  0xda   : > { %v556_v51 = vpop.f32.mrf.mxu0  ;;  %v684_v54 = vpop.f32.mrf.mxu1 }
  0xdb   : > { %872 = vst [vmem:[%s1342_s28] sm:$0xff] %v808_v46  ;;  %v811_v52 = vmax.f32 %v565_v47, 0.0  ;;  %v557_v53 = vadd.f32 %v1335_v34, %v556_v51  ;;  %904 = vst [vmem:[%s1342_s28 + $0x100] sm:$0xff] %v840_v49  ;;  %v843_v55 = vmax.f32 %v693_v50, 0.0  ;;  %v685_v56 = vadd.f32 %v1335_v34, %v684_v54 }
  0xdc   : > { %v1114_v57 = vpop.f32.mrf.mxu0  ;;  %v1146_v60 = vpop.f32.mrf.mxu1 }
  0xdd   : > { %875 = vst [vmem:[%s1342_s28 + $0x18] sm:$0xff] %v811_v52  ;;  %v809_v58 = vmax.f32 %v557_v53, 0.0  ;;  %v578_v59 = vadd.f32 %v1114_v57, %v1335_v34  ;;  %907 = vst [vmem:[%s1342_s28 + $0x118] sm:$0xff] %v843_v55  ;;  %v841_v61 = vmax.f32 %v685_v56, 0.0  ;;  %v706_v62 = vadd.f32 %v1146_v60, %v1335_v34 }
  0xde   : > { %v569_v63 = vpop.f32.mrf.mxu0  ;;  %v697_v2 = vpop.f32.mrf.mxu1 }
  0xdf   : > { %873 = vst [vmem:[%s1342_s28 + $0x8] sm:$0xff] %v809_v58  ;;  %v814_v0 = vmax.f32 %v578_v59, 0.0  ;;  %v570_v1 = vadd.f32 %v1335_v34, %v569_v63  ;;  %905 = vst [vmem:[%s1342_s28 + $0x108] sm:$0xff] %v841_v61  ;;  %v846_v3 = vmax.f32 %v706_v62, 0.0  ;;  %v698_v4 = vadd.f32 %v1335_v34, %v697_v2 }
  0xe0   : > { %v1115_v5 = vpop.f32.mrf.mxu0  ;;  %v1147_v8 = vpop.f32.mrf.mxu1 }
  0xe1   : > { %878 = vst [vmem:[%s1342_s28 + $0x30] sm:$0xff] %v814_v0  ;;  %v812_v6 = vmax.f32 %v570_v1, 0.0  ;;  %v581_v7 = vadd.f32 %v1115_v5, %v1335_v34  ;;  %910 = vst [vmem:[%s1342_s28 + $0x130] sm:$0xff] %v846_v3  ;;  %v844_v9 = vmax.f32 %v698_v4, 0.0  ;;  %v709_v10 = vadd.f32 %v1147_v8, %v1335_v34 }
  0xe2   : > { %v572_v11 = vpop.f32.mrf.mxu0  ;;  %v700_v14 = vpop.f32.mrf.mxu1 }
  0xe3   : > { %876 = vst [vmem:[%s1342_s28 + $0x20] sm:$0xff] %v812_v6  ;;  %v815_v12 = vmax.f32 %v581_v7, 0.0  ;;  %v573_v13 = vadd.f32 %v1335_v34, %v572_v11  ;;  %908 = vst [vmem:[%s1342_s28 + $0x120] sm:$0xff] %v844_v9  ;;  %v847_v15 = vmax.f32 %v709_v10, 0.0  ;;  %v701_v16 = vadd.f32 %v1335_v34, %v700_v14 }
  0xe4   : > { %v1118_v17 = vpop.f32.mrf.mxu0  ;;  %v1150_v20 = vpop.f32.mrf.mxu1 }
  0xe5   : > { %879 = vst [vmem:[%s1342_s28 + $0x38] sm:$0xff] %v815_v12  ;;  %v813_v18 = vmax.f32 %v573_v13, 0.0  ;;  %v594_v19 = vadd.f32 %v1118_v17, %v1335_v34  ;;  %911 = vst [vmem:[%s1342_s28 + $0x138] sm:$0xff] %v847_v15  ;;  %v845_v21 = vmax.f32 %v701_v16, 0.0  ;;  %v722_v22 = vadd.f32 %v1150_v20, %v1335_v34 }
  0xe6   : > { %v585_v23 = vpop.f32.mrf.mxu0  ;;  %v713_v26 = vpop.f32.mrf.mxu1 }
  0xe7   : > { %877 = vst [vmem:[%s1342_s28 + $0x28] sm:$0xff] %v813_v18  ;;  %v818_v24 = vmax.f32 %v594_v19, 0.0  ;;  %v586_v25 = vadd.f32 %v1335_v34, %v585_v23  ;;  %909 = vst [vmem:[%s1342_s28 + $0x128] sm:$0xff] %v845_v21  ;;  %v850_v27 = vmax.f32 %v722_v22, 0.0  ;;  %v714_v28 = vadd.f32 %v1335_v34, %v713_v26 }
  0xe8   : > { %v1119_v29 = vpop.f32.mrf.mxu0  ;;  %v1151_v32 = vpop.f32.mrf.mxu1 }
  0xe9   : > { %882 = vst [vmem:[%s1342_s28 + $0x50] sm:$0xff] %v818_v24  ;;  %v816_v30 = vmax.f32 %v586_v25, 0.0  ;;  %v597_v31 = vadd.f32 %v1119_v29, %v1335_v34  ;;  %914 = vst [vmem:[%s1342_s28 + $0x150] sm:$0xff] %v850_v27  ;;  %v848_v33 = vmax.f32 %v714_v28, 0.0  ;;  %v725_v35 = vadd.f32 %v1151_v32, %v1335_v34 }
  0xea   : > { %v588_v36 = vpop.f32.mrf.mxu0  ;;  %v716_v39 = vpop.f32.mrf.mxu1 }
  0xeb   : > { %880 = vst [vmem:[%s1342_s28 + $0x40] sm:$0xff] %v816_v30  ;;  %v819_v37 = vmax.f32 %v597_v31, 0.0  ;;  %v589_v38 = vadd.f32 %v1335_v34, %v588_v36  ;;  %912 = vst [vmem:[%s1342_s28 + $0x140] sm:$0xff] %v848_v33  ;;  %v851_v40 = vmax.f32 %v725_v35, 0.0  ;;  %v717_v41 = vadd.f32 %v1335_v34, %v716_v39 }
  0xec   : > { %v1122_v42 = vpop.f32.mrf.mxu0  ;;  %v1154_v45 = vpop.f32.mrf.mxu1 }
  0xed   : > { %883 = vst [vmem:[%s1342_s28 + $0x58] sm:$0xff] %v819_v37  ;;  %v817_v43 = vmax.f32 %v589_v38, 0.0  ;;  %v610_v44 = vadd.f32 %v1122_v42, %v1335_v34  ;;  %915 = vst [vmem:[%s1342_s28 + $0x158] sm:$0xff] %v851_v40  ;;  %v849_v46 = vmax.f32 %v717_v41, 0.0  ;;  %v738_v47 = vadd.f32 %v1154_v45, %v1335_v34 }
  0xee   : > { %v601_v48 = vpop.f32.mrf.mxu0  ;;  %v729_v51 = vpop.f32.mrf.mxu1 }
  0xef   : > { %881 = vst [vmem:[%s1342_s28 + $0x48] sm:$0xff] %v817_v43  ;;  %v822_v49 = vmax.f32 %v610_v44, 0.0  ;;  %v602_v50 = vadd.f32 %v1335_v34, %v601_v48  ;;  %913 = vst [vmem:[%s1342_s28 + $0x148] sm:$0xff] %v849_v46  ;;  %v854_v52 = vmax.f32 %v738_v47, 0.0  ;;  %v730_v53 = vadd.f32 %v1335_v34, %v729_v51 }
  0xf0   : > { %v1123_v54 = vpop.f32.mrf.mxu0  ;;  %v1155_v57 = vpop.f32.mrf.mxu1 }
  0xf1   : > { %886 = vst [vmem:[%s1342_s28 + $0x70] sm:$0xff] %v822_v49  ;;  %v820_v55 = vmax.f32 %v602_v50, 0.0  ;;  %v613_v56 = vadd.f32 %v1123_v54, %v1335_v34  ;;  %918 = vst [vmem:[%s1342_s28 + $0x170] sm:$0xff] %v854_v52  ;;  %v852_v58 = vmax.f32 %v730_v53, 0.0  ;;  %v741_v59 = vadd.f32 %v1155_v57, %v1335_v34 }
  0xf2   : > { %v604_v60 = vpop.f32.mrf.mxu0  ;;  %v732_v63 = vpop.f32.mrf.mxu1 }
  0xf3   : > { %884 = vst [vmem:[%s1342_s28 + $0x60] sm:$0xff] %v820_v55  ;;  %v823_v61 = vmax.f32 %v613_v56, 0.0  ;;  %v605_v62 = vadd.f32 %v1335_v34, %v604_v60  ;;  %916 = vst [vmem:[%s1342_s28 + $0x160] sm:$0xff] %v852_v58  ;;  %v855_v0 = vmax.f32 %v741_v59, 0.0  ;;  %v733_v1 = vadd.f32 %v1335_v34, %v732_v63 }
  0xf4   : > { %v1126_v2 = vpop.f32.mrf.mxu0  ;;  %v1158_v5 = vpop.f32.mrf.mxu1 }
  0xf5   : > { %887 = vst [vmem:[%s1342_s28 + $0x78] sm:$0xff] %v823_v61  ;;  %v821_v3 = vmax.f32 %v605_v62, 0.0  ;;  %v626_v4 = vadd.f32 %v1126_v2, %v1335_v34  ;;  %919 = vst [vmem:[%s1342_s28 + $0x178] sm:$0xff] %v855_v0  ;;  %v853_v6 = vmax.f32 %v733_v1, 0.0  ;;  %v754_v7 = vadd.f32 %v1158_v5, %v1335_v34 }
  0xf6   : > { %v617_v8 = vpop.f32.mrf.mxu0  ;;  %v745_v11 = vpop.f32.mrf.mxu1 }
  0xf7   : > { %885 = vst [vmem:[%s1342_s28 + $0x68] sm:$0xff] %v821_v3  ;;  %v826_v9 = vmax.f32 %v626_v4, 0.0  ;;  %v618_v10 = vadd.f32 %v1335_v34, %v617_v8  ;;  %917 = vst [vmem:[%s1342_s28 + $0x168] sm:$0xff] %v853_v6  ;;  %v858_v12 = vmax.f32 %v754_v7, 0.0  ;;  %v746_v13 = vadd.f32 %v1335_v34, %v745_v11 }
  0xf8   : > { %v1127_v14 = vpop.f32.mrf.mxu0  ;;  %v1159_v17 = vpop.f32.mrf.mxu1 }
  0xf9   : > { %890 = vst [vmem:[%s1342_s28 + $0x90] sm:$0xff] %v826_v9  ;;  %v824_v15 = vmax.f32 %v618_v10, 0.0  ;;  %v629_v16 = vadd.f32 %v1127_v14, %v1335_v34  ;;  %922 = vst [vmem:[%s1342_s28 + $0x190] sm:$0xff] %v858_v12  ;;  %v856_v18 = vmax.f32 %v746_v13, 0.0  ;;  %v757_v19 = vadd.f32 %v1159_v17, %v1335_v34 }
  0xfa   : > { %v620_v20 = vpop.f32.mrf.mxu0  ;;  %v748_v23 = vpop.f32.mrf.mxu1 }
  0xfb   : > { %888 = vst [vmem:[%s1342_s28 + $0x80] sm:$0xff] %v824_v15  ;;  %v827_v21 = vmax.f32 %v629_v16, 0.0  ;;  %v621_v22 = vadd.f32 %v1335_v34, %v620_v20  ;;  %920 = vst [vmem:[%s1342_s28 + $0x180] sm:$0xff] %v856_v18  ;;  %v859_v24 = vmax.f32 %v757_v19, 0.0  ;;  %v749_v25 = vadd.f32 %v1335_v34, %v748_v23 }
  0xfc   : > { %v1130_v26 = vpop.f32.mrf.mxu0  ;;  %v1162_v29 = vpop.f32.mrf.mxu1 }
  0xfd   : > { %891 = vst [vmem:[%s1342_s28 + $0x98] sm:$0xff] %v827_v21  ;;  %v825_v27 = vmax.f32 %v621_v22, 0.0  ;;  %v642_v28 = vadd.f32 %v1130_v26, %v1335_v34  ;;  %923 = vst [vmem:[%s1342_s28 + $0x198] sm:$0xff] %v859_v24  ;;  %v857_v30 = vmax.f32 %v749_v25, 0.0  ;;  %v770_v31 = vadd.f32 %v1162_v29, %v1335_v34 }
  0xfe   : > { %v633_v32 = vpop.f32.mrf.mxu0  ;;  %v761_v36 = vpop.f32.mrf.mxu1 }
  0xff   : > { %889 = vst [vmem:[%s1342_s28 + $0x88] sm:$0xff] %v825_v27  ;;  %v830_v33 = vmax.f32 %v642_v28, 0.0  ;;  %v634_v35 = vadd.f32 %v1335_v34, %v633_v32  ;;  %921 = vst [vmem:[%s1342_s28 + $0x188] sm:$0xff] %v857_v30  ;;  %v862_v37 = vmax.f32 %v770_v31, 0.0  ;;  %v762_v38 = vadd.f32 %v1335_v34, %v761_v36 }
 0x100   : > { %v1131_v39 = vpop.f32.mrf.mxu0  ;;  %v1163_v42 = vpop.f32.mrf.mxu1 }
 0x101   : > { %894 = vst [vmem:[%s1342_s28 + $0xb0] sm:$0xff] %v830_v33  ;;  %v828_v40 = vmax.f32 %v634_v35, 0.0  ;;  %v645_v41 = vadd.f32 %v1131_v39, %v1335_v34  ;;  %926 = vst [vmem:[%s1342_s28 + $0x1b0] sm:$0xff] %v862_v37  ;;  %v860_v43 = vmax.f32 %v762_v38, 0.0  ;;  %v773_v44 = vadd.f32 %v1163_v42, %v1335_v34 }
 0x102   : > { %v636_v45 = vpop.f32.mrf.mxu0  ;;  %v764_v48 = vpop.f32.mrf.mxu1 }
 0x103   : > { %892 = vst [vmem:[%s1342_s28 + $0xa0] sm:$0xff] %v828_v40  ;;  %v831_v46 = vmax.f32 %v645_v41, 0.0  ;;  %v637_v47 = vadd.f32 %v1335_v34, %v636_v45  ;;  %924 = vst [vmem:[%s1342_s28 + $0x1a0] sm:$0xff] %v860_v43  ;;  %v863_v49 = vmax.f32 %v773_v44, 0.0  ;;  %v765_v50 = vadd.f32 %v1335_v34, %v764_v48 }
 0x104   : > { %v1134_v51 = vpop.f32.mrf.mxu0  ;;  %v1166_v54 = vpop.f32.mrf.mxu1 }
 0x105   : > { %895 = vst [vmem:[%s1342_s28 + $0xb8] sm:$0xff] %v831_v46  ;;  %v829_v52 = vmax.f32 %v637_v47, 0.0  ;;  %v658_v53 = vadd.f32 %v1134_v51, %v1335_v34  ;;  %927 = vst [vmem:[%s1342_s28 + $0x1b8] sm:$0xff] %v863_v49  ;;  %v861_v55 = vmax.f32 %v765_v50, 0.0  ;;  %v786_v56 = vadd.f32 %v1166_v54, %v1335_v34 }
 0x106   : > { %v649_v57 = vpop.f32.mrf.mxu0  ;;  %v777_v60 = vpop.f32.mrf.mxu1 }
 0x107   : > { %893 = vst [vmem:[%s1342_s28 + $0xa8] sm:$0xff] %v829_v52  ;;  %v834_v58 = vmax.f32 %v658_v53, 0.0  ;;  %v650_v59 = vadd.f32 %v1335_v34, %v649_v57  ;;  %925 = vst [vmem:[%s1342_s28 + $0x1a8] sm:$0xff] %v861_v55  ;;  %v866_v61 = vmax.f32 %v786_v56, 0.0  ;;  %v778_v62 = vadd.f32 %v1335_v34, %v777_v60 }
 0x108   : > { %v1135_v63 = vpop.f32.mrf.mxu0  ;;  %v1167_v2 = vpop.f32.mrf.mxu1 }
 0x109   : > { %898 = vst [vmem:[%s1342_s28 + $0xd0] sm:$0xff] %v834_v58  ;;  %v832_v0 = vmax.f32 %v650_v59, 0.0  ;;  %v661_v1 = vadd.f32 %v1135_v63, %v1335_v34  ;;  %930 = vst [vmem:[%s1342_s28 + $0x1d0] sm:$0xff] %v866_v61  ;;  %v864_v3 = vmax.f32 %v778_v62, 0.0  ;;  %v789_v4 = vadd.f32 %v1167_v2, %v1335_v34 }
 0x10a   : > { %v652_v5 = vpop.f32.mrf.mxu0  ;;  %v780_v8 = vpop.f32.mrf.mxu1 }
 0x10b   : > { %896 = vst [vmem:[%s1342_s28 + $0xc0] sm:$0xff] %v832_v0  ;;  %v835_v6 = vmax.f32 %v661_v1, 0.0  ;;  %v653_v7 = vadd.f32 %v1335_v34, %v652_v5  ;;  %928 = vst [vmem:[%s1342_s28 + $0x1c0] sm:$0xff] %v864_v3  ;;  %v867_v9 = vmax.f32 %v789_v4, 0.0  ;;  %v781_v10 = vadd.f32 %v1335_v34, %v780_v8 }
 0x10c   : > { %v1138_v11 = vpop.f32.mrf.mxu0  ;;  %v1170_v14 = vpop.f32.mrf.mxu1 }
 0x10d   : > { %899 = vst [vmem:[%s1342_s28 + $0xd8] sm:$0xff] %v835_v6  ;;  %v833_v12 = vmax.f32 %v653_v7, 0.0  ;;  %v674_v13 = vadd.f32 %v1138_v11, %v1335_v34  ;;  %931 = vst [vmem:[%s1342_s28 + $0x1d8] sm:$0xff] %v867_v9  ;;  %v865_v15 = vmax.f32 %v781_v10, 0.0  ;;  %v802_v16 = vadd.f32 %v1170_v14, %v1335_v34 }
 0x10e   : > { %v665_v17 = vpop.f32.mrf.mxu0  ;;  %v793_v20 = vpop.f32.mrf.mxu1 }
 0x10f   : > { %897 = vst [vmem:[%s1342_s28 + $0xc8] sm:$0xff] %v833_v12  ;;  %v838_v18 = vmax.f32 %v674_v13, 0.0  ;;  %v666_v19 = vadd.f32 %v1335_v34, %v665_v17  ;;  %929 = vst [vmem:[%s1342_s28 + $0x1c8] sm:$0xff] %v865_v15  ;;  %v870_v21 = vmax.f32 %v802_v16, 0.0  ;;  %v794_v22 = vadd.f32 %v1335_v34, %v793_v20 }
 0x110   : > { %v1139_v23 = vpop.f32.mrf.mxu0  ;;  %v1171_v26 = vpop.f32.mrf.mxu1 }
 0x111   : > { %902 = vst [vmem:[%s1342_s28 + $0xf0] sm:$0xff] %v838_v18  ;;  %v836_v24 = vmax.f32 %v666_v19, 0.0  ;;  %v677_v25 = vadd.f32 %v1139_v23, %v1335_v34  ;;  %934 = vst [vmem:[%s1342_s28 + $0x1f0] sm:$0xff] %v870_v21  ;;  %v868_v27 = vmax.f32 %v794_v22, 0.0  ;;  %v805_v28 = vadd.f32 %v1171_v26, %v1335_v34 }
 0x112   : > { %v668_v29 = vpop.f32.mrf.mxu0  ;;  %v796_v32 = vpop.f32.mrf.mxu1 }
 0x113   : > { %900 = vst [vmem:[%s1342_s28 + $0xe0] sm:$0xff] %v836_v24  ;;  %v839_v30 = vmax.f32 %v677_v25, 0.0  ;;  %v669_v31 = vadd.f32 %v1335_v34, %v668_v29  ;;  %932 = vst [vmem:[%s1342_s28 + $0x1e0] sm:$0xff] %v868_v27  ;;  %v871_v33 = vmax.f32 %v805_v28, 0.0  ;;  %v797_v35 = vadd.f32 %v1335_v34, %v796_v32 }
 0x115   : > { %903 = vst [vmem:[%s1342_s28 + $0xf8] sm:$0xff] %v839_v30  ;;  %v837_v36 = vmax.f32 %v669_v31, 0.0  ;;  %935 = vst [vmem:[%s1342_s28 + $0x1f8] sm:$0xff] %v871_v33  ;;  %v869_v37 = vmax.f32 %v797_v35, 0.0 }
 0x117   : > { %901 = vst [vmem:[%s1342_s28 + $0xe8] sm:$0xff] %v837_v36  ;;  %933 = vst [vmem:[%s1342_s28 + $0x1e8] sm:$0xff] %v869_v37 }
 0x118 PF: > { %s13_s12 = sadd.s32 1, %s1224_s12  }
 0x119   : > { %p10_p4 = scmp.ge.s32.totalorder %s13_s12, 10  }
 0x11b   :  { %12 = sbr.rel (!%p10_p4) target bundleno = 1 (0x1), region = 62 }

// kernel: _lambda_.21
= control target key start
LH: loop header
LB: loop body
LE: loop exit
PB: predicated region body
PF: predicated region fallthrough
CT: control target
= control target key end

     0   :  { %s1276_s12 = smov 0   ;;  %s1574_s0 = inlined_call_operand.vmem [shape: bf16[2048,64], index: 0, kind: input, shape index: {}]   ;;  %s1575_s1 = inlined_call_operand.vmem [shape: bf16[64,64], index: 1, kind: input, shape index: {}]   ;;  %s1576_s2 = inlined_call_operand.vmem [shape: f32[1,64], index: 2, kind: input, shape index: {}]   ;;  %s1577_s3 = inlined_call_operand.vmem [shape: f32[2048,64], index: 3, kind: output, shape index: {}]  }
   0x1 LB: > { %s1008_s13 = sadd.s32 4294967295, %s1254_s12   ;;  %p1012_p0 = scmp.ge.s32.totalorder %s1254_s12, 1  ;;  %s1254_s12 = sphi %s1276_s12, %s13_s12  }
   0x2   : > { %p138_p1 = scmp.lt.s32.totalorder %s1254_s12, 5 }
   0x4   : > { %p139_p2 = pnand %p1012_p0, %p138_p1 }
   0x5   : > { %s1013_s16 = sshll.u32 (!%p139_p2), %s1008_s13, 6 }
   0x6   : > { %142 = sbr.rel (%p139_p2) target bundleno = 288 (0x120), region = 32  ;;  %p163_p3 = scmp.lt.s32.totalorder (!%p139_p2), %s1013_s16, 255 }
   0xb   : > { %v1212_v0 = vld [vmem:[%s1575_s1 + $0x18] sm:$0xff]   ;;  %v1213_v1 = vld [vmem:[%s1575_s1 + $0x10] sm:$0xff]   ;;  %s1579_s16 = smov (!%p163_p3, %s1013_s16), 255  ;;  %v1214_v2 = vld [vmem:[%s1575_s1 + $0x8] sm:$0xff]   ;;  %vm438_vm0 = vcmask 523264  }
   0xc   : > { %1124 = vmatprep.subr.bf16.mxu0 %v1212_v0  ;;  %1196 = vmatprep.subr.bf16.mxu1 %v1212_v0  ;;  %s1014_s21 = sshll.u32 %s1579_s16, 2  ;;  %v1215_v3 = vld [vmem:[%s1575_s1] sm:$0xff]   ;;  %s1016_s29 = sshll.u32 %s1579_s16, 3 }
   0xd   : > { %1125 = vmatpush3.bf16.msra.mxu0 %v1212_v0  ;;  %1200 = vmatpush3.bf16.msra.mxu1 %v1212_v0  ;;  %s1302_s26 = scalar_lea.vmem %s1574_s0, %s1014_s21  ;;  %v1371_v36 = vld [vmem:[%s1576_s2] ss:$0 sm:$0xff]  ;;  %s1379_s5 = scalar_lea.vmem %s1577_s3, %s1016_s29 }
   0xe   : > { %1126 = vmatprep.subr.bf16.mxu0 %v1213_v1  ;;  %1197 = vmatprep.subr.bf16.mxu1 %v1213_v1  ;;  %v1216_v4 = vld [vmem:[%s1302_s26] sm:$0xff]   ;;  %v1218_v6 = vld [vmem:[%s1302_s26 + $0x8] sm:$0xff]   ;;  %v1220_v8 = vld [vmem:[%s1302_s26 + $0x10] sm:$0xff]  }
   0xf   : > { %v1217_v5 = vld [vmem:[%s1302_s26 + $0x80] sm:$0xff]   ;;  %1132 = vmatprep.mubr.msk.bf16.mxu0 %vm438_vm0, %v1216_v4  ;;  %v1219_v7 = vld [vmem:[%s1302_s26 + $0x88] sm:$0xff]   ;;  %v1221_v9 = vld [vmem:[%s1302_s26 + $0x90] sm:$0xff]  }
  0x10   : > { %1164 = vmatprep.mubr.msk.bf16.mxu1 %vm438_vm0, %v1217_v5  ;;  %v1222_v10 = vld [vmem:[%s1302_s26 + $0x18] sm:$0xff]   ;;  %v1224_v12 = vld [vmem:[%s1302_s26 + $0x20] sm:$0xff]   ;;  %v1226_v14 = vld [vmem:[%s1302_s26 + $0x28] sm:$0xff]  }
  0x11   : > { %1127 = vmatpush3.bf16.msra.mxu0 %v1213_v1  ;;  %1201 = vmatpush3.bf16.msra.mxu1 %v1213_v1  ;;  %v1223_v11 = vld [vmem:[%s1302_s26 + $0x98] sm:$0xff]   ;;  %v1225_v13 = vld [vmem:[%s1302_s26 + $0xa0] sm:$0xff]   ;;  %v1227_v15 = vld [vmem:[%s1302_s26 + $0xa8] sm:$0xff]  }
  0x12   : > { %1128 = vmatprep.subr.bf16.mxu0 %v1214_v2  ;;  %1198 = vmatprep.subr.bf16.mxu1 %v1214_v2  ;;  %v1228_v16 = vld [vmem:[%s1302_s26 + $0x30] sm:$0xff]   ;;  %v1230_v18 = vld [vmem:[%s1302_s26 + $0x38] sm:$0xff]   ;;  %v1232_v20 = vld [vmem:[%s1302_s26 + $0x40] sm:$0xff]  }
  0x13   : > { %v1229_v17 = vld [vmem:[%s1302_s26 + $0xb0] sm:$0xff]   ;;  %v1231_v19 = vld [vmem:[%s1302_s26 + $0xb8] sm:$0xff]   ;;  %v1233_v21 = vld [vmem:[%s1302_s26 + $0xc0] sm:$0xff]  }
  0x14   : > { %v1234_v22 = vld [vmem:[%s1302_s26 + $0x48] sm:$0xff]   ;;  %v1236_v24 = vld [vmem:[%s1302_s26 + $0x50] sm:$0xff]   ;;  %v1238_v26 = vld [vmem:[%s1302_s26 + $0x58] sm:$0xff]  }
  0x15   : > { %1129 = vmatpush3.bf16.msra.mxu0 %v1214_v2  ;;  %1202 = vmatpush3.bf16.msra.mxu1 %v1214_v2  ;;  %v1235_v23 = vld [vmem:[%s1302_s26 + $0xc8] sm:$0xff]   ;;  %v1237_v25 = vld [vmem:[%s1302_s26 + $0xd0] sm:$0xff]   ;;  %v1239_v27 = vld [vmem:[%s1302_s26 + $0xd8] sm:$0xff]  }
  0x16   : > { %1130 = vmatprep.subr.bf16.mxu0 %v1215_v3  ;;  %1199 = vmatprep.subr.bf16.mxu1 %v1215_v3  ;;  %v1240_v28 = vld [vmem:[%s1302_s26 + $0x60] sm:$0xff]   ;;  %v1242_v30 = vld [vmem:[%s1302_s26 + $0x68] sm:$0xff]   ;;  %v1244_v32 = vld [vmem:[%s1302_s26 + $0x70] sm:$0xff]  }
  0x17   : > { %v1241_v29 = vld [vmem:[%s1302_s26 + $0xe0] sm:$0xff]   ;;  %v1243_v31 = vld [vmem:[%s1302_s26 + $0xe8] sm:$0xff]   ;;  %v1245_v33 = vld [vmem:[%s1302_s26 + $0xf0] sm:$0xff]  }
  0x18   : > { %v1246_v34 = vld [vmem:[%s1302_s26 + $0x78] sm:$0xff]  }
  0x19   : > { %1131 = vmatpush3.bf16.msra.mxu0 %v1215_v3  ;;  %1203 = vmatpush3.bf16.msra.mxu1 %v1215_v3  ;;  %v1247_v35 = vld [vmem:[%s1302_s26 + $0xf8] sm:$0xff]  }
  0x1c   : > { %1133 = vmatmul.mubr.msk.bf16.vlgmr.msra.gmra.mxu0 %vm438_vm0, %v1218_v6  ;;  %1165 = vmatmul.mubr.msk.bf16.vlgmr.msra.gmra.mxu1 %vm438_vm0, %v1219_v7 }
  0x1d   : > { %1136 = vmatprep.mubr.msk.bf16.mxu0 %vm438_vm0, %v1220_v8  ;;  %1168 = vmatprep.mubr.msk.bf16.mxu1 %vm438_vm0, %v1221_v9 }
  0x24   : > { %1137 = vmatmul.mubr.msk.bf16.gmra.mxu0 %vm438_vm0, %v1222_v10  ;;  %1169 = vmatmul.mubr.msk.bf16.gmra.mxu1 %vm438_vm0, %v1223_v11 }
  0x25   : > { %1140 = vmatprep.mubr.msk.bf16.mxu0 %vm438_vm0, %v1224_v12  ;;  %1172 = vmatprep.mubr.msk.bf16.mxu1 %vm438_vm0, %v1225_v13 }
  0x2c   : > { %1141 = vmatmul.mubr.msk.bf16.gmra.mxu0 %vm438_vm0, %v1226_v14  ;;  %1173 = vmatmul.mubr.msk.bf16.gmra.mxu1 %vm438_vm0, %v1227_v15 }
  0x2d   : > { %1144 = vmatprep.mubr.msk.bf16.mxu0 %vm438_vm0, %v1228_v16  ;;  %1176 = vmatprep.mubr.msk.bf16.mxu1 %vm438_vm0, %v1229_v17 }
  0x34   : > { %1145 = vmatmul.mubr.msk.bf16.gmra.mxu0 %vm438_vm0, %v1230_v18  ;;  %1177 = vmatmul.mubr.msk.bf16.gmra.mxu1 %vm438_vm0, %v1231_v19 }
  0x35   : > { %1148 = vmatprep.mubr.msk.bf16.mxu0 %vm438_vm0, %v1232_v20  ;;  %1180 = vmatprep.mubr.msk.bf16.mxu1 %vm438_vm0, %v1233_v21 }
  0x3c   : > { %1149 = vmatmul.mubr.msk.bf16.gmra.mxu0 %vm438_vm0, %v1234_v22  ;;  %1181 = vmatmul.mubr.msk.bf16.gmra.mxu1 %vm438_vm0, %v1235_v23 }
  0x3d   : > { %1152 = vmatprep.mubr.msk.bf16.mxu0 %vm438_vm0, %v1236_v24  ;;  %1184 = vmatprep.mubr.msk.bf16.mxu1 %vm438_vm0, %v1237_v25 }
  0x44   : > { %1153 = vmatmul.mubr.msk.bf16.gmra.mxu0 %vm438_vm0, %v1238_v26  ;;  %1185 = vmatmul.mubr.msk.bf16.gmra.mxu1 %vm438_vm0, %v1239_v27 }
  0x45   : > { %1156 = vmatprep.mubr.msk.bf16.mxu0 %vm438_vm0, %v1240_v28  ;;  %1188 = vmatprep.mubr.msk.bf16.mxu1 %vm438_vm0, %v1241_v29 }
  0x4c   : > { %1157 = vmatmul.mubr.msk.bf16.gmra.mxu0 %vm438_vm0, %v1242_v30  ;;  %1189 = vmatmul.mubr.msk.bf16.gmra.mxu1 %vm438_vm0, %v1243_v31 }
  0x4d   : > { %1160 = vmatprep.mubr.msk.bf16.mxu0 %vm438_vm0, %v1244_v32  ;;  %1192 = vmatprep.mubr.msk.bf16.mxu1 %vm438_vm0, %v1245_v33 }
  0x54   : > { %1161 = vmatmul.mubr.msk.bf16.gmra.mxu0 %vm438_vm0, %v1246_v34  ;;  %1193 = vmatmul.mubr.msk.bf16.gmra.mxu1 %vm438_vm0, %v1247_v35 }
  0xdc   : > { %v1134_v37 = vpop.f32.mrf.mxu0  ;;  %v1166_v38 = vpop.f32.mrf.mxu1 }
  0xdd   : > { %v578_v39 = vadd.f32 %v1134_v37, %v1371_v36  ;;  %v706_v40 = vadd.f32 %v1166_v38, %v1371_v36 }
  0xde   : > { %v569_v41 = vpop.f32.mrf.mxu0  ;;  %v697_v42 = vpop.f32.mrf.mxu1 }
  0xdf   : > { %v826_v43 = vmax.f32 %v578_v39, 0.0  ;;  %v858_v44 = vmax.f32 %v706_v40, 0.0  ;;  %v570_v45 = vadd.f32 %v1371_v36, %v569_v41  ;;  %v698_v46 = vadd.f32 %v1371_v36, %v697_v42 }
  0xe0   : > { %v1135_v47 = vpop.f32.mrf.mxu0  ;;  %v1167_v48 = vpop.f32.mrf.mxu1 }
  0xe1   : > { %890 = vst.msk [vmem:[%s1379_s5 + $0x10] sm:$0xff] %vm438_vm0, %v826_v43  ;;  %922 = vst.msk [vmem:[%s1379_s5 + $0x110] sm:$0xff] %vm438_vm0, %v858_v44  ;;  %v824_v49 = vmax.f32 %v570_v45, 0.0  ;;  %v856_v50 = vmax.f32 %v698_v46, 0.0  ;;  %v581_v51 = vadd.f32 %v1135_v47, %v1371_v36  ;;  %v709_v52 = vadd.f32 %v1167_v48, %v1371_v36 }
  0xe2   : > { %v572_v53 = vpop.f32.mrf.mxu0  ;;  %v700_v54 = vpop.f32.mrf.mxu1 }
  0xe3   : > { %888 = vst.msk [vmem:[%s1379_s5] sm:$0xff] %vm438_vm0, %v824_v49  ;;  %920 = vst.msk [vmem:[%s1379_s5 + $0x100] sm:$0xff] %vm438_vm0, %v856_v50  ;;  %v827_v55 = vmax.f32 %v581_v51, 0.0  ;;  %v859_v56 = vmax.f32 %v709_v52, 0.0  ;;  %v573_v57 = vadd.f32 %v1371_v36, %v572_v53  ;;  %v701_v58 = vadd.f32 %v1371_v36, %v700_v54 }
  0xe4   : > { %v1138_v59 = vpop.f32.mrf.mxu0  ;;  %v1170_v60 = vpop.f32.mrf.mxu1 }
  0xe5   : > { %891 = vst.msk [vmem:[%s1379_s5 + $0x18] sm:$0xff] %vm438_vm0, %v827_v55  ;;  %923 = vst.msk [vmem:[%s1379_s5 + $0x118] sm:$0xff] %vm438_vm0, %v859_v56  ;;  %v825_v61 = vmax.f32 %v573_v57, 0.0  ;;  %v857_v62 = vmax.f32 %v701_v58, 0.0  ;;  %v594_v63 = vadd.f32 %v1138_v59, %v1371_v36  ;;  %v722_v0 = vadd.f32 %v1170_v60, %v1371_v36 }
  0xe6   : > { %v585_v1 = vpop.f32.mrf.mxu0  ;;  %v713_v2 = vpop.f32.mrf.mxu1 }
  0xe7   : > { %889 = vst.msk [vmem:[%s1379_s5 + $0x8] sm:$0xff] %vm438_vm0, %v825_v61  ;;  %921 = vst.msk [vmem:[%s1379_s5 + $0x108] sm:$0xff] %vm438_vm0, %v857_v62  ;;  %v830_v3 = vmax.f32 %v594_v63, 0.0  ;;  %v862_v4 = vmax.f32 %v722_v0, 0.0  ;;  %v586_v5 = vadd.f32 %v1371_v36, %v585_v1  ;;  %v714_v6 = vadd.f32 %v1371_v36, %v713_v2 }
  0xe8   : > { %v1139_v7 = vpop.f32.mrf.mxu0  ;;  %v1171_v8 = vpop.f32.mrf.mxu1 }
  0xe9   : > { %894 = vst.msk [vmem:[%s1379_s5 + $0x30] sm:$0xff] %vm438_vm0, %v830_v3  ;;  %926 = vst.msk [vmem:[%s1379_s5 + $0x130] sm:$0xff] %vm438_vm0, %v862_v4  ;;  %v828_v9 = vmax.f32 %v586_v5, 0.0  ;;  %v860_v10 = vmax.f32 %v714_v6, 0.0  ;;  %v597_v11 = vadd.f32 %v1139_v7, %v1371_v36  ;;  %v725_v12 = vadd.f32 %v1171_v8, %v1371_v36 }
  0xea   : > { %v588_v13 = vpop.f32.mrf.mxu0  ;;  %v716_v14 = vpop.f32.mrf.mxu1 }
  0xeb   : > { %892 = vst.msk [vmem:[%s1379_s5 + $0x20] sm:$0xff] %vm438_vm0, %v828_v9  ;;  %924 = vst.msk [vmem:[%s1379_s5 + $0x120] sm:$0xff] %vm438_vm0, %v860_v10  ;;  %v831_v15 = vmax.f32 %v597_v11, 0.0  ;;  %v863_v16 = vmax.f32 %v725_v12, 0.0  ;;  %v589_v17 = vadd.f32 %v1371_v36, %v588_v13  ;;  %v717_v18 = vadd.f32 %v1371_v36, %v716_v14 }
  0xec   : > { %v1142_v19 = vpop.f32.mrf.mxu0  ;;  %v1174_v20 = vpop.f32.mrf.mxu1 }
  0xed   : > { %895 = vst.msk [vmem:[%s1379_s5 + $0x38] sm:$0xff] %vm438_vm0, %v831_v15  ;;  %927 = vst.msk [vmem:[%s1379_s5 + $0x138] sm:$0xff] %vm438_vm0, %v863_v16  ;;  %v829_v21 = vmax.f32 %v589_v17, 0.0  ;;  %v861_v22 = vmax.f32 %v717_v18, 0.0  ;;  %v610_v23 = vadd.f32 %v1142_v19, %v1371_v36  ;;  %v738_v24 = vadd.f32 %v1174_v20, %v1371_v36 }
  0xee   : > { %v601_v25 = vpop.f32.mrf.mxu0  ;;  %v729_v26 = vpop.f32.mrf.mxu1 }
  0xef   : > { %893 = vst.msk [vmem:[%s1379_s5 + $0x28] sm:$0xff] %vm438_vm0, %v829_v21  ;;  %925 = vst.msk [vmem:[%s1379_s5 + $0x128] sm:$0xff] %vm438_vm0, %v861_v22  ;;  %v834_v27 = vmax.f32 %v610_v23, 0.0  ;;  %v866_v28 = vmax.f32 %v738_v24, 0.0  ;;  %v602_v29 = vadd.f32 %v1371_v36, %v601_v25  ;;  %v730_v30 = vadd.f32 %v1371_v36, %v729_v26 }
  0xf0   : > { %v1143_v31 = vpop.f32.mrf.mxu0  ;;  %v1175_v32 = vpop.f32.mrf.mxu1 }
  0xf1   : > { %898 = vst.msk [vmem:[%s1379_s5 + $0x50] sm:$0xff] %vm438_vm0, %v834_v27  ;;  %930 = vst.msk [vmem:[%s1379_s5 + $0x150] sm:$0xff] %vm438_vm0, %v866_v28  ;;  %v832_v33 = vmax.f32 %v602_v29, 0.0  ;;  %v864_v34 = vmax.f32 %v730_v30, 0.0  ;;  %v613_v35 = vadd.f32 %v1143_v31, %v1371_v36  ;;  %v741_v37 = vadd.f32 %v1175_v32, %v1371_v36 }
  0xf2   : > { %v604_v38 = vpop.f32.mrf.mxu0  ;;  %v732_v39 = vpop.f32.mrf.mxu1 }
  0xf3   : > { %896 = vst.msk [vmem:[%s1379_s5 + $0x40] sm:$0xff] %vm438_vm0, %v832_v33  ;;  %928 = vst.msk [vmem:[%s1379_s5 + $0x140] sm:$0xff] %vm438_vm0, %v864_v34  ;;  %v835_v40 = vmax.f32 %v613_v35, 0.0  ;;  %v867_v41 = vmax.f32 %v741_v37, 0.0  ;;  %v605_v42 = vadd.f32 %v1371_v36, %v604_v38  ;;  %v733_v43 = vadd.f32 %v1371_v36, %v732_v39 }
  0xf4   : > { %v1146_v44 = vpop.f32.mrf.mxu0  ;;  %v1178_v45 = vpop.f32.mrf.mxu1 }
  0xf5   : > { %899 = vst.msk [vmem:[%s1379_s5 + $0x58] sm:$0xff] %vm438_vm0, %v835_v40  ;;  %931 = vst.msk [vmem:[%s1379_s5 + $0x158] sm:$0xff] %vm438_vm0, %v867_v41  ;;  %v833_v46 = vmax.f32 %v605_v42, 0.0  ;;  %v865_v47 = vmax.f32 %v733_v43, 0.0  ;;  %v626_v48 = vadd.f32 %v1146_v44, %v1371_v36  ;;  %v754_v49 = vadd.f32 %v1178_v45, %v1371_v36 }
  0xf6   : > { %v617_v50 = vpop.f32.mrf.mxu0  ;;  %v745_v51 = vpop.f32.mrf.mxu1 }
  0xf7   : > { %897 = vst.msk [vmem:[%s1379_s5 + $0x48] sm:$0xff] %vm438_vm0, %v833_v46  ;;  %929 = vst.msk [vmem:[%s1379_s5 + $0x148] sm:$0xff] %vm438_vm0, %v865_v47  ;;  %v838_v52 = vmax.f32 %v626_v48, 0.0  ;;  %v870_v53 = vmax.f32 %v754_v49, 0.0  ;;  %v618_v54 = vadd.f32 %v1371_v36, %v617_v50  ;;  %v746_v55 = vadd.f32 %v1371_v36, %v745_v51 }
  0xf8   : > { %v1147_v56 = vpop.f32.mrf.mxu0  ;;  %v1179_v57 = vpop.f32.mrf.mxu1 }
  0xf9   : > { %902 = vst.msk [vmem:[%s1379_s5 + $0x70] sm:$0xff] %vm438_vm0, %v838_v52  ;;  %934 = vst.msk [vmem:[%s1379_s5 + $0x170] sm:$0xff] %vm438_vm0, %v870_v53  ;;  %v836_v58 = vmax.f32 %v618_v54, 0.0  ;;  %v868_v59 = vmax.f32 %v746_v55, 0.0  ;;  %v629_v60 = vadd.f32 %v1147_v56, %v1371_v36  ;;  %v757_v61 = vadd.f32 %v1179_v57, %v1371_v36 }
  0xfa   : > { %v620_v62 = vpop.f32.mrf.mxu0  ;;  %v748_v63 = vpop.f32.mrf.mxu1 }
  0xfb   : > { %900 = vst.msk [vmem:[%s1379_s5 + $0x60] sm:$0xff] %vm438_vm0, %v836_v58  ;;  %932 = vst.msk [vmem:[%s1379_s5 + $0x160] sm:$0xff] %vm438_vm0, %v868_v59  ;;  %v839_v0 = vmax.f32 %v629_v60, 0.0  ;;  %v871_v1 = vmax.f32 %v757_v61, 0.0  ;;  %v621_v2 = vadd.f32 %v1371_v36, %v620_v62  ;;  %v749_v3 = vadd.f32 %v1371_v36, %v748_v63 }
  0xfc   : > { %v1150_v4 = vpop.f32.mrf.mxu0  ;;  %v1182_v5 = vpop.f32.mrf.mxu1 }
  0xfd   : > { %903 = vst.msk [vmem:[%s1379_s5 + $0x78] sm:$0xff] %vm438_vm0, %v839_v0  ;;  %935 = vst.msk [vmem:[%s1379_s5 + $0x178] sm:$0xff] %vm438_vm0, %v871_v1  ;;  %v837_v6 = vmax.f32 %v621_v2, 0.0  ;;  %v869_v7 = vmax.f32 %v749_v3, 0.0  ;;  %v642_v8 = vadd.f32 %v1150_v4, %v1371_v36  ;;  %v770_v9 = vadd.f32 %v1182_v5, %v1371_v36 }
  0xfe   : > { %v633_v10 = vpop.f32.mrf.mxu0  ;;  %v761_v11 = vpop.f32.mrf.mxu1 }
  0xff   : > { %901 = vst.msk [vmem:[%s1379_s5 + $0x68] sm:$0xff] %vm438_vm0, %v837_v6  ;;  %933 = vst.msk [vmem:[%s1379_s5 + $0x168] sm:$0xff] %vm438_vm0, %v869_v7  ;;  %v842_v12 = vmax.f32 %v642_v8, 0.0  ;;  %v874_v13 = vmax.f32 %v770_v9, 0.0  ;;  %v634_v14 = vadd.f32 %v1371_v36, %v633_v10  ;;  %v762_v15 = vadd.f32 %v1371_v36, %v761_v11 }
 0x100   : > { %v1151_v16 = vpop.f32.mrf.mxu0  ;;  %v1183_v17 = vpop.f32.mrf.mxu1 }
 0x101   : > { %906 = vst.msk [vmem:[%s1379_s5 + $0x90] sm:$0xff] %vm438_vm0, %v842_v12  ;;  %938 = vst.msk [vmem:[%s1379_s5 + $0x190] sm:$0xff] %vm438_vm0, %v874_v13  ;;  %v840_v18 = vmax.f32 %v634_v14, 0.0  ;;  %v872_v19 = vmax.f32 %v762_v15, 0.0  ;;  %v645_v20 = vadd.f32 %v1151_v16, %v1371_v36  ;;  %v773_v21 = vadd.f32 %v1183_v17, %v1371_v36 }
 0x102   : > { %v636_v22 = vpop.f32.mrf.mxu0  ;;  %v764_v23 = vpop.f32.mrf.mxu1 }
 0x103   : > { %904 = vst.msk [vmem:[%s1379_s5 + $0x80] sm:$0xff] %vm438_vm0, %v840_v18  ;;  %936 = vst.msk [vmem:[%s1379_s5 + $0x180] sm:$0xff] %vm438_vm0, %v872_v19  ;;  %v843_v24 = vmax.f32 %v645_v20, 0.0  ;;  %v875_v25 = vmax.f32 %v773_v21, 0.0  ;;  %v637_v26 = vadd.f32 %v1371_v36, %v636_v22  ;;  %v765_v27 = vadd.f32 %v1371_v36, %v764_v23 }
 0x104   : > { %v1154_v28 = vpop.f32.mrf.mxu0  ;;  %v1186_v29 = vpop.f32.mrf.mxu1 }
 0x105   : > { %907 = vst.msk [vmem:[%s1379_s5 + $0x98] sm:$0xff] %vm438_vm0, %v843_v24  ;;  %939 = vst.msk [vmem:[%s1379_s5 + $0x198] sm:$0xff] %vm438_vm0, %v875_v25  ;;  %v841_v30 = vmax.f32 %v637_v26, 0.0  ;;  %v873_v31 = vmax.f32 %v765_v27, 0.0  ;;  %v658_v32 = vadd.f32 %v1154_v28, %v1371_v36  ;;  %v786_v33 = vadd.f32 %v1186_v29, %v1371_v36 }
 0x106   : > { %v649_v34 = vpop.f32.mrf.mxu0  ;;  %v777_v35 = vpop.f32.mrf.mxu1 }
 0x107   : > { %905 = vst.msk [vmem:[%s1379_s5 + $0x88] sm:$0xff] %vm438_vm0, %v841_v30  ;;  %937 = vst.msk [vmem:[%s1379_s5 + $0x188] sm:$0xff] %vm438_vm0, %v873_v31  ;;  %v846_v37 = vmax.f32 %v658_v32, 0.0  ;;  %v878_v38 = vmax.f32 %v786_v33, 0.0  ;;  %v650_v39 = vadd.f32 %v1371_v36, %v649_v34  ;;  %v778_v40 = vadd.f32 %v1371_v36, %v777_v35 }
 0x108   : > { %v1155_v41 = vpop.f32.mrf.mxu0  ;;  %v1187_v42 = vpop.f32.mrf.mxu1 }
 0x109   : > { %910 = vst.msk [vmem:[%s1379_s5 + $0xb0] sm:$0xff] %vm438_vm0, %v846_v37  ;;  %942 = vst.msk [vmem:[%s1379_s5 + $0x1b0] sm:$0xff] %vm438_vm0, %v878_v38  ;;  %v844_v43 = vmax.f32 %v650_v39, 0.0  ;;  %v876_v44 = vmax.f32 %v778_v40, 0.0  ;;  %v661_v45 = vadd.f32 %v1155_v41, %v1371_v36  ;;  %v789_v46 = vadd.f32 %v1187_v42, %v1371_v36 }
 0x10a   : > { %v652_v47 = vpop.f32.mrf.mxu0  ;;  %v780_v48 = vpop.f32.mrf.mxu1 }
 0x10b   : > { %908 = vst.msk [vmem:[%s1379_s5 + $0xa0] sm:$0xff] %vm438_vm0, %v844_v43  ;;  %940 = vst.msk [vmem:[%s1379_s5 + $0x1a0] sm:$0xff] %vm438_vm0, %v876_v44  ;;  %v847_v49 = vmax.f32 %v661_v45, 0.0  ;;  %v879_v50 = vmax.f32 %v789_v46, 0.0  ;;  %v653_v51 = vadd.f32 %v1371_v36, %v652_v47  ;;  %v781_v52 = vadd.f32 %v1371_v36, %v780_v48 }
 0x10c   : > { %v1158_v53 = vpop.f32.mrf.mxu0  ;;  %v1190_v54 = vpop.f32.mrf.mxu1 }
 0x10d   : > { %911 = vst.msk [vmem:[%s1379_s5 + $0xb8] sm:$0xff] %vm438_vm0, %v847_v49  ;;  %943 = vst.msk [vmem:[%s1379_s5 + $0x1b8] sm:$0xff] %vm438_vm0, %v879_v50  ;;  %v845_v55 = vmax.f32 %v653_v51, 0.0  ;;  %v877_v56 = vmax.f32 %v781_v52, 0.0  ;;  %v674_v57 = vadd.f32 %v1158_v53, %v1371_v36  ;;  %v802_v58 = vadd.f32 %v1190_v54, %v1371_v36 }
 0x10e   : > { %v665_v59 = vpop.f32.mrf.mxu0  ;;  %v793_v60 = vpop.f32.mrf.mxu1 }
 0x10f   : > { %909 = vst.msk [vmem:[%s1379_s5 + $0xa8] sm:$0xff] %vm438_vm0, %v845_v55  ;;  %941 = vst.msk [vmem:[%s1379_s5 + $0x1a8] sm:$0xff] %vm438_vm0, %v877_v56  ;;  %v850_v61 = vmax.f32 %v674_v57, 0.0  ;;  %v882_v62 = vmax.f32 %v802_v58, 0.0  ;;  %v666_v63 = vadd.f32 %v1371_v36, %v665_v59  ;;  %v794_v0 = vadd.f32 %v1371_v36, %v793_v60 }
 0x110   : > { %v1159_v1 = vpop.f32.mrf.mxu0  ;;  %v1191_v2 = vpop.f32.mrf.mxu1 }
 0x111   : > { %914 = vst.msk [vmem:[%s1379_s5 + $0xd0] sm:$0xff] %vm438_vm0, %v850_v61  ;;  %946 = vst.msk [vmem:[%s1379_s5 + $0x1d0] sm:$0xff] %vm438_vm0, %v882_v62  ;;  %v848_v3 = vmax.f32 %v666_v63, 0.0  ;;  %v880_v4 = vmax.f32 %v794_v0, 0.0  ;;  %v677_v5 = vadd.f32 %v1159_v1, %v1371_v36  ;;  %v805_v6 = vadd.f32 %v1191_v2, %v1371_v36 }
 0x112   : > { %v668_v7 = vpop.f32.mrf.mxu0  ;;  %v796_v8 = vpop.f32.mrf.mxu1 }
 0x113   : > { %912 = vst.msk [vmem:[%s1379_s5 + $0xc0] sm:$0xff] %vm438_vm0, %v848_v3  ;;  %944 = vst.msk [vmem:[%s1379_s5 + $0x1c0] sm:$0xff] %vm438_vm0, %v880_v4  ;;  %v851_v9 = vmax.f32 %v677_v5, 0.0  ;;  %v883_v10 = vmax.f32 %v805_v6, 0.0  ;;  %v669_v11 = vadd.f32 %v1371_v36, %v668_v7  ;;  %v797_v12 = vadd.f32 %v1371_v36, %v796_v8 }
 0x114   : > { %v1162_v13 = vpop.f32.mrf.mxu0  ;;  %v1194_v14 = vpop.f32.mrf.mxu1 }
 0x115   : > { %915 = vst.msk [vmem:[%s1379_s5 + $0xd8] sm:$0xff] %vm438_vm0, %v851_v9  ;;  %947 = vst.msk [vmem:[%s1379_s5 + $0x1d8] sm:$0xff] %vm438_vm0, %v883_v10  ;;  %v849_v15 = vmax.f32 %v669_v11, 0.0  ;;  %v881_v16 = vmax.f32 %v797_v12, 0.0  ;;  %v690_v17 = vadd.f32 %v1162_v13, %v1371_v36  ;;  %v818_v18 = vadd.f32 %v1194_v14, %v1371_v36 }
 0x116   : > { %v681_v19 = vpop.f32.mrf.mxu0  ;;  %v809_v20 = vpop.f32.mrf.mxu1 }
 0x117   : > { %913 = vst.msk [vmem:[%s1379_s5 + $0xc8] sm:$0xff] %vm438_vm0, %v849_v15  ;;  %945 = vst.msk [vmem:[%s1379_s5 + $0x1c8] sm:$0xff] %vm438_vm0, %v881_v16  ;;  %v854_v21 = vmax.f32 %v690_v17, 0.0  ;;  %v886_v22 = vmax.f32 %v818_v18, 0.0  ;;  %v682_v23 = vadd.f32 %v1371_v36, %v681_v19  ;;  %v810_v24 = vadd.f32 %v1371_v36, %v809_v20 }
 0x118   : > { %v1163_v25 = vpop.f32.mrf.mxu0  ;;  %v1195_v26 = vpop.f32.mrf.mxu1 }
 0x119   : > { %918 = vst.msk [vmem:[%s1379_s5 + $0xf0] sm:$0xff] %vm438_vm0, %v854_v21  ;;  %950 = vst.msk [vmem:[%s1379_s5 + $0x1f0] sm:$0xff] %vm438_vm0, %v886_v22  ;;  %v852_v27 = vmax.f32 %v682_v23, 0.0  ;;  %v884_v28 = vmax.f32 %v810_v24, 0.0  ;;  %v693_v29 = vadd.f32 %v1163_v25, %v1371_v36  ;;  %v821_v30 = vadd.f32 %v1195_v26, %v1371_v36 }
 0x11a   : > { %v684_v31 = vpop.f32.mrf.mxu0  ;;  %v812_v32 = vpop.f32.mrf.mxu1 }
 0x11b   : > { %916 = vst.msk [vmem:[%s1379_s5 + $0xe0] sm:$0xff] %vm438_vm0, %v852_v27  ;;  %948 = vst.msk [vmem:[%s1379_s5 + $0x1e0] sm:$0xff] %vm438_vm0, %v884_v28  ;;  %v855_v33 = vmax.f32 %v693_v29, 0.0  ;;  %v887_v34 = vmax.f32 %v821_v30, 0.0  ;;  %v685_v35 = vadd.f32 %v1371_v36, %v684_v31  ;;  %v813_v37 = vadd.f32 %v1371_v36, %v812_v32 }
 0x11d   : > { %919 = vst.msk [vmem:[%s1379_s5 + $0xf8] sm:$0xff] %vm438_vm0, %v855_v33  ;;  %951 = vst.msk [vmem:[%s1379_s5 + $0x1f8] sm:$0xff] %vm438_vm0, %v887_v34  ;;  %v853_v38 = vmax.f32 %v685_v35, 0.0  ;;  %v885_v39 = vmax.f32 %v813_v37, 0.0 }
 0x11f   : > { %917 = vst.msk [vmem:[%s1379_s5 + $0xe8] sm:$0xff] %vm438_vm0, %v853_v38  ;;  %949 = vst.msk [vmem:[%s1379_s5 + $0x1e8] sm:$0xff] %vm438_vm0, %v885_v39 }
 0x120 PF: > { %s13_s12 = sadd.s32 1, %s1254_s12  }
 0x121   : > { %p10_p4 = scmp.ge.s32.totalorder %s13_s12, 6  }
 0x123   :  { %12 = sbr.rel (!%p10_p4) target bundleno = 1 (0x1), region = 62 }

// kernel: _lambda_.22
= control target key start
LH: loop header
LB: loop body
LE: loop exit
PB: predicated region body
PF: predicated region fallthrough
CT: control target
= control target key end

     0   :  { %s1495_s12 = smov 0   ;;  %s1876_s0 = inlined_call_operand.vmem [shape: bf16[2048,192], index: 0, kind: input, shape index: {}]   ;;  %s1877_s1 = inlined_call_operand.vmem [shape: bf16[192,64], index: 1, kind: input, shape index: {}]   ;;  %s1878_s2 = inlined_call_operand.vmem [shape: f32[1,64], index: 2, kind: input, shape index: {}]   ;;  %s1879_s3 = inlined_call_operand.vmem [shape: f32[2048,64], index: 3, kind: output, shape index: {}]  }
   0x1 LB: > { %s1203_s13 = sadd.s32 4294967295, %s1472_s12   ;;  %p1207_p0 = scmp.ge.s32.totalorder %s1472_s12, 1  ;;  %s1472_s12 = sphi %s1495_s12, %s13_s12  }
   0x2   : > { %p139_p1 = scmp.lt.s32.totalorder %s1472_s12, 5 }
   0x4   : > { %p140_p2 = pnand %p1207_p0, %p139_p1 }
   0x5   : > { %s1208_s16 = sshll.u32 (!%p140_p2), %s1203_s13, 6 }
   0x6   : > { %143 = sbr.rel (%p140_p2) target bundleno = 382 (0x17e), region = 32  ;;  %p165_p3 = scmp.lt.s32.totalorder (!%p140_p2), %s1208_s16, 255 }
   0xb   : > { %v1358_v0 = vld [vmem:[%s1877_s1 + $0x38] sm:$0xff]   ;;  %v1474_v1 = vmov 0   ;;  %v1359_v2 = vld [vmem:[%s1877_s1 + $0x30] sm:$0xff]   ;;  %s1881_s16 = smov (!%p165_p3, %s1208_s16), 255  ;;  %v1360_v3 = vld [vmem:[%s1877_s1 + $0x28] sm:$0xff]   ;;  %vm633_vm0 = vcmask 523264  }
   0xc   : > { %730 = vmatprep.subr.bf16.mxu0 %v1474_v1  ;;  %1325 = vmatprep.subr.bf16.mxu1 %v1474_v1  ;;  %s1324_s21 = sshll.u32 %s1881_s16, 3  ;;  %v1361_v4 = vld [vmem:[%s1877_s1 + $0x20] sm:$0xff]   ;;  %v1362_v6 = vld [vmem:[%s1877_s1 + $0x18] sm:$0xff]   ;;  %v1363_v8 = vld [vmem:[%s1877_s1 + $0x10] sm:$0xff]  }
   0xd   : > { %731 = vmatpush1.bf16.msra.mxu0 %v1358_v0  ;;  %1337 = vmatpush1.bf16.msra.mxu1 %v1358_v0  ;;  %s1529_s26 = scalar_lea.vmem %s1876_s0, %s1324_s21  ;;  %v1364_v9 = vld [vmem:[%s1877_s1 + $0x8] sm:$0xff]   ;;  %v1365_v10 = vld [vmem:[%s1877_s1] sm:$0xff]   ;;  %v1366_v11 = vld [vmem:[%s1877_s1 + $0x58] sm:$0xff]   ;;  %s1681_s23 = scalar_lea.vmem %s1879_s3, %s1324_s21 }
   0xe   : > { %732 = vmatprep.subr.bf16.mxu0 %v1474_v1  ;;  %1326 = vmatprep.subr.bf16.mxu1 %v1474_v1  ;;  %v1372_v5 = vld [vmem:[%s1529_s26 + $0x4] ss:$8 sps:$4 sm:$0xff]   ;;  %v1367_v12 = vld [vmem:[%s1877_s1 + $0x50] sm:$0xff]   ;;  %v1370_v15 = vld [vmem:[%s1529_s26] ss:$8 sps:$4 sm:$0xff]  }
   0xf   : > { %v1375_v7 = vld [vmem:[%s1529_s26 + $0x104] ss:$8 sps:$4 sm:$0xff]   ;;  %1290 = vmatprep.mubr.msk.bf16.mxu0 %vm633_vm0, %v1372_v5  ;;  %v1373_v16 = vld [vmem:[%s1529_s26 + $0x100] ss:$8 sps:$4 sm:$0xff]   ;;  %v1376_v17 = vld [vmem:[%s1529_s26 + $0x14] ss:$8 sps:$4 sm:$0xff]  }
  0x10   : > { %1306 = vmatprep.mubr.msk.bf16.mxu1 %vm633_vm0, %v1375_v7  ;;  %v1368_v13 = vld [vmem:[%s1877_s1 + $0x48] sm:$0xff]   ;;  %v1369_v14 = vld [vmem:[%s1877_s1 + $0x40] sm:$0xff]   ;;  %v1378_v18 = vld [vmem:[%s1529_s26 + $0x114] ss:$8 sps:$4 sm:$0xff]  }
  0x11   : > { %733 = vmatpush1.bf16.msra.mxu0 %v1359_v2  ;;  %1338 = vmatpush1.bf16.msra.mxu1 %v1359_v2  ;;  %v1380_v19 = vld [vmem:[%s1529_s26 + $0x10] ss:$8 sps:$4 sm:$0xff]   ;;  %v1382_v21 = vld [vmem:[%s1529_s26 + $0x24] ss:$8 sps:$4 sm:$0xff]   ;;  %v1386_v23 = vld [vmem:[%s1529_s26 + $0x20] ss:$8 sps:$4 sm:$0xff]  }
  0x12   : > { %734 = vmatprep.subr.bf16.mxu0 %v1474_v1  ;;  %1327 = vmatprep.subr.bf16.mxu1 %v1474_v1  ;;  %v1381_v20 = vld [vmem:[%s1529_s26 + $0x110] ss:$8 sps:$4 sm:$0xff]   ;;  %v1384_v22 = vld [vmem:[%s1529_s26 + $0x124] ss:$8 sps:$4 sm:$0xff]   ;;  %v1387_v24 = vld [vmem:[%s1529_s26 + $0x120] ss:$8 sps:$4 sm:$0xff]  }
  0x13   : > { %v1388_v25 = vld [vmem:[%s1529_s26 + $0x34] ss:$8 sps:$4 sm:$0xff]   ;;  %v1392_v27 = vld [vmem:[%s1529_s26 + $0x30] ss:$8 sps:$4 sm:$0xff]   ;;  %v1394_v29 = vld [vmem:[%s1529_s26 + $0x44] ss:$8 sps:$4 sm:$0xff]  }
  0x14   : > { %v1390_v26 = vld [vmem:[%s1529_s26 + $0x134] ss:$8 sps:$4 sm:$0xff]   ;;  %v1393_v28 = vld [vmem:[%s1529_s26 + $0x130] ss:$8 sps:$4 sm:$0xff]   ;;  %v1396_v30 = vld [vmem:[%s1529_s26 + $0x144] ss:$8 sps:$4 sm:$0xff]  }
  0x15   : > { %735 = vmatpush1.bf16.msra.mxu0 %v1360_v3  ;;  %1339 = vmatpush1.bf16.msra.mxu1 %v1360_v3  ;;  %v1398_v31 = vld [vmem:[%s1529_s26 + $0x40] ss:$8 sps:$4 sm:$0xff]   ;;  %v1400_v33 = vld [vmem:[%s1529_s26 + $0x54] ss:$8 sps:$4 sm:$0xff]   ;;  %v1404_v35 = vld [vmem:[%s1529_s26 + $0x50] ss:$8 sps:$4 sm:$0xff]  }
  0x16   : > { %736 = vmatprep.subr.bf16.mxu0 %v1474_v1  ;;  %1328 = vmatprep.subr.bf16.mxu1 %v1474_v1  ;;  %v1399_v32 = vld [vmem:[%s1529_s26 + $0x140] ss:$8 sps:$4 sm:$0xff]   ;;  %v1402_v34 = vld [vmem:[%s1529_s26 + $0x154] ss:$8 sps:$4 sm:$0xff]   ;;  %v1405_v36 = vld [vmem:[%s1529_s26 + $0x150] ss:$8 sps:$4 sm:$0xff]  }
  0x17   : > { %v1406_v37 = vld [vmem:[%s1529_s26 + $0x64] ss:$8 sps:$4 sm:$0xff]   ;;  %v1410_v39 = vld [vmem:[%s1529_s26 + $0x60] ss:$8 sps:$4 sm:$0xff]   ;;  %v1412_v41 = vld [vmem:[%s1529_s26 + $0x74] ss:$8 sps:$4 sm:$0xff]  }
  0x18   : > { %v1408_v38 = vld [vmem:[%s1529_s26 + $0x164] ss:$8 sps:$4 sm:$0xff]   ;;  %v1411_v40 = vld [vmem:[%s1529_s26 + $0x160] ss:$8 sps:$4 sm:$0xff]   ;;  %v1414_v42 = vld [vmem:[%s1529_s26 + $0x174] ss:$8 sps:$4 sm:$0xff]  }
  0x19   : > { %737 = vmatpush1.bf16.msra.mxu0 %v1361_v4  ;;  %1340 = vmatpush1.bf16.msra.mxu1 %v1361_v4  ;;  %v1416_v43 = vld [vmem:[%s1529_s26 + $0x70] ss:$8 sps:$4 sm:$0xff]   ;;  %v1418_v45 = vld [vmem:[%s1529_s26 + $0x84] ss:$8 sps:$4 sm:$0xff]   ;;  %v1422_v47 = vld [vmem:[%s1529_s26 + $0x80] ss:$8 sps:$4 sm:$0xff]  }
  0x1a   : > { %738 = vmatprep.subr.bf16.mxu0 %v1474_v1  ;;  %1329 = vmatprep.subr.bf16.mxu1 %v1474_v1  ;;  %v1417_v44 = vld [vmem:[%s1529_s26 + $0x170] ss:$8 sps:$4 sm:$0xff]   ;;  %v1420_v46 = vld [vmem:[%s1529_s26 + $0x184] ss:$8 sps:$4 sm:$0xff]   ;;  %v1423_v48 = vld [vmem:[%s1529_s26 + $0x180] ss:$8 sps:$4 sm:$0xff]  }
  0x1b   : > { %v1424_v49 = vld [vmem:[%s1529_s26 + $0x94] ss:$8 sps:$4 sm:$0xff]   ;;  %v1428_v51 = vld [vmem:[%s1529_s26 + $0x90] ss:$8 sps:$4 sm:$0xff]   ;;  %v1430_v53 = vld [vmem:[%s1529_s26 + $0xa4] ss:$8 sps:$4 sm:$0xff]  }
  0x1c   : > { %v1426_v50 = vld [vmem:[%s1529_s26 + $0x194] ss:$8 sps:$4 sm:$0xff]   ;;  %v1429_v52 = vld [vmem:[%s1529_s26 + $0x190] ss:$8 sps:$4 sm:$0xff]   ;;  %v1432_v54 = vld [vmem:[%s1529_s26 + $0x1a4] ss:$8 sps:$4 sm:$0xff]  }
  0x1d   : > { %739 = vmatpush1.bf16.msra.mxu0 %v1362_v6  ;;  %1341 = vmatpush1.bf16.msra.mxu1 %v1362_v6  ;;  %v1434_v55 = vld [vmem:[%s1529_s26 + $0xa0] ss:$8 sps:$4 sm:$0xff]   ;;  %v1436_v57 = vld [vmem:[%s1529_s26 + $0xb4] ss:$8 sps:$4 sm:$0xff]   ;;  %v1440_v59 = vld [vmem:[%s1529_s26 + $0xb0] ss:$8 sps:$4 sm:$0xff]  }
  0x1e   : > { %740 = vmatprep.subr.bf16.mxu0 %v1474_v1  ;;  %1330 = vmatprep.subr.bf16.mxu1 %v1474_v1  ;;  %v1435_v56 = vld [vmem:[%s1529_s26 + $0x1a0] ss:$8 sps:$4 sm:$0xff]   ;;  %v1438_v58 = vld [vmem:[%s1529_s26 + $0x1b4] ss:$8 sps:$4 sm:$0xff]   ;;  %v1441_v60 = vld [vmem:[%s1529_s26 + $0x1b0] ss:$8 sps:$4 sm:$0xff]  }
  0x1f   : > { %v1442_v61 = vld [vmem:[%s1529_s26 + $0xc4] ss:$8 sps:$4 sm:$0xff]   ;;  %v1446_v63 = vld [vmem:[%s1529_s26 + $0xc0] ss:$8 sps:$4 sm:$0xff]   ;;  %v1450_v2 = vld [vmem:[%s1529_s26 + $0x1d4] ss:$8 sps:$4 sm:$0xff]  }
  0x20   : > { %v1444_v62 = vld [vmem:[%s1529_s26 + $0x1c4] ss:$8 sps:$4 sm:$0xff]   ;;  %v1447_v0 = vld [vmem:[%s1529_s26 + $0x1c0] ss:$8 sps:$4 sm:$0xff]   ;;  %v1452_v3 = vld [vmem:[%s1529_s26 + $0xd0] ss:$8 sps:$4 sm:$0xff]  }
  0x21   : > { %741 = vmatpush1.bf16.msra.mxu0 %v1363_v8  ;;  %1342 = vmatpush1.bf16.msra.mxu1 %v1363_v8  ;;  %v1453_v4 = vld [vmem:[%s1529_s26 + $0x1d0] ss:$8 sps:$4 sm:$0xff]   ;;  %v1454_v5 = vld [vmem:[%s1529_s26 + $0xe4] ss:$8 sps:$4 sm:$0xff]   ;;  %v1458_v7 = vld [vmem:[%s1529_s26 + $0xe0] ss:$8 sps:$4 sm:$0xff]  }
  0x22   : > { %742 = vmatprep.subr.bf16.mxu0 %v1474_v1  ;;  %1331 = vmatprep.subr.bf16.mxu1 %v1474_v1  ;;  %v1456_v6 = vld [vmem:[%s1529_s26 + $0x1e4] ss:$8 sps:$4 sm:$0xff]   ;;  %v1459_v8 = vld [vmem:[%s1529_s26 + $0x1e0] ss:$8 sps:$4 sm:$0xff]  }
  0x25   : > { %743 = vmatpush1.bf16.msra.mxu0 %v1364_v9  ;;  %1343 = vmatpush1.bf16.msra.mxu1 %v1364_v9  ;;  %v1460_v9 = vld [vmem:[%s1529_s26 + $0xf4] ss:$8 sps:$4 sm:$0xff]  }
  0x26   : > { %744 = vmatprep.subr.bf16.mxu0 %v1474_v1  ;;  %1332 = vmatprep.subr.bf16.mxu1 %v1474_v1 }
  0x29   : > { %745 = vmatpush1.bf16.msra.mxu0 %v1365_v10  ;;  %1344 = vmatpush1.bf16.msra.mxu1 %v1365_v10  ;;  %v1462_v10 = vld [vmem:[%s1529_s26 + $0x1f4] ss:$8 sps:$4 sm:$0xff]  }
  0x2a   : > { %754 = vmatprep.subr.bf16.mxu0 %v1474_v1  ;;  %1333 = vmatprep.subr.bf16.mxu1 %v1474_v1 }
  0x2d   : > { %755 = vmatpush2.bf16.msra.mxu0 %v1366_v11  ;;  %1345 = vmatpush2.bf16.msra.mxu1 %v1366_v11  ;;  %v1464_v11 = vld [vmem:[%s1529_s26 + $0xf0] ss:$8 sps:$4 sm:$0xff]  }
  0x2e   : > { %756 = vmatprep.subr.bf16.mxu0 %v1474_v1  ;;  %1334 = vmatprep.subr.bf16.mxu1 %v1474_v1 }
  0x31   : > { %757 = vmatpush2.bf16.msra.mxu0 %v1367_v12  ;;  %1346 = vmatpush2.bf16.msra.mxu1 %v1367_v12  ;;  %v1465_v12 = vld [vmem:[%s1529_s26 + $0x1f0] ss:$8 sps:$4 sm:$0xff]  }
  0x32   : > { %758 = vmatprep.subr.bf16.mxu0 %v1474_v1  ;;  %1335 = vmatprep.subr.bf16.mxu1 %v1474_v1 }
  0x35   : > { %759 = vmatpush2.bf16.msra.mxu0 %v1368_v13  ;;  %1347 = vmatpush2.bf16.msra.mxu1 %v1368_v13  ;;  %v1672_v13 = vld [vmem:[%s1878_s2] ss:$0 sm:$0xff] }
  0x36   : > { %760 = vmatprep.subr.bf16.mxu0 %v1474_v1  ;;  %1336 = vmatprep.subr.bf16.mxu1 %v1474_v1  ;;  %v1448_v1 = vld [vmem:[%s1529_s26 + $0xd4] ss:$8 sps:$4 sm:$0xff]  }
  0x39   : > { %761 = vmatpush2.bf16.msra.mxu0 %v1369_v14  ;;  %1348 = vmatpush2.bf16.msra.mxu1 %v1369_v14 }
  0x3c   : > { %763 = vmatmul.mubr.bf16.vlgmr.msra.gmra.mxu0 %v1370_v15  ;;  %891 = vmatmul.mubr.bf16.vlgmr.msra.gmra.mxu1 %v1373_v16 }
  0x3d   : > { %1291 = vmatprep.mubr.msk.bf16.mxu0 %vm633_vm0, %v1376_v17  ;;  %1307 = vmatprep.mubr.msk.bf16.mxu1 %vm633_vm0, %v1378_v18 }
  0x44   : > { %771 = vmatmul.mubr.bf16.gmra.mxu0 %v1380_v19  ;;  %899 = vmatmul.mubr.bf16.gmra.mxu1 %v1381_v20 }
  0x45   : > { %1292 = vmatprep.mubr.msk.bf16.mxu0 %vm633_vm0, %v1382_v21  ;;  %1308 = vmatprep.mubr.msk.bf16.mxu1 %vm633_vm0, %v1384_v22 }
  0x4c   : > { %779 = vmatmul.mubr.bf16.gmra.mxu0 %v1386_v23  ;;  %907 = vmatmul.mubr.bf16.gmra.mxu1 %v1387_v24 }
  0x4d   : > { %1293 = vmatprep.mubr.msk.bf16.mxu0 %vm633_vm0, %v1388_v25  ;;  %1309 = vmatprep.mubr.msk.bf16.mxu1 %vm633_vm0, %v1390_v26 }
  0x54   : > { %787 = vmatmul.mubr.bf16.gmra.mxu0 %v1392_v27  ;;  %915 = vmatmul.mubr.bf16.gmra.mxu1 %v1393_v28 }
  0x55   : > { %1294 = vmatprep.mubr.msk.bf16.mxu0 %vm633_vm0, %v1394_v29  ;;  %1310 = vmatprep.mubr.msk.bf16.mxu1 %vm633_vm0, %v1396_v30 }
  0x5c   : > { %795 = vmatmul.mubr.bf16.gmra.mxu0 %v1398_v31  ;;  %923 = vmatmul.mubr.bf16.gmra.mxu1 %v1399_v32 }
  0x5d   : > { %1295 = vmatprep.mubr.msk.bf16.mxu0 %vm633_vm0, %v1400_v33  ;;  %1311 = vmatprep.mubr.msk.bf16.mxu1 %vm633_vm0, %v1402_v34 }
  0x64   : > { %803 = vmatmul.mubr.bf16.gmra.mxu0 %v1404_v35  ;;  %931 = vmatmul.mubr.bf16.gmra.mxu1 %v1405_v36 }
  0x65   : > { %1296 = vmatprep.mubr.msk.bf16.mxu0 %vm633_vm0, %v1406_v37  ;;  %1312 = vmatprep.mubr.msk.bf16.mxu1 %vm633_vm0, %v1408_v38 }
  0x6c   : > { %811 = vmatmul.mubr.bf16.gmra.mxu0 %v1410_v39  ;;  %939 = vmatmul.mubr.bf16.gmra.mxu1 %v1411_v40 }
  0x6d   : > { %1297 = vmatprep.mubr.msk.bf16.mxu0 %vm633_vm0, %v1412_v41  ;;  %1313 = vmatprep.mubr.msk.bf16.mxu1 %vm633_vm0, %v1414_v42 }
  0x74   : > { %819 = vmatmul.mubr.bf16.gmra.mxu0 %v1416_v43  ;;  %947 = vmatmul.mubr.bf16.gmra.mxu1 %v1417_v44 }
  0x75   : > { %1298 = vmatprep.mubr.msk.bf16.mxu0 %vm633_vm0, %v1418_v45  ;;  %1314 = vmatprep.mubr.msk.bf16.mxu1 %vm633_vm0, %v1420_v46 }
  0x7c   : > { %827 = vmatmul.mubr.bf16.gmra.mxu0 %v1422_v47  ;;  %955 = vmatmul.mubr.bf16.gmra.mxu1 %v1423_v48 }
  0x7d   : > { %1299 = vmatprep.mubr.msk.bf16.mxu0 %vm633_vm0, %v1424_v49  ;;  %1315 = vmatprep.mubr.msk.bf16.mxu1 %vm633_vm0, %v1426_v50 }
  0x84   : > { %835 = vmatmul.mubr.bf16.gmra.mxu0 %v1428_v51  ;;  %963 = vmatmul.mubr.bf16.gmra.mxu1 %v1429_v52 }
  0x85   : > { %1300 = vmatprep.mubr.msk.bf16.mxu0 %vm633_vm0, %v1430_v53  ;;  %1316 = vmatprep.mubr.msk.bf16.mxu1 %vm633_vm0, %v1432_v54 }
  0x8c   : > { %843 = vmatmul.mubr.bf16.gmra.mxu0 %v1434_v55  ;;  %971 = vmatmul.mubr.bf16.gmra.mxu1 %v1435_v56 }
  0x8d   : > { %1301 = vmatprep.mubr.msk.bf16.mxu0 %vm633_vm0, %v1436_v57  ;;  %1317 = vmatprep.mubr.msk.bf16.mxu1 %vm633_vm0, %v1438_v58 }
  0x94   : > { %851 = vmatmul.mubr.bf16.gmra.mxu0 %v1440_v59  ;;  %979 = vmatmul.mubr.bf16.gmra.mxu1 %v1441_v60 }
  0x95   : > { %1302 = vmatprep.mubr.msk.bf16.mxu0 %vm633_vm0, %v1442_v61  ;;  %1318 = vmatprep.mubr.msk.bf16.mxu1 %vm633_vm0, %v1444_v62 }
  0x9c   : > { %859 = vmatmul.mubr.bf16.gmra.mxu0 %v1446_v63  ;;  %987 = vmatmul.mubr.bf16.gmra.mxu1 %v1447_v0 }
  0x9d   : > { %1303 = vmatprep.mubr.msk.bf16.mxu0 %vm633_vm0, %v1448_v1  ;;  %1319 = vmatprep.mubr.msk.bf16.mxu1 %vm633_vm0, %v1450_v2 }
  0xa4   : > { %867 = vmatmul.mubr.bf16.gmra.mxu0 %v1452_v3  ;;  %995 = vmatmul.mubr.bf16.gmra.mxu1 %v1453_v4 }
  0xa5   : > { %1304 = vmatprep.mubr.msk.bf16.mxu0 %vm633_vm0, %v1454_v5  ;;  %1320 = vmatprep.mubr.msk.bf16.mxu1 %vm633_vm0, %v1456_v6 }
  0xac   : > { %875 = vmatmul.mubr.bf16.gmra.mxu0 %v1458_v7  ;;  %1003 = vmatmul.mubr.bf16.gmra.mxu1 %v1459_v8 }
  0xad   : > { %1305 = vmatprep.mubr.msk.bf16.mxu0 %vm633_vm0, %v1460_v9  ;;  %1321 = vmatprep.mubr.msk.bf16.mxu1 %vm633_vm0, %v1462_v10 }
  0xb4   : > { %883 = vmatmul.mubr.bf16.gmra.mxu0 %v1464_v11  ;;  %1011 = vmatmul.mubr.bf16.gmra.mxu1 %v1465_v12 }
  0xfc   : > { %v764_v14 = vpop.f32.mrf.mxu0  ;;  %v892_v15 = vpop.f32.mrf.mxu1 }
  0xfd   : > { %v765_v16 = vadd.f32 %v1672_v13, %v764_v14  ;;  %v893_v17 = vadd.f32 %v1672_v13, %v892_v15 }
  0xfe   : > { %v766_v18 = vpop.f32.mrf.mxu0  ;;  %v894_v19 = vpop.f32.mrf.mxu1 }
  0xff   : > { %v1019_v20 = vmax.f32 %v765_v16, 0.0  ;;  %v1051_v21 = vmax.f32 %v893_v17, 0.0 }
 0x100   : > { %v767_v22 = vpop.f32.mrf.mxu0  ;;  %v895_v23 = vpop.f32.mrf.mxu1 }
 0x101   : > { %1083 = vst.msk [vmem:[%s1681_s23] sm:$0xff] %vm633_vm0, %v1019_v20  ;;  %1115 = vst.msk [vmem:[%s1681_s23 + $0x100] sm:$0xff] %vm633_vm0, %v1051_v21  ;;  %v768_v24 = vadd.f32 %v1672_v13, %v767_v22  ;;  %v896_v25 = vadd.f32 %v1672_v13, %v895_v23 }
 0x102   : > { %v769_v26 = vpop.f32.mrf.mxu0  ;;  %v897_v27 = vpop.f32.mrf.mxu1 }
 0x103   : > { %v1020_v28 = vmax.f32 %v768_v24, 0.0  ;;  %v1052_v29 = vmax.f32 %v896_v25, 0.0 }
 0x104   : > { %v772_v30 = vpop.f32.mrf.mxu0  ;;  %v900_v31 = vpop.f32.mrf.mxu1 }
 0x105   : > { %1084 = vst.msk [vmem:[%s1681_s23 + $0x8] sm:$0xff] %vm633_vm0, %v1020_v28  ;;  %1116 = vst.msk [vmem:[%s1681_s23 + $0x108] sm:$0xff] %vm633_vm0, %v1052_v29  ;;  %v773_v32 = vadd.f32 %v1672_v13, %v772_v30  ;;  %v901_v33 = vadd.f32 %v1672_v13, %v900_v31 }
 0x106   : > { %v774_v34 = vpop.f32.mrf.mxu0  ;;  %v902_v35 = vpop.f32.mrf.mxu1 }
 0x107   : > { %v1021_v36 = vmax.f32 %v773_v32, 0.0  ;;  %v1053_v37 = vmax.f32 %v901_v33, 0.0 }
 0x108   : > { %v775_v38 = vpop.f32.mrf.mxu0  ;;  %v903_v39 = vpop.f32.mrf.mxu1 }
 0x109   : > { %1085 = vst.msk [vmem:[%s1681_s23 + $0x10] sm:$0xff] %vm633_vm0, %v1021_v36  ;;  %1117 = vst.msk [vmem:[%s1681_s23 + $0x110] sm:$0xff] %vm633_vm0, %v1053_v37  ;;  %v776_v40 = vadd.f32 %v1672_v13, %v775_v38  ;;  %v904_v41 = vadd.f32 %v1672_v13, %v903_v39 }
 0x10a   : > { %v777_v42 = vpop.f32.mrf.mxu0  ;;  %v905_v43 = vpop.f32.mrf.mxu1 }
 0x10b   : > { %v1022_v44 = vmax.f32 %v776_v40, 0.0  ;;  %v1054_v45 = vmax.f32 %v904_v41, 0.0 }
 0x10c   : > { %v780_v46 = vpop.f32.mrf.mxu0  ;;  %v908_v47 = vpop.f32.mrf.mxu1 }
 0x10d   : > { %1086 = vst.msk [vmem:[%s1681_s23 + $0x18] sm:$0xff] %vm633_vm0, %v1022_v44  ;;  %1118 = vst.msk [vmem:[%s1681_s23 + $0x118] sm:$0xff] %vm633_vm0, %v1054_v45  ;;  %v781_v48 = vadd.f32 %v1672_v13, %v780_v46  ;;  %v909_v49 = vadd.f32 %v1672_v13, %v908_v47 }
 0x10e   : > { %v782_v50 = vpop.f32.mrf.mxu0  ;;  %v910_v51 = vpop.f32.mrf.mxu1 }
 0x10f   : > { %v1023_v52 = vmax.f32 %v781_v48, 0.0  ;;  %v1055_v53 = vmax.f32 %v909_v49, 0.0 }
 0x110   : > { %v783_v54 = vpop.f32.mrf.mxu0  ;;  %v911_v55 = vpop.f32.mrf.mxu1 }
 0x111   : > { %1087 = vst.msk [vmem:[%s1681_s23 + $0x20] sm:$0xff] %vm633_vm0, %v1023_v52  ;;  %1119 = vst.msk [vmem:[%s1681_s23 + $0x120] sm:$0xff] %vm633_vm0, %v1055_v53  ;;  %v784_v56 = vadd.f32 %v1672_v13, %v783_v54  ;;  %v912_v57 = vadd.f32 %v1672_v13, %v911_v55 }
 0x112   : > { %v785_v58 = vpop.f32.mrf.mxu0  ;;  %v913_v59 = vpop.f32.mrf.mxu1 }
 0x113   : > { %v1024_v60 = vmax.f32 %v784_v56, 0.0  ;;  %v1056_v61 = vmax.f32 %v912_v57, 0.0 }
 0x114   : > { %v788_v62 = vpop.f32.mrf.mxu0  ;;  %v916_v63 = vpop.f32.mrf.mxu1 }
 0x115   : > { %1088 = vst.msk [vmem:[%s1681_s23 + $0x28] sm:$0xff] %vm633_vm0, %v1024_v60  ;;  %1120 = vst.msk [vmem:[%s1681_s23 + $0x128] sm:$0xff] %vm633_vm0, %v1056_v61  ;;  %v789_v0 = vadd.f32 %v1672_v13, %v788_v62  ;;  %v917_v1 = vadd.f32 %v1672_v13, %v916_v63 }
 0x116   : > { %v790_v2 = vpop.f32.mrf.mxu0  ;;  %v918_v3 = vpop.f32.mrf.mxu1 }
 0x117   : > { %v1025_v4 = vmax.f32 %v789_v0, 0.0  ;;  %v1057_v5 = vmax.f32 %v917_v1, 0.0 }
 0x118   : > { %v791_v6 = vpop.f32.mrf.mxu0  ;;  %v919_v7 = vpop.f32.mrf.mxu1 }
 0x119   : > { %1089 = vst.msk [vmem:[%s1681_s23 + $0x30] sm:$0xff] %vm633_vm0, %v1025_v4  ;;  %1121 = vst.msk [vmem:[%s1681_s23 + $0x130] sm:$0xff] %vm633_vm0, %v1057_v5  ;;  %v792_v8 = vadd.f32 %v1672_v13, %v791_v6  ;;  %v920_v9 = vadd.f32 %v1672_v13, %v919_v7 }
 0x11a   : > { %v793_v10 = vpop.f32.mrf.mxu0  ;;  %v921_v11 = vpop.f32.mrf.mxu1 }
 0x11b   : > { %v1026_v12 = vmax.f32 %v792_v8, 0.0  ;;  %v1058_v14 = vmax.f32 %v920_v9, 0.0 }
 0x11c   : > { %v796_v15 = vpop.f32.mrf.mxu0  ;;  %v924_v16 = vpop.f32.mrf.mxu1 }
 0x11d   : > { %1090 = vst.msk [vmem:[%s1681_s23 + $0x38] sm:$0xff] %vm633_vm0, %v1026_v12  ;;  %1122 = vst.msk [vmem:[%s1681_s23 + $0x138] sm:$0xff] %vm633_vm0, %v1058_v14  ;;  %v797_v17 = vadd.f32 %v1672_v13, %v796_v15  ;;  %v925_v18 = vadd.f32 %v1672_v13, %v924_v16 }
 0x11e   : > { %v798_v19 = vpop.f32.mrf.mxu0  ;;  %v926_v20 = vpop.f32.mrf.mxu1 }
 0x11f   : > { %v1027_v21 = vmax.f32 %v797_v17, 0.0  ;;  %v1059_v22 = vmax.f32 %v925_v18, 0.0 }
 0x120   : > { %v799_v23 = vpop.f32.mrf.mxu0  ;;  %v927_v24 = vpop.f32.mrf.mxu1 }
 0x121   : > { %1091 = vst.msk [vmem:[%s1681_s23 + $0x40] sm:$0xff] %vm633_vm0, %v1027_v21  ;;  %1123 = vst.msk [vmem:[%s1681_s23 + $0x140] sm:$0xff] %vm633_vm0, %v1059_v22  ;;  %v800_v25 = vadd.f32 %v1672_v13, %v799_v23  ;;  %v928_v26 = vadd.f32 %v1672_v13, %v927_v24 }
 0x122   : > { %v801_v27 = vpop.f32.mrf.mxu0  ;;  %v929_v28 = vpop.f32.mrf.mxu1 }
 0x123   : > { %v1028_v29 = vmax.f32 %v800_v25, 0.0  ;;  %v1060_v30 = vmax.f32 %v928_v26, 0.0 }
 0x124   : > { %v804_v31 = vpop.f32.mrf.mxu0  ;;  %v932_v32 = vpop.f32.mrf.mxu1 }
 0x125   : > { %1092 = vst.msk [vmem:[%s1681_s23 + $0x48] sm:$0xff] %vm633_vm0, %v1028_v29  ;;  %1124 = vst.msk [vmem:[%s1681_s23 + $0x148] sm:$0xff] %vm633_vm0, %v1060_v30  ;;  %v805_v33 = vadd.f32 %v1672_v13, %v804_v31  ;;  %v933_v34 = vadd.f32 %v1672_v13, %v932_v32 }
 0x126   : > { %v806_v35 = vpop.f32.mrf.mxu0  ;;  %v934_v36 = vpop.f32.mrf.mxu1 }
 0x127   : > { %v1029_v37 = vmax.f32 %v805_v33, 0.0  ;;  %v1061_v38 = vmax.f32 %v933_v34, 0.0 }
 0x128   : > { %v807_v39 = vpop.f32.mrf.mxu0  ;;  %v935_v40 = vpop.f32.mrf.mxu1 }
 0x129   : > { %1093 = vst.msk [vmem:[%s1681_s23 + $0x50] sm:$0xff] %vm633_vm0, %v1029_v37  ;;  %1125 = vst.msk [vmem:[%s1681_s23 + $0x150] sm:$0xff] %vm633_vm0, %v1061_v38  ;;  %v808_v41 = vadd.f32 %v1672_v13, %v807_v39  ;;  %v936_v42 = vadd.f32 %v1672_v13, %v935_v40 }
 0x12a   : > { %v809_v43 = vpop.f32.mrf.mxu0  ;;  %v937_v44 = vpop.f32.mrf.mxu1 }
 0x12b   : > { %v1030_v45 = vmax.f32 %v808_v41, 0.0  ;;  %v1062_v46 = vmax.f32 %v936_v42, 0.0 }
 0x12c   : > { %v812_v47 = vpop.f32.mrf.mxu0  ;;  %v940_v48 = vpop.f32.mrf.mxu1 }
 0x12d   : > { %1094 = vst.msk [vmem:[%s1681_s23 + $0x58] sm:$0xff] %vm633_vm0, %v1030_v45  ;;  %1126 = vst.msk [vmem:[%s1681_s23 + $0x158] sm:$0xff] %vm633_vm0, %v1062_v46  ;;  %v813_v49 = vadd.f32 %v1672_v13, %v812_v47  ;;  %v941_v50 = vadd.f32 %v1672_v13, %v940_v48 }
 0x12e   : > { %v814_v51 = vpop.f32.mrf.mxu0  ;;  %v942_v52 = vpop.f32.mrf.mxu1 }
 0x12f   : > { %v1031_v53 = vmax.f32 %v813_v49, 0.0  ;;  %v1063_v54 = vmax.f32 %v941_v50, 0.0 }
 0x130   : > { %v815_v55 = vpop.f32.mrf.mxu0  ;;  %v943_v56 = vpop.f32.mrf.mxu1 }
 0x131   : > { %1095 = vst.msk [vmem:[%s1681_s23 + $0x60] sm:$0xff] %vm633_vm0, %v1031_v53  ;;  %1127 = vst.msk [vmem:[%s1681_s23 + $0x160] sm:$0xff] %vm633_vm0, %v1063_v54  ;;  %v816_v57 = vadd.f32 %v1672_v13, %v815_v55  ;;  %v944_v58 = vadd.f32 %v1672_v13, %v943_v56 }
 0x132   : > { %v817_v59 = vpop.f32.mrf.mxu0  ;;  %v945_v60 = vpop.f32.mrf.mxu1 }
 0x133   : > { %v1032_v61 = vmax.f32 %v816_v57, 0.0  ;;  %v1064_v62 = vmax.f32 %v944_v58, 0.0 }
 0x134   : > { %v820_v63 = vpop.f32.mrf.mxu0  ;;  %v948_v0 = vpop.f32.mrf.mxu1 }
 0x135   : > { %1096 = vst.msk [vmem:[%s1681_s23 + $0x68] sm:$0xff] %vm633_vm0, %v1032_v61  ;;  %1128 = vst.msk [vmem:[%s1681_s23 + $0x168] sm:$0xff] %vm633_vm0, %v1064_v62  ;;  %v821_v1 = vadd.f32 %v1672_v13, %v820_v63  ;;  %v949_v2 = vadd.f32 %v1672_v13, %v948_v0 }
 0x136   : > { %v822_v3 = vpop.f32.mrf.mxu0  ;;  %v950_v4 = vpop.f32.mrf.mxu1 }
 0x137   : > { %v1033_v5 = vmax.f32 %v821_v1, 0.0  ;;  %v1065_v6 = vmax.f32 %v949_v2, 0.0 }
 0x138   : > { %v823_v7 = vpop.f32.mrf.mxu0  ;;  %v951_v8 = vpop.f32.mrf.mxu1 }
 0x139   : > { %1097 = vst.msk [vmem:[%s1681_s23 + $0x70] sm:$0xff] %vm633_vm0, %v1033_v5  ;;  %1129 = vst.msk [vmem:[%s1681_s23 + $0x170] sm:$0xff] %vm633_vm0, %v1065_v6  ;;  %v824_v9 = vadd.f32 %v1672_v13, %v823_v7  ;;  %v952_v10 = vadd.f32 %v1672_v13, %v951_v8 }
 0x13a   : > { %v825_v11 = vpop.f32.mrf.mxu0  ;;  %v953_v12 = vpop.f32.mrf.mxu1 }
 0x13b   : > { %v1034_v14 = vmax.f32 %v824_v9, 0.0  ;;  %v1066_v15 = vmax.f32 %v952_v10, 0.0 }
 0x13c   : > { %v828_v16 = vpop.f32.mrf.mxu0  ;;  %v956_v17 = vpop.f32.mrf.mxu1 }
 0x13d   : > { %1098 = vst.msk [vmem:[%s1681_s23 + $0x78] sm:$0xff] %vm633_vm0, %v1034_v14  ;;  %1130 = vst.msk [vmem:[%s1681_s23 + $0x178] sm:$0xff] %vm633_vm0, %v1066_v15  ;;  %v829_v18 = vadd.f32 %v1672_v13, %v828_v16  ;;  %v957_v19 = vadd.f32 %v1672_v13, %v956_v17 }
 0x13e   : > { %v830_v20 = vpop.f32.mrf.mxu0  ;;  %v958_v21 = vpop.f32.mrf.mxu1 }
 0x13f   : > { %v1035_v22 = vmax.f32 %v829_v18, 0.0  ;;  %v1067_v23 = vmax.f32 %v957_v19, 0.0 }
 0x140   : > { %v831_v24 = vpop.f32.mrf.mxu0  ;;  %v959_v25 = vpop.f32.mrf.mxu1 }
 0x141   : > { %1099 = vst.msk [vmem:[%s1681_s23 + $0x80] sm:$0xff] %vm633_vm0, %v1035_v22  ;;  %1131 = vst.msk [vmem:[%s1681_s23 + $0x180] sm:$0xff] %vm633_vm0, %v1067_v23  ;;  %v832_v26 = vadd.f32 %v1672_v13, %v831_v24  ;;  %v960_v27 = vadd.f32 %v1672_v13, %v959_v25 }
 0x142   : > { %v833_v28 = vpop.f32.mrf.mxu0  ;;  %v961_v29 = vpop.f32.mrf.mxu1 }
 0x143   : > { %v1036_v30 = vmax.f32 %v832_v26, 0.0  ;;  %v1068_v31 = vmax.f32 %v960_v27, 0.0 }
 0x144   : > { %v836_v32 = vpop.f32.mrf.mxu0  ;;  %v964_v33 = vpop.f32.mrf.mxu1 }
 0x145   : > { %1100 = vst.msk [vmem:[%s1681_s23 + $0x88] sm:$0xff] %vm633_vm0, %v1036_v30  ;;  %1132 = vst.msk [vmem:[%s1681_s23 + $0x188] sm:$0xff] %vm633_vm0, %v1068_v31  ;;  %v837_v34 = vadd.f32 %v1672_v13, %v836_v32  ;;  %v965_v35 = vadd.f32 %v1672_v13, %v964_v33 }
 0x146   : > { %v838_v36 = vpop.f32.mrf.mxu0  ;;  %v966_v37 = vpop.f32.mrf.mxu1 }
 0x147   : > { %v1037_v38 = vmax.f32 %v837_v34, 0.0  ;;  %v1069_v39 = vmax.f32 %v965_v35, 0.0 }
 0x148   : > { %v839_v40 = vpop.f32.mrf.mxu0  ;;  %v967_v41 = vpop.f32.mrf.mxu1 }
 0x149   : > { %1101 = vst.msk [vmem:[%s1681_s23 + $0x90] sm:$0xff] %vm633_vm0, %v1037_v38  ;;  %1133 = vst.msk [vmem:[%s1681_s23 + $0x190] sm:$0xff] %vm633_vm0, %v1069_v39  ;;  %v840_v42 = vadd.f32 %v1672_v13, %v839_v40  ;;  %v968_v43 = vadd.f32 %v1672_v13, %v967_v41 }
 0x14a   : > { %v841_v44 = vpop.f32.mrf.mxu0  ;;  %v969_v45 = vpop.f32.mrf.mxu1 }
 0x14b   : > { %v1038_v46 = vmax.f32 %v840_v42, 0.0  ;;  %v1070_v47 = vmax.f32 %v968_v43, 0.0 }
 0x14c   : > { %v844_v48 = vpop.f32.mrf.mxu0  ;;  %v972_v49 = vpop.f32.mrf.mxu1 }
 0x14d   : > { %1102 = vst.msk [vmem:[%s1681_s23 + $0x98] sm:$0xff] %vm633_vm0, %v1038_v46  ;;  %1134 = vst.msk [vmem:[%s1681_s23 + $0x198] sm:$0xff] %vm633_vm0, %v1070_v47  ;;  %v845_v50 = vadd.f32 %v1672_v13, %v844_v48  ;;  %v973_v51 = vadd.f32 %v1672_v13, %v972_v49 }
 0x14e   : > { %v846_v52 = vpop.f32.mrf.mxu0  ;;  %v974_v53 = vpop.f32.mrf.mxu1 }
 0x14f   : > { %v1039_v54 = vmax.f32 %v845_v50, 0.0  ;;  %v1071_v55 = vmax.f32 %v973_v51, 0.0 }
 0x150   : > { %v847_v56 = vpop.f32.mrf.mxu0  ;;  %v975_v57 = vpop.f32.mrf.mxu1 }
 0x151   : > { %1103 = vst.msk [vmem:[%s1681_s23 + $0xa0] sm:$0xff] %vm633_vm0, %v1039_v54  ;;  %1135 = vst.msk [vmem:[%s1681_s23 + $0x1a0] sm:$0xff] %vm633_vm0, %v1071_v55  ;;  %v848_v58 = vadd.f32 %v1672_v13, %v847_v56  ;;  %v976_v59 = vadd.f32 %v1672_v13, %v975_v57 }
 0x152   : > { %v849_v60 = vpop.f32.mrf.mxu0  ;;  %v977_v61 = vpop.f32.mrf.mxu1 }
 0x153   : > { %v1040_v62 = vmax.f32 %v848_v58, 0.0  ;;  %v1072_v63 = vmax.f32 %v976_v59, 0.0 }
 0x154   : > { %v852_v0 = vpop.f32.mrf.mxu0  ;;  %v980_v1 = vpop.f32.mrf.mxu1 }
 0x155   : > { %1104 = vst.msk [vmem:[%s1681_s23 + $0xa8] sm:$0xff] %vm633_vm0, %v1040_v62  ;;  %1136 = vst.msk [vmem:[%s1681_s23 + $0x1a8] sm:$0xff] %vm633_vm0, %v1072_v63  ;;  %v853_v2 = vadd.f32 %v1672_v13, %v852_v0  ;;  %v981_v3 = vadd.f32 %v1672_v13, %v980_v1 }
 0x156   : > { %v854_v4 = vpop.f32.mrf.mxu0  ;;  %v982_v5 = vpop.f32.mrf.mxu1 }
 0x157   : > { %v1041_v6 = vmax.f32 %v853_v2, 0.0  ;;  %v1073_v7 = vmax.f32 %v981_v3, 0.0 }
 0x158   : > { %v855_v8 = vpop.f32.mrf.mxu0  ;;  %v983_v9 = vpop.f32.mrf.mxu1 }
 0x159   : > { %1105 = vst.msk [vmem:[%s1681_s23 + $0xb0] sm:$0xff] %vm633_vm0, %v1041_v6  ;;  %1137 = vst.msk [vmem:[%s1681_s23 + $0x1b0] sm:$0xff] %vm633_vm0, %v1073_v7  ;;  %v856_v10 = vadd.f32 %v1672_v13, %v855_v8  ;;  %v984_v11 = vadd.f32 %v1672_v13, %v983_v9 }
 0x15a   : > { %v857_v12 = vpop.f32.mrf.mxu0  ;;  %v985_v14 = vpop.f32.mrf.mxu1 }
 0x15b   : > { %v1042_v15 = vmax.f32 %v856_v10, 0.0  ;;  %v1074_v16 = vmax.f32 %v984_v11, 0.0 }
 0x15c   : > { %v860_v17 = vpop.f32.mrf.mxu0  ;;  %v988_v18 = vpop.f32.mrf.mxu1 }
 0x15d   : > { %1106 = vst.msk [vmem:[%s1681_s23 + $0xb8] sm:$0xff] %vm633_vm0, %v1042_v15  ;;  %1138 = vst.msk [vmem:[%s1681_s23 + $0x1b8] sm:$0xff] %vm633_vm0, %v1074_v16  ;;  %v861_v19 = vadd.f32 %v1672_v13, %v860_v17  ;;  %v989_v20 = vadd.f32 %v1672_v13, %v988_v18 }
 0x15e   : > { %v862_v21 = vpop.f32.mrf.mxu0  ;;  %v990_v22 = vpop.f32.mrf.mxu1 }
 0x15f   : > { %v1043_v23 = vmax.f32 %v861_v19, 0.0  ;;  %v1075_v24 = vmax.f32 %v989_v20, 0.0 }
 0x160   : > { %v863_v25 = vpop.f32.mrf.mxu0  ;;  %v991_v26 = vpop.f32.mrf.mxu1 }
 0x161   : > { %1107 = vst.msk [vmem:[%s1681_s23 + $0xc0] sm:$0xff] %vm633_vm0, %v1043_v23  ;;  %1139 = vst.msk [vmem:[%s1681_s23 + $0x1c0] sm:$0xff] %vm633_vm0, %v1075_v24  ;;  %v864_v27 = vadd.f32 %v1672_v13, %v863_v25  ;;  %v992_v28 = vadd.f32 %v1672_v13, %v991_v26 }
 0x162   : > { %v865_v29 = vpop.f32.mrf.mxu0  ;;  %v993_v30 = vpop.f32.mrf.mxu1 }
 0x163   : > { %v1044_v31 = vmax.f32 %v864_v27, 0.0  ;;  %v1076_v32 = vmax.f32 %v992_v28, 0.0 }
 0x164   : > { %v868_v33 = vpop.f32.mrf.mxu0  ;;  %v996_v34 = vpop.f32.mrf.mxu1 }
 0x165   : > { %1108 = vst.msk [vmem:[%s1681_s23 + $0xc8] sm:$0xff] %vm633_vm0, %v1044_v31  ;;  %1140 = vst.msk [vmem:[%s1681_s23 + $0x1c8] sm:$0xff] %vm633_vm0, %v1076_v32  ;;  %v869_v35 = vadd.f32 %v1672_v13, %v868_v33  ;;  %v997_v36 = vadd.f32 %v1672_v13, %v996_v34 }
 0x166   : > { %v870_v37 = vpop.f32.mrf.mxu0  ;;  %v998_v38 = vpop.f32.mrf.mxu1 }
 0x167   : > { %v1045_v39 = vmax.f32 %v869_v35, 0.0  ;;  %v1077_v40 = vmax.f32 %v997_v36, 0.0 }
 0x168   : > { %v871_v41 = vpop.f32.mrf.mxu0  ;;  %v999_v42 = vpop.f32.mrf.mxu1 }
 0x169   : > { %1109 = vst.msk [vmem:[%s1681_s23 + $0xd0] sm:$0xff] %vm633_vm0, %v1045_v39  ;;  %1141 = vst.msk [vmem:[%s1681_s23 + $0x1d0] sm:$0xff] %vm633_vm0, %v1077_v40  ;;  %v872_v43 = vadd.f32 %v1672_v13, %v871_v41  ;;  %v1000_v44 = vadd.f32 %v1672_v13, %v999_v42 }
 0x16a   : > { %v873_v45 = vpop.f32.mrf.mxu0  ;;  %v1001_v46 = vpop.f32.mrf.mxu1 }
 0x16b   : > { %v1046_v47 = vmax.f32 %v872_v43, 0.0  ;;  %v1078_v48 = vmax.f32 %v1000_v44, 0.0 }
 0x16c   : > { %v876_v49 = vpop.f32.mrf.mxu0  ;;  %v1004_v50 = vpop.f32.mrf.mxu1 }
 0x16d   : > { %1110 = vst.msk [vmem:[%s1681_s23 + $0xd8] sm:$0xff] %vm633_vm0, %v1046_v47  ;;  %1142 = vst.msk [vmem:[%s1681_s23 + $0x1d8] sm:$0xff] %vm633_vm0, %v1078_v48  ;;  %v877_v51 = vadd.f32 %v1672_v13, %v876_v49  ;;  %v1005_v52 = vadd.f32 %v1672_v13, %v1004_v50 }
 0x16e   : > { %v878_v53 = vpop.f32.mrf.mxu0  ;;  %v1006_v54 = vpop.f32.mrf.mxu1 }
 0x16f   : > { %v1047_v55 = vmax.f32 %v877_v51, 0.0  ;;  %v1079_v56 = vmax.f32 %v1005_v52, 0.0 }
 0x170   : > { %v879_v57 = vpop.f32.mrf.mxu0  ;;  %v1007_v58 = vpop.f32.mrf.mxu1 }
 0x171   : > { %1111 = vst.msk [vmem:[%s1681_s23 + $0xe0] sm:$0xff] %vm633_vm0, %v1047_v55  ;;  %1143 = vst.msk [vmem:[%s1681_s23 + $0x1e0] sm:$0xff] %vm633_vm0, %v1079_v56  ;;  %v880_v59 = vadd.f32 %v1672_v13, %v879_v57  ;;  %v1008_v60 = vadd.f32 %v1672_v13, %v1007_v58 }
 0x172   : > { %v881_v61 = vpop.f32.mrf.mxu0  ;;  %v1009_v62 = vpop.f32.mrf.mxu1 }
 0x173   : > { %v1048_v63 = vmax.f32 %v880_v59, 0.0  ;;  %v1080_v0 = vmax.f32 %v1008_v60, 0.0 }
 0x174   : > { %v884_v1 = vpop.f32.mrf.mxu0  ;;  %v1012_v2 = vpop.f32.mrf.mxu1 }
 0x175   : > { %1112 = vst.msk [vmem:[%s1681_s23 + $0xe8] sm:$0xff] %vm633_vm0, %v1048_v63  ;;  %1144 = vst.msk [vmem:[%s1681_s23 + $0x1e8] sm:$0xff] %vm633_vm0, %v1080_v0  ;;  %v885_v3 = vadd.f32 %v1672_v13, %v884_v1  ;;  %v1013_v4 = vadd.f32 %v1672_v13, %v1012_v2 }
 0x176   : > { %v886_v5 = vpop.f32.mrf.mxu0  ;;  %v1014_v6 = vpop.f32.mrf.mxu1 }
 0x177   : > { %v1049_v7 = vmax.f32 %v885_v3, 0.0  ;;  %v1081_v8 = vmax.f32 %v1013_v4, 0.0 }
 0x178   : > { %v887_v9 = vpop.f32.mrf.mxu0  ;;  %v1015_v10 = vpop.f32.mrf.mxu1 }
 0x179   : > { %1113 = vst.msk [vmem:[%s1681_s23 + $0xf0] sm:$0xff] %vm633_vm0, %v1049_v7  ;;  %1145 = vst.msk [vmem:[%s1681_s23 + $0x1f0] sm:$0xff] %vm633_vm0, %v1081_v8  ;;  %v888_v11 = vadd.f32 %v1672_v13, %v887_v9  ;;  %v1016_v12 = vadd.f32 %v1672_v13, %v1015_v10 }
 0x17a   : > { %v889_v14 = vpop.f32.mrf.mxu0  ;;  %v1017_v15 = vpop.f32.mrf.mxu1 }
 0x17b   : > { %v1050_v16 = vmax.f32 %v888_v11, 0.0  ;;  %v1082_v17 = vmax.f32 %v1016_v12, 0.0 }
 0x17d   : > { %1114 = vst.msk [vmem:[%s1681_s23 + $0xf8] sm:$0xff] %vm633_vm0, %v1050_v16  ;;  %1146 = vst.msk [vmem:[%s1681_s23 + $0x1f8] sm:$0xff] %vm633_vm0, %v1082_v17 }
 0x17e PF: > { %s13_s12 = sadd.s32 1, %s1472_s12  }
 0x17f   : > { %p10_p4 = scmp.ge.s32.totalorder %s13_s12, 6  }
 0x181   :  { %12 = sbr.rel (!%p10_p4) target bundleno = 1 (0x1), region = 62 }

// kernel: _lambda_.24
= control target key start
LH: loop header
LB: loop body
LE: loop exit
PB: predicated region body
PF: predicated region fallthrough
CT: control target
= control target key end

     0   :  { %s1400_s12 = smov 0   ;;  %s1808_s0 = inlined_call_operand.vmem [shape: bf16[2048,64], index: 0, kind: input, shape index: {}]   ;;  %s1809_s1 = inlined_call_operand.vmem [shape: bf16[64,256], index: 1, kind: input, shape index: {}]   ;;  %s1810_s2 = inlined_call_operand.vmem [shape: f32[1,256], index: 2, kind: input, shape index: {}]   ;;  %s1811_s3 = inlined_call_operand.vmem [shape: f32[2048,256], index: 3, kind: output, shape index: {}]  }
   0x1 LB: > { %s1225_s13 = sadd.s32 4294967295, %s1377_s12   ;;  %p1229_p0 = scmp.ge.s32.totalorder %s1377_s12, 1  ;;  %s1377_s12 = sphi %s1400_s12, %s13_s12  }
   0x2   : > { %p138_p1 = scmp.lt.s32.totalorder %s1377_s12, 5 }
   0x4   : > { %p139_p2 = pnand %p1229_p0, %p138_p1 }
   0x5   : > { %s1230_s16 = sshll.u32 (!%p139_p2), %s1225_s13, 6 }
   0x6   : > { %142 = sbr.rel (%p139_p2) target bundleno = 353 (0x161), region = 32  ;;  %p164_p3 = scmp.lt.s32.totalorder (!%p139_p2), %s1230_s16, 255 }
   0xb   : > { %v1327_v0 = vld [vmem:[%s1809_s1 + $0x34] ss:$8 sps:$4 sm:$0xff]   ;;  %v1329_v1 = vld [vmem:[%s1809_s1 + $0x30] ss:$8 sps:$4 sm:$0xff]   ;;  %v1379_v2 = vmov 0   ;;  %s1813_s16 = smov (!%p164_p3, %s1230_s16), 255  ;;  %v251_v41 = vlaneseq }
   0xc   : > { %590 = vmatprep.mubr.bf16.mxu0 %v1379_v2  ;;  %750 = vmatprep.mubr.bf16.mxu1 %v1379_v2  ;;  %v1330_v3 = vld [vmem:[%s1809_s1 + $0x24] ss:$8 sps:$4 sm:$0xff]   ;;  %v1332_v4 = vld [vmem:[%s1809_s1 + $0x20] ss:$8 sps:$4 sm:$0xff]   ;;  %v1333_v5 = vld [vmem:[%s1809_s1 + $0x14] ss:$8 sps:$4 sm:$0xff]  }
   0xd   : > { %566 = vmatprep.subr.bf16.mxu0 %v1327_v0  ;;  %1310 = vmatprep.subr.bf16.mxu1 %v1327_v0  ;;  %s1231_s25 = sshll.u32 %s1813_s16, 2  ;;  %v1335_v6 = vld [vmem:[%s1809_s1 + $0x10] ss:$8 sps:$4 sm:$0xff]   ;;  %v1336_v7 = vld [vmem:[%s1809_s1 + $0x4] ss:$8 sps:$4 sm:$0xff]   ;;  %vm461_vm0 = vcmask 523264  }
   0xe   : > { %567 = vmatpush1.bf16.msra.mxu0 %v1329_v1  ;;  %1314 = vmatpush1.bf16.msra.mxu1 %v1329_v1  ;;  %s1431_s28 = scalar_lea.vmem %s1808_s0, %s1231_s25  ;;  %v1338_v8 = vld [vmem:[%s1809_s1] ss:$8 sps:$4 sm:$0xff]   ;;  %v252_v42 = vshrl.u32 %v251_v41, 7  ;;  %s1309_s10 = sshll.u32 %s1813_s16, 4 }
   0xf   : > { %568 = vmatprep.subr.bf16.mxu0 %v1330_v3  ;;  %1311 = vmatprep.subr.bf16.mxu1 %v1330_v3  ;;  %v1339_v9 = vld [vmem:[%s1431_s28] sm:$0xff]   ;;  %v1341_v11 = vld [vmem:[%s1431_s28 + $0x8] sm:$0xff]   ;;  %v1343_v13 = vld [vmem:[%s1431_s28 + $0x10] sm:$0xff]   ;;  %s1549_s14 = scalar_lea.vmem %s1811_s3, %s1309_s10 }
  0x10   : > { %v1340_v10 = vld [vmem:[%s1431_s28 + $0x80] sm:$0xff]   ;;  %v1342_v12 = vld [vmem:[%s1431_s28 + $0x88] sm:$0xff]   ;;  %v1344_v14 = vld [vmem:[%s1431_s28 + $0x90] sm:$0xff]   ;;  %v253_v43 = vsub.s32 0, %v252_v42  ;;  %v257_v45 = vsub.s32 1, %v252_v42 }
  0x11   : > { %v1345_v15 = vld [vmem:[%s1431_s28 + $0x18] sm:$0xff]   ;;  %v1347_v17 = vld [vmem:[%s1431_s28 + $0x20] sm:$0xff]   ;;  %v1349_v19 = vld [vmem:[%s1431_s28 + $0x28] sm:$0xff]  }
  0x12   : > { %569 = vmatpush1.bf16.msra.mxu0 %v1332_v4  ;;  %1315 = vmatpush1.bf16.msra.mxu1 %v1332_v4  ;;  %v1346_v16 = vld [vmem:[%s1431_s28 + $0x98] sm:$0xff]   ;;  %v1348_v18 = vld [vmem:[%s1431_s28 + $0xa0] sm:$0xff]   ;;  %v1350_v20 = vld [vmem:[%s1431_s28 + $0xa8] sm:$0xff]  }
  0x13   : > { %570 = vmatprep.subr.bf16.mxu0 %v1333_v5  ;;  %1312 = vmatprep.subr.bf16.mxu1 %v1333_v5  ;;  %v1351_v21 = vld [vmem:[%s1431_s28 + $0x30] sm:$0xff]   ;;  %v1353_v23 = vld [vmem:[%s1431_s28 + $0x38] sm:$0xff]   ;;  %v1355_v25 = vld [vmem:[%s1431_s28 + $0x40] sm:$0xff]  }
  0x14   : > { %v1352_v22 = vld [vmem:[%s1431_s28 + $0xb0] sm:$0xff]   ;;  %v1354_v24 = vld [vmem:[%s1431_s28 + $0xb8] sm:$0xff]   ;;  %v1356_v26 = vld [vmem:[%s1431_s28 + $0xc0] sm:$0xff]  }
  0x15   : > { %v1357_v27 = vld [vmem:[%s1431_s28 + $0x48] sm:$0xff]   ;;  %v1359_v29 = vld [vmem:[%s1431_s28 + $0x50] sm:$0xff]   ;;  %v1361_v31 = vld [vmem:[%s1431_s28 + $0x58] sm:$0xff]  }
  0x16   : > { %571 = vmatpush1.bf16.msra.mxu0 %v1335_v6  ;;  %1316 = vmatpush1.bf16.msra.mxu1 %v1335_v6  ;;  %v1358_v28 = vld [vmem:[%s1431_s28 + $0xc8] sm:$0xff]   ;;  %v1360_v30 = vld [vmem:[%s1431_s28 + $0xd0] sm:$0xff]   ;;  %v1362_v32 = vld [vmem:[%s1431_s28 + $0xd8] sm:$0xff]  }
  0x17   : > { %572 = vmatprep.subr.bf16.mxu0 %v1336_v7  ;;  %1313 = vmatprep.subr.bf16.mxu1 %v1336_v7  ;;  %v1363_v33 = vld [vmem:[%s1431_s28 + $0x60] sm:$0xff]   ;;  %v1365_v35 = vld [vmem:[%s1431_s28 + $0x68] sm:$0xff]   ;;  %v1367_v37 = vld [vmem:[%s1431_s28 + $0x70] sm:$0xff]  }
  0x18   : > { %v1364_v34 = vld [vmem:[%s1431_s28 + $0xe0] sm:$0xff]   ;;  %v1366_v36 = vld [vmem:[%s1431_s28 + $0xe8] sm:$0xff]   ;;  %v1368_v38 = vld [vmem:[%s1431_s28 + $0xf0] sm:$0xff]  }
  0x19   : > { %v1369_v39 = vld [vmem:[%s1431_s28 + $0x78] sm:$0xff]   ;;  %v249_v44 = vld [vmem:[%s1810_s2] sm:$0x3] }
  0x1a   : > { %573 = vmatpush1.bf16.msra.mxu0 %v1338_v8  ;;  %1317 = vmatpush1.bf16.msra.mxu1 %v1338_v8  ;;  %v1370_v40 = vld [vmem:[%s1431_s28 + $0xf8] sm:$0xff]   ;;  %v1539_v46 = vrot.slane %v249_v44, %v253_v43  ;;  %v1542_v47 = vrot.slane %v249_v44, %v257_v45 }
  0x1d   : > { %1275 = vmatmul.mubr.msk.bf16.vlgmr.msra.gmra.mxu0 %vm461_vm0, %v1339_v9  ;;  %1291 = vmatmul.mubr.msk.bf16.vlgmr.msra.gmra.mxu1 %vm461_vm0, %v1340_v10 }
  0x1e   : > { %600 = vmatprep.mubr.bf16.mxu0 %v1379_v2  ;;  %760 = vmatprep.mubr.bf16.mxu1 %v1379_v2 }
  0x25   : > { %1276 = vmatmul.mubr.msk.bf16.gmra.mxu0 %vm461_vm0, %v1341_v11  ;;  %1292 = vmatmul.mubr.msk.bf16.gmra.mxu1 %vm461_vm0, %v1342_v12 }
  0x26   : > { %610 = vmatprep.mubr.bf16.mxu0 %v1379_v2  ;;  %770 = vmatprep.mubr.bf16.mxu1 %v1379_v2 }
  0x2d   : > { %1277 = vmatmul.mubr.msk.bf16.gmra.mxu0 %vm461_vm0, %v1343_v13  ;;  %1293 = vmatmul.mubr.msk.bf16.gmra.mxu1 %vm461_vm0, %v1344_v14 }
  0x2e   : > { %620 = vmatprep.mubr.bf16.mxu0 %v1379_v2  ;;  %780 = vmatprep.mubr.bf16.mxu1 %v1379_v2 }
  0x35   : > { %1278 = vmatmul.mubr.msk.bf16.gmra.mxu0 %vm461_vm0, %v1345_v15  ;;  %1294 = vmatmul.mubr.msk.bf16.gmra.mxu1 %vm461_vm0, %v1346_v16 }
  0x36   : > { %630 = vmatprep.mubr.bf16.mxu0 %v1379_v2  ;;  %790 = vmatprep.mubr.bf16.mxu1 %v1379_v2 }
  0x3d   : > { %1279 = vmatmul.mubr.msk.bf16.gmra.mxu0 %vm461_vm0, %v1347_v17  ;;  %1295 = vmatmul.mubr.msk.bf16.gmra.mxu1 %vm461_vm0, %v1348_v18 }
  0x3e   : > { %640 = vmatprep.mubr.bf16.mxu0 %v1379_v2  ;;  %800 = vmatprep.mubr.bf16.mxu1 %v1379_v2 }
  0x45   : > { %1280 = vmatmul.mubr.msk.bf16.gmra.mxu0 %vm461_vm0, %v1349_v19  ;;  %1296 = vmatmul.mubr.msk.bf16.gmra.mxu1 %vm461_vm0, %v1350_v20 }
  0x46   : > { %650 = vmatprep.mubr.bf16.mxu0 %v1379_v2  ;;  %810 = vmatprep.mubr.bf16.mxu1 %v1379_v2 }
  0x4d   : > { %1281 = vmatmul.mubr.msk.bf16.gmra.mxu0 %vm461_vm0, %v1351_v21  ;;  %1297 = vmatmul.mubr.msk.bf16.gmra.mxu1 %vm461_vm0, %v1352_v22 }
  0x4e   : > { %660 = vmatprep.mubr.bf16.mxu0 %v1379_v2  ;;  %820 = vmatprep.mubr.bf16.mxu1 %v1379_v2 }
  0x55   : > { %1282 = vmatmul.mubr.msk.bf16.gmra.mxu0 %vm461_vm0, %v1353_v23  ;;  %1298 = vmatmul.mubr.msk.bf16.gmra.mxu1 %vm461_vm0, %v1354_v24 }
  0x56   : > { %670 = vmatprep.mubr.bf16.mxu0 %v1379_v2  ;;  %830 = vmatprep.mubr.bf16.mxu1 %v1379_v2 }
  0x5d   : > { %1283 = vmatmul.mubr.msk.bf16.gmra.mxu0 %vm461_vm0, %v1355_v25  ;;  %1299 = vmatmul.mubr.msk.bf16.gmra.mxu1 %vm461_vm0, %v1356_v26 }
  0x5e   : > { %680 = vmatprep.mubr.bf16.mxu0 %v1379_v2  ;;  %840 = vmatprep.mubr.bf16.mxu1 %v1379_v2 }
  0x65   : > { %1284 = vmatmul.mubr.msk.bf16.gmra.mxu0 %vm461_vm0, %v1357_v27  ;;  %1300 = vmatmul.mubr.msk.bf16.gmra.mxu1 %vm461_vm0, %v1358_v28 }
  0x66   : > { %690 = vmatprep.mubr.bf16.mxu0 %v1379_v2  ;;  %850 = vmatprep.mubr.bf16.mxu1 %v1379_v2 }
  0x6d   : > { %1285 = vmatmul.mubr.msk.bf16.gmra.mxu0 %vm461_vm0, %v1359_v29  ;;  %1301 = vmatmul.mubr.msk.bf16.gmra.mxu1 %vm461_vm0, %v1360_v30 }
  0x6e   : > { %700 = vmatprep.mubr.bf16.mxu0 %v1379_v2  ;;  %860 = vmatprep.mubr.bf16.mxu1 %v1379_v2 }
  0x75   : > { %1286 = vmatmul.mubr.msk.bf16.gmra.mxu0 %vm461_vm0, %v1361_v31  ;;  %1302 = vmatmul.mubr.msk.bf16.gmra.mxu1 %vm461_vm0, %v1362_v32 }
  0x76   : > { %710 = vmatprep.mubr.bf16.mxu0 %v1379_v2  ;;  %870 = vmatprep.mubr.bf16.mxu1 %v1379_v2 }
  0x7d   : > { %1287 = vmatmul.mubr.msk.bf16.gmra.mxu0 %vm461_vm0, %v1363_v33  ;;  %1303 = vmatmul.mubr.msk.bf16.gmra.mxu1 %vm461_vm0, %v1364_v34 }
  0x7e   : > { %720 = vmatprep.mubr.bf16.mxu0 %v1379_v2  ;;  %880 = vmatprep.mubr.bf16.mxu1 %v1379_v2 }
  0x85   : > { %1288 = vmatmul.mubr.msk.bf16.gmra.mxu0 %vm461_vm0, %v1365_v35  ;;  %1304 = vmatmul.mubr.msk.bf16.gmra.mxu1 %vm461_vm0, %v1366_v36 }
  0x86   : > { %730 = vmatprep.mubr.bf16.mxu0 %v1379_v2  ;;  %890 = vmatprep.mubr.bf16.mxu1 %v1379_v2 }
  0x8d   : > { %1289 = vmatmul.mubr.msk.bf16.gmra.mxu0 %vm461_vm0, %v1367_v37  ;;  %1305 = vmatmul.mubr.msk.bf16.gmra.mxu1 %vm461_vm0, %v1368_v38 }
  0x8e   : > { %740 = vmatprep.mubr.bf16.mxu0 %v1379_v2  ;;  %900 = vmatprep.mubr.bf16.mxu1 %v1379_v2 }
  0x95   : > { %1290 = vmatmul.mubr.msk.bf16.gmra.mxu0 %vm461_vm0, %v1369_v39  ;;  %1306 = vmatmul.mubr.msk.bf16.gmra.mxu1 %vm461_vm0, %v1370_v40 }
  0xdd   : > { %v592_v48 = vpop.f32.mrf.mxu0  ;;  %v752_v49 = vpop.f32.mrf.mxu1 }
  0xde   : > { %v593_v50 = vadd.f32 %v592_v48, %v1539_v46  ;;  %v753_v51 = vadd.f32 %v752_v49, %v1539_v46 }
  0xdf   : > { %v594_v52 = vpop.f32.mrf.mxu0  ;;  %v754_v53 = vpop.f32.mrf.mxu1 }
  0xe0   : > { %v911_v54 = vmax.f32 %v593_v50, 0.0  ;;  %v975_v55 = vmax.f32 %v753_v51, 0.0  ;;  %v595_v56 = vadd.f32 %v594_v52, %v1542_v47  ;;  %v755_v57 = vadd.f32 %v754_v53, %v1542_v47 }
  0xe1   : > { %v596_v58 = vpop.f32.mrf.mxu0  ;;  %v756_v59 = vpop.f32.mrf.mxu1 }
  0xe2   : > { %1039 = vst [vmem:[%s1549_s14] sm:$0xff] %v911_v54  ;;  %1103 = vst [vmem:[%s1549_s14 + $0x200] sm:$0xff] %v975_v55  ;;  %v912_v60 = vmax.f32 %v595_v56, 0.0  ;;  %v976_v61 = vmax.f32 %v755_v57, 0.0  ;;  %v597_v62 = vadd.f32 %v596_v58, %v1539_v46  ;;  %v757_v63 = vadd.f32 %v756_v59, %v1539_v46 }
  0xe3   : > { %v598_v0 = vpop.f32.mrf.mxu0  ;;  %v758_v1 = vpop.f32.mrf.mxu1 }
  0xe4   : > { %1040 = vst [vmem:[%s1549_s14 + $0x8] sm:$0xff] %v912_v60  ;;  %1104 = vst [vmem:[%s1549_s14 + $0x208] sm:$0xff] %v976_v61  ;;  %v913_v2 = vmax.f32 %v597_v62, 0.0  ;;  %v977_v3 = vmax.f32 %v757_v63, 0.0  ;;  %v599_v4 = vadd.f32 %v598_v0, %v1542_v47  ;;  %v759_v5 = vadd.f32 %v758_v1, %v1542_v47 }
  0xe5   : > { %v602_v6 = vpop.f32.mrf.mxu0  ;;  %v762_v7 = vpop.f32.mrf.mxu1 }
  0xe6   : > { %1041 = vst [vmem:[%s1549_s14 + $0x10] sm:$0xff] %v913_v2  ;;  %1105 = vst [vmem:[%s1549_s14 + $0x210] sm:$0xff] %v977_v3  ;;  %v914_v8 = vmax.f32 %v599_v4, 0.0  ;;  %v978_v9 = vmax.f32 %v759_v5, 0.0  ;;  %v603_v10 = vadd.f32 %v602_v6, %v1539_v46  ;;  %v763_v11 = vadd.f32 %v762_v7, %v1539_v46 }
  0xe7   : > { %v604_v12 = vpop.f32.mrf.mxu0  ;;  %v764_v13 = vpop.f32.mrf.mxu1 }
  0xe8   : > { %1042 = vst [vmem:[%s1549_s14 + $0x18] sm:$0xff] %v914_v8  ;;  %1106 = vst [vmem:[%s1549_s14 + $0x218] sm:$0xff] %v978_v9  ;;  %v915_v14 = vmax.f32 %v603_v10, 0.0  ;;  %v979_v15 = vmax.f32 %v763_v11, 0.0  ;;  %v605_v16 = vadd.f32 %v604_v12, %v1542_v47  ;;  %v765_v17 = vadd.f32 %v764_v13, %v1542_v47 }
  0xe9   : > { %v606_v18 = vpop.f32.mrf.mxu0  ;;  %v766_v19 = vpop.f32.mrf.mxu1 }
  0xea   : > { %1043 = vst [vmem:[%s1549_s14 + $0x20] sm:$0xff] %v915_v14  ;;  %1107 = vst [vmem:[%s1549_s14 + $0x220] sm:$0xff] %v979_v15  ;;  %v916_v20 = vmax.f32 %v605_v16, 0.0  ;;  %v980_v21 = vmax.f32 %v765_v17, 0.0  ;;  %v607_v22 = vadd.f32 %v606_v18, %v1539_v46  ;;  %v767_v23 = vadd.f32 %v766_v19, %v1539_v46 }
  0xeb   : > { %v608_v24 = vpop.f32.mrf.mxu0  ;;  %v768_v25 = vpop.f32.mrf.mxu1 }
  0xec   : > { %1044 = vst [vmem:[%s1549_s14 + $0x28] sm:$0xff] %v916_v20  ;;  %1108 = vst [vmem:[%s1549_s14 + $0x228] sm:$0xff] %v980_v21  ;;  %v917_v26 = vmax.f32 %v607_v22, 0.0  ;;  %v981_v27 = vmax.f32 %v767_v23, 0.0  ;;  %v609_v28 = vadd.f32 %v608_v24, %v1542_v47  ;;  %v769_v29 = vadd.f32 %v768_v25, %v1542_v47 }
  0xed   : > { %v612_v30 = vpop.f32.mrf.mxu0  ;;  %v772_v31 = vpop.f32.mrf.mxu1 }
  0xee   : > { %1045 = vst [vmem:[%s1549_s14 + $0x30] sm:$0xff] %v917_v26  ;;  %1109 = vst [vmem:[%s1549_s14 + $0x230] sm:$0xff] %v981_v27  ;;  %v918_v32 = vmax.f32 %v609_v28, 0.0  ;;  %v982_v33 = vmax.f32 %v769_v29, 0.0  ;;  %v613_v34 = vadd.f32 %v612_v30, %v1539_v46  ;;  %v773_v35 = vadd.f32 %v772_v31, %v1539_v46 }
  0xef   : > { %v614_v36 = vpop.f32.mrf.mxu0  ;;  %v774_v37 = vpop.f32.mrf.mxu1 }
  0xf0   : > { %1046 = vst [vmem:[%s1549_s14 + $0x38] sm:$0xff] %v918_v32  ;;  %1110 = vst [vmem:[%s1549_s14 + $0x238] sm:$0xff] %v982_v33  ;;  %v919_v38 = vmax.f32 %v613_v34, 0.0  ;;  %v983_v39 = vmax.f32 %v773_v35, 0.0  ;;  %v615_v40 = vadd.f32 %v614_v36, %v1542_v47  ;;  %v775_v41 = vadd.f32 %v774_v37, %v1542_v47 }
  0xf1   : > { %v616_v42 = vpop.f32.mrf.mxu0  ;;  %v776_v43 = vpop.f32.mrf.mxu1 }
  0xf2   : > { %1047 = vst [vmem:[%s1549_s14 + $0x40] sm:$0xff] %v919_v38  ;;  %1111 = vst [vmem:[%s1549_s14 + $0x240] sm:$0xff] %v983_v39  ;;  %v920_v44 = vmax.f32 %v615_v40, 0.0  ;;  %v984_v45 = vmax.f32 %v775_v41, 0.0  ;;  %v617_v48 = vadd.f32 %v616_v42, %v1539_v46  ;;  %v777_v49 = vadd.f32 %v776_v43, %v1539_v46 }
  0xf3   : > { %v618_v50 = vpop.f32.mrf.mxu0  ;;  %v778_v51 = vpop.f32.mrf.mxu1 }
  0xf4   : > { %1048 = vst [vmem:[%s1549_s14 + $0x48] sm:$0xff] %v920_v44  ;;  %1112 = vst [vmem:[%s1549_s14 + $0x248] sm:$0xff] %v984_v45  ;;  %v921_v52 = vmax.f32 %v617_v48, 0.0  ;;  %v985_v53 = vmax.f32 %v777_v49, 0.0  ;;  %v619_v54 = vadd.f32 %v618_v50, %v1542_v47  ;;  %v779_v55 = vadd.f32 %v778_v51, %v1542_v47 }
  0xf5   : > { %v622_v56 = vpop.f32.mrf.mxu0  ;;  %v782_v57 = vpop.f32.mrf.mxu1 }
  0xf6   : > { %1049 = vst [vmem:[%s1549_s14 + $0x50] sm:$0xff] %v921_v52  ;;  %1113 = vst [vmem:[%s1549_s14 + $0x250] sm:$0xff] %v985_v53  ;;  %v922_v58 = vmax.f32 %v619_v54, 0.0  ;;  %v986_v59 = vmax.f32 %v779_v55, 0.0  ;;  %v623_v60 = vadd.f32 %v622_v56, %v1539_v46  ;;  %v783_v61 = vadd.f32 %v782_v57, %v1539_v46 }
  0xf7   : > { %v624_v62 = vpop.f32.mrf.mxu0  ;;  %v784_v63 = vpop.f32.mrf.mxu1 }
  0xf8   : > { %1050 = vst [vmem:[%s1549_s14 + $0x58] sm:$0xff] %v922_v58  ;;  %1114 = vst [vmem:[%s1549_s14 + $0x258] sm:$0xff] %v986_v59  ;;  %v923_v0 = vmax.f32 %v623_v60, 0.0  ;;  %v987_v1 = vmax.f32 %v783_v61, 0.0  ;;  %v625_v2 = vadd.f32 %v624_v62, %v1542_v47  ;;  %v785_v3 = vadd.f32 %v784_v63, %v1542_v47 }
  0xf9   : > { %v626_v4 = vpop.f32.mrf.mxu0  ;;  %v786_v5 = vpop.f32.mrf.mxu1 }
  0xfa   : > { %1051 = vst [vmem:[%s1549_s14 + $0x60] sm:$0xff] %v923_v0  ;;  %1115 = vst [vmem:[%s1549_s14 + $0x260] sm:$0xff] %v987_v1  ;;  %v924_v6 = vmax.f32 %v625_v2, 0.0  ;;  %v988_v7 = vmax.f32 %v785_v3, 0.0  ;;  %v627_v8 = vadd.f32 %v626_v4, %v1539_v46  ;;  %v787_v9 = vadd.f32 %v786_v5, %v1539_v46 }
  0xfb   : > { %v628_v10 = vpop.f32.mrf.mxu0  ;;  %v788_v11 = vpop.f32.mrf.mxu1 }
  0xfc   : > { %1052 = vst [vmem:[%s1549_s14 + $0x68] sm:$0xff] %v924_v6  ;;  %1116 = vst [vmem:[%s1549_s14 + $0x268] sm:$0xff] %v988_v7  ;;  %v925_v12 = vmax.f32 %v627_v8, 0.0  ;;  %v989_v13 = vmax.f32 %v787_v9, 0.0  ;;  %v629_v14 = vadd.f32 %v628_v10, %v1542_v47  ;;  %v789_v15 = vadd.f32 %v788_v11, %v1542_v47 }
  0xfd   : > { %v632_v16 = vpop.f32.mrf.mxu0  ;;  %v792_v17 = vpop.f32.mrf.mxu1 }
  0xfe   : > { %1053 = vst [vmem:[%s1549_s14 + $0x70] sm:$0xff] %v925_v12  ;;  %1117 = vst [vmem:[%s1549_s14 + $0x270] sm:$0xff] %v989_v13  ;;  %v926_v18 = vmax.f32 %v629_v14, 0.0  ;;  %v990_v19 = vmax.f32 %v789_v15, 0.0  ;;  %v633_v20 = vadd.f32 %v632_v16, %v1539_v46  ;;  %v793_v21 = vadd.f32 %v792_v17, %v1539_v46 }
  0xff   : > { %v634_v22 = vpop.f32.mrf.mxu0  ;;  %v794_v23 = vpop.f32.mrf.mxu1 }
 0x100   : > { %1054 = vst [vmem:[%s1549_s14 + $0x78] sm:$0xff] %v926_v18  ;;  %1118 = vst [vmem:[%s1549_s14 + $0x278] sm:$0xff] %v990_v19  ;;  %v927_v24 = vmax.f32 %v633_v20, 0.0  ;;  %v991_v25 = vmax.f32 %v793_v21, 0.0  ;;  %v635_v26 = vadd.f32 %v634_v22, %v1542_v47  ;;  %v795_v27 = vadd.f32 %v794_v23, %v1542_v47 }
 0x101   : > { %v636_v28 = vpop.f32.mrf.mxu0  ;;  %v796_v29 = vpop.f32.mrf.mxu1 }
 0x102   : > { %1055 = vst [vmem:[%s1549_s14 + $0x80] sm:$0xff] %v927_v24  ;;  %1119 = vst [vmem:[%s1549_s14 + $0x280] sm:$0xff] %v991_v25  ;;  %v928_v30 = vmax.f32 %v635_v26, 0.0  ;;  %v992_v31 = vmax.f32 %v795_v27, 0.0  ;;  %v637_v32 = vadd.f32 %v636_v28, %v1539_v46  ;;  %v797_v33 = vadd.f32 %v796_v29, %v1539_v46 }
 0x103   : > { %v638_v34 = vpop.f32.mrf.mxu0  ;;  %v798_v35 = vpop.f32.mrf.mxu1 }
 0x104   : > { %1056 = vst [vmem:[%s1549_s14 + $0x88] sm:$0xff] %v928_v30  ;;  %1120 = vst [vmem:[%s1549_s14 + $0x288] sm:$0xff] %v992_v31  ;;  %v929_v36 = vmax.f32 %v637_v32, 0.0  ;;  %v993_v37 = vmax.f32 %v797_v33, 0.0  ;;  %v639_v38 = vadd.f32 %v638_v34, %v1542_v47  ;;  %v799_v39 = vadd.f32 %v798_v35, %v1542_v47 }
 0x105   : > { %v642_v40 = vpop.f32.mrf.mxu0  ;;  %v802_v41 = vpop.f32.mrf.mxu1 }
 0x106   : > { %1057 = vst [vmem:[%s1549_s14 + $0x90] sm:$0xff] %v929_v36  ;;  %1121 = vst [vmem:[%s1549_s14 + $0x290] sm:$0xff] %v993_v37  ;;  %v930_v42 = vmax.f32 %v639_v38, 0.0  ;;  %v994_v43 = vmax.f32 %v799_v39, 0.0  ;;  %v643_v44 = vadd.f32 %v642_v40, %v1539_v46  ;;  %v803_v45 = vadd.f32 %v802_v41, %v1539_v46 }
 0x107   : > { %v644_v48 = vpop.f32.mrf.mxu0  ;;  %v804_v49 = vpop.f32.mrf.mxu1 }
 0x108   : > { %1058 = vst [vmem:[%s1549_s14 + $0x98] sm:$0xff] %v930_v42  ;;  %1122 = vst [vmem:[%s1549_s14 + $0x298] sm:$0xff] %v994_v43  ;;  %v931_v50 = vmax.f32 %v643_v44, 0.0  ;;  %v995_v51 = vmax.f32 %v803_v45, 0.0  ;;  %v645_v52 = vadd.f32 %v644_v48, %v1542_v47  ;;  %v805_v53 = vadd.f32 %v804_v49, %v1542_v47 }
 0x109   : > { %v646_v54 = vpop.f32.mrf.mxu0  ;;  %v806_v55 = vpop.f32.mrf.mxu1 }
 0x10a   : > { %1059 = vst [vmem:[%s1549_s14 + $0xa0] sm:$0xff] %v931_v50  ;;  %1123 = vst [vmem:[%s1549_s14 + $0x2a0] sm:$0xff] %v995_v51  ;;  %v932_v56 = vmax.f32 %v645_v52, 0.0  ;;  %v996_v57 = vmax.f32 %v805_v53, 0.0  ;;  %v647_v58 = vadd.f32 %v646_v54, %v1539_v46  ;;  %v807_v59 = vadd.f32 %v806_v55, %v1539_v46 }
 0x10b   : > { %v648_v60 = vpop.f32.mrf.mxu0  ;;  %v808_v61 = vpop.f32.mrf.mxu1 }
 0x10c   : > { %1060 = vst [vmem:[%s1549_s14 + $0xa8] sm:$0xff] %v932_v56  ;;  %1124 = vst [vmem:[%s1549_s14 + $0x2a8] sm:$0xff] %v996_v57  ;;  %v933_v62 = vmax.f32 %v647_v58, 0.0  ;;  %v997_v63 = vmax.f32 %v807_v59, 0.0  ;;  %v649_v0 = vadd.f32 %v648_v60, %v1542_v47  ;;  %v809_v1 = vadd.f32 %v808_v61, %v1542_v47 }
 0x10d   : > { %v652_v2 = vpop.f32.mrf.mxu0  ;;  %v812_v3 = vpop.f32.mrf.mxu1 }
 0x10e   : > { %1061 = vst [vmem:[%s1549_s14 + $0xb0] sm:$0xff] %v933_v62  ;;  %1125 = vst [vmem:[%s1549_s14 + $0x2b0] sm:$0xff] %v997_v63  ;;  %v934_v4 = vmax.f32 %v649_v0, 0.0  ;;  %v998_v5 = vmax.f32 %v809_v1, 0.0  ;;  %v653_v6 = vadd.f32 %v652_v2, %v1539_v46  ;;  %v813_v7 = vadd.f32 %v812_v3, %v1539_v46 }
 0x10f   : > { %v654_v8 = vpop.f32.mrf.mxu0  ;;  %v814_v9 = vpop.f32.mrf.mxu1 }
 0x110   : > { %1062 = vst [vmem:[%s1549_s14 + $0xb8] sm:$0xff] %v934_v4  ;;  %1126 = vst [vmem:[%s1549_s14 + $0x2b8] sm:$0xff] %v998_v5  ;;  %v935_v10 = vmax.f32 %v653_v6, 0.0  ;;  %v999_v11 = vmax.f32 %v813_v7, 0.0  ;;  %v655_v12 = vadd.f32 %v654_v8, %v1542_v47  ;;  %v815_v13 = vadd.f32 %v814_v9, %v1542_v47 }
 0x111   : > { %v656_v14 = vpop.f32.mrf.mxu0  ;;  %v816_v15 = vpop.f32.mrf.mxu1 }
 0x112   : > { %1063 = vst [vmem:[%s1549_s14 + $0xc0] sm:$0xff] %v935_v10  ;;  %1127 = vst [vmem:[%s1549_s14 + $0x2c0] sm:$0xff] %v999_v11  ;;  %v936_v16 = vmax.f32 %v655_v12, 0.0  ;;  %v1000_v17 = vmax.f32 %v815_v13, 0.0  ;;  %v657_v18 = vadd.f32 %v656_v14, %v1539_v46  ;;  %v817_v19 = vadd.f32 %v816_v15, %v1539_v46 }
 0x113   : > { %v658_v20 = vpop.f32.mrf.mxu0  ;;  %v818_v21 = vpop.f32.mrf.mxu1 }
 0x114   : > { %1064 = vst [vmem:[%s1549_s14 + $0xc8] sm:$0xff] %v936_v16  ;;  %1128 = vst [vmem:[%s1549_s14 + $0x2c8] sm:$0xff] %v1000_v17  ;;  %v937_v22 = vmax.f32 %v657_v18, 0.0  ;;  %v1001_v23 = vmax.f32 %v817_v19, 0.0  ;;  %v659_v24 = vadd.f32 %v658_v20, %v1542_v47  ;;  %v819_v25 = vadd.f32 %v818_v21, %v1542_v47 }
 0x115   : > { %v662_v26 = vpop.f32.mrf.mxu0  ;;  %v822_v27 = vpop.f32.mrf.mxu1 }
 0x116   : > { %1065 = vst [vmem:[%s1549_s14 + $0xd0] sm:$0xff] %v937_v22  ;;  %1129 = vst [vmem:[%s1549_s14 + $0x2d0] sm:$0xff] %v1001_v23  ;;  %v938_v28 = vmax.f32 %v659_v24, 0.0  ;;  %v1002_v29 = vmax.f32 %v819_v25, 0.0  ;;  %v663_v30 = vadd.f32 %v662_v26, %v1539_v46  ;;  %v823_v31 = vadd.f32 %v822_v27, %v1539_v46 }
 0x117   : > { %v664_v32 = vpop.f32.mrf.mxu0  ;;  %v824_v33 = vpop.f32.mrf.mxu1 }
 0x118   : > { %1066 = vst [vmem:[%s1549_s14 + $0xd8] sm:$0xff] %v938_v28  ;;  %1130 = vst [vmem:[%s1549_s14 + $0x2d8] sm:$0xff] %v1002_v29  ;;  %v939_v34 = vmax.f32 %v663_v30, 0.0  ;;  %v1003_v35 = vmax.f32 %v823_v31, 0.0  ;;  %v665_v36 = vadd.f32 %v664_v32, %v1542_v47  ;;  %v825_v37 = vadd.f32 %v824_v33, %v1542_v47 }
 0x119   : > { %v666_v38 = vpop.f32.mrf.mxu0  ;;  %v826_v39 = vpop.f32.mrf.mxu1 }
 0x11a   : > { %1067 = vst [vmem:[%s1549_s14 + $0xe0] sm:$0xff] %v939_v34  ;;  %1131 = vst [vmem:[%s1549_s14 + $0x2e0] sm:$0xff] %v1003_v35  ;;  %v940_v40 = vmax.f32 %v665_v36, 0.0  ;;  %v1004_v41 = vmax.f32 %v825_v37, 0.0  ;;  %v667_v42 = vadd.f32 %v666_v38, %v1539_v46  ;;  %v827_v43 = vadd.f32 %v826_v39, %v1539_v46 }
 0x11b   : > { %v668_v44 = vpop.f32.mrf.mxu0  ;;  %v828_v45 = vpop.f32.mrf.mxu1 }
 0x11c   : > { %1068 = vst [vmem:[%s1549_s14 + $0xe8] sm:$0xff] %v940_v40  ;;  %1132 = vst [vmem:[%s1549_s14 + $0x2e8] sm:$0xff] %v1004_v41  ;;  %v941_v48 = vmax.f32 %v667_v42, 0.0  ;;  %v1005_v49 = vmax.f32 %v827_v43, 0.0  ;;  %v669_v50 = vadd.f32 %v668_v44, %v1542_v47  ;;  %v829_v51 = vadd.f32 %v828_v45, %v1542_v47 }
 0x11d   : > { %v672_v52 = vpop.f32.mrf.mxu0  ;;  %v832_v53 = vpop.f32.mrf.mxu1 }
 0x11e   : > { %1069 = vst [vmem:[%s1549_s14 + $0xf0] sm:$0xff] %v941_v48  ;;  %1133 = vst [vmem:[%s1549_s14 + $0x2f0] sm:$0xff] %v1005_v49  ;;  %v942_v54 = vmax.f32 %v669_v50, 0.0  ;;  %v1006_v55 = vmax.f32 %v829_v51, 0.0  ;;  %v673_v56 = vadd.f32 %v672_v52, %v1539_v46  ;;  %v833_v57 = vadd.f32 %v832_v53, %v1539_v46 }
 0x11f   : > { %v674_v58 = vpop.f32.mrf.mxu0  ;;  %v834_v59 = vpop.f32.mrf.mxu1 }
 0x120   : > { %1070 = vst [vmem:[%s1549_s14 + $0xf8] sm:$0xff] %v942_v54  ;;  %1134 = vst [vmem:[%s1549_s14 + $0x2f8] sm:$0xff] %v1006_v55  ;;  %v943_v60 = vmax.f32 %v673_v56, 0.0  ;;  %v1007_v61 = vmax.f32 %v833_v57, 0.0  ;;  %v675_v62 = vadd.f32 %v674_v58, %v1542_v47  ;;  %v835_v63 = vadd.f32 %v834_v59, %v1542_v47 }
 0x121   : > { %v676_v0 = vpop.f32.mrf.mxu0  ;;  %v836_v1 = vpop.f32.mrf.mxu1 }
 0x122   : > { %1071 = vst [vmem:[%s1549_s14 + $0x100] sm:$0xff] %v943_v60  ;;  %1135 = vst [vmem:[%s1549_s14 + $0x300] sm:$0xff] %v1007_v61  ;;  %v944_v2 = vmax.f32 %v675_v62, 0.0  ;;  %v1008_v3 = vmax.f32 %v835_v63, 0.0  ;;  %v677_v4 = vadd.f32 %v676_v0, %v1539_v46  ;;  %v837_v5 = vadd.f32 %v836_v1, %v1539_v46 }
 0x123   : > { %v678_v6 = vpop.f32.mrf.mxu0  ;;  %v838_v7 = vpop.f32.mrf.mxu1 }
 0x124   : > { %1072 = vst [vmem:[%s1549_s14 + $0x108] sm:$0xff] %v944_v2  ;;  %1136 = vst [vmem:[%s1549_s14 + $0x308] sm:$0xff] %v1008_v3  ;;  %v945_v8 = vmax.f32 %v677_v4, 0.0  ;;  %v1009_v9 = vmax.f32 %v837_v5, 0.0  ;;  %v679_v10 = vadd.f32 %v678_v6, %v1542_v47  ;;  %v839_v11 = vadd.f32 %v838_v7, %v1542_v47 }
 0x125   : > { %v682_v12 = vpop.f32.mrf.mxu0  ;;  %v842_v13 = vpop.f32.mrf.mxu1 }
 0x126   : > { %1073 = vst [vmem:[%s1549_s14 + $0x110] sm:$0xff] %v945_v8  ;;  %1137 = vst [vmem:[%s1549_s14 + $0x310] sm:$0xff] %v1009_v9  ;;  %v946_v14 = vmax.f32 %v679_v10, 0.0  ;;  %v1010_v15 = vmax.f32 %v839_v11, 0.0  ;;  %v683_v16 = vadd.f32 %v682_v12, %v1539_v46  ;;  %v843_v17 = vadd.f32 %v842_v13, %v1539_v46 }
 0x127   : > { %v684_v18 = vpop.f32.mrf.mxu0  ;;  %v844_v19 = vpop.f32.mrf.mxu1 }
 0x128   : > { %1074 = vst [vmem:[%s1549_s14 + $0x118] sm:$0xff] %v946_v14  ;;  %1138 = vst [vmem:[%s1549_s14 + $0x318] sm:$0xff] %v1010_v15  ;;  %v947_v20 = vmax.f32 %v683_v16, 0.0  ;;  %v1011_v21 = vmax.f32 %v843_v17, 0.0  ;;  %v685_v22 = vadd.f32 %v684_v18, %v1542_v47  ;;  %v845_v23 = vadd.f32 %v844_v19, %v1542_v47 }
 0x129   : > { %v686_v24 = vpop.f32.mrf.mxu0  ;;  %v846_v25 = vpop.f32.mrf.mxu1 }
 0x12a   : > { %1075 = vst [vmem:[%s1549_s14 + $0x120] sm:$0xff] %v947_v20  ;;  %1139 = vst [vmem:[%s1549_s14 + $0x320] sm:$0xff] %v1011_v21  ;;  %v948_v26 = vmax.f32 %v685_v22, 0.0  ;;  %v1012_v27 = vmax.f32 %v845_v23, 0.0  ;;  %v687_v28 = vadd.f32 %v686_v24, %v1539_v46  ;;  %v847_v29 = vadd.f32 %v846_v25, %v1539_v46 }
 0x12b   : > { %v688_v30 = vpop.f32.mrf.mxu0  ;;  %v848_v31 = vpop.f32.mrf.mxu1 }
 0x12c   : > { %1076 = vst [vmem:[%s1549_s14 + $0x128] sm:$0xff] %v948_v26  ;;  %1140 = vst [vmem:[%s1549_s14 + $0x328] sm:$0xff] %v1012_v27  ;;  %v949_v32 = vmax.f32 %v687_v28, 0.0  ;;  %v1013_v33 = vmax.f32 %v847_v29, 0.0  ;;  %v689_v34 = vadd.f32 %v688_v30, %v1542_v47  ;;  %v849_v35 = vadd.f32 %v848_v31, %v1542_v47 }
 0x12d   : > { %v692_v36 = vpop.f32.mrf.mxu0  ;;  %v852_v37 = vpop.f32.mrf.mxu1 }
 0x12e   : > { %1077 = vst [vmem:[%s1549_s14 + $0x130] sm:$0xff] %v949_v32  ;;  %1141 = vst [vmem:[%s1549_s14 + $0x330] sm:$0xff] %v1013_v33  ;;  %v950_v38 = vmax.f32 %v689_v34, 0.0  ;;  %v1014_v39 = vmax.f32 %v849_v35, 0.0  ;;  %v693_v40 = vadd.f32 %v692_v36, %v1539_v46  ;;  %v853_v41 = vadd.f32 %v852_v37, %v1539_v46 }
 0x12f   : > { %v694_v42 = vpop.f32.mrf.mxu0  ;;  %v854_v43 = vpop.f32.mrf.mxu1 }
 0x130   : > { %1078 = vst [vmem:[%s1549_s14 + $0x138] sm:$0xff] %v950_v38  ;;  %1142 = vst [vmem:[%s1549_s14 + $0x338] sm:$0xff] %v1014_v39  ;;  %v951_v44 = vmax.f32 %v693_v40, 0.0  ;;  %v1015_v45 = vmax.f32 %v853_v41, 0.0  ;;  %v695_v48 = vadd.f32 %v694_v42, %v1542_v47  ;;  %v855_v49 = vadd.f32 %v854_v43, %v1542_v47 }
 0x131   : > { %v696_v50 = vpop.f32.mrf.mxu0  ;;  %v856_v51 = vpop.f32.mrf.mxu1 }
 0x132   : > { %1079 = vst [vmem:[%s1549_s14 + $0x140] sm:$0xff] %v951_v44  ;;  %1143 = vst [vmem:[%s1549_s14 + $0x340] sm:$0xff] %v1015_v45  ;;  %v952_v52 = vmax.f32 %v695_v48, 0.0  ;;  %v1016_v53 = vmax.f32 %v855_v49, 0.0  ;;  %v697_v54 = vadd.f32 %v696_v50, %v1539_v46  ;;  %v857_v55 = vadd.f32 %v856_v51, %v1539_v46 }
 0x133   : > { %v698_v56 = vpop.f32.mrf.mxu0  ;;  %v858_v57 = vpop.f32.mrf.mxu1 }
 0x134   : > { %1080 = vst [vmem:[%s1549_s14 + $0x148] sm:$0xff] %v952_v52  ;;  %1144 = vst [vmem:[%s1549_s14 + $0x348] sm:$0xff] %v1016_v53  ;;  %v953_v58 = vmax.f32 %v697_v54, 0.0  ;;  %v1017_v59 = vmax.f32 %v857_v55, 0.0  ;;  %v699_v60 = vadd.f32 %v698_v56, %v1542_v47  ;;  %v859_v61 = vadd.f32 %v858_v57, %v1542_v47 }
 0x135   : > { %v702_v62 = vpop.f32.mrf.mxu0  ;;  %v862_v63 = vpop.f32.mrf.mxu1 }
 0x136   : > { %1081 = vst [vmem:[%s1549_s14 + $0x150] sm:$0xff] %v953_v58  ;;  %1145 = vst [vmem:[%s1549_s14 + $0x350] sm:$0xff] %v1017_v59  ;;  %v954_v0 = vmax.f32 %v699_v60, 0.0  ;;  %v1018_v1 = vmax.f32 %v859_v61, 0.0  ;;  %v703_v2 = vadd.f32 %v702_v62, %v1539_v46  ;;  %v863_v3 = vadd.f32 %v862_v63, %v1539_v46 }
 0x137   : > { %v704_v4 = vpop.f32.mrf.mxu0  ;;  %v864_v5 = vpop.f32.mrf.mxu1 }
 0x138   : > { %1082 = vst [vmem:[%s1549_s14 + $0x158] sm:$0xff] %v954_v0  ;;  %1146 = vst [vmem:[%s1549_s14 + $0x358] sm:$0xff] %v1018_v1  ;;  %v955_v6 = vmax.f32 %v703_v2, 0.0  ;;  %v1019_v7 = vmax.f32 %v863_v3, 0.0  ;;  %v705_v8 = vadd.f32 %v704_v4, %v1542_v47  ;;  %v865_v9 = vadd.f32 %v864_v5, %v1542_v47 }
 0x139   : > { %v706_v10 = vpop.f32.mrf.mxu0  ;;  %v866_v11 = vpop.f32.mrf.mxu1 }
 0x13a   : > { %1083 = vst [vmem:[%s1549_s14 + $0x160] sm:$0xff] %v955_v6  ;;  %1147 = vst [vmem:[%s1549_s14 + $0x360] sm:$0xff] %v1019_v7  ;;  %v956_v12 = vmax.f32 %v705_v8, 0.0  ;;  %v1020_v13 = vmax.f32 %v865_v9, 0.0  ;;  %v707_v14 = vadd.f32 %v706_v10, %v1539_v46  ;;  %v867_v15 = vadd.f32 %v866_v11, %v1539_v46 }
 0x13b   : > { %v708_v16 = vpop.f32.mrf.mxu0  ;;  %v868_v17 = vpop.f32.mrf.mxu1 }
 0x13c   : > { %1084 = vst [vmem:[%s1549_s14 + $0x168] sm:$0xff] %v956_v12  ;;  %1148 = vst [vmem:[%s1549_s14 + $0x368] sm:$0xff] %v1020_v13  ;;  %v957_v18 = vmax.f32 %v707_v14, 0.0  ;;  %v1021_v19 = vmax.f32 %v867_v15, 0.0  ;;  %v709_v20 = vadd.f32 %v708_v16, %v1542_v47  ;;  %v869_v21 = vadd.f32 %v868_v17, %v1542_v47 }
 0x13d   : > { %v712_v22 = vpop.f32.mrf.mxu0  ;;  %v872_v23 = vpop.f32.mrf.mxu1 }
 0x13e   : > { %1085 = vst [vmem:[%s1549_s14 + $0x170] sm:$0xff] %v957_v18  ;;  %1149 = vst [vmem:[%s1549_s14 + $0x370] sm:$0xff] %v1021_v19  ;;  %v958_v24 = vmax.f32 %v709_v20, 0.0  ;;  %v1022_v25 = vmax.f32 %v869_v21, 0.0  ;;  %v713_v26 = vadd.f32 %v712_v22, %v1539_v46  ;;  %v873_v27 = vadd.f32 %v872_v23, %v1539_v46 }
 0x13f   : > { %v714_v28 = vpop.f32.mrf.mxu0  ;;  %v874_v29 = vpop.f32.mrf.mxu1 }
 0x140   : > { %1086 = vst [vmem:[%s1549_s14 + $0x178] sm:$0xff] %v958_v24  ;;  %1150 = vst [vmem:[%s1549_s14 + $0x378] sm:$0xff] %v1022_v25  ;;  %v959_v30 = vmax.f32 %v713_v26, 0.0  ;;  %v1023_v31 = vmax.f32 %v873_v27, 0.0  ;;  %v715_v32 = vadd.f32 %v714_v28, %v1542_v47  ;;  %v875_v33 = vadd.f32 %v874_v29, %v1542_v47 }
 0x141   : > { %v716_v34 = vpop.f32.mrf.mxu0  ;;  %v876_v35 = vpop.f32.mrf.mxu1 }
 0x142   : > { %1087 = vst [vmem:[%s1549_s14 + $0x180] sm:$0xff] %v959_v30  ;;  %1151 = vst [vmem:[%s1549_s14 + $0x380] sm:$0xff] %v1023_v31  ;;  %v960_v36 = vmax.f32 %v715_v32, 0.0  ;;  %v1024_v37 = vmax.f32 %v875_v33, 0.0  ;;  %v717_v38 = vadd.f32 %v716_v34, %v1539_v46  ;;  %v877_v39 = vadd.f32 %v876_v35, %v1539_v46 }
 0x143   : > { %v718_v40 = vpop.f32.mrf.mxu0  ;;  %v878_v41 = vpop.f32.mrf.mxu1 }
 0x144   : > { %1088 = vst [vmem:[%s1549_s14 + $0x188] sm:$0xff] %v960_v36  ;;  %1152 = vst [vmem:[%s1549_s14 + $0x388] sm:$0xff] %v1024_v37  ;;  %v961_v42 = vmax.f32 %v717_v38, 0.0  ;;  %v1025_v43 = vmax.f32 %v877_v39, 0.0  ;;  %v719_v44 = vadd.f32 %v718_v40, %v1542_v47  ;;  %v879_v45 = vadd.f32 %v878_v41, %v1542_v47 }
 0x145   : > { %v722_v48 = vpop.f32.mrf.mxu0  ;;  %v882_v49 = vpop.f32.mrf.mxu1 }
 0x146   : > { %1089 = vst [vmem:[%s1549_s14 + $0x190] sm:$0xff] %v961_v42  ;;  %1153 = vst [vmem:[%s1549_s14 + $0x390] sm:$0xff] %v1025_v43  ;;  %v962_v50 = vmax.f32 %v719_v44, 0.0  ;;  %v1026_v51 = vmax.f32 %v879_v45, 0.0  ;;  %v723_v52 = vadd.f32 %v722_v48, %v1539_v46  ;;  %v883_v53 = vadd.f32 %v882_v49, %v1539_v46 }
 0x147   : > { %v724_v54 = vpop.f32.mrf.mxu0  ;;  %v884_v55 = vpop.f32.mrf.mxu1 }
 0x148   : > { %1090 = vst [vmem:[%s1549_s14 + $0x198] sm:$0xff] %v962_v50  ;;  %1154 = vst [vmem:[%s1549_s14 + $0x398] sm:$0xff] %v1026_v51  ;;  %v963_v56 = vmax.f32 %v723_v52, 0.0  ;;  %v1027_v57 = vmax.f32 %v883_v53, 0.0  ;;  %v725_v58 = vadd.f32 %v724_v54, %v1542_v47  ;;  %v885_v59 = vadd.f32 %v884_v55, %v1542_v47 }
 0x149   : > { %v726_v60 = vpop.f32.mrf.mxu0  ;;  %v886_v61 = vpop.f32.mrf.mxu1 }
 0x14a   : > { %1091 = vst [vmem:[%s1549_s14 + $0x1a0] sm:$0xff] %v963_v56  ;;  %1155 = vst [vmem:[%s1549_s14 + $0x3a0] sm:$0xff] %v1027_v57  ;;  %v964_v62 = vmax.f32 %v725_v58, 0.0  ;;  %v1028_v63 = vmax.f32 %v885_v59, 0.0  ;;  %v727_v0 = vadd.f32 %v726_v60, %v1539_v46  ;;  %v887_v1 = vadd.f32 %v886_v61, %v1539_v46 }
 0x14b   : > { %v728_v2 = vpop.f32.mrf.mxu0  ;;  %v888_v3 = vpop.f32.mrf.mxu1 }
 0x14c   : > { %1092 = vst [vmem:[%s1549_s14 + $0x1a8] sm:$0xff] %v964_v62  ;;  %1156 = vst [vmem:[%s1549_s14 + $0x3a8] sm:$0xff] %v1028_v63  ;;  %v965_v4 = vmax.f32 %v727_v0, 0.0  ;;  %v1029_v5 = vmax.f32 %v887_v1, 0.0  ;;  %v729_v6 = vadd.f32 %v728_v2, %v1542_v47  ;;  %v889_v7 = vadd.f32 %v888_v3, %v1542_v47 }
 0x14d   : > { %v732_v8 = vpop.f32.mrf.mxu0  ;;  %v892_v9 = vpop.f32.mrf.mxu1 }
 0x14e   : > { %1093 = vst [vmem:[%s1549_s14 + $0x1b0] sm:$0xff] %v965_v4  ;;  %1157 = vst [vmem:[%s1549_s14 + $0x3b0] sm:$0xff] %v1029_v5  ;;  %v966_v10 = vmax.f32 %v729_v6, 0.0  ;;  %v1030_v11 = vmax.f32 %v889_v7, 0.0  ;;  %v733_v12 = vadd.f32 %v732_v8, %v1539_v46  ;;  %v893_v13 = vadd.f32 %v892_v9, %v1539_v46 }
 0x14f   : > { %v734_v14 = vpop.f32.mrf.mxu0  ;;  %v894_v15 = vpop.f32.mrf.mxu1 }
 0x150   : > { %1094 = vst [vmem:[%s1549_s14 + $0x1b8] sm:$0xff] %v966_v10  ;;  %1158 = vst [vmem:[%s1549_s14 + $0x3b8] sm:$0xff] %v1030_v11  ;;  %v967_v16 = vmax.f32 %v733_v12, 0.0  ;;  %v1031_v17 = vmax.f32 %v893_v13, 0.0  ;;  %v735_v18 = vadd.f32 %v734_v14, %v1542_v47  ;;  %v895_v19 = vadd.f32 %v894_v15, %v1542_v47 }
 0x151   : > { %v736_v20 = vpop.f32.mrf.mxu0  ;;  %v896_v21 = vpop.f32.mrf.mxu1 }
 0x152   : > { %1095 = vst [vmem:[%s1549_s14 + $0x1c0] sm:$0xff] %v967_v16  ;;  %1159 = vst [vmem:[%s1549_s14 + $0x3c0] sm:$0xff] %v1031_v17  ;;  %v968_v22 = vmax.f32 %v735_v18, 0.0  ;;  %v1032_v23 = vmax.f32 %v895_v19, 0.0  ;;  %v737_v24 = vadd.f32 %v736_v20, %v1539_v46  ;;  %v897_v25 = vadd.f32 %v896_v21, %v1539_v46 }
 0x153   : > { %v738_v26 = vpop.f32.mrf.mxu0  ;;  %v898_v27 = vpop.f32.mrf.mxu1 }
 0x154   : > { %1096 = vst [vmem:[%s1549_s14 + $0x1c8] sm:$0xff] %v968_v22  ;;  %1160 = vst [vmem:[%s1549_s14 + $0x3c8] sm:$0xff] %v1032_v23  ;;  %v969_v28 = vmax.f32 %v737_v24, 0.0  ;;  %v1033_v29 = vmax.f32 %v897_v25, 0.0  ;;  %v739_v30 = vadd.f32 %v738_v26, %v1542_v47  ;;  %v899_v31 = vadd.f32 %v898_v27, %v1542_v47 }
 0x155   : > { %v742_v32 = vpop.f32.mrf.mxu0  ;;  %v902_v33 = vpop.f32.mrf.mxu1 }
 0x156   : > { %1097 = vst [vmem:[%s1549_s14 + $0x1d0] sm:$0xff] %v969_v28  ;;  %1161 = vst [vmem:[%s1549_s14 + $0x3d0] sm:$0xff] %v1033_v29  ;;  %v970_v34 = vmax.f32 %v739_v30, 0.0  ;;  %v1034_v35 = vmax.f32 %v899_v31, 0.0  ;;  %v743_v36 = vadd.f32 %v742_v32, %v1539_v46  ;;  %v903_v37 = vadd.f32 %v902_v33, %v1539_v46 }
 0x157   : > { %v744_v38 = vpop.f32.mrf.mxu0  ;;  %v904_v39 = vpop.f32.mrf.mxu1 }
 0x158   : > { %1098 = vst [vmem:[%s1549_s14 + $0x1d8] sm:$0xff] %v970_v34  ;;  %1162 = vst [vmem:[%s1549_s14 + $0x3d8] sm:$0xff] %v1034_v35  ;;  %v971_v40 = vmax.f32 %v743_v36, 0.0  ;;  %v1035_v41 = vmax.f32 %v903_v37, 0.0  ;;  %v745_v42 = vadd.f32 %v744_v38, %v1542_v47  ;;  %v905_v43 = vadd.f32 %v904_v39, %v1542_v47 }
 0x159   : > { %v746_v44 = vpop.f32.mrf.mxu0  ;;  %v906_v45 = vpop.f32.mrf.mxu1 }
 0x15a   : > { %1099 = vst [vmem:[%s1549_s14 + $0x1e0] sm:$0xff] %v971_v40  ;;  %1163 = vst [vmem:[%s1549_s14 + $0x3e0] sm:$0xff] %v1035_v41  ;;  %v972_v48 = vmax.f32 %v745_v42, 0.0  ;;  %v1036_v49 = vmax.f32 %v905_v43, 0.0  ;;  %v747_v50 = vadd.f32 %v746_v44, %v1539_v46  ;;  %v907_v51 = vadd.f32 %v906_v45, %v1539_v46 }
 0x15b   : > { %v748_v52 = vpop.f32.mrf.mxu0  ;;  %v908_v53 = vpop.f32.mrf.mxu1 }
 0x15c   : > { %1100 = vst [vmem:[%s1549_s14 + $0x1e8] sm:$0xff] %v972_v48  ;;  %1164 = vst [vmem:[%s1549_s14 + $0x3e8] sm:$0xff] %v1036_v49  ;;  %v973_v54 = vmax.f32 %v747_v50, 0.0  ;;  %v1037_v55 = vmax.f32 %v907_v51, 0.0  ;;  %v749_v56 = vadd.f32 %v748_v52, %v1542_v47  ;;  %v909_v57 = vadd.f32 %v908_v53, %v1542_v47 }
 0x15e   : > { %1101 = vst [vmem:[%s1549_s14 + $0x1f0] sm:$0xff] %v973_v54  ;;  %1165 = vst [vmem:[%s1549_s14 + $0x3f0] sm:$0xff] %v1037_v55  ;;  %v974_v58 = vmax.f32 %v749_v56, 0.0  ;;  %v1038_v59 = vmax.f32 %v909_v57, 0.0 }
 0x160   : > { %1102 = vst [vmem:[%s1549_s14 + $0x1f8] sm:$0xff] %v974_v58  ;;  %1166 = vst [vmem:[%s1549_s14 + $0x3f8] sm:$0xff] %v1038_v59 }
 0x161 PF: > { %s13_s12 = sadd.s32 1, %s1377_s12  }
 0x162   : > { %p10_p4 = scmp.ge.s32.totalorder %s13_s12, 6  }
 0x164   :  { %12 = sbr.rel (!%p10_p4) target bundleno = 1 (0x1), region = 62 }

// kernel: _lambda_.25
= control target key start
LH: loop header
LB: loop body
LE: loop exit
PB: predicated region body
PF: predicated region fallthrough
CT: control target
= control target key end

     0   :  { %s1447_s12 = smov 0   ;;  %s1816_s0 = inlined_call_operand.vmem [shape: bf16[2048,256], index: 0, kind: input, shape index: {}]   ;;  %s1817_s1 = inlined_call_operand.vmem [shape: bf16[256,64], index: 1, kind: input, shape index: {}]   ;;  %s1818_s2 = inlined_call_operand.vmem [shape: f32[1,64], index: 2, kind: input, shape index: {}]   ;;  %s1819_s3 = inlined_call_operand.vmem [shape: f32[2048,64], index: 3, kind: output, shape index: {}]  }
   0x1 LB: > { %s1171_s13 = sadd.s32 4294967295, %s1424_s12   ;;  %p1175_p0 = scmp.ge.s32.totalorder %s1424_s12, 1  ;;  %s1424_s12 = sphi %s1447_s12, %s13_s12  }
   0x2   : > { %p139_p1 = scmp.lt.s32.totalorder %s1424_s12, 5 }
   0x4   : > { %p140_p2 = pnand %p1175_p0, %p139_p1 }
   0x5   : > { %s1176_s16 = sshll.u32 (!%p140_p2), %s1171_s13, 6 }
   0x6   : > { %143 = sbr.rel (%p140_p2) target bundleno = 398 (0x18e), region = 32  ;;  %p165_p3 = scmp.lt.s32.totalorder (!%p140_p2), %s1176_s16, 255 }
   0xb   : > { %v1306_v0 = vld [vmem:[%s1817_s1 + $0x38] sm:$0xff]   ;;  %v1426_v1 = vmov 0   ;;  %v1307_v2 = vld [vmem:[%s1817_s1 + $0x30] sm:$0xff]   ;;  %v1308_v3 = vld [vmem:[%s1817_s1 + $0x28] sm:$0xff]   ;;  %s1821_s16 = smov (!%p165_p3, %s1176_s16), 255  ;;  %vm1050_vm0 = vcmask 523264  }
   0xc   : > { %697 = vmatprep.subr.bf16.mxu0 %v1426_v1  ;;  %1265 = vmatprep.subr.bf16.mxu1 %v1426_v1  ;;  %v1309_v4 = vld [vmem:[%s1817_s1 + $0x20] sm:$0xff]   ;;  %s1264_s23 = sshll.u32 %s1821_s16, 3  ;;  %v1310_v5 = vld [vmem:[%s1817_s1 + $0x18] sm:$0xff]   ;;  %v1311_v7 = vld [vmem:[%s1817_s1 + $0x10] sm:$0xff]  }
   0xd   : > { %698 = vmatpush1.bf16.msra.mxu0 %v1306_v0  ;;  %1281 = vmatpush1.bf16.msra.mxu1 %v1306_v0  ;;  %s1486_s28 = scalar_lea.vmem %s1816_s0, %s1264_s23  ;;  %v1312_v9 = vld [vmem:[%s1817_s1 + $0x8] sm:$0xff]   ;;  %v1313_v10 = vld [vmem:[%s1817_s1] sm:$0xff]   ;;  %v1314_v11 = vld [vmem:[%s1817_s1 + $0x78] sm:$0xff]   ;;  %s1621_s5 = scalar_lea.vmem %s1819_s3, %s1264_s23 }
   0xe   : > { %699 = vmatprep.subr.bf16.mxu0 %v1426_v1  ;;  %1266 = vmatprep.subr.bf16.mxu1 %v1426_v1  ;;  %v1324_v6 = vld [vmem:[%s1486_s28 + $0x4] ss:$8 sps:$4 sm:$0xff]   ;;  %v1315_v12 = vld [vmem:[%s1817_s1 + $0x70] sm:$0xff]   ;;  %v1318_v15 = vld [vmem:[%s1817_s1 + $0x58] sm:$0xff]  }
   0xf   : > { %v1327_v8 = vld [vmem:[%s1486_s28 + $0x104] ss:$8 sps:$4 sm:$0xff]   ;;  %729 = vmatprep.mubr.bf16.mxu0 %v1324_v6  ;;  %v1319_v16 = vld [vmem:[%s1817_s1 + $0x50] sm:$0xff]   ;;  %v1322_v19 = vld [vmem:[%s1486_s28] ss:$8 sps:$4 sm:$0xff]  }
  0x10   : > { %857 = vmatprep.mubr.bf16.mxu1 %v1327_v8  ;;  %v1316_v13 = vld [vmem:[%s1817_s1 + $0x68] sm:$0xff]   ;;  %v1317_v14 = vld [vmem:[%s1817_s1 + $0x60] sm:$0xff]   ;;  %v1328_v21 = vld [vmem:[%s1486_s28 + $0x14] ss:$8 sps:$4 sm:$0xff]  }
  0x11   : > { %700 = vmatpush1.bf16.msra.mxu0 %v1307_v2  ;;  %1282 = vmatpush1.bf16.msra.mxu1 %v1307_v2  ;;  %v1320_v17 = vld [vmem:[%s1817_s1 + $0x48] sm:$0xff]   ;;  %v1321_v18 = vld [vmem:[%s1817_s1 + $0x40] sm:$0xff]   ;;  %v1330_v22 = vld [vmem:[%s1486_s28 + $0x114] ss:$8 sps:$4 sm:$0xff]  }
  0x12   : > { %701 = vmatprep.subr.bf16.mxu0 %v1426_v1  ;;  %1267 = vmatprep.subr.bf16.mxu1 %v1426_v1  ;;  %v1325_v20 = vld [vmem:[%s1486_s28 + $0x100] ss:$8 sps:$4 sm:$0xff]   ;;  %v1332_v23 = vld [vmem:[%s1486_s28 + $0x10] ss:$8 sps:$4 sm:$0xff]   ;;  %v1334_v25 = vld [vmem:[%s1486_s28 + $0x24] ss:$8 sps:$4 sm:$0xff]  }
  0x13   : > { %v1333_v24 = vld [vmem:[%s1486_s28 + $0x110] ss:$8 sps:$4 sm:$0xff]   ;;  %v1336_v26 = vld [vmem:[%s1486_s28 + $0x124] ss:$8 sps:$4 sm:$0xff]   ;;  %v1338_v27 = vld [vmem:[%s1486_s28 + $0x20] ss:$8 sps:$4 sm:$0xff]  }
  0x14   : > { %v1339_v28 = vld [vmem:[%s1486_s28 + $0x120] ss:$8 sps:$4 sm:$0xff]   ;;  %v1340_v29 = vld [vmem:[%s1486_s28 + $0x34] ss:$8 sps:$4 sm:$0xff]   ;;  %v1344_v31 = vld [vmem:[%s1486_s28 + $0x30] ss:$8 sps:$4 sm:$0xff]  }
  0x15   : > { %702 = vmatpush1.bf16.msra.mxu0 %v1308_v3  ;;  %1283 = vmatpush1.bf16.msra.mxu1 %v1308_v3  ;;  %v1342_v30 = vld [vmem:[%s1486_s28 + $0x134] ss:$8 sps:$4 sm:$0xff]   ;;  %v1345_v32 = vld [vmem:[%s1486_s28 + $0x130] ss:$8 sps:$4 sm:$0xff]   ;;  %v1346_v33 = vld [vmem:[%s1486_s28 + $0x44] ss:$8 sps:$4 sm:$0xff]  }
  0x16   : > { %703 = vmatprep.subr.bf16.mxu0 %v1426_v1  ;;  %1268 = vmatprep.subr.bf16.mxu1 %v1426_v1  ;;  %v1348_v34 = vld [vmem:[%s1486_s28 + $0x144] ss:$8 sps:$4 sm:$0xff]   ;;  %v1350_v35 = vld [vmem:[%s1486_s28 + $0x40] ss:$8 sps:$4 sm:$0xff]   ;;  %v1352_v37 = vld [vmem:[%s1486_s28 + $0x54] ss:$8 sps:$4 sm:$0xff]  }
  0x17   : > { %v1351_v36 = vld [vmem:[%s1486_s28 + $0x140] ss:$8 sps:$4 sm:$0xff]   ;;  %v1354_v38 = vld [vmem:[%s1486_s28 + $0x154] ss:$8 sps:$4 sm:$0xff]   ;;  %v1356_v39 = vld [vmem:[%s1486_s28 + $0x50] ss:$8 sps:$4 sm:$0xff]  }
  0x18   : > { %v1357_v40 = vld [vmem:[%s1486_s28 + $0x150] ss:$8 sps:$4 sm:$0xff]   ;;  %v1358_v41 = vld [vmem:[%s1486_s28 + $0x64] ss:$8 sps:$4 sm:$0xff]   ;;  %v1362_v43 = vld [vmem:[%s1486_s28 + $0x60] ss:$8 sps:$4 sm:$0xff]  }
  0x19   : > { %704 = vmatpush1.bf16.msra.mxu0 %v1309_v4  ;;  %1284 = vmatpush1.bf16.msra.mxu1 %v1309_v4  ;;  %v1360_v42 = vld [vmem:[%s1486_s28 + $0x164] ss:$8 sps:$4 sm:$0xff]   ;;  %v1363_v44 = vld [vmem:[%s1486_s28 + $0x160] ss:$8 sps:$4 sm:$0xff]   ;;  %v1364_v45 = vld [vmem:[%s1486_s28 + $0x74] ss:$8 sps:$4 sm:$0xff]  }
  0x1a   : > { %705 = vmatprep.subr.bf16.mxu0 %v1426_v1  ;;  %1269 = vmatprep.subr.bf16.mxu1 %v1426_v1  ;;  %v1366_v46 = vld [vmem:[%s1486_s28 + $0x174] ss:$8 sps:$4 sm:$0xff]   ;;  %v1368_v47 = vld [vmem:[%s1486_s28 + $0x70] ss:$8 sps:$4 sm:$0xff]   ;;  %v1370_v49 = vld [vmem:[%s1486_s28 + $0x84] ss:$8 sps:$4 sm:$0xff]  }
  0x1b   : > { %v1369_v48 = vld [vmem:[%s1486_s28 + $0x170] ss:$8 sps:$4 sm:$0xff]   ;;  %v1372_v50 = vld [vmem:[%s1486_s28 + $0x184] ss:$8 sps:$4 sm:$0xff]   ;;  %v1374_v51 = vld [vmem:[%s1486_s28 + $0x80] ss:$8 sps:$4 sm:$0xff]  }
  0x1c   : > { %v1375_v52 = vld [vmem:[%s1486_s28 + $0x180] ss:$8 sps:$4 sm:$0xff]   ;;  %v1376_v53 = vld [vmem:[%s1486_s28 + $0x94] ss:$8 sps:$4 sm:$0xff]   ;;  %v1380_v55 = vld [vmem:[%s1486_s28 + $0x90] ss:$8 sps:$4 sm:$0xff]  }
  0x1d   : > { %706 = vmatpush1.bf16.msra.mxu0 %v1310_v5  ;;  %1285 = vmatpush1.bf16.msra.mxu1 %v1310_v5  ;;  %v1378_v54 = vld [vmem:[%s1486_s28 + $0x194] ss:$8 sps:$4 sm:$0xff]   ;;  %v1381_v56 = vld [vmem:[%s1486_s28 + $0x190] ss:$8 sps:$4 sm:$0xff]   ;;  %v1382_v57 = vld [vmem:[%s1486_s28 + $0xa4] ss:$8 sps:$4 sm:$0xff]  }
  0x1e   : > { %707 = vmatprep.subr.bf16.mxu0 %v1426_v1  ;;  %1270 = vmatprep.subr.bf16.mxu1 %v1426_v1  ;;  %v1384_v58 = vld [vmem:[%s1486_s28 + $0x1a4] ss:$8 sps:$4 sm:$0xff]   ;;  %v1386_v59 = vld [vmem:[%s1486_s28 + $0xa0] ss:$8 sps:$4 sm:$0xff]   ;;  %v1388_v61 = vld [vmem:[%s1486_s28 + $0xb4] ss:$8 sps:$4 sm:$0xff]  }
  0x1f   : > { %v1387_v60 = vld [vmem:[%s1486_s28 + $0x1a0] ss:$8 sps:$4 sm:$0xff]   ;;  %v1390_v62 = vld [vmem:[%s1486_s28 + $0x1b4] ss:$8 sps:$4 sm:$0xff]   ;;  %v1392_v63 = vld [vmem:[%s1486_s28 + $0xb0] ss:$8 sps:$4 sm:$0xff]  }
  0x20   : > { %v1393_v0 = vld [vmem:[%s1486_s28 + $0x1b0] ss:$8 sps:$4 sm:$0xff]   ;;  %v1396_v2 = vld [vmem:[%s1486_s28 + $0x1c4] ss:$8 sps:$4 sm:$0xff]   ;;  %v1398_v3 = vld [vmem:[%s1486_s28 + $0xc0] ss:$8 sps:$4 sm:$0xff]  }
  0x21   : > { %708 = vmatpush1.bf16.msra.mxu0 %v1311_v7  ;;  %1286 = vmatpush1.bf16.msra.mxu1 %v1311_v7  ;;  %v1399_v4 = vld [vmem:[%s1486_s28 + $0x1c0] ss:$8 sps:$4 sm:$0xff]   ;;  %v1400_v5 = vld [vmem:[%s1486_s28 + $0xd4] ss:$8 sps:$4 sm:$0xff]   ;;  %v1404_v7 = vld [vmem:[%s1486_s28 + $0xd0] ss:$8 sps:$4 sm:$0xff]  }
  0x22   : > { %709 = vmatprep.subr.bf16.mxu0 %v1426_v1  ;;  %1271 = vmatprep.subr.bf16.mxu1 %v1426_v1  ;;  %v1402_v6 = vld [vmem:[%s1486_s28 + $0x1d4] ss:$8 sps:$4 sm:$0xff]   ;;  %v1405_v8 = vld [vmem:[%s1486_s28 + $0x1d0] ss:$8 sps:$4 sm:$0xff]  }
  0x25   : > { %710 = vmatpush1.bf16.msra.mxu0 %v1312_v9  ;;  %1287 = vmatpush1.bf16.msra.mxu1 %v1312_v9  ;;  %v1406_v9 = vld [vmem:[%s1486_s28 + $0xe4] ss:$8 sps:$4 sm:$0xff]  }
  0x26   : > { %711 = vmatprep.subr.bf16.mxu0 %v1426_v1  ;;  %1272 = vmatprep.subr.bf16.mxu1 %v1426_v1 }
  0x29   : > { %712 = vmatpush1.bf16.msra.mxu0 %v1313_v10  ;;  %1288 = vmatpush1.bf16.msra.mxu1 %v1313_v10  ;;  %v1408_v10 = vld [vmem:[%s1486_s28 + $0x1e4] ss:$8 sps:$4 sm:$0xff]  }
  0x2a   : > { %713 = vmatprep.subr.bf16.mxu0 %v1426_v1  ;;  %1273 = vmatprep.subr.bf16.mxu1 %v1426_v1 }
  0x2d   : > { %714 = vmatpush2.bf16.msra.mxu0 %v1314_v11  ;;  %1289 = vmatpush2.bf16.msra.mxu1 %v1314_v11  ;;  %v1410_v11 = vld [vmem:[%s1486_s28 + $0xe0] ss:$8 sps:$4 sm:$0xff]  }
  0x2e   : > { %715 = vmatprep.subr.bf16.mxu0 %v1426_v1  ;;  %1274 = vmatprep.subr.bf16.mxu1 %v1426_v1 }
  0x31   : > { %716 = vmatpush2.bf16.msra.mxu0 %v1315_v12  ;;  %1290 = vmatpush2.bf16.msra.mxu1 %v1315_v12  ;;  %v1411_v12 = vld [vmem:[%s1486_s28 + $0x1e0] ss:$8 sps:$4 sm:$0xff]  }
  0x32   : > { %717 = vmatprep.subr.bf16.mxu0 %v1426_v1  ;;  %1275 = vmatprep.subr.bf16.mxu1 %v1426_v1 }
  0x35   : > { %718 = vmatpush2.bf16.msra.mxu0 %v1316_v13  ;;  %1291 = vmatpush2.bf16.msra.mxu1 %v1316_v13  ;;  %v1412_v13 = vld [vmem:[%s1486_s28 + $0xf4] ss:$8 sps:$4 sm:$0xff]  }
  0x36   : > { %719 = vmatprep.subr.bf16.mxu0 %v1426_v1  ;;  %1276 = vmatprep.subr.bf16.mxu1 %v1426_v1 }
  0x39   : > { %720 = vmatpush2.bf16.msra.mxu0 %v1317_v14  ;;  %1292 = vmatpush2.bf16.msra.mxu1 %v1317_v14  ;;  %v1414_v14 = vld [vmem:[%s1486_s28 + $0x1f4] ss:$8 sps:$4 sm:$0xff]  }
  0x3a   : > { %721 = vmatprep.subr.bf16.mxu0 %v1426_v1  ;;  %1277 = vmatprep.subr.bf16.mxu1 %v1426_v1 }
  0x3d   : > { %722 = vmatpush2.bf16.msra.mxu0 %v1318_v15  ;;  %1293 = vmatpush2.bf16.msra.mxu1 %v1318_v15  ;;  %v1416_v15 = vld [vmem:[%s1486_s28 + $0xf0] ss:$8 sps:$4 sm:$0xff]  }
  0x3e   : > { %723 = vmatprep.subr.bf16.mxu0 %v1426_v1  ;;  %1278 = vmatprep.subr.bf16.mxu1 %v1426_v1 }
  0x41   : > { %724 = vmatpush2.bf16.msra.mxu0 %v1319_v16  ;;  %1294 = vmatpush2.bf16.msra.mxu1 %v1319_v16  ;;  %v1417_v16 = vld [vmem:[%s1486_s28 + $0x1f0] ss:$8 sps:$4 sm:$0xff]  }
  0x42   : > { %725 = vmatprep.subr.bf16.mxu0 %v1426_v1  ;;  %1279 = vmatprep.subr.bf16.mxu1 %v1426_v1 }
  0x45   : > { %726 = vmatpush2.bf16.msra.mxu0 %v1320_v17  ;;  %1295 = vmatpush2.bf16.msra.mxu1 %v1320_v17  ;;  %v1612_v17 = vld [vmem:[%s1818_s2] ss:$0 sm:$0xff] }
  0x46   : > { %727 = vmatprep.subr.bf16.mxu0 %v1426_v1  ;;  %1280 = vmatprep.subr.bf16.mxu1 %v1426_v1  ;;  %v1394_v1 = vld [vmem:[%s1486_s28 + $0xc4] ss:$8 sps:$4 sm:$0xff]  }
  0x49   : > { %728 = vmatpush2.bf16.msra.mxu0 %v1321_v18  ;;  %1296 = vmatpush2.bf16.msra.mxu1 %v1321_v18 }
  0x4c   : > { %730 = vmatmul.mubr.bf16.vlgmr.msra.gmra.mxu0 %v1322_v19  ;;  %858 = vmatmul.mubr.bf16.vlgmr.msra.gmra.mxu1 %v1325_v20 }
  0x4d   : > { %737 = vmatprep.mubr.bf16.mxu0 %v1328_v21  ;;  %865 = vmatprep.mubr.bf16.mxu1 %v1330_v22 }
  0x54   : > { %738 = vmatmul.mubr.bf16.gmra.mxu0 %v1332_v23  ;;  %866 = vmatmul.mubr.bf16.gmra.mxu1 %v1333_v24 }
  0x55   : > { %745 = vmatprep.mubr.bf16.mxu0 %v1334_v25  ;;  %873 = vmatprep.mubr.bf16.mxu1 %v1336_v26 }
  0x5c   : > { %746 = vmatmul.mubr.bf16.gmra.mxu0 %v1338_v27  ;;  %874 = vmatmul.mubr.bf16.gmra.mxu1 %v1339_v28 }
  0x5d   : > { %753 = vmatprep.mubr.bf16.mxu0 %v1340_v29  ;;  %881 = vmatprep.mubr.bf16.mxu1 %v1342_v30 }
  0x64   : > { %754 = vmatmul.mubr.bf16.gmra.mxu0 %v1344_v31  ;;  %882 = vmatmul.mubr.bf16.gmra.mxu1 %v1345_v32 }
  0x65   : > { %761 = vmatprep.mubr.bf16.mxu0 %v1346_v33  ;;  %889 = vmatprep.mubr.bf16.mxu1 %v1348_v34 }
  0x6c   : > { %762 = vmatmul.mubr.bf16.gmra.mxu0 %v1350_v35  ;;  %890 = vmatmul.mubr.bf16.gmra.mxu1 %v1351_v36 }
  0x6d   : > { %769 = vmatprep.mubr.bf16.mxu0 %v1352_v37  ;;  %897 = vmatprep.mubr.bf16.mxu1 %v1354_v38 }
  0x74   : > { %770 = vmatmul.mubr.bf16.gmra.mxu0 %v1356_v39  ;;  %898 = vmatmul.mubr.bf16.gmra.mxu1 %v1357_v40 }
  0x75   : > { %777 = vmatprep.mubr.bf16.mxu0 %v1358_v41  ;;  %905 = vmatprep.mubr.bf16.mxu1 %v1360_v42 }
  0x7c   : > { %778 = vmatmul.mubr.bf16.gmra.mxu0 %v1362_v43  ;;  %906 = vmatmul.mubr.bf16.gmra.mxu1 %v1363_v44 }
  0x7d   : > { %785 = vmatprep.mubr.bf16.mxu0 %v1364_v45  ;;  %913 = vmatprep.mubr.bf16.mxu1 %v1366_v46 }
  0x84   : > { %786 = vmatmul.mubr.bf16.gmra.mxu0 %v1368_v47  ;;  %914 = vmatmul.mubr.bf16.gmra.mxu1 %v1369_v48 }
  0x85   : > { %793 = vmatprep.mubr.bf16.mxu0 %v1370_v49  ;;  %921 = vmatprep.mubr.bf16.mxu1 %v1372_v50 }
  0x8c   : > { %794 = vmatmul.mubr.bf16.gmra.mxu0 %v1374_v51  ;;  %922 = vmatmul.mubr.bf16.gmra.mxu1 %v1375_v52 }
  0x8d   : > { %801 = vmatprep.mubr.bf16.mxu0 %v1376_v53  ;;  %929 = vmatprep.mubr.bf16.mxu1 %v1378_v54 }
  0x94   : > { %802 = vmatmul.mubr.bf16.gmra.mxu0 %v1380_v55  ;;  %930 = vmatmul.mubr.bf16.gmra.mxu1 %v1381_v56 }
  0x95   : > { %809 = vmatprep.mubr.bf16.mxu0 %v1382_v57  ;;  %937 = vmatprep.mubr.bf16.mxu1 %v1384_v58 }
  0x9c   : > { %810 = vmatmul.mubr.bf16.gmra.mxu0 %v1386_v59  ;;  %938 = vmatmul.mubr.bf16.gmra.mxu1 %v1387_v60 }
  0x9d   : > { %817 = vmatprep.mubr.bf16.mxu0 %v1388_v61  ;;  %945 = vmatprep.mubr.bf16.mxu1 %v1390_v62 }
  0xa4   : > { %818 = vmatmul.mubr.bf16.gmra.mxu0 %v1392_v63  ;;  %946 = vmatmul.mubr.bf16.gmra.mxu1 %v1393_v0 }
  0xa5   : > { %825 = vmatprep.mubr.bf16.mxu0 %v1394_v1  ;;  %953 = vmatprep.mubr.bf16.mxu1 %v1396_v2 }
  0xac   : > { %826 = vmatmul.mubr.bf16.gmra.mxu0 %v1398_v3  ;;  %954 = vmatmul.mubr.bf16.gmra.mxu1 %v1399_v4 }
  0xad   : > { %833 = vmatprep.mubr.bf16.mxu0 %v1400_v5  ;;  %961 = vmatprep.mubr.bf16.mxu1 %v1402_v6 }
  0xb4   : > { %834 = vmatmul.mubr.bf16.gmra.mxu0 %v1404_v7  ;;  %962 = vmatmul.mubr.bf16.gmra.mxu1 %v1405_v8 }
  0xb5   : > { %841 = vmatprep.mubr.bf16.mxu0 %v1406_v9  ;;  %969 = vmatprep.mubr.bf16.mxu1 %v1408_v10 }
  0xbc   : > { %842 = vmatmul.mubr.bf16.gmra.mxu0 %v1410_v11  ;;  %970 = vmatmul.mubr.bf16.gmra.mxu1 %v1411_v12 }
  0xbd   : > { %849 = vmatprep.mubr.bf16.mxu0 %v1412_v13  ;;  %977 = vmatprep.mubr.bf16.mxu1 %v1414_v14 }
  0xc4   : > { %850 = vmatmul.mubr.bf16.gmra.mxu0 %v1416_v15  ;;  %978 = vmatmul.mubr.bf16.gmra.mxu1 %v1417_v16 }
 0x10c   : > { %v731_v18 = vpop.f32.mrf.mxu0  ;;  %v859_v19 = vpop.f32.mrf.mxu1 }
 0x10d   : > { %v732_v20 = vadd.f32 %v1612_v17, %v731_v18  ;;  %v860_v21 = vadd.f32 %v1612_v17, %v859_v19 }
 0x10e   : > { %v733_v22 = vpop.f32.mrf.mxu0  ;;  %v861_v23 = vpop.f32.mrf.mxu1 }
 0x10f   : > { %v986_v24 = vmax.f32 %v732_v20, 0.0  ;;  %v1018_v25 = vmax.f32 %v860_v21, 0.0 }
 0x110   : > { %v734_v26 = vpop.f32.mrf.mxu0  ;;  %v862_v27 = vpop.f32.mrf.mxu1 }
 0x111   : > { %1051 = vst.msk [vmem:[%s1621_s5] sm:$0xff] %vm1050_vm0, %v986_v24  ;;  %1083 = vst.msk [vmem:[%s1621_s5 + $0x100] sm:$0xff] %vm1050_vm0, %v1018_v25  ;;  %v735_v28 = vadd.f32 %v1612_v17, %v734_v26  ;;  %v863_v29 = vadd.f32 %v1612_v17, %v862_v27 }
 0x112   : > { %v736_v30 = vpop.f32.mrf.mxu0  ;;  %v864_v31 = vpop.f32.mrf.mxu1 }
 0x113   : > { %v987_v32 = vmax.f32 %v735_v28, 0.0  ;;  %v1019_v33 = vmax.f32 %v863_v29, 0.0 }
 0x114   : > { %v739_v34 = vpop.f32.mrf.mxu0  ;;  %v867_v35 = vpop.f32.mrf.mxu1 }
 0x115   : > { %1052 = vst.msk [vmem:[%s1621_s5 + $0x8] sm:$0xff] %vm1050_vm0, %v987_v32  ;;  %1084 = vst.msk [vmem:[%s1621_s5 + $0x108] sm:$0xff] %vm1050_vm0, %v1019_v33  ;;  %v740_v36 = vadd.f32 %v1612_v17, %v739_v34  ;;  %v868_v37 = vadd.f32 %v1612_v17, %v867_v35 }
 0x116   : > { %v741_v38 = vpop.f32.mrf.mxu0  ;;  %v869_v39 = vpop.f32.mrf.mxu1 }
 0x117   : > { %v988_v40 = vmax.f32 %v740_v36, 0.0  ;;  %v1020_v41 = vmax.f32 %v868_v37, 0.0 }
 0x118   : > { %v742_v42 = vpop.f32.mrf.mxu0  ;;  %v870_v43 = vpop.f32.mrf.mxu1 }
 0x119   : > { %1053 = vst.msk [vmem:[%s1621_s5 + $0x10] sm:$0xff] %vm1050_vm0, %v988_v40  ;;  %1085 = vst.msk [vmem:[%s1621_s5 + $0x110] sm:$0xff] %vm1050_vm0, %v1020_v41  ;;  %v743_v44 = vadd.f32 %v1612_v17, %v742_v42  ;;  %v871_v45 = vadd.f32 %v1612_v17, %v870_v43 }
 0x11a   : > { %v744_v46 = vpop.f32.mrf.mxu0  ;;  %v872_v47 = vpop.f32.mrf.mxu1 }
 0x11b   : > { %v989_v48 = vmax.f32 %v743_v44, 0.0  ;;  %v1021_v49 = vmax.f32 %v871_v45, 0.0 }
 0x11c   : > { %v747_v50 = vpop.f32.mrf.mxu0  ;;  %v875_v51 = vpop.f32.mrf.mxu1 }
 0x11d   : > { %1054 = vst.msk [vmem:[%s1621_s5 + $0x18] sm:$0xff] %vm1050_vm0, %v989_v48  ;;  %1086 = vst.msk [vmem:[%s1621_s5 + $0x118] sm:$0xff] %vm1050_vm0, %v1021_v49  ;;  %v748_v52 = vadd.f32 %v1612_v17, %v747_v50  ;;  %v876_v53 = vadd.f32 %v1612_v17, %v875_v51 }
 0x11e   : > { %v749_v54 = vpop.f32.mrf.mxu0  ;;  %v877_v55 = vpop.f32.mrf.mxu1 }
 0x11f   : > { %v990_v56 = vmax.f32 %v748_v52, 0.0  ;;  %v1022_v57 = vmax.f32 %v876_v53, 0.0 }
 0x120   : > { %v750_v58 = vpop.f32.mrf.mxu0  ;;  %v878_v59 = vpop.f32.mrf.mxu1 }
 0x121   : > { %1055 = vst.msk [vmem:[%s1621_s5 + $0x20] sm:$0xff] %vm1050_vm0, %v990_v56  ;;  %1087 = vst.msk [vmem:[%s1621_s5 + $0x120] sm:$0xff] %vm1050_vm0, %v1022_v57  ;;  %v751_v60 = vadd.f32 %v1612_v17, %v750_v58  ;;  %v879_v61 = vadd.f32 %v1612_v17, %v878_v59 }
 0x122   : > { %v752_v62 = vpop.f32.mrf.mxu0  ;;  %v880_v63 = vpop.f32.mrf.mxu1 }
 0x123   : > { %v991_v0 = vmax.f32 %v751_v60, 0.0  ;;  %v1023_v1 = vmax.f32 %v879_v61, 0.0 }
 0x124   : > { %v755_v2 = vpop.f32.mrf.mxu0  ;;  %v883_v3 = vpop.f32.mrf.mxu1 }
 0x125   : > { %1056 = vst.msk [vmem:[%s1621_s5 + $0x28] sm:$0xff] %vm1050_vm0, %v991_v0  ;;  %1088 = vst.msk [vmem:[%s1621_s5 + $0x128] sm:$0xff] %vm1050_vm0, %v1023_v1  ;;  %v756_v4 = vadd.f32 %v1612_v17, %v755_v2  ;;  %v884_v5 = vadd.f32 %v1612_v17, %v883_v3 }
 0x126   : > { %v757_v6 = vpop.f32.mrf.mxu0  ;;  %v885_v7 = vpop.f32.mrf.mxu1 }
 0x127   : > { %v992_v8 = vmax.f32 %v756_v4, 0.0  ;;  %v1024_v9 = vmax.f32 %v884_v5, 0.0 }
 0x128   : > { %v758_v10 = vpop.f32.mrf.mxu0  ;;  %v886_v11 = vpop.f32.mrf.mxu1 }
 0x129   : > { %1057 = vst.msk [vmem:[%s1621_s5 + $0x30] sm:$0xff] %vm1050_vm0, %v992_v8  ;;  %1089 = vst.msk [vmem:[%s1621_s5 + $0x130] sm:$0xff] %vm1050_vm0, %v1024_v9  ;;  %v759_v12 = vadd.f32 %v1612_v17, %v758_v10  ;;  %v887_v13 = vadd.f32 %v1612_v17, %v886_v11 }
 0x12a   : > { %v760_v14 = vpop.f32.mrf.mxu0  ;;  %v888_v15 = vpop.f32.mrf.mxu1 }
 0x12b   : > { %v993_v16 = vmax.f32 %v759_v12, 0.0  ;;  %v1025_v18 = vmax.f32 %v887_v13, 0.0 }
 0x12c   : > { %v763_v19 = vpop.f32.mrf.mxu0  ;;  %v891_v20 = vpop.f32.mrf.mxu1 }
 0x12d   : > { %1058 = vst.msk [vmem:[%s1621_s5 + $0x38] sm:$0xff] %vm1050_vm0, %v993_v16  ;;  %1090 = vst.msk [vmem:[%s1621_s5 + $0x138] sm:$0xff] %vm1050_vm0, %v1025_v18  ;;  %v764_v21 = vadd.f32 %v1612_v17, %v763_v19  ;;  %v892_v22 = vadd.f32 %v1612_v17, %v891_v20 }
 0x12e   : > { %v765_v23 = vpop.f32.mrf.mxu0  ;;  %v893_v24 = vpop.f32.mrf.mxu1 }
 0x12f   : > { %v994_v25 = vmax.f32 %v764_v21, 0.0  ;;  %v1026_v26 = vmax.f32 %v892_v22, 0.0 }
 0x130   : > { %v766_v27 = vpop.f32.mrf.mxu0  ;;  %v894_v28 = vpop.f32.mrf.mxu1 }
 0x131   : > { %1059 = vst.msk [vmem:[%s1621_s5 + $0x40] sm:$0xff] %vm1050_vm0, %v994_v25  ;;  %1091 = vst.msk [vmem:[%s1621_s5 + $0x140] sm:$0xff] %vm1050_vm0, %v1026_v26  ;;  %v767_v29 = vadd.f32 %v1612_v17, %v766_v27  ;;  %v895_v30 = vadd.f32 %v1612_v17, %v894_v28 }
 0x132   : > { %v768_v31 = vpop.f32.mrf.mxu0  ;;  %v896_v32 = vpop.f32.mrf.mxu1 }
 0x133   : > { %v995_v33 = vmax.f32 %v767_v29, 0.0  ;;  %v1027_v34 = vmax.f32 %v895_v30, 0.0 }
 0x134   : > { %v771_v35 = vpop.f32.mrf.mxu0  ;;  %v899_v36 = vpop.f32.mrf.mxu1 }
 0x135   : > { %1060 = vst.msk [vmem:[%s1621_s5 + $0x48] sm:$0xff] %vm1050_vm0, %v995_v33  ;;  %1092 = vst.msk [vmem:[%s1621_s5 + $0x148] sm:$0xff] %vm1050_vm0, %v1027_v34  ;;  %v772_v37 = vadd.f32 %v1612_v17, %v771_v35  ;;  %v900_v38 = vadd.f32 %v1612_v17, %v899_v36 }
 0x136   : > { %v773_v39 = vpop.f32.mrf.mxu0  ;;  %v901_v40 = vpop.f32.mrf.mxu1 }
 0x137   : > { %v996_v41 = vmax.f32 %v772_v37, 0.0  ;;  %v1028_v42 = vmax.f32 %v900_v38, 0.0 }
 0x138   : > { %v774_v43 = vpop.f32.mrf.mxu0  ;;  %v902_v44 = vpop.f32.mrf.mxu1 }
 0x139   : > { %1061 = vst.msk [vmem:[%s1621_s5 + $0x50] sm:$0xff] %vm1050_vm0, %v996_v41  ;;  %1093 = vst.msk [vmem:[%s1621_s5 + $0x150] sm:$0xff] %vm1050_vm0, %v1028_v42  ;;  %v775_v45 = vadd.f32 %v1612_v17, %v774_v43  ;;  %v903_v46 = vadd.f32 %v1612_v17, %v902_v44 }
 0x13a   : > { %v776_v47 = vpop.f32.mrf.mxu0  ;;  %v904_v48 = vpop.f32.mrf.mxu1 }
 0x13b   : > { %v997_v49 = vmax.f32 %v775_v45, 0.0  ;;  %v1029_v50 = vmax.f32 %v903_v46, 0.0 }
 0x13c   : > { %v779_v51 = vpop.f32.mrf.mxu0  ;;  %v907_v52 = vpop.f32.mrf.mxu1 }
 0x13d   : > { %1062 = vst.msk [vmem:[%s1621_s5 + $0x58] sm:$0xff] %vm1050_vm0, %v997_v49  ;;  %1094 = vst.msk [vmem:[%s1621_s5 + $0x158] sm:$0xff] %vm1050_vm0, %v1029_v50  ;;  %v780_v53 = vadd.f32 %v1612_v17, %v779_v51  ;;  %v908_v54 = vadd.f32 %v1612_v17, %v907_v52 }
 0x13e   : > { %v781_v55 = vpop.f32.mrf.mxu0  ;;  %v909_v56 = vpop.f32.mrf.mxu1 }
 0x13f   : > { %v998_v57 = vmax.f32 %v780_v53, 0.0  ;;  %v1030_v58 = vmax.f32 %v908_v54, 0.0 }
 0x140   : > { %v782_v59 = vpop.f32.mrf.mxu0  ;;  %v910_v60 = vpop.f32.mrf.mxu1 }
 0x141   : > { %1063 = vst.msk [vmem:[%s1621_s5 + $0x60] sm:$0xff] %vm1050_vm0, %v998_v57  ;;  %1095 = vst.msk [vmem:[%s1621_s5 + $0x160] sm:$0xff] %vm1050_vm0, %v1030_v58  ;;  %v783_v61 = vadd.f32 %v1612_v17, %v782_v59  ;;  %v911_v62 = vadd.f32 %v1612_v17, %v910_v60 }
 0x142   : > { %v784_v63 = vpop.f32.mrf.mxu0  ;;  %v912_v0 = vpop.f32.mrf.mxu1 }
 0x143   : > { %v999_v1 = vmax.f32 %v783_v61, 0.0  ;;  %v1031_v2 = vmax.f32 %v911_v62, 0.0 }
 0x144   : > { %v787_v3 = vpop.f32.mrf.mxu0  ;;  %v915_v4 = vpop.f32.mrf.mxu1 }
 0x145   : > { %1064 = vst.msk [vmem:[%s1621_s5 + $0x68] sm:$0xff] %vm1050_vm0, %v999_v1  ;;  %1096 = vst.msk [vmem:[%s1621_s5 + $0x168] sm:$0xff] %vm1050_vm0, %v1031_v2  ;;  %v788_v5 = vadd.f32 %v1612_v17, %v787_v3  ;;  %v916_v6 = vadd.f32 %v1612_v17, %v915_v4 }
 0x146   : > { %v789_v7 = vpop.f32.mrf.mxu0  ;;  %v917_v8 = vpop.f32.mrf.mxu1 }
 0x147   : > { %v1000_v9 = vmax.f32 %v788_v5, 0.0  ;;  %v1032_v10 = vmax.f32 %v916_v6, 0.0 }
 0x148   : > { %v790_v11 = vpop.f32.mrf.mxu0  ;;  %v918_v12 = vpop.f32.mrf.mxu1 }
 0x149   : > { %1065 = vst.msk [vmem:[%s1621_s5 + $0x70] sm:$0xff] %vm1050_vm0, %v1000_v9  ;;  %1097 = vst.msk [vmem:[%s1621_s5 + $0x170] sm:$0xff] %vm1050_vm0, %v1032_v10  ;;  %v791_v13 = vadd.f32 %v1612_v17, %v790_v11  ;;  %v919_v14 = vadd.f32 %v1612_v17, %v918_v12 }
 0x14a   : > { %v792_v15 = vpop.f32.mrf.mxu0  ;;  %v920_v16 = vpop.f32.mrf.mxu1 }
 0x14b   : > { %v1001_v18 = vmax.f32 %v791_v13, 0.0  ;;  %v1033_v19 = vmax.f32 %v919_v14, 0.0 }
 0x14c   : > { %v795_v20 = vpop.f32.mrf.mxu0  ;;  %v923_v21 = vpop.f32.mrf.mxu1 }
 0x14d   : > { %1066 = vst.msk [vmem:[%s1621_s5 + $0x78] sm:$0xff] %vm1050_vm0, %v1001_v18  ;;  %1098 = vst.msk [vmem:[%s1621_s5 + $0x178] sm:$0xff] %vm1050_vm0, %v1033_v19  ;;  %v796_v22 = vadd.f32 %v1612_v17, %v795_v20  ;;  %v924_v23 = vadd.f32 %v1612_v17, %v923_v21 }
 0x14e   : > { %v797_v24 = vpop.f32.mrf.mxu0  ;;  %v925_v25 = vpop.f32.mrf.mxu1 }
 0x14f   : > { %v1002_v26 = vmax.f32 %v796_v22, 0.0  ;;  %v1034_v27 = vmax.f32 %v924_v23, 0.0 }
 0x150   : > { %v798_v28 = vpop.f32.mrf.mxu0  ;;  %v926_v29 = vpop.f32.mrf.mxu1 }
 0x151   : > { %1067 = vst.msk [vmem:[%s1621_s5 + $0x80] sm:$0xff] %vm1050_vm0, %v1002_v26  ;;  %1099 = vst.msk [vmem:[%s1621_s5 + $0x180] sm:$0xff] %vm1050_vm0, %v1034_v27  ;;  %v799_v30 = vadd.f32 %v1612_v17, %v798_v28  ;;  %v927_v31 = vadd.f32 %v1612_v17, %v926_v29 }
 0x152   : > { %v800_v32 = vpop.f32.mrf.mxu0  ;;  %v928_v33 = vpop.f32.mrf.mxu1 }
 0x153   : > { %v1003_v34 = vmax.f32 %v799_v30, 0.0  ;;  %v1035_v35 = vmax.f32 %v927_v31, 0.0 }
 0x154   : > { %v803_v36 = vpop.f32.mrf.mxu0  ;;  %v931_v37 = vpop.f32.mrf.mxu1 }
 0x155   : > { %1068 = vst.msk [vmem:[%s1621_s5 + $0x88] sm:$0xff] %vm1050_vm0, %v1003_v34  ;;  %1100 = vst.msk [vmem:[%s1621_s5 + $0x188] sm:$0xff] %vm1050_vm0, %v1035_v35  ;;  %v804_v38 = vadd.f32 %v1612_v17, %v803_v36  ;;  %v932_v39 = vadd.f32 %v1612_v17, %v931_v37 }
 0x156   : > { %v805_v40 = vpop.f32.mrf.mxu0  ;;  %v933_v41 = vpop.f32.mrf.mxu1 }
 0x157   : > { %v1004_v42 = vmax.f32 %v804_v38, 0.0  ;;  %v1036_v43 = vmax.f32 %v932_v39, 0.0 }
 0x158   : > { %v806_v44 = vpop.f32.mrf.mxu0  ;;  %v934_v45 = vpop.f32.mrf.mxu1 }
 0x159   : > { %1069 = vst.msk [vmem:[%s1621_s5 + $0x90] sm:$0xff] %vm1050_vm0, %v1004_v42  ;;  %1101 = vst.msk [vmem:[%s1621_s5 + $0x190] sm:$0xff] %vm1050_vm0, %v1036_v43  ;;  %v807_v46 = vadd.f32 %v1612_v17, %v806_v44  ;;  %v935_v47 = vadd.f32 %v1612_v17, %v934_v45 }
 0x15a   : > { %v808_v48 = vpop.f32.mrf.mxu0  ;;  %v936_v49 = vpop.f32.mrf.mxu1 }
 0x15b   : > { %v1005_v50 = vmax.f32 %v807_v46, 0.0  ;;  %v1037_v51 = vmax.f32 %v935_v47, 0.0 }
 0x15c   : > { %v811_v52 = vpop.f32.mrf.mxu0  ;;  %v939_v53 = vpop.f32.mrf.mxu1 }
 0x15d   : > { %1070 = vst.msk [vmem:[%s1621_s5 + $0x98] sm:$0xff] %vm1050_vm0, %v1005_v50  ;;  %1102 = vst.msk [vmem:[%s1621_s5 + $0x198] sm:$0xff] %vm1050_vm0, %v1037_v51  ;;  %v812_v54 = vadd.f32 %v1612_v17, %v811_v52  ;;  %v940_v55 = vadd.f32 %v1612_v17, %v939_v53 }
 0x15e   : > { %v813_v56 = vpop.f32.mrf.mxu0  ;;  %v941_v57 = vpop.f32.mrf.mxu1 }
 0x15f   : > { %v1006_v58 = vmax.f32 %v812_v54, 0.0  ;;  %v1038_v59 = vmax.f32 %v940_v55, 0.0 }
 0x160   : > { %v814_v60 = vpop.f32.mrf.mxu0  ;;  %v942_v61 = vpop.f32.mrf.mxu1 }
 0x161   : > { %1071 = vst.msk [vmem:[%s1621_s5 + $0xa0] sm:$0xff] %vm1050_vm0, %v1006_v58  ;;  %1103 = vst.msk [vmem:[%s1621_s5 + $0x1a0] sm:$0xff] %vm1050_vm0, %v1038_v59  ;;  %v815_v62 = vadd.f32 %v1612_v17, %v814_v60  ;;  %v943_v63 = vadd.f32 %v1612_v17, %v942_v61 }
 0x162   : > { %v816_v0 = vpop.f32.mrf.mxu0  ;;  %v944_v1 = vpop.f32.mrf.mxu1 }
 0x163   : > { %v1007_v2 = vmax.f32 %v815_v62, 0.0  ;;  %v1039_v3 = vmax.f32 %v943_v63, 0.0 }
 0x164   : > { %v819_v4 = vpop.f32.mrf.mxu0  ;;  %v947_v5 = vpop.f32.mrf.mxu1 }
 0x165   : > { %1072 = vst.msk [vmem:[%s1621_s5 + $0xa8] sm:$0xff] %vm1050_vm0, %v1007_v2  ;;  %1104 = vst.msk [vmem:[%s1621_s5 + $0x1a8] sm:$0xff] %vm1050_vm0, %v1039_v3  ;;  %v820_v6 = vadd.f32 %v1612_v17, %v819_v4  ;;  %v948_v7 = vadd.f32 %v1612_v17, %v947_v5 }
 0x166   : > { %v821_v8 = vpop.f32.mrf.mxu0  ;;  %v949_v9 = vpop.f32.mrf.mxu1 }
 0x167   : > { %v1008_v10 = vmax.f32 %v820_v6, 0.0  ;;  %v1040_v11 = vmax.f32 %v948_v7, 0.0 }
 0x168   : > { %v822_v12 = vpop.f32.mrf.mxu0  ;;  %v950_v13 = vpop.f32.mrf.mxu1 }
 0x169   : > { %1073 = vst.msk [vmem:[%s1621_s5 + $0xb0] sm:$0xff] %vm1050_vm0, %v1008_v10  ;;  %1105 = vst.msk [vmem:[%s1621_s5 + $0x1b0] sm:$0xff] %vm1050_vm0, %v1040_v11  ;;  %v823_v14 = vadd.f32 %v1612_v17, %v822_v12  ;;  %v951_v15 = vadd.f32 %v1612_v17, %v950_v13 }
 0x16a   : > { %v824_v16 = vpop.f32.mrf.mxu0  ;;  %v952_v18 = vpop.f32.mrf.mxu1 }
 0x16b   : > { %v1009_v19 = vmax.f32 %v823_v14, 0.0  ;;  %v1041_v20 = vmax.f32 %v951_v15, 0.0 }
 0x16c   : > { %v827_v21 = vpop.f32.mrf.mxu0  ;;  %v955_v22 = vpop.f32.mrf.mxu1 }
 0x16d   : > { %1074 = vst.msk [vmem:[%s1621_s5 + $0xb8] sm:$0xff] %vm1050_vm0, %v1009_v19  ;;  %1106 = vst.msk [vmem:[%s1621_s5 + $0x1b8] sm:$0xff] %vm1050_vm0, %v1041_v20  ;;  %v828_v23 = vadd.f32 %v1612_v17, %v827_v21  ;;  %v956_v24 = vadd.f32 %v1612_v17, %v955_v22 }
 0x16e   : > { %v829_v25 = vpop.f32.mrf.mxu0  ;;  %v957_v26 = vpop.f32.mrf.mxu1 }
 0x16f   : > { %v1010_v27 = vmax.f32 %v828_v23, 0.0  ;;  %v1042_v28 = vmax.f32 %v956_v24, 0.0 }
 0x170   : > { %v830_v29 = vpop.f32.mrf.mxu0  ;;  %v958_v30 = vpop.f32.mrf.mxu1 }
 0x171   : > { %1075 = vst.msk [vmem:[%s1621_s5 + $0xc0] sm:$0xff] %vm1050_vm0, %v1010_v27  ;;  %1107 = vst.msk [vmem:[%s1621_s5 + $0x1c0] sm:$0xff] %vm1050_vm0, %v1042_v28  ;;  %v831_v31 = vadd.f32 %v1612_v17, %v830_v29  ;;  %v959_v32 = vadd.f32 %v1612_v17, %v958_v30 }
 0x172   : > { %v832_v33 = vpop.f32.mrf.mxu0  ;;  %v960_v34 = vpop.f32.mrf.mxu1 }
 0x173   : > { %v1011_v35 = vmax.f32 %v831_v31, 0.0  ;;  %v1043_v36 = vmax.f32 %v959_v32, 0.0 }
 0x174   : > { %v835_v37 = vpop.f32.mrf.mxu0  ;;  %v963_v38 = vpop.f32.mrf.mxu1 }
 0x175   : > { %1076 = vst.msk [vmem:[%s1621_s5 + $0xc8] sm:$0xff] %vm1050_vm0, %v1011_v35  ;;  %1108 = vst.msk [vmem:[%s1621_s5 + $0x1c8] sm:$0xff] %vm1050_vm0, %v1043_v36  ;;  %v836_v39 = vadd.f32 %v1612_v17, %v835_v37  ;;  %v964_v40 = vadd.f32 %v1612_v17, %v963_v38 }
 0x176   : > { %v837_v41 = vpop.f32.mrf.mxu0  ;;  %v965_v42 = vpop.f32.mrf.mxu1 }
 0x177   : > { %v1012_v43 = vmax.f32 %v836_v39, 0.0  ;;  %v1044_v44 = vmax.f32 %v964_v40, 0.0 }
 0x178   : > { %v838_v45 = vpop.f32.mrf.mxu0  ;;  %v966_v46 = vpop.f32.mrf.mxu1 }
 0x179   : > { %1077 = vst.msk [vmem:[%s1621_s5 + $0xd0] sm:$0xff] %vm1050_vm0, %v1012_v43  ;;  %1109 = vst.msk [vmem:[%s1621_s5 + $0x1d0] sm:$0xff] %vm1050_vm0, %v1044_v44  ;;  %v839_v47 = vadd.f32 %v1612_v17, %v838_v45  ;;  %v967_v48 = vadd.f32 %v1612_v17, %v966_v46 }
 0x17a   : > { %v840_v49 = vpop.f32.mrf.mxu0  ;;  %v968_v50 = vpop.f32.mrf.mxu1 }
 0x17b   : > { %v1013_v51 = vmax.f32 %v839_v47, 0.0  ;;  %v1045_v52 = vmax.f32 %v967_v48, 0.0 }
 0x17c   : > { %v843_v53 = vpop.f32.mrf.mxu0  ;;  %v971_v54 = vpop.f32.mrf.mxu1 }
 0x17d   : > { %1078 = vst.msk [vmem:[%s1621_s5 + $0xd8] sm:$0xff] %vm1050_vm0, %v1013_v51  ;;  %1110 = vst.msk [vmem:[%s1621_s5 + $0x1d8] sm:$0xff] %vm1050_vm0, %v1045_v52  ;;  %v844_v55 = vadd.f32 %v1612_v17, %v843_v53  ;;  %v972_v56 = vadd.f32 %v1612_v17, %v971_v54 }
 0x17e   : > { %v845_v57 = vpop.f32.mrf.mxu0  ;;  %v973_v58 = vpop.f32.mrf.mxu1 }
 0x17f   : > { %v1014_v59 = vmax.f32 %v844_v55, 0.0  ;;  %v1046_v60 = vmax.f32 %v972_v56, 0.0 }
 0x180   : > { %v846_v61 = vpop.f32.mrf.mxu0  ;;  %v974_v62 = vpop.f32.mrf.mxu1 }
 0x181   : > { %1079 = vst.msk [vmem:[%s1621_s5 + $0xe0] sm:$0xff] %vm1050_vm0, %v1014_v59  ;;  %1111 = vst.msk [vmem:[%s1621_s5 + $0x1e0] sm:$0xff] %vm1050_vm0, %v1046_v60  ;;  %v847_v63 = vadd.f32 %v1612_v17, %v846_v61  ;;  %v975_v0 = vadd.f32 %v1612_v17, %v974_v62 }
 0x182   : > { %v848_v1 = vpop.f32.mrf.mxu0  ;;  %v976_v2 = vpop.f32.mrf.mxu1 }
 0x183   : > { %v1015_v3 = vmax.f32 %v847_v63, 0.0  ;;  %v1047_v4 = vmax.f32 %v975_v0, 0.0 }
 0x184   : > { %v851_v5 = vpop.f32.mrf.mxu0  ;;  %v979_v6 = vpop.f32.mrf.mxu1 }
 0x185   : > { %1080 = vst.msk [vmem:[%s1621_s5 + $0xe8] sm:$0xff] %vm1050_vm0, %v1015_v3  ;;  %1112 = vst.msk [vmem:[%s1621_s5 + $0x1e8] sm:$0xff] %vm1050_vm0, %v1047_v4  ;;  %v852_v7 = vadd.f32 %v1612_v17, %v851_v5  ;;  %v980_v8 = vadd.f32 %v1612_v17, %v979_v6 }
 0x186   : > { %v853_v9 = vpop.f32.mrf.mxu0  ;;  %v981_v10 = vpop.f32.mrf.mxu1 }
 0x187   : > { %v1016_v11 = vmax.f32 %v852_v7, 0.0  ;;  %v1048_v12 = vmax.f32 %v980_v8, 0.0 }
 0x188   : > { %v854_v13 = vpop.f32.mrf.mxu0  ;;  %v982_v14 = vpop.f32.mrf.mxu1 }
 0x189   : > { %1081 = vst.msk [vmem:[%s1621_s5 + $0xf0] sm:$0xff] %vm1050_vm0, %v1016_v11  ;;  %1113 = vst.msk [vmem:[%s1621_s5 + $0x1f0] sm:$0xff] %vm1050_vm0, %v1048_v12  ;;  %v855_v15 = vadd.f32 %v1612_v17, %v854_v13  ;;  %v983_v16 = vadd.f32 %v1612_v17, %v982_v14 }
 0x18a   : > { %v856_v18 = vpop.f32.mrf.mxu0  ;;  %v984_v19 = vpop.f32.mrf.mxu1 }
 0x18b   : > { %v1017_v20 = vmax.f32 %v855_v15, 0.0  ;;  %v1049_v21 = vmax.f32 %v983_v16, 0.0 }
 0x18d   : > { %1082 = vst.msk [vmem:[%s1621_s5 + $0xf8] sm:$0xff] %vm1050_vm0, %v1017_v20  ;;  %1114 = vst.msk [vmem:[%s1621_s5 + $0x1f8] sm:$0xff] %vm1050_vm0, %v1049_v21 }
 0x18e PF: > { %s13_s12 = sadd.s32 1, %s1424_s12  }
 0x18f   : > { %p10_p4 = scmp.ge.s32.totalorder %s13_s12, 6  }
 0x191   :  { %12 = sbr.rel (!%p10_p4) target bundleno = 1 (0x1), region = 62 }

// kernel: _lambda_.29
= control target key start
LH: loop header
LB: loop body
LE: loop exit
PB: predicated region body
PF: predicated region fallthrough
CT: control target
= control target key end

     0   :  { %s2542_s1 = inlined_call_operand.vmem [shape: bf16[256,256], index: 1, kind: input, shape index: {}]   ;;  %s2543_s0 = inlined_call_operand.vmem [shape: bf16[576,256], index: 0, kind: input, shape index: {}]   ;;  %s2544_s2 = inlined_call_operand.vmem [shape: f32[1,256], index: 2, kind: input, shape index: {}]   ;;  %s2545_s3 = inlined_call_operand.vmem [shape: f32[576,256], index: 3, kind: output, shape index: {}]  }
   0x1   :  { %v1471_v0 = vld [vmem:[%s2542_s1 + $0x74] ss:$8 sps:$4 sm:$0xff]   ;;  %v1473_v1 = vld [vmem:[%s2542_s1 + $0x70] ss:$8 sps:$4 sm:$0xff]   ;;  %v1474_v2 = vld [vmem:[%s2542_s1 + $0x64] ss:$8 sps:$4 sm:$0xff]  }
   0x2   :  { %650 = vmatprep.subr.bf16.mxu0 %v1471_v0  ;;  %1439 = vmatprep.subr.bf16.mxu1 %v1471_v0  ;;  %v1476_v3 = vld [vmem:[%s2542_s1 + $0x60] ss:$8 sps:$4 sm:$0xff]   ;;  %v1477_v4 = vld [vmem:[%s2542_s1 + $0x54] ss:$8 sps:$4 sm:$0xff]   ;;  %v1479_v5 = vld [vmem:[%s2542_s1 + $0x50] ss:$8 sps:$4 sm:$0xff]  }
   0x3   :  { %651 = vmatpush1.bf16.msra.mxu0 %v1473_v1  ;;  %1455 = vmatpush1.bf16.msra.mxu1 %v1473_v1  ;;  %v1480_v6 = vld [vmem:[%s2542_s1 + $0x44] ss:$8 sps:$4 sm:$0xff]   ;;  %v1482_v7 = vld [vmem:[%s2542_s1 + $0x40] ss:$8 sps:$4 sm:$0xff]   ;;  %v1483_v8 = vld [vmem:[%s2542_s1 + $0x34] ss:$8 sps:$4 sm:$0xff]  }
   0x4   :  { %652 = vmatprep.subr.bf16.mxu0 %v1474_v2  ;;  %1440 = vmatprep.subr.bf16.mxu1 %v1474_v2  ;;  %v1485_v9 = vld [vmem:[%s2542_s1 + $0x30] ss:$8 sps:$4 sm:$0xff]   ;;  %v1486_v10 = vld [vmem:[%s2542_s1 + $0x24] ss:$8 sps:$4 sm:$0xff]   ;;  %v1488_v11 = vld [vmem:[%s2542_s1 + $0x20] ss:$8 sps:$4 sm:$0xff]  }
   0x5   :  { %v1489_v12 = vld [vmem:[%s2542_s1 + $0x14] ss:$8 sps:$4 sm:$0xff]   ;;  %v1521_v13 = vld [vmem:[%s2543_s0 + $0x4] ss:$8 sps:$4 sm:$0xff]   ;;  %v1491_v14 = vld [vmem:[%s2542_s1 + $0x10] ss:$8 sps:$4 sm:$0xff]  }
   0x6   :  { %v1524_v15 = vld [vmem:[%s2543_s0 + $0x124] ss:$8 sps:$4 sm:$0xff]   ;;  %682 = vmatprep.mubr.bf16.mxu0 %v1521_v13  ;;  %v1494_v17 = vld [vmem:[%s2542_s1] ss:$8 sps:$4 sm:$0xff]   ;;  %v1495_v18 = vld [vmem:[%s2542_s1 + $0xf4] ss:$8 sps:$4 sm:$0xff]  }
   0x7   :  { %653 = vmatpush1.bf16.msra.mxu0 %v1476_v3  ;;  %1456 = vmatpush1.bf16.msra.mxu1 %v1476_v3  ;;  %v1492_v16 = vld [vmem:[%s2542_s1 + $0x4] ss:$8 sps:$4 sm:$0xff]   ;;  %v1497_v19 = vld [vmem:[%s2542_s1 + $0xf0] ss:$8 sps:$4 sm:$0xff]   ;;  %v1500_v21 = vld [vmem:[%s2542_s1 + $0xe0] ss:$8 sps:$4 sm:$0xff]  }
   0x8   :  { %654 = vmatprep.subr.bf16.mxu0 %v1477_v4  ;;  %1441 = vmatprep.subr.bf16.mxu1 %v1477_v4  ;;  %v1498_v20 = vld [vmem:[%s2542_s1 + $0xe4] ss:$8 sps:$4 sm:$0xff]   ;;  %v1501_v22 = vld [vmem:[%s2542_s1 + $0xd4] ss:$8 sps:$4 sm:$0xff]   ;;  %v1503_v23 = vld [vmem:[%s2542_s1 + $0xd0] ss:$8 sps:$4 sm:$0xff]  }
   0x9   :  { %862 = vmatprep.mubr.bf16.mxu1 %v1524_v15  ;;  %v1504_v24 = vld [vmem:[%s2542_s1 + $0xc4] ss:$8 sps:$4 sm:$0xff]   ;;  %v1506_v25 = vld [vmem:[%s2542_s1 + $0xc0] ss:$8 sps:$4 sm:$0xff]   ;;  %v1507_v26 = vld [vmem:[%s2542_s1 + $0xb4] ss:$8 sps:$4 sm:$0xff]  }
   0xa   :  { %v1509_v27 = vld [vmem:[%s2542_s1 + $0xb0] ss:$8 sps:$4 sm:$0xff]   ;;  %v1510_v28 = vld [vmem:[%s2542_s1 + $0xa4] ss:$8 sps:$4 sm:$0xff]   ;;  %v1512_v29 = vld [vmem:[%s2542_s1 + $0xa0] ss:$8 sps:$4 sm:$0xff]  }
   0xb   :  { %655 = vmatpush1.bf16.msra.mxu0 %v1479_v5  ;;  %1457 = vmatpush1.bf16.msra.mxu1 %v1479_v5  ;;  %v1513_v30 = vld [vmem:[%s2542_s1 + $0x94] ss:$8 sps:$4 sm:$0xff]   ;;  %v1515_v31 = vld [vmem:[%s2542_s1 + $0x90] ss:$8 sps:$4 sm:$0xff]   ;;  %v1516_v32 = vld [vmem:[%s2542_s1 + $0x84] ss:$8 sps:$4 sm:$0xff]  }
   0xc   :  { %656 = vmatprep.subr.bf16.mxu0 %v1480_v6  ;;  %1442 = vmatprep.subr.bf16.mxu1 %v1480_v6  ;;  %v1518_v33 = vld [vmem:[%s2542_s1 + $0x80] ss:$8 sps:$4 sm:$0xff]   ;;  %v1525_v36 = vld [vmem:[%s2543_s0 + $0x14] ss:$8 sps:$4 sm:$0xff]   ;;  %v1529_v38 = vld [vmem:[%s2543_s0 + $0x10] ss:$8 sps:$4 sm:$0xff]  }
   0xd   :  { %v1519_v34 = vld [vmem:[%s2543_s0] ss:$8 sps:$4 sm:$0xff]   ;;  %v1527_v37 = vld [vmem:[%s2543_s0 + $0x134] ss:$8 sps:$4 sm:$0xff]   ;;  %v1530_v39 = vld [vmem:[%s2543_s0 + $0x130] ss:$8 sps:$4 sm:$0xff]  }
   0xe   :  { %v1522_v35 = vld [vmem:[%s2543_s0 + $0x120] ss:$8 sps:$4 sm:$0xff]   ;;  %v1531_v40 = vld [vmem:[%s2543_s0 + $0x24] ss:$8 sps:$4 sm:$0xff]   ;;  %v1537_v44 = vld [vmem:[%s2543_s0 + $0x34] ss:$8 sps:$4 sm:$0xff]  }
   0xf   :  { %657 = vmatpush1.bf16.msra.mxu0 %v1482_v7  ;;  %1458 = vmatpush1.bf16.msra.mxu1 %v1482_v7  ;;  %v1533_v41 = vld [vmem:[%s2543_s0 + $0x144] ss:$8 sps:$4 sm:$0xff]   ;;  %v1535_v42 = vld [vmem:[%s2543_s0 + $0x20] ss:$8 sps:$4 sm:$0xff]   ;;  %v1539_v45 = vld [vmem:[%s2543_s0 + $0x154] ss:$8 sps:$4 sm:$0xff]  }
  0x10   :  { %658 = vmatprep.subr.bf16.mxu0 %v1483_v8  ;;  %1443 = vmatprep.subr.bf16.mxu1 %v1483_v8  ;;  %v1536_v43 = vld [vmem:[%s2543_s0 + $0x140] ss:$8 sps:$4 sm:$0xff]   ;;  %v1541_v46 = vld [vmem:[%s2543_s0 + $0x30] ss:$8 sps:$4 sm:$0xff]   ;;  %v1543_v48 = vld [vmem:[%s2543_s0 + $0x44] ss:$8 sps:$4 sm:$0xff]  }
  0x11   :  { %v1542_v47 = vld [vmem:[%s2543_s0 + $0x150] ss:$8 sps:$4 sm:$0xff]   ;;  %v1545_v49 = vld [vmem:[%s2543_s0 + $0x164] ss:$8 sps:$4 sm:$0xff]   ;;  %v1547_v50 = vld [vmem:[%s2543_s0 + $0x40] ss:$8 sps:$4 sm:$0xff]  }
  0x12   :  { %v1548_v51 = vld [vmem:[%s2543_s0 + $0x160] ss:$8 sps:$4 sm:$0xff]   ;;  %v1549_v52 = vld [vmem:[%s2543_s0 + $0x54] ss:$8 sps:$4 sm:$0xff]   ;;  %v1553_v54 = vld [vmem:[%s2543_s0 + $0x50] ss:$8 sps:$4 sm:$0xff]  }
  0x13   :  { %659 = vmatpush1.bf16.msra.mxu0 %v1485_v9  ;;  %1459 = vmatpush1.bf16.msra.mxu1 %v1485_v9  ;;  %v1551_v53 = vld [vmem:[%s2543_s0 + $0x174] ss:$8 sps:$4 sm:$0xff]   ;;  %v1554_v55 = vld [vmem:[%s2543_s0 + $0x170] ss:$8 sps:$4 sm:$0xff]   ;;  %v1555_v56 = vld [vmem:[%s2543_s0 + $0x64] ss:$8 sps:$4 sm:$0xff]  }
  0x14   :  { %660 = vmatprep.subr.bf16.mxu0 %v1486_v10  ;;  %1444 = vmatprep.subr.bf16.mxu1 %v1486_v10  ;;  %v1557_v57 = vld [vmem:[%s2543_s0 + $0x184] ss:$8 sps:$4 sm:$0xff]   ;;  %v1559_v58 = vld [vmem:[%s2543_s0 + $0x60] ss:$8 sps:$4 sm:$0xff]   ;;  %v1561_v60 = vld [vmem:[%s2543_s0 + $0x74] ss:$8 sps:$4 sm:$0xff]  }
  0x15   :  { %v1560_v59 = vld [vmem:[%s2543_s0 + $0x180] ss:$8 sps:$4 sm:$0xff]   ;;  %v1563_v61 = vld [vmem:[%s2543_s0 + $0x194] ss:$8 sps:$4 sm:$0xff]   ;;  %v1565_v62 = vld [vmem:[%s2543_s0 + $0x70] ss:$8 sps:$4 sm:$0xff]  }
  0x16   :  { %v1566_v63 = vld [vmem:[%s2543_s0 + $0x190] ss:$8 sps:$4 sm:$0xff]   ;;  %v1567_v0 = vld [vmem:[%s2543_s0 + $0x84] ss:$8 sps:$4 sm:$0xff]   ;;  %v1571_v2 = vld [vmem:[%s2543_s0 + $0x80] ss:$8 sps:$4 sm:$0xff]  }
  0x17   :  { %661 = vmatpush1.bf16.msra.mxu0 %v1488_v11  ;;  %1460 = vmatpush1.bf16.msra.mxu1 %v1488_v11  ;;  %v1569_v1 = vld [vmem:[%s2543_s0 + $0x1a4] ss:$8 sps:$4 sm:$0xff]   ;;  %v1572_v3 = vld [vmem:[%s2543_s0 + $0x1a0] ss:$8 sps:$4 sm:$0xff]   ;;  %v1573_v4 = vld [vmem:[%s2543_s0 + $0x94] ss:$8 sps:$4 sm:$0xff]  }
  0x18   :  { %662 = vmatprep.subr.bf16.mxu0 %v1489_v12  ;;  %1445 = vmatprep.subr.bf16.mxu1 %v1489_v12  ;;  %v1575_v5 = vld [vmem:[%s2543_s0 + $0x1b4] ss:$8 sps:$4 sm:$0xff]   ;;  %v1577_v6 = vld [vmem:[%s2543_s0 + $0x90] ss:$8 sps:$4 sm:$0xff]   ;;  %v1579_v8 = vld [vmem:[%s2543_s0 + $0xa4] ss:$8 sps:$4 sm:$0xff]  }
  0x19   :  { %v1578_v7 = vld [vmem:[%s2543_s0 + $0x1b0] ss:$8 sps:$4 sm:$0xff]   ;;  %v1581_v9 = vld [vmem:[%s2543_s0 + $0x1c4] ss:$8 sps:$4 sm:$0xff]   ;;  %v1583_v10 = vld [vmem:[%s2543_s0 + $0xa0] ss:$8 sps:$4 sm:$0xff]  }
  0x1a   :  { %v1584_v11 = vld [vmem:[%s2543_s0 + $0x1c0] ss:$8 sps:$4 sm:$0xff]   ;;  %v1585_v12 = vld [vmem:[%s2543_s0 + $0xb4] ss:$8 sps:$4 sm:$0xff]   ;;  %v1590_v15 = vld [vmem:[%s2543_s0 + $0x1d0] ss:$8 sps:$4 sm:$0xff]  }
  0x1b   :  { %663 = vmatpush1.bf16.msra.mxu0 %v1491_v14  ;;  %1461 = vmatpush1.bf16.msra.mxu1 %v1491_v14  ;;  %v1587_v13 = vld [vmem:[%s2543_s0 + $0x1d4] ss:$8 sps:$4 sm:$0xff]   ;;  %v1589_v14 = vld [vmem:[%s2543_s0 + $0xb0] ss:$8 sps:$4 sm:$0xff]  }
  0x1c   :  { %664 = vmatprep.subr.bf16.mxu0 %v1492_v16  ;;  %1446 = vmatprep.subr.bf16.mxu1 %v1492_v16  ;;  %v1591_v16 = vld [vmem:[%s2543_s0 + $0xc4] ss:$8 sps:$4 sm:$0xff]  }
  0x1f   :  { %665 = vmatpush1.bf16.msra.mxu0 %v1494_v17  ;;  %1462 = vmatpush1.bf16.msra.mxu1 %v1494_v17  ;;  %v1593_v17 = vld [vmem:[%s2543_s0 + $0x1e4] ss:$8 sps:$4 sm:$0xff]  }
  0x20   :  { %666 = vmatprep.subr.bf16.mxu0 %v1495_v18  ;;  %1447 = vmatprep.subr.bf16.mxu1 %v1495_v18  ;;  %v1595_v18 = vld [vmem:[%s2543_s0 + $0xc0] ss:$8 sps:$4 sm:$0xff]  }
  0x23   :  { %667 = vmatpush2.bf16.msra.mxu0 %v1497_v19  ;;  %1463 = vmatpush2.bf16.msra.mxu1 %v1497_v19  ;;  %v1596_v19 = vld [vmem:[%s2543_s0 + $0x1e0] ss:$8 sps:$4 sm:$0xff]  }
  0x24   :  { %668 = vmatprep.subr.bf16.mxu0 %v1498_v20  ;;  %1448 = vmatprep.subr.bf16.mxu1 %v1498_v20  ;;  %v1597_v20 = vld [vmem:[%s2543_s0 + $0xd4] ss:$8 sps:$4 sm:$0xff]  }
  0x27   :  { %669 = vmatpush2.bf16.msra.mxu0 %v1500_v21  ;;  %1464 = vmatpush2.bf16.msra.mxu1 %v1500_v21  ;;  %v1599_v21 = vld [vmem:[%s2543_s0 + $0x1f4] ss:$8 sps:$4 sm:$0xff]  }
  0x28   :  { %670 = vmatprep.subr.bf16.mxu0 %v1501_v22  ;;  %1449 = vmatprep.subr.bf16.mxu1 %v1501_v22  ;;  %v1601_v22 = vld [vmem:[%s2543_s0 + $0xd0] ss:$8 sps:$4 sm:$0xff]  }
  0x2b   :  { %671 = vmatpush2.bf16.msra.mxu0 %v1503_v23  ;;  %1465 = vmatpush2.bf16.msra.mxu1 %v1503_v23  ;;  %v1602_v23 = vld [vmem:[%s2543_s0 + $0x1f0] ss:$8 sps:$4 sm:$0xff]  }
  0x2c   :  { %672 = vmatprep.subr.bf16.mxu0 %v1504_v24  ;;  %1450 = vmatprep.subr.bf16.mxu1 %v1504_v24  ;;  %v1603_v24 = vld [vmem:[%s2543_s0 + $0xe4] ss:$8 sps:$4 sm:$0xff]  }
  0x2f   :  { %673 = vmatpush2.bf16.msra.mxu0 %v1506_v25  ;;  %1466 = vmatpush2.bf16.msra.mxu1 %v1506_v25  ;;  %v1605_v25 = vld [vmem:[%s2543_s0 + $0x204] ss:$8 sps:$4 sm:$0xff]  }
  0x30   :  { %674 = vmatprep.subr.bf16.mxu0 %v1507_v26  ;;  %1451 = vmatprep.subr.bf16.mxu1 %v1507_v26  ;;  %v1607_v26 = vld [vmem:[%s2543_s0 + $0xe0] ss:$8 sps:$4 sm:$0xff]  }
  0x33   :  { %675 = vmatpush2.bf16.msra.mxu0 %v1509_v27  ;;  %1467 = vmatpush2.bf16.msra.mxu1 %v1509_v27  ;;  %v1608_v27 = vld [vmem:[%s2543_s0 + $0x200] ss:$8 sps:$4 sm:$0xff]  }
  0x34   :  { %676 = vmatprep.subr.bf16.mxu0 %v1510_v28  ;;  %1452 = vmatprep.subr.bf16.mxu1 %v1510_v28  ;;  %v1609_v28 = vld [vmem:[%s2543_s0 + $0xf4] ss:$8 sps:$4 sm:$0xff]  }
  0x37   :  { %677 = vmatpush2.bf16.msra.mxu0 %v1512_v29  ;;  %1468 = vmatpush2.bf16.msra.mxu1 %v1512_v29  ;;  %v1611_v29 = vld [vmem:[%s2543_s0 + $0x214] ss:$8 sps:$4 sm:$0xff]  }
  0x38   :  { %678 = vmatprep.subr.bf16.mxu0 %v1513_v30  ;;  %1453 = vmatprep.subr.bf16.mxu1 %v1513_v30  ;;  %v1613_v30 = vld [vmem:[%s2543_s0 + $0xf0] ss:$8 sps:$4 sm:$0xff]  }
  0x3b   :  { %679 = vmatpush2.bf16.msra.mxu0 %v1515_v31  ;;  %1469 = vmatpush2.bf16.msra.mxu1 %v1515_v31  ;;  %v1614_v31 = vld [vmem:[%s2543_s0 + $0x210] ss:$8 sps:$4 sm:$0xff]  }
  0x3c   :  { %680 = vmatprep.subr.bf16.mxu0 %v1516_v32  ;;  %1454 = vmatprep.subr.bf16.mxu1 %v1516_v32  ;;  %v1615_v32 = vld [vmem:[%s2543_s0 + $0x104] ss:$8 sps:$4 sm:$0xff]  }
  0x3f   :  { %681 = vmatpush2.bf16.msra.mxu0 %v1518_v33  ;;  %1470 = vmatpush2.bf16.msra.mxu1 %v1518_v33  ;;  %v1617_v33 = vld [vmem:[%s2543_s0 + $0x224] ss:$8 sps:$4 sm:$0xff]  }
  0x42   :  { %683 = vmatmul.mubr.bf16.vlgmr.msra.gmra.mxu0 %v1519_v34  ;;  %863 = vmatmul.mubr.bf16.vlgmr.msra.gmra.mxu1 %v1522_v35  ;;  %v1619_v34 = vld [vmem:[%s2543_s0 + $0x100] ss:$8 sps:$4 sm:$0xff]  }
  0x43   :  { %692 = vmatprep.mubr.bf16.mxu0 %v1525_v36  ;;  %872 = vmatprep.mubr.bf16.mxu1 %v1527_v37  ;;  %v1620_v35 = vld [vmem:[%s2543_s0 + $0x220] ss:$8 sps:$4 sm:$0xff]   ;;  %v1621_v36 = vld [vmem:[%s2543_s0 + $0x114] ss:$8 sps:$4 sm:$0xff]  }
  0x44   :  { %v1623_v37 = vld [vmem:[%s2543_s0 + $0x234] ss:$8 sps:$4 sm:$0xff]  }
  0x4a   :  { %693 = vmatmul.mubr.bf16.gmra.mxu0 %v1529_v38  ;;  %873 = vmatmul.mubr.bf16.gmra.mxu1 %v1530_v39  ;;  %v1625_v38 = vld [vmem:[%s2543_s0 + $0x110] ss:$8 sps:$4 sm:$0xff]  }
  0x4b   :  { %702 = vmatprep.mubr.bf16.mxu0 %v1531_v40  ;;  %882 = vmatprep.mubr.bf16.mxu1 %v1533_v41  ;;  %v1626_v39 = vld [vmem:[%s2543_s0 + $0x230] ss:$8 sps:$4 sm:$0xff]   ;;  %v120_v40 = vlaneseq }
  0x4d   :  { %v121_v41 = vshrl.u32 %v120_v40, 7 }
  0x52   :  { %703 = vmatmul.mubr.bf16.gmra.mxu0 %v1535_v42  ;;  %883 = vmatmul.mubr.bf16.gmra.mxu1 %v1536_v43  ;;  %v122_v42 = vsub.s32 0, %v121_v41  ;;  %v118_v43 = vld [vmem:[%s2544_s2] sm:$0x3] }
  0x53   :  { %712 = vmatprep.mubr.bf16.mxu0 %v1537_v44  ;;  %892 = vmatprep.mubr.bf16.mxu1 %v1539_v45  ;;  %v126_v44 = vsub.s32 1, %v121_v41 }
  0x54   :  { %v1962_v45 = vrot.slane %v118_v43, %v122_v42 }
  0x5a   :  { %713 = vmatmul.mubr.bf16.gmra.mxu0 %v1541_v46  ;;  %893 = vmatmul.mubr.bf16.gmra.mxu1 %v1542_v47  ;;  %v1964_v46 = vrot.slane %v118_v43, %v126_v44 }
  0x5b   :  { %722 = vmatprep.mubr.bf16.mxu0 %v1543_v48  ;;  %902 = vmatprep.mubr.bf16.mxu1 %v1545_v49 }
  0x62   :  { %723 = vmatmul.mubr.bf16.gmra.mxu0 %v1547_v50  ;;  %903 = vmatmul.mubr.bf16.gmra.mxu1 %v1548_v51 }
  0x63   :  { %732 = vmatprep.mubr.bf16.mxu0 %v1549_v52  ;;  %912 = vmatprep.mubr.bf16.mxu1 %v1551_v53 }
  0x6a   :  { %733 = vmatmul.mubr.bf16.gmra.mxu0 %v1553_v54  ;;  %913 = vmatmul.mubr.bf16.gmra.mxu1 %v1554_v55 }
  0x6b   :  { %742 = vmatprep.mubr.bf16.mxu0 %v1555_v56  ;;  %922 = vmatprep.mubr.bf16.mxu1 %v1557_v57 }
  0x72   :  { %743 = vmatmul.mubr.bf16.gmra.mxu0 %v1559_v58  ;;  %923 = vmatmul.mubr.bf16.gmra.mxu1 %v1560_v59 }
  0x73   :  { %752 = vmatprep.mubr.bf16.mxu0 %v1561_v60  ;;  %932 = vmatprep.mubr.bf16.mxu1 %v1563_v61 }
  0x7a   :  { %753 = vmatmul.mubr.bf16.gmra.mxu0 %v1565_v62  ;;  %933 = vmatmul.mubr.bf16.gmra.mxu1 %v1566_v63 }
  0x7b   :  { %762 = vmatprep.mubr.bf16.mxu0 %v1567_v0  ;;  %942 = vmatprep.mubr.bf16.mxu1 %v1569_v1 }
  0x82   :  { %763 = vmatmul.mubr.bf16.gmra.mxu0 %v1571_v2  ;;  %943 = vmatmul.mubr.bf16.gmra.mxu1 %v1572_v3 }
  0x83   :  { %772 = vmatprep.mubr.bf16.mxu0 %v1573_v4  ;;  %952 = vmatprep.mubr.bf16.mxu1 %v1575_v5 }
  0x8a   :  { %773 = vmatmul.mubr.bf16.gmra.mxu0 %v1577_v6  ;;  %953 = vmatmul.mubr.bf16.gmra.mxu1 %v1578_v7 }
  0x8b   :  { %782 = vmatprep.mubr.bf16.mxu0 %v1579_v8  ;;  %962 = vmatprep.mubr.bf16.mxu1 %v1581_v9 }
  0x92   :  { %783 = vmatmul.mubr.bf16.gmra.mxu0 %v1583_v10  ;;  %963 = vmatmul.mubr.bf16.gmra.mxu1 %v1584_v11 }
  0x93   :  { %792 = vmatprep.mubr.bf16.mxu0 %v1585_v12  ;;  %972 = vmatprep.mubr.bf16.mxu1 %v1587_v13 }
  0x9a   :  { %793 = vmatmul.mubr.bf16.gmra.mxu0 %v1589_v14  ;;  %973 = vmatmul.mubr.bf16.gmra.mxu1 %v1590_v15 }
  0x9b   :  { %802 = vmatprep.mubr.bf16.mxu0 %v1591_v16  ;;  %982 = vmatprep.mubr.bf16.mxu1 %v1593_v17 }
  0xa2   :  { %803 = vmatmul.mubr.bf16.gmra.mxu0 %v1595_v18  ;;  %983 = vmatmul.mubr.bf16.gmra.mxu1 %v1596_v19 }
  0xa3   :  { %812 = vmatprep.mubr.bf16.mxu0 %v1597_v20  ;;  %992 = vmatprep.mubr.bf16.mxu1 %v1599_v21 }
  0xaa   :  { %813 = vmatmul.mubr.bf16.gmra.mxu0 %v1601_v22  ;;  %993 = vmatmul.mubr.bf16.gmra.mxu1 %v1602_v23 }
  0xab   :  { %822 = vmatprep.mubr.bf16.mxu0 %v1603_v24  ;;  %1002 = vmatprep.mubr.bf16.mxu1 %v1605_v25 }
  0xb2   :  { %823 = vmatmul.mubr.bf16.gmra.mxu0 %v1607_v26  ;;  %1003 = vmatmul.mubr.bf16.gmra.mxu1 %v1608_v27 }
  0xb3   :  { %832 = vmatprep.mubr.bf16.mxu0 %v1609_v28  ;;  %1012 = vmatprep.mubr.bf16.mxu1 %v1611_v29 }
  0xba   :  { %833 = vmatmul.mubr.bf16.gmra.mxu0 %v1613_v30  ;;  %1013 = vmatmul.mubr.bf16.gmra.mxu1 %v1614_v31 }
  0xbb   :  { %842 = vmatprep.mubr.bf16.mxu0 %v1615_v32  ;;  %1022 = vmatprep.mubr.bf16.mxu1 %v1617_v33 }
  0xc2   :  { %843 = vmatmul.mubr.bf16.gmra.mxu0 %v1619_v34  ;;  %1023 = vmatmul.mubr.bf16.gmra.mxu1 %v1620_v35 }
  0xc3   :  { %852 = vmatprep.mubr.bf16.mxu0 %v1621_v36  ;;  %1032 = vmatprep.mubr.bf16.mxu1 %v1623_v37 }
  0xca   :  { %853 = vmatmul.mubr.bf16.gmra.mxu0 %v1625_v38  ;;  %1033 = vmatmul.mubr.bf16.gmra.mxu1 %v1626_v39 }
 0x102   :  { %v684_v47 = vpop.f32.mrf.mxu0  ;;  %v864_v48 = vpop.f32.mrf.mxu1 }
 0x103   :  { %v685_v49 = vadd.f32 %v684_v47, %v1962_v45  ;;  %v865_v50 = vadd.f32 %v864_v48, %v1962_v45 }
 0x104   :  { %v686_v51 = vpop.f32.mrf.mxu0  ;;  %v866_v52 = vpop.f32.mrf.mxu1 }
 0x105   :  { %v1043_v53 = vmax.f32 %v685_v49, 0.0  ;;  %v1115_v54 = vmax.f32 %v865_v50, 0.0  ;;  %v687_v55 = vadd.f32 %v686_v51, %v1964_v46  ;;  %v867_v56 = vadd.f32 %v866_v52, %v1964_v46 }
 0x106   :  { %v688_v57 = vpop.f32.mrf.mxu0  ;;  %v868_v58 = vpop.f32.mrf.mxu1 }
 0x107   :  { %1187 = vst [vmem:[%s2545_s3] sm:$0xff] %v1043_v53  ;;  %1259 = vst [vmem:[%s2545_s3 + $0x240] sm:$0xff] %v1115_v54  ;;  %v1044_v59 = vmax.f32 %v687_v55, 0.0  ;;  %v1116_v60 = vmax.f32 %v867_v56, 0.0  ;;  %v689_v61 = vadd.f32 %v688_v57, %v1962_v45  ;;  %v869_v62 = vadd.f32 %v868_v58, %v1962_v45 }
 0x108   :  { %v690_v63 = vpop.f32.mrf.mxu0  ;;  %v870_v0 = vpop.f32.mrf.mxu1 }
 0x109   :  { %1188 = vst [vmem:[%s2545_s3 + $0x8] sm:$0xff] %v1044_v59  ;;  %1260 = vst [vmem:[%s2545_s3 + $0x248] sm:$0xff] %v1116_v60  ;;  %v1045_v1 = vmax.f32 %v689_v61, 0.0  ;;  %v1117_v2 = vmax.f32 %v869_v62, 0.0  ;;  %v691_v3 = vadd.f32 %v690_v63, %v1964_v46  ;;  %v871_v4 = vadd.f32 %v870_v0, %v1964_v46 }
 0x10a   :  { %v694_v5 = vpop.f32.mrf.mxu0  ;;  %v874_v6 = vpop.f32.mrf.mxu1 }
 0x10b   :  { %1189 = vst [vmem:[%s2545_s3 + $0x10] sm:$0xff] %v1045_v1  ;;  %1261 = vst [vmem:[%s2545_s3 + $0x250] sm:$0xff] %v1117_v2  ;;  %v1046_v7 = vmax.f32 %v691_v3, 0.0  ;;  %v1118_v8 = vmax.f32 %v871_v4, 0.0  ;;  %v695_v9 = vadd.f32 %v694_v5, %v1962_v45  ;;  %v875_v10 = vadd.f32 %v874_v6, %v1962_v45 }
 0x10c   :  { %v696_v11 = vpop.f32.mrf.mxu0  ;;  %v876_v12 = vpop.f32.mrf.mxu1 }
 0x10d   :  { %1190 = vst [vmem:[%s2545_s3 + $0x18] sm:$0xff] %v1046_v7  ;;  %1262 = vst [vmem:[%s2545_s3 + $0x258] sm:$0xff] %v1118_v8  ;;  %v1047_v13 = vmax.f32 %v695_v9, 0.0  ;;  %v1119_v14 = vmax.f32 %v875_v10, 0.0  ;;  %v697_v15 = vadd.f32 %v696_v11, %v1964_v46  ;;  %v877_v16 = vadd.f32 %v876_v12, %v1964_v46 }
 0x10e   :  { %v698_v17 = vpop.f32.mrf.mxu0  ;;  %v878_v18 = vpop.f32.mrf.mxu1 }
 0x10f   :  { %1191 = vst [vmem:[%s2545_s3 + $0x20] sm:$0xff] %v1047_v13  ;;  %1263 = vst [vmem:[%s2545_s3 + $0x260] sm:$0xff] %v1119_v14  ;;  %v1048_v19 = vmax.f32 %v697_v15, 0.0  ;;  %v1120_v20 = vmax.f32 %v877_v16, 0.0  ;;  %v699_v21 = vadd.f32 %v698_v17, %v1962_v45  ;;  %v879_v22 = vadd.f32 %v878_v18, %v1962_v45 }
 0x110   :  { %v700_v23 = vpop.f32.mrf.mxu0  ;;  %v880_v24 = vpop.f32.mrf.mxu1 }
 0x111   :  { %1192 = vst [vmem:[%s2545_s3 + $0x28] sm:$0xff] %v1048_v19  ;;  %1264 = vst [vmem:[%s2545_s3 + $0x268] sm:$0xff] %v1120_v20  ;;  %v1049_v25 = vmax.f32 %v699_v21, 0.0  ;;  %v1121_v26 = vmax.f32 %v879_v22, 0.0  ;;  %v701_v27 = vadd.f32 %v700_v23, %v1964_v46  ;;  %v881_v28 = vadd.f32 %v880_v24, %v1964_v46 }
 0x112   :  { %v704_v29 = vpop.f32.mrf.mxu0  ;;  %v884_v30 = vpop.f32.mrf.mxu1 }
 0x113   :  { %1193 = vst [vmem:[%s2545_s3 + $0x30] sm:$0xff] %v1049_v25  ;;  %1265 = vst [vmem:[%s2545_s3 + $0x270] sm:$0xff] %v1121_v26  ;;  %v1050_v31 = vmax.f32 %v701_v27, 0.0  ;;  %v1122_v32 = vmax.f32 %v881_v28, 0.0  ;;  %v705_v33 = vadd.f32 %v704_v29, %v1962_v45  ;;  %v885_v34 = vadd.f32 %v884_v30, %v1962_v45 }
 0x114   :  { %v706_v35 = vpop.f32.mrf.mxu0  ;;  %v886_v36 = vpop.f32.mrf.mxu1 }
 0x115   :  { %1194 = vst [vmem:[%s2545_s3 + $0x38] sm:$0xff] %v1050_v31  ;;  %1266 = vst [vmem:[%s2545_s3 + $0x278] sm:$0xff] %v1122_v32  ;;  %v1051_v37 = vmax.f32 %v705_v33, 0.0  ;;  %v1123_v38 = vmax.f32 %v885_v34, 0.0  ;;  %v707_v39 = vadd.f32 %v706_v35, %v1964_v46  ;;  %v887_v40 = vadd.f32 %v886_v36, %v1964_v46 }
 0x116   :  { %v708_v41 = vpop.f32.mrf.mxu0  ;;  %v888_v42 = vpop.f32.mrf.mxu1 }
 0x117   :  { %1195 = vst [vmem:[%s2545_s3 + $0x40] sm:$0xff] %v1051_v37  ;;  %1267 = vst [vmem:[%s2545_s3 + $0x280] sm:$0xff] %v1123_v38  ;;  %v1052_v43 = vmax.f32 %v707_v39, 0.0  ;;  %v1124_v44 = vmax.f32 %v887_v40, 0.0  ;;  %v709_v47 = vadd.f32 %v708_v41, %v1962_v45  ;;  %v889_v48 = vadd.f32 %v888_v42, %v1962_v45 }
 0x118   :  { %v710_v49 = vpop.f32.mrf.mxu0  ;;  %v890_v50 = vpop.f32.mrf.mxu1 }
 0x119   :  { %1196 = vst [vmem:[%s2545_s3 + $0x48] sm:$0xff] %v1052_v43  ;;  %1268 = vst [vmem:[%s2545_s3 + $0x288] sm:$0xff] %v1124_v44  ;;  %v1053_v51 = vmax.f32 %v709_v47, 0.0  ;;  %v1125_v52 = vmax.f32 %v889_v48, 0.0  ;;  %v711_v53 = vadd.f32 %v710_v49, %v1964_v46  ;;  %v891_v54 = vadd.f32 %v890_v50, %v1964_v46 }
 0x11a   :  { %v714_v55 = vpop.f32.mrf.mxu0  ;;  %v894_v56 = vpop.f32.mrf.mxu1 }
 0x11b   :  { %1197 = vst [vmem:[%s2545_s3 + $0x50] sm:$0xff] %v1053_v51  ;;  %1269 = vst [vmem:[%s2545_s3 + $0x290] sm:$0xff] %v1125_v52  ;;  %v1054_v57 = vmax.f32 %v711_v53, 0.0  ;;  %v1126_v58 = vmax.f32 %v891_v54, 0.0  ;;  %v715_v59 = vadd.f32 %v714_v55, %v1962_v45  ;;  %v895_v60 = vadd.f32 %v894_v56, %v1962_v45 }
 0x11c   :  { %v716_v61 = vpop.f32.mrf.mxu0  ;;  %v896_v62 = vpop.f32.mrf.mxu1 }
 0x11d   :  { %1198 = vst [vmem:[%s2545_s3 + $0x58] sm:$0xff] %v1054_v57  ;;  %1270 = vst [vmem:[%s2545_s3 + $0x298] sm:$0xff] %v1126_v58  ;;  %v1055_v63 = vmax.f32 %v715_v59, 0.0  ;;  %v1127_v0 = vmax.f32 %v895_v60, 0.0  ;;  %v717_v1 = vadd.f32 %v716_v61, %v1964_v46  ;;  %v897_v2 = vadd.f32 %v896_v62, %v1964_v46 }
 0x11e   :  { %v718_v3 = vpop.f32.mrf.mxu0  ;;  %v898_v4 = vpop.f32.mrf.mxu1 }
 0x11f   :  { %1199 = vst [vmem:[%s2545_s3 + $0x60] sm:$0xff] %v1055_v63  ;;  %1271 = vst [vmem:[%s2545_s3 + $0x2a0] sm:$0xff] %v1127_v0  ;;  %v1056_v5 = vmax.f32 %v717_v1, 0.0  ;;  %v1128_v6 = vmax.f32 %v897_v2, 0.0  ;;  %v719_v7 = vadd.f32 %v718_v3, %v1962_v45  ;;  %v899_v8 = vadd.f32 %v898_v4, %v1962_v45 }
 0x120   :  { %v720_v9 = vpop.f32.mrf.mxu0  ;;  %v900_v10 = vpop.f32.mrf.mxu1 }
 0x121   :  { %1200 = vst [vmem:[%s2545_s3 + $0x68] sm:$0xff] %v1056_v5  ;;  %1272 = vst [vmem:[%s2545_s3 + $0x2a8] sm:$0xff] %v1128_v6  ;;  %v1057_v11 = vmax.f32 %v719_v7, 0.0  ;;  %v1129_v12 = vmax.f32 %v899_v8, 0.0  ;;  %v721_v13 = vadd.f32 %v720_v9, %v1964_v46  ;;  %v901_v14 = vadd.f32 %v900_v10, %v1964_v46 }
 0x122   :  { %v724_v15 = vpop.f32.mrf.mxu0  ;;  %v904_v16 = vpop.f32.mrf.mxu1 }
 0x123   :  { %1201 = vst [vmem:[%s2545_s3 + $0x70] sm:$0xff] %v1057_v11  ;;  %1273 = vst [vmem:[%s2545_s3 + $0x2b0] sm:$0xff] %v1129_v12  ;;  %v1058_v17 = vmax.f32 %v721_v13, 0.0  ;;  %v1130_v18 = vmax.f32 %v901_v14, 0.0  ;;  %v725_v19 = vadd.f32 %v724_v15, %v1962_v45  ;;  %v905_v20 = vadd.f32 %v904_v16, %v1962_v45 }
 0x124   :  { %v726_v21 = vpop.f32.mrf.mxu0  ;;  %v906_v22 = vpop.f32.mrf.mxu1 }
 0x125   :  { %1202 = vst [vmem:[%s2545_s3 + $0x78] sm:$0xff] %v1058_v17  ;;  %1274 = vst [vmem:[%s2545_s3 + $0x2b8] sm:$0xff] %v1130_v18  ;;  %v1059_v23 = vmax.f32 %v725_v19, 0.0  ;;  %v1131_v24 = vmax.f32 %v905_v20, 0.0  ;;  %v727_v25 = vadd.f32 %v726_v21, %v1964_v46  ;;  %v907_v26 = vadd.f32 %v906_v22, %v1964_v46 }
 0x126   :  { %v728_v27 = vpop.f32.mrf.mxu0  ;;  %v908_v28 = vpop.f32.mrf.mxu1 }
 0x127   :  { %1203 = vst [vmem:[%s2545_s3 + $0x80] sm:$0xff] %v1059_v23  ;;  %1275 = vst [vmem:[%s2545_s3 + $0x2c0] sm:$0xff] %v1131_v24  ;;  %v1060_v29 = vmax.f32 %v727_v25, 0.0  ;;  %v1132_v30 = vmax.f32 %v907_v26, 0.0  ;;  %v729_v31 = vadd.f32 %v728_v27, %v1962_v45  ;;  %v909_v32 = vadd.f32 %v908_v28, %v1962_v45 }
 0x128   :  { %v730_v33 = vpop.f32.mrf.mxu0  ;;  %v910_v34 = vpop.f32.mrf.mxu1 }
 0x129   :  { %1204 = vst [vmem:[%s2545_s3 + $0x88] sm:$0xff] %v1060_v29  ;;  %1276 = vst [vmem:[%s2545_s3 + $0x2c8] sm:$0xff] %v1132_v30  ;;  %v1061_v35 = vmax.f32 %v729_v31, 0.0  ;;  %v1133_v36 = vmax.f32 %v909_v32, 0.0  ;;  %v731_v37 = vadd.f32 %v730_v33, %v1964_v46  ;;  %v911_v38 = vadd.f32 %v910_v34, %v1964_v46 }
 0x12a   :  { %v734_v39 = vpop.f32.mrf.mxu0  ;;  %v914_v40 = vpop.f32.mrf.mxu1 }
 0x12b   :  { %1205 = vst [vmem:[%s2545_s3 + $0x90] sm:$0xff] %v1061_v35  ;;  %1277 = vst [vmem:[%s2545_s3 + $0x2d0] sm:$0xff] %v1133_v36  ;;  %v1062_v41 = vmax.f32 %v731_v37, 0.0  ;;  %v1134_v42 = vmax.f32 %v911_v38, 0.0  ;;  %v735_v43 = vadd.f32 %v734_v39, %v1962_v45  ;;  %v915_v44 = vadd.f32 %v914_v40, %v1962_v45 }
 0x12c   :  { %v736_v47 = vpop.f32.mrf.mxu0  ;;  %v916_v48 = vpop.f32.mrf.mxu1 }
 0x12d   :  { %1206 = vst [vmem:[%s2545_s3 + $0x98] sm:$0xff] %v1062_v41  ;;  %1278 = vst [vmem:[%s2545_s3 + $0x2d8] sm:$0xff] %v1134_v42  ;;  %v1063_v49 = vmax.f32 %v735_v43, 0.0  ;;  %v1135_v50 = vmax.f32 %v915_v44, 0.0  ;;  %v737_v51 = vadd.f32 %v736_v47, %v1964_v46  ;;  %v917_v52 = vadd.f32 %v916_v48, %v1964_v46 }
 0x12e   :  { %v738_v53 = vpop.f32.mrf.mxu0  ;;  %v918_v54 = vpop.f32.mrf.mxu1 }
 0x12f   :  { %1207 = vst [vmem:[%s2545_s3 + $0xa0] sm:$0xff] %v1063_v49  ;;  %1279 = vst [vmem:[%s2545_s3 + $0x2e0] sm:$0xff] %v1135_v50  ;;  %v1064_v55 = vmax.f32 %v737_v51, 0.0  ;;  %v1136_v56 = vmax.f32 %v917_v52, 0.0  ;;  %v739_v57 = vadd.f32 %v738_v53, %v1962_v45  ;;  %v919_v58 = vadd.f32 %v918_v54, %v1962_v45 }
 0x130   :  { %v740_v59 = vpop.f32.mrf.mxu0  ;;  %v920_v60 = vpop.f32.mrf.mxu1 }
 0x131   :  { %1208 = vst [vmem:[%s2545_s3 + $0xa8] sm:$0xff] %v1064_v55  ;;  %1280 = vst [vmem:[%s2545_s3 + $0x2e8] sm:$0xff] %v1136_v56  ;;  %v1065_v61 = vmax.f32 %v739_v57, 0.0  ;;  %v1137_v62 = vmax.f32 %v919_v58, 0.0  ;;  %v741_v63 = vadd.f32 %v740_v59, %v1964_v46  ;;  %v921_v0 = vadd.f32 %v920_v60, %v1964_v46 }
 0x132   :  { %v744_v1 = vpop.f32.mrf.mxu0  ;;  %v924_v2 = vpop.f32.mrf.mxu1 }
 0x133   :  { %1209 = vst [vmem:[%s2545_s3 + $0xb0] sm:$0xff] %v1065_v61  ;;  %1281 = vst [vmem:[%s2545_s3 + $0x2f0] sm:$0xff] %v1137_v62  ;;  %v1066_v3 = vmax.f32 %v741_v63, 0.0  ;;  %v1138_v4 = vmax.f32 %v921_v0, 0.0  ;;  %v745_v5 = vadd.f32 %v744_v1, %v1962_v45  ;;  %v925_v6 = vadd.f32 %v924_v2, %v1962_v45 }
 0x134   :  { %v746_v7 = vpop.f32.mrf.mxu0  ;;  %v926_v8 = vpop.f32.mrf.mxu1 }
 0x135   :  { %1210 = vst [vmem:[%s2545_s3 + $0xb8] sm:$0xff] %v1066_v3  ;;  %1282 = vst [vmem:[%s2545_s3 + $0x2f8] sm:$0xff] %v1138_v4  ;;  %v1067_v9 = vmax.f32 %v745_v5, 0.0  ;;  %v1139_v10 = vmax.f32 %v925_v6, 0.0  ;;  %v747_v11 = vadd.f32 %v746_v7, %v1964_v46  ;;  %v927_v12 = vadd.f32 %v926_v8, %v1964_v46 }
 0x136   :  { %v748_v13 = vpop.f32.mrf.mxu0  ;;  %v928_v14 = vpop.f32.mrf.mxu1 }
 0x137   :  { %1211 = vst [vmem:[%s2545_s3 + $0xc0] sm:$0xff] %v1067_v9  ;;  %1283 = vst [vmem:[%s2545_s3 + $0x300] sm:$0xff] %v1139_v10  ;;  %v1068_v15 = vmax.f32 %v747_v11, 0.0  ;;  %v1140_v16 = vmax.f32 %v927_v12, 0.0  ;;  %v749_v17 = vadd.f32 %v748_v13, %v1962_v45  ;;  %v929_v18 = vadd.f32 %v928_v14, %v1962_v45 }
 0x138   :  { %v750_v19 = vpop.f32.mrf.mxu0  ;;  %v930_v20 = vpop.f32.mrf.mxu1 }
 0x139   :  { %1212 = vst [vmem:[%s2545_s3 + $0xc8] sm:$0xff] %v1068_v15  ;;  %1284 = vst [vmem:[%s2545_s3 + $0x308] sm:$0xff] %v1140_v16  ;;  %v1069_v21 = vmax.f32 %v749_v17, 0.0  ;;  %v1141_v22 = vmax.f32 %v929_v18, 0.0  ;;  %v751_v23 = vadd.f32 %v750_v19, %v1964_v46  ;;  %v931_v24 = vadd.f32 %v930_v20, %v1964_v46 }
 0x13a   :  { %v754_v25 = vpop.f32.mrf.mxu0  ;;  %v934_v26 = vpop.f32.mrf.mxu1 }
 0x13b   :  { %1213 = vst [vmem:[%s2545_s3 + $0xd0] sm:$0xff] %v1069_v21  ;;  %1285 = vst [vmem:[%s2545_s3 + $0x310] sm:$0xff] %v1141_v22  ;;  %v1070_v27 = vmax.f32 %v751_v23, 0.0  ;;  %v1142_v28 = vmax.f32 %v931_v24, 0.0  ;;  %v755_v29 = vadd.f32 %v754_v25, %v1962_v45  ;;  %v935_v30 = vadd.f32 %v934_v26, %v1962_v45 }
 0x13c   :  { %v756_v31 = vpop.f32.mrf.mxu0  ;;  %v936_v32 = vpop.f32.mrf.mxu1 }
 0x13d   :  { %1214 = vst [vmem:[%s2545_s3 + $0xd8] sm:$0xff] %v1070_v27  ;;  %1286 = vst [vmem:[%s2545_s3 + $0x318] sm:$0xff] %v1142_v28  ;;  %v1071_v33 = vmax.f32 %v755_v29, 0.0  ;;  %v1143_v34 = vmax.f32 %v935_v30, 0.0  ;;  %v757_v35 = vadd.f32 %v756_v31, %v1964_v46  ;;  %v937_v36 = vadd.f32 %v936_v32, %v1964_v46 }
 0x13e   :  { %v758_v37 = vpop.f32.mrf.mxu0  ;;  %v938_v38 = vpop.f32.mrf.mxu1 }
 0x13f   :  { %1215 = vst [vmem:[%s2545_s3 + $0xe0] sm:$0xff] %v1071_v33  ;;  %1287 = vst [vmem:[%s2545_s3 + $0x320] sm:$0xff] %v1143_v34  ;;  %v1072_v39 = vmax.f32 %v757_v35, 0.0  ;;  %v1144_v40 = vmax.f32 %v937_v36, 0.0  ;;  %v759_v41 = vadd.f32 %v758_v37, %v1962_v45  ;;  %v939_v42 = vadd.f32 %v938_v38, %v1962_v45 }
 0x140   :  { %v760_v43 = vpop.f32.mrf.mxu0  ;;  %v940_v44 = vpop.f32.mrf.mxu1 }
 0x141   :  { %1216 = vst [vmem:[%s2545_s3 + $0xe8] sm:$0xff] %v1072_v39  ;;  %1288 = vst [vmem:[%s2545_s3 + $0x328] sm:$0xff] %v1144_v40  ;;  %v1073_v47 = vmax.f32 %v759_v41, 0.0  ;;  %v1145_v48 = vmax.f32 %v939_v42, 0.0  ;;  %v761_v49 = vadd.f32 %v760_v43, %v1964_v46  ;;  %v941_v50 = vadd.f32 %v940_v44, %v1964_v46 }
 0x142   :  { %v764_v51 = vpop.f32.mrf.mxu0  ;;  %v944_v52 = vpop.f32.mrf.mxu1 }
 0x143   :  { %1217 = vst [vmem:[%s2545_s3 + $0xf0] sm:$0xff] %v1073_v47  ;;  %1289 = vst [vmem:[%s2545_s3 + $0x330] sm:$0xff] %v1145_v48  ;;  %v1074_v53 = vmax.f32 %v761_v49, 0.0  ;;  %v1146_v54 = vmax.f32 %v941_v50, 0.0  ;;  %v765_v55 = vadd.f32 %v764_v51, %v1962_v45  ;;  %v945_v56 = vadd.f32 %v944_v52, %v1962_v45 }
 0x144   :  { %v766_v57 = vpop.f32.mrf.mxu0  ;;  %v946_v58 = vpop.f32.mrf.mxu1 }
 0x145   :  { %1218 = vst [vmem:[%s2545_s3 + $0xf8] sm:$0xff] %v1074_v53  ;;  %1290 = vst [vmem:[%s2545_s3 + $0x338] sm:$0xff] %v1146_v54  ;;  %v1075_v59 = vmax.f32 %v765_v55, 0.0  ;;  %v1147_v60 = vmax.f32 %v945_v56, 0.0  ;;  %v767_v61 = vadd.f32 %v766_v57, %v1964_v46  ;;  %v947_v62 = vadd.f32 %v946_v58, %v1964_v46 }
 0x146   :  { %v768_v63 = vpop.f32.mrf.mxu0  ;;  %v948_v0 = vpop.f32.mrf.mxu1 }
 0x147   :  { %1219 = vst [vmem:[%s2545_s3 + $0x100] sm:$0xff] %v1075_v59  ;;  %1291 = vst [vmem:[%s2545_s3 + $0x340] sm:$0xff] %v1147_v60  ;;  %v1076_v1 = vmax.f32 %v767_v61, 0.0  ;;  %v1148_v2 = vmax.f32 %v947_v62, 0.0  ;;  %v769_v3 = vadd.f32 %v768_v63, %v1962_v45  ;;  %v949_v4 = vadd.f32 %v948_v0, %v1962_v45 }
 0x148   :  { %v770_v5 = vpop.f32.mrf.mxu0  ;;  %v950_v6 = vpop.f32.mrf.mxu1 }
 0x149   :  { %1220 = vst [vmem:[%s2545_s3 + $0x108] sm:$0xff] %v1076_v1  ;;  %1292 = vst [vmem:[%s2545_s3 + $0x348] sm:$0xff] %v1148_v2  ;;  %v1077_v7 = vmax.f32 %v769_v3, 0.0  ;;  %v1149_v8 = vmax.f32 %v949_v4, 0.0  ;;  %v771_v9 = vadd.f32 %v770_v5, %v1964_v46  ;;  %v951_v10 = vadd.f32 %v950_v6, %v1964_v46 }
 0x14a   :  { %v774_v11 = vpop.f32.mrf.mxu0  ;;  %v954_v12 = vpop.f32.mrf.mxu1 }
 0x14b   :  { %1221 = vst [vmem:[%s2545_s3 + $0x110] sm:$0xff] %v1077_v7  ;;  %1293 = vst [vmem:[%s2545_s3 + $0x350] sm:$0xff] %v1149_v8  ;;  %v1078_v13 = vmax.f32 %v771_v9, 0.0  ;;  %v1150_v14 = vmax.f32 %v951_v10, 0.0  ;;  %v775_v15 = vadd.f32 %v774_v11, %v1962_v45  ;;  %v955_v16 = vadd.f32 %v954_v12, %v1962_v45 }
 0x14c   :  { %v776_v17 = vpop.f32.mrf.mxu0  ;;  %v956_v18 = vpop.f32.mrf.mxu1 }
 0x14d   :  { %1222 = vst [vmem:[%s2545_s3 + $0x118] sm:$0xff] %v1078_v13  ;;  %1294 = vst [vmem:[%s2545_s3 + $0x358] sm:$0xff] %v1150_v14  ;;  %v1079_v19 = vmax.f32 %v775_v15, 0.0  ;;  %v1151_v20 = vmax.f32 %v955_v16, 0.0  ;;  %v777_v21 = vadd.f32 %v776_v17, %v1964_v46  ;;  %v957_v22 = vadd.f32 %v956_v18, %v1964_v46 }
 0x14e   :  { %v778_v23 = vpop.f32.mrf.mxu0  ;;  %v958_v24 = vpop.f32.mrf.mxu1 }
 0x14f   :  { %1223 = vst [vmem:[%s2545_s3 + $0x120] sm:$0xff] %v1079_v19  ;;  %1295 = vst [vmem:[%s2545_s3 + $0x360] sm:$0xff] %v1151_v20  ;;  %v1080_v25 = vmax.f32 %v777_v21, 0.0  ;;  %v1152_v26 = vmax.f32 %v957_v22, 0.0  ;;  %v779_v27 = vadd.f32 %v778_v23, %v1962_v45  ;;  %v959_v28 = vadd.f32 %v958_v24, %v1962_v45 }
 0x150   :  { %v780_v29 = vpop.f32.mrf.mxu0  ;;  %v960_v30 = vpop.f32.mrf.mxu1 }
 0x151   :  { %1224 = vst [vmem:[%s2545_s3 + $0x128] sm:$0xff] %v1080_v25  ;;  %1296 = vst [vmem:[%s2545_s3 + $0x368] sm:$0xff] %v1152_v26  ;;  %v1081_v31 = vmax.f32 %v779_v27, 0.0  ;;  %v1153_v32 = vmax.f32 %v959_v28, 0.0  ;;  %v781_v33 = vadd.f32 %v780_v29, %v1964_v46  ;;  %v961_v34 = vadd.f32 %v960_v30, %v1964_v46 }
 0x152   :  { %v784_v35 = vpop.f32.mrf.mxu0  ;;  %v964_v36 = vpop.f32.mrf.mxu1 }
 0x153   :  { %1225 = vst [vmem:[%s2545_s3 + $0x130] sm:$0xff] %v1081_v31  ;;  %1297 = vst [vmem:[%s2545_s3 + $0x370] sm:$0xff] %v1153_v32  ;;  %v1082_v37 = vmax.f32 %v781_v33, 0.0  ;;  %v1154_v38 = vmax.f32 %v961_v34, 0.0  ;;  %v785_v39 = vadd.f32 %v784_v35, %v1962_v45  ;;  %v965_v40 = vadd.f32 %v964_v36, %v1962_v45 }
 0x154   :  { %v786_v41 = vpop.f32.mrf.mxu0  ;;  %v966_v42 = vpop.f32.mrf.mxu1 }
 0x155   :  { %1226 = vst [vmem:[%s2545_s3 + $0x138] sm:$0xff] %v1082_v37  ;;  %1298 = vst [vmem:[%s2545_s3 + $0x378] sm:$0xff] %v1154_v38  ;;  %v1083_v43 = vmax.f32 %v785_v39, 0.0  ;;  %v1155_v44 = vmax.f32 %v965_v40, 0.0  ;;  %v787_v47 = vadd.f32 %v786_v41, %v1964_v46  ;;  %v967_v48 = vadd.f32 %v966_v42, %v1964_v46 }
 0x156   :  { %v788_v49 = vpop.f32.mrf.mxu0  ;;  %v968_v50 = vpop.f32.mrf.mxu1 }
 0x157   :  { %1227 = vst [vmem:[%s2545_s3 + $0x140] sm:$0xff] %v1083_v43  ;;  %1299 = vst [vmem:[%s2545_s3 + $0x380] sm:$0xff] %v1155_v44  ;;  %v1084_v51 = vmax.f32 %v787_v47, 0.0  ;;  %v1156_v52 = vmax.f32 %v967_v48, 0.0  ;;  %v789_v53 = vadd.f32 %v788_v49, %v1962_v45  ;;  %v969_v54 = vadd.f32 %v968_v50, %v1962_v45 }
 0x158   :  { %v790_v55 = vpop.f32.mrf.mxu0  ;;  %v970_v56 = vpop.f32.mrf.mxu1 }
 0x159   :  { %1228 = vst [vmem:[%s2545_s3 + $0x148] sm:$0xff] %v1084_v51  ;;  %1300 = vst [vmem:[%s2545_s3 + $0x388] sm:$0xff] %v1156_v52  ;;  %v1085_v57 = vmax.f32 %v789_v53, 0.0  ;;  %v1157_v58 = vmax.f32 %v969_v54, 0.0  ;;  %v791_v59 = vadd.f32 %v790_v55, %v1964_v46  ;;  %v971_v60 = vadd.f32 %v970_v56, %v1964_v46 }
 0x15a   :  { %v794_v61 = vpop.f32.mrf.mxu0  ;;  %v974_v62 = vpop.f32.mrf.mxu1 }
 0x15b   :  { %1229 = vst [vmem:[%s2545_s3 + $0x150] sm:$0xff] %v1085_v57  ;;  %1301 = vst [vmem:[%s2545_s3 + $0x390] sm:$0xff] %v1157_v58  ;;  %v1086_v63 = vmax.f32 %v791_v59, 0.0  ;;  %v1158_v0 = vmax.f32 %v971_v60, 0.0  ;;  %v795_v1 = vadd.f32 %v794_v61, %v1962_v45  ;;  %v975_v2 = vadd.f32 %v974_v62, %v1962_v45 }
 0x15c   :  { %v796_v3 = vpop.f32.mrf.mxu0  ;;  %v976_v4 = vpop.f32.mrf.mxu1 }
 0x15d   :  { %1230 = vst [vmem:[%s2545_s3 + $0x158] sm:$0xff] %v1086_v63  ;;  %1302 = vst [vmem:[%s2545_s3 + $0x398] sm:$0xff] %v1158_v0  ;;  %v1087_v5 = vmax.f32 %v795_v1, 0.0  ;;  %v1159_v6 = vmax.f32 %v975_v2, 0.0  ;;  %v797_v7 = vadd.f32 %v796_v3, %v1964_v46  ;;  %v977_v8 = vadd.f32 %v976_v4, %v1964_v46 }
 0x15e   :  { %v798_v9 = vpop.f32.mrf.mxu0  ;;  %v978_v10 = vpop.f32.mrf.mxu1 }
 0x15f   :  { %1231 = vst [vmem:[%s2545_s3 + $0x160] sm:$0xff] %v1087_v5  ;;  %1303 = vst [vmem:[%s2545_s3 + $0x3a0] sm:$0xff] %v1159_v6  ;;  %v1088_v11 = vmax.f32 %v797_v7, 0.0  ;;  %v1160_v12 = vmax.f32 %v977_v8, 0.0  ;;  %v799_v13 = vadd.f32 %v798_v9, %v1962_v45  ;;  %v979_v14 = vadd.f32 %v978_v10, %v1962_v45 }
 0x160   :  { %v800_v15 = vpop.f32.mrf.mxu0  ;;  %v980_v16 = vpop.f32.mrf.mxu1 }
 0x161   :  { %1232 = vst [vmem:[%s2545_s3 + $0x168] sm:$0xff] %v1088_v11  ;;  %1304 = vst [vmem:[%s2545_s3 + $0x3a8] sm:$0xff] %v1160_v12  ;;  %v1089_v17 = vmax.f32 %v799_v13, 0.0  ;;  %v1161_v18 = vmax.f32 %v979_v14, 0.0  ;;  %v801_v19 = vadd.f32 %v800_v15, %v1964_v46  ;;  %v981_v20 = vadd.f32 %v980_v16, %v1964_v46 }
 0x162   :  { %v804_v21 = vpop.f32.mrf.mxu0  ;;  %v984_v22 = vpop.f32.mrf.mxu1 }
 0x163   :  { %1233 = vst [vmem:[%s2545_s3 + $0x170] sm:$0xff] %v1089_v17  ;;  %1305 = vst [vmem:[%s2545_s3 + $0x3b0] sm:$0xff] %v1161_v18  ;;  %v1090_v23 = vmax.f32 %v801_v19, 0.0  ;;  %v1162_v24 = vmax.f32 %v981_v20, 0.0  ;;  %v805_v25 = vadd.f32 %v804_v21, %v1962_v45  ;;  %v985_v26 = vadd.f32 %v984_v22, %v1962_v45 }
 0x164   :  { %v806_v27 = vpop.f32.mrf.mxu0  ;;  %v986_v28 = vpop.f32.mrf.mxu1 }
 0x165   :  { %1234 = vst [vmem:[%s2545_s3 + $0x178] sm:$0xff] %v1090_v23  ;;  %1306 = vst [vmem:[%s2545_s3 + $0x3b8] sm:$0xff] %v1162_v24  ;;  %v1091_v29 = vmax.f32 %v805_v25, 0.0  ;;  %v1163_v30 = vmax.f32 %v985_v26, 0.0  ;;  %v807_v31 = vadd.f32 %v806_v27, %v1964_v46  ;;  %v987_v32 = vadd.f32 %v986_v28, %v1964_v46 }
 0x166   :  { %v808_v33 = vpop.f32.mrf.mxu0  ;;  %v988_v34 = vpop.f32.mrf.mxu1 }
 0x167   :  { %1235 = vst [vmem:[%s2545_s3 + $0x180] sm:$0xff] %v1091_v29  ;;  %1307 = vst [vmem:[%s2545_s3 + $0x3c0] sm:$0xff] %v1163_v30  ;;  %v1092_v35 = vmax.f32 %v807_v31, 0.0  ;;  %v1164_v36 = vmax.f32 %v987_v32, 0.0  ;;  %v809_v37 = vadd.f32 %v808_v33, %v1962_v45  ;;  %v989_v38 = vadd.f32 %v988_v34, %v1962_v45 }
 0x168   :  { %v810_v39 = vpop.f32.mrf.mxu0  ;;  %v990_v40 = vpop.f32.mrf.mxu1 }
 0x169   :  { %1236 = vst [vmem:[%s2545_s3 + $0x188] sm:$0xff] %v1092_v35  ;;  %1308 = vst [vmem:[%s2545_s3 + $0x3c8] sm:$0xff] %v1164_v36  ;;  %v1093_v41 = vmax.f32 %v809_v37, 0.0  ;;  %v1165_v42 = vmax.f32 %v989_v38, 0.0  ;;  %v811_v43 = vadd.f32 %v810_v39, %v1964_v46  ;;  %v991_v44 = vadd.f32 %v990_v40, %v1964_v46 }
 0x16a   :  { %v814_v47 = vpop.f32.mrf.mxu0  ;;  %v994_v48 = vpop.f32.mrf.mxu1 }
 0x16b   :  { %1237 = vst [vmem:[%s2545_s3 + $0x190] sm:$0xff] %v1093_v41  ;;  %1309 = vst [vmem:[%s2545_s3 + $0x3d0] sm:$0xff] %v1165_v42  ;;  %v1094_v49 = vmax.f32 %v811_v43, 0.0  ;;  %v1166_v50 = vmax.f32 %v991_v44, 0.0  ;;  %v815_v51 = vadd.f32 %v814_v47, %v1962_v45  ;;  %v995_v52 = vadd.f32 %v994_v48, %v1962_v45 }
 0x16c   :  { %v816_v53 = vpop.f32.mrf.mxu0  ;;  %v996_v54 = vpop.f32.mrf.mxu1 }
 0x16d   :  { %1238 = vst [vmem:[%s2545_s3 + $0x198] sm:$0xff] %v1094_v49  ;;  %1310 = vst [vmem:[%s2545_s3 + $0x3d8] sm:$0xff] %v1166_v50  ;;  %v1095_v55 = vmax.f32 %v815_v51, 0.0  ;;  %v1167_v56 = vmax.f32 %v995_v52, 0.0  ;;  %v817_v57 = vadd.f32 %v816_v53, %v1964_v46  ;;  %v997_v58 = vadd.f32 %v996_v54, %v1964_v46 }
 0x16e   :  { %v818_v59 = vpop.f32.mrf.mxu0  ;;  %v998_v60 = vpop.f32.mrf.mxu1 }
 0x16f   :  { %1239 = vst [vmem:[%s2545_s3 + $0x1a0] sm:$0xff] %v1095_v55  ;;  %1311 = vst [vmem:[%s2545_s3 + $0x3e0] sm:$0xff] %v1167_v56  ;;  %v1096_v61 = vmax.f32 %v817_v57, 0.0  ;;  %v1168_v62 = vmax.f32 %v997_v58, 0.0  ;;  %v819_v63 = vadd.f32 %v818_v59, %v1962_v45  ;;  %v999_v0 = vadd.f32 %v998_v60, %v1962_v45 }
 0x170   :  { %v820_v1 = vpop.f32.mrf.mxu0  ;;  %v1000_v2 = vpop.f32.mrf.mxu1 }
 0x171   :  { %1240 = vst [vmem:[%s2545_s3 + $0x1a8] sm:$0xff] %v1096_v61  ;;  %1312 = vst [vmem:[%s2545_s3 + $0x3e8] sm:$0xff] %v1168_v62  ;;  %v1097_v3 = vmax.f32 %v819_v63, 0.0  ;;  %v1169_v4 = vmax.f32 %v999_v0, 0.0  ;;  %v821_v5 = vadd.f32 %v820_v1, %v1964_v46  ;;  %v1001_v6 = vadd.f32 %v1000_v2, %v1964_v46 }
 0x172   :  { %v824_v7 = vpop.f32.mrf.mxu0  ;;  %v1004_v8 = vpop.f32.mrf.mxu1 }
 0x173   :  { %1241 = vst [vmem:[%s2545_s3 + $0x1b0] sm:$0xff] %v1097_v3  ;;  %1313 = vst [vmem:[%s2545_s3 + $0x3f0] sm:$0xff] %v1169_v4  ;;  %v1098_v9 = vmax.f32 %v821_v5, 0.0  ;;  %v1170_v10 = vmax.f32 %v1001_v6, 0.0  ;;  %v825_v11 = vadd.f32 %v824_v7, %v1962_v45  ;;  %v1005_v12 = vadd.f32 %v1004_v8, %v1962_v45 }
 0x174   :  { %v826_v13 = vpop.f32.mrf.mxu0  ;;  %v1006_v14 = vpop.f32.mrf.mxu1 }
 0x175   :  { %1242 = vst [vmem:[%s2545_s3 + $0x1b8] sm:$0xff] %v1098_v9  ;;  %1314 = vst [vmem:[%s2545_s3 + $0x3f8] sm:$0xff] %v1170_v10  ;;  %v1099_v15 = vmax.f32 %v825_v11, 0.0  ;;  %v1171_v16 = vmax.f32 %v1005_v12, 0.0  ;;  %v827_v17 = vadd.f32 %v826_v13, %v1964_v46  ;;  %v1007_v18 = vadd.f32 %v1006_v14, %v1964_v46 }
 0x176   :  { %v828_v19 = vpop.f32.mrf.mxu0  ;;  %v1008_v20 = vpop.f32.mrf.mxu1 }
 0x177   :  { %1243 = vst [vmem:[%s2545_s3 + $0x1c0] sm:$0xff] %v1099_v15  ;;  %1315 = vst [vmem:[%s2545_s3 + $0x400] sm:$0xff] %v1171_v16  ;;  %v1100_v21 = vmax.f32 %v827_v17, 0.0  ;;  %v1172_v22 = vmax.f32 %v1007_v18, 0.0  ;;  %v829_v23 = vadd.f32 %v828_v19, %v1962_v45  ;;  %v1009_v24 = vadd.f32 %v1008_v20, %v1962_v45 }
 0x178   :  { %v830_v25 = vpop.f32.mrf.mxu0  ;;  %v1010_v26 = vpop.f32.mrf.mxu1 }
 0x179   :  { %1244 = vst [vmem:[%s2545_s3 + $0x1c8] sm:$0xff] %v1100_v21  ;;  %1316 = vst [vmem:[%s2545_s3 + $0x408] sm:$0xff] %v1172_v22  ;;  %v1101_v27 = vmax.f32 %v829_v23, 0.0  ;;  %v1173_v28 = vmax.f32 %v1009_v24, 0.0  ;;  %v831_v29 = vadd.f32 %v830_v25, %v1964_v46  ;;  %v1011_v30 = vadd.f32 %v1010_v26, %v1964_v46 }
 0x17a   :  { %v834_v31 = vpop.f32.mrf.mxu0  ;;  %v1014_v32 = vpop.f32.mrf.mxu1 }
 0x17b   :  { %1245 = vst [vmem:[%s2545_s3 + $0x1d0] sm:$0xff] %v1101_v27  ;;  %1317 = vst [vmem:[%s2545_s3 + $0x410] sm:$0xff] %v1173_v28  ;;  %v1102_v33 = vmax.f32 %v831_v29, 0.0  ;;  %v1174_v34 = vmax.f32 %v1011_v30, 0.0  ;;  %v835_v35 = vadd.f32 %v834_v31, %v1962_v45  ;;  %v1015_v36 = vadd.f32 %v1014_v32, %v1962_v45 }
 0x17c   :  { %v836_v37 = vpop.f32.mrf.mxu0  ;;  %v1016_v38 = vpop.f32.mrf.mxu1 }
 0x17d   :  { %1246 = vst [vmem:[%s2545_s3 + $0x1d8] sm:$0xff] %v1102_v33  ;;  %1318 = vst [vmem:[%s2545_s3 + $0x418] sm:$0xff] %v1174_v34  ;;  %v1103_v39 = vmax.f32 %v835_v35, 0.0  ;;  %v1175_v40 = vmax.f32 %v1015_v36, 0.0  ;;  %v837_v41 = vadd.f32 %v836_v37, %v1964_v46  ;;  %v1017_v42 = vadd.f32 %v1016_v38, %v1964_v46 }
 0x17e   :  { %v838_v43 = vpop.f32.mrf.mxu0  ;;  %v1018_v44 = vpop.f32.mrf.mxu1 }
 0x17f   :  { %1247 = vst [vmem:[%s2545_s3 + $0x1e0] sm:$0xff] %v1103_v39  ;;  %1319 = vst [vmem:[%s2545_s3 + $0x420] sm:$0xff] %v1175_v40  ;;  %v1104_v47 = vmax.f32 %v837_v41, 0.0  ;;  %v1176_v48 = vmax.f32 %v1017_v42, 0.0  ;;  %v839_v49 = vadd.f32 %v838_v43, %v1962_v45  ;;  %v1019_v50 = vadd.f32 %v1018_v44, %v1962_v45 }
 0x180   :  { %v840_v51 = vpop.f32.mrf.mxu0  ;;  %v1020_v52 = vpop.f32.mrf.mxu1 }
 0x181   :  { %1248 = vst [vmem:[%s2545_s3 + $0x1e8] sm:$0xff] %v1104_v47  ;;  %1320 = vst [vmem:[%s2545_s3 + $0x428] sm:$0xff] %v1176_v48  ;;  %v1105_v53 = vmax.f32 %v839_v49, 0.0  ;;  %v1177_v54 = vmax.f32 %v1019_v50, 0.0  ;;  %v841_v55 = vadd.f32 %v840_v51, %v1964_v46  ;;  %v1021_v56 = vadd.f32 %v1020_v52, %v1964_v46 }
 0x182   :  { %v844_v57 = vpop.f32.mrf.mxu0  ;;  %v1024_v58 = vpop.f32.mrf.mxu1 }
 0x183   :  { %1249 = vst [vmem:[%s2545_s3 + $0x1f0] sm:$0xff] %v1105_v53  ;;  %1321 = vst [vmem:[%s2545_s3 + $0x430] sm:$0xff] %v1177_v54  ;;  %v1106_v59 = vmax.f32 %v841_v55, 0.0  ;;  %v1178_v60 = vmax.f32 %v1021_v56, 0.0  ;;  %v845_v61 = vadd.f32 %v844_v57, %v1962_v45  ;;  %v1025_v62 = vadd.f32 %v1024_v58, %v1962_v45 }
 0x184   :  { %v846_v63 = vpop.f32.mrf.mxu0  ;;  %v1026_v0 = vpop.f32.mrf.mxu1 }
 0x185   :  { %1250 = vst [vmem:[%s2545_s3 + $0x1f8] sm:$0xff] %v1106_v59  ;;  %1322 = vst [vmem:[%s2545_s3 + $0x438] sm:$0xff] %v1178_v60  ;;  %v1107_v1 = vmax.f32 %v845_v61, 0.0  ;;  %v1179_v2 = vmax.f32 %v1025_v62, 0.0  ;;  %v847_v3 = vadd.f32 %v846_v63, %v1964_v46  ;;  %v1027_v4 = vadd.f32 %v1026_v0, %v1964_v46 }
 0x186   :  { %v848_v5 = vpop.f32.mrf.mxu0  ;;  %v1028_v6 = vpop.f32.mrf.mxu1 }
 0x187   :  { %1251 = vst [vmem:[%s2545_s3 + $0x200] sm:$0xff] %v1107_v1  ;;  %1323 = vst [vmem:[%s2545_s3 + $0x440] sm:$0xff] %v1179_v2  ;;  %v1108_v7 = vmax.f32 %v847_v3, 0.0  ;;  %v1180_v8 = vmax.f32 %v1027_v4, 0.0  ;;  %v849_v9 = vadd.f32 %v848_v5, %v1962_v45  ;;  %v1029_v10 = vadd.f32 %v1028_v6, %v1962_v45 }
 0x188   :  { %v850_v11 = vpop.f32.mrf.mxu0  ;;  %v1030_v12 = vpop.f32.mrf.mxu1 }
 0x189   :  { %1252 = vst [vmem:[%s2545_s3 + $0x208] sm:$0xff] %v1108_v7  ;;  %1324 = vst [vmem:[%s2545_s3 + $0x448] sm:$0xff] %v1180_v8  ;;  %v1109_v13 = vmax.f32 %v849_v9, 0.0  ;;  %v1181_v14 = vmax.f32 %v1029_v10, 0.0  ;;  %v851_v15 = vadd.f32 %v850_v11, %v1964_v46  ;;  %v1031_v16 = vadd.f32 %v1030_v12, %v1964_v46 }
 0x18a   :  { %v854_v17 = vpop.f32.mrf.mxu0  ;;  %v1034_v18 = vpop.f32.mrf.mxu1 }
 0x18b   :  { %1253 = vst [vmem:[%s2545_s3 + $0x210] sm:$0xff] %v1109_v13  ;;  %1325 = vst [vmem:[%s2545_s3 + $0x450] sm:$0xff] %v1181_v14  ;;  %v1110_v19 = vmax.f32 %v851_v15, 0.0  ;;  %v1182_v20 = vmax.f32 %v1031_v16, 0.0  ;;  %v855_v21 = vadd.f32 %v854_v17, %v1962_v45  ;;  %v1035_v22 = vadd.f32 %v1034_v18, %v1962_v45 }
 0x18c   :  { %v856_v23 = vpop.f32.mrf.mxu0  ;;  %v1036_v24 = vpop.f32.mrf.mxu1 }
 0x18d   :  { %1254 = vst [vmem:[%s2545_s3 + $0x218] sm:$0xff] %v1110_v19  ;;  %1326 = vst [vmem:[%s2545_s3 + $0x458] sm:$0xff] %v1182_v20  ;;  %v1111_v25 = vmax.f32 %v855_v21, 0.0  ;;  %v1183_v26 = vmax.f32 %v1035_v22, 0.0  ;;  %v857_v27 = vadd.f32 %v856_v23, %v1964_v46  ;;  %v1037_v28 = vadd.f32 %v1036_v24, %v1964_v46 }
 0x18e   :  { %v858_v29 = vpop.f32.mrf.mxu0  ;;  %v1038_v30 = vpop.f32.mrf.mxu1 }
 0x18f   :  { %1255 = vst [vmem:[%s2545_s3 + $0x220] sm:$0xff] %v1111_v25  ;;  %1327 = vst [vmem:[%s2545_s3 + $0x460] sm:$0xff] %v1183_v26  ;;  %v1112_v31 = vmax.f32 %v857_v27, 0.0  ;;  %v1184_v32 = vmax.f32 %v1037_v28, 0.0  ;;  %v859_v33 = vadd.f32 %v858_v29, %v1962_v45  ;;  %v1039_v34 = vadd.f32 %v1038_v30, %v1962_v45 }
 0x190   :  { %v860_v35 = vpop.f32.mrf.mxu0  ;;  %v1040_v36 = vpop.f32.mrf.mxu1 }
 0x191   :  { %1256 = vst [vmem:[%s2545_s3 + $0x228] sm:$0xff] %v1112_v31  ;;  %1328 = vst [vmem:[%s2545_s3 + $0x468] sm:$0xff] %v1184_v32  ;;  %v1113_v37 = vmax.f32 %v859_v33, 0.0  ;;  %v1185_v38 = vmax.f32 %v1039_v34, 0.0  ;;  %v861_v39 = vadd.f32 %v860_v35, %v1964_v46  ;;  %v1041_v40 = vadd.f32 %v1040_v36, %v1964_v46 }
 0x193   :  { %1257 = vst [vmem:[%s2545_s3 + $0x230] sm:$0xff] %v1113_v37  ;;  %1329 = vst [vmem:[%s2545_s3 + $0x470] sm:$0xff] %v1185_v38  ;;  %v1114_v45 = vmax.f32 %v861_v39, 0.0  ;;  %v1186_v41 = vmax.f32 %v1041_v40, 0.0 }
 0x195   :  { %1258 = vst [vmem:[%s2545_s3 + $0x238] sm:$0xff] %v1114_v45  ;;  %1330 = vst [vmem:[%s2545_s3 + $0x478] sm:$0xff] %v1186_v41 }

// kernel: _lambda_.31
= control target key start
LH: loop header
LB: loop body
LE: loop exit
PB: predicated region body
PF: predicated region fallthrough
CT: control target
= control target key end

     0   :  { %v1005_v0 = vmov 0   ;;  %vm501_vm0 = vcmask 1041408   ;;  %vm502_vm1 = vcmask 1042432   ;;  %v1006_v23 = vmov 65535   ;;  %s1408_s1 = inlined_call_operand.vmem [shape: bf16[485,37], index: 1, kind: input, shape index: {}]   ;;  %s1409_s0 = inlined_call_operand.vmem [shape: bf16[144,485], index: 0, kind: input, shape index: {}]   ;;  %s1410_s2 = inlined_call_operand.vmem [shape: f32[1,37], index: 2, kind: input, shape index: {}]   ;;  %s1411_s3 = inlined_call_operand.vmem [shape: f32[144,37], index: 3, kind: output, shape index: {}]  }
   0x1   :  { %888 = vmatprep.subr.bf16.mxu1 %v1005_v0  ;;  %v920_v1 = vld [vmem:[%s1408_s1 + $0x78] sm:$0xff]   ;;  %v923_v4 = vld [vmem:[%s1408_s1 + $0x70] sm:$0xff]   ;;  %v926_v7 = vld [vmem:[%s1408_s1 + $0x68] sm:$0xff]   ;;  %v503_v24 = vsel %vm501_vm0, 4294967295, %v1006_v23  ;;  %vm473_vm2 = vcmask 826368   ;;  %vm718_vm3 = vcmask 302080  }
   0x2   :  { %v1034_v2 = vld [vmem:[%s1408_s1 + $0xb8] sm:$0xff]   ;;  %818 = vmatprep.subr.bf16.mxu0 %v920_v1  ;;  %v1047_v5 = vld [vmem:[%s1408_s1 + $0xb0] sm:$0xff]   ;;  %v1059_v8 = vld [vmem:[%s1408_s1 + $0xa8] sm:$0xff]   ;;  %v504_v29 = vsel %vm502_vm1, %v503_v24, 0 }
   0x3   :  { %v922_v3 = vld [vmem:[%s1408_s1 + $0x38] sm:$0xff]   ;;  %903 = vmatpush1.bf16.msra.mxu1 %v1034_v2  ;;  %v925_v6 = vld [vmem:[%s1408_s1 + $0x30] sm:$0xff]   ;;  %v928_v9 = vld [vmem:[%s1408_s1 + $0x28] sm:$0xff]  }
   0x4   :  { %819 = vmatpush3.bf16.msra.mxu0 %v922_v3  ;;  %889 = vmatprep.subr.bf16.mxu1 %v1005_v0  ;;  %v929_v10 = vld [vmem:[%s1408_s1 + $0x60] sm:$0xff]   ;;  %v932_v13 = vld [vmem:[%s1408_s1 + $0x58] sm:$0xff]   ;;  %v935_v16 = vld [vmem:[%s1408_s1 + $0x50] sm:$0xff]  }
   0x5   :  { %820 = vmatprep.subr.bf16.mxu0 %v923_v4  ;;  %v1072_v11 = vld [vmem:[%s1408_s1 + $0xa0] sm:$0xff]   ;;  %v1085_v14 = vld [vmem:[%s1408_s1 + $0x98] sm:$0xff]   ;;  %v1098_v17 = vld [vmem:[%s1408_s1 + $0x90] sm:$0xff]  }
   0x6   :  { %v931_v12 = vld [vmem:[%s1408_s1 + $0x20] sm:$0xff]   ;;  %v934_v15 = vld [vmem:[%s1408_s1 + $0x18] sm:$0xff]   ;;  %v937_v18 = vld [vmem:[%s1408_s1 + $0x10] sm:$0xff]  }
   0x7   :  { %904 = vmatpush1.bf16.msra.mxu1 %v1047_v5  ;;  %v938_v19 = vld [vmem:[%s1408_s1 + $0x48] sm:$0xff]   ;;  %v941_v22 = vld [vmem:[%s1408_s1 + $0x40] sm:$0xff]   ;;  %v947_v27 = vld [vmem:[%s1408_s1 + $0xf0] ss:$0 sps:$4 sm:$0x77]  }
   0x8   :  { %821 = vmatpush3.bf16.msra.mxu0 %v925_v6  ;;  %890 = vmatprep.subr.bf16.mxu1 %v1005_v0  ;;  %v1110_v20 = vld [vmem:[%s1408_s1 + $0x88] sm:$0xff]   ;;  %v946_v25 = vld [vmem:[%s1409_s0 + $0x4] ss:$16 sps:$4 sm:$0xff]   ;;  %v944_v30 = vld [vmem:[%s1409_s0] ss:$16 sps:$4 sm:$0xff]   ;;  %v1140_v31 = vand.u32 %v947_v27, %v504_v29 }
   0x9   :  { %822 = vmatprep.subr.bf16.mxu0 %v926_v7  ;;  %v940_v21 = vld [vmem:[%s1408_s1 + $0x8] sm:$0xff]   ;;  %v1126_v26 = vld [vmem:[%s1408_s1 + $0x80] sm:$0xff]   ;;  %540 = vmatprep.mubr.bf16.mxu0 %v946_v25  ;;  %v953_v38 = vld [vmem:[%s1408_s1 + $0xd8] sm:$0xff]  }
   0xa   :  { %v943_v28 = vld [vmem:[%s1408_s1] sm:$0xff]   ;;  %v1151_v33 = vld [vmem:[%s1408_s1 + $0xe8] sm:$0xff]   ;;  %v957_v40 = vld [vmem:[%s1408_s1 + $0xd0] sm:$0xff]  }
   0xb   :  { %905 = vmatpush1.bf16.msra.mxu1 %v1059_v8  ;;  %v949_v32 = vld [vmem:[%s1409_s0 + $0x24] ss:$16 sps:$4 sm:$0xff]   ;;  %v965_v34 = vld [vmem:[%s1409_s0 + $0x2c] ss:$16 sps:$4 sm:$0xff]   ;;  %v951_v35 = vld [vmem:[%s1409_s0 + $0x20] ss:$16 sps:$4 sm:$0xff]  }
   0xc   :  { %823 = vmatpush3.bf16.msra.mxu0 %v928_v9  ;;  %891 = vmatprep.subr.bf16.mxu1 %v1005_v0  ;;  %v952_v36 = vld [vmem:[%s1408_s1 + $0xe0] sm:$0xff]   ;;  %v958_v42 = vld [vmem:[%s1408_s1 + $0xc8] sm:$0xff]  }
   0xd   :  { %824 = vmatprep.subr.bf16.mxu0 %v929_v10  ;;  %810 = vmatprep.mubr.msk.bf16.mxu1 %vm473_vm2, %v965_v34  ;;  %v954_v37 = vld [vmem:[%s1409_s0 + $0x44] ss:$16 sps:$4 sm:$0xff]   ;;  %v956_v39 = vld [vmem:[%s1409_s0 + $0x40] ss:$16 sps:$4 sm:$0xff]   ;;  %v963_v46 = vld [vmem:[%s1409_s0 + $0x28] ss:$16 sps:$4 sm:$0xff]  }
   0xe   :  { %v959_v41 = vld [vmem:[%s1409_s0 + $0x64] ss:$16 sps:$4 sm:$0xff]   ;;  %v961_v43 = vld [vmem:[%s1409_s0 + $0x60] ss:$16 sps:$4 sm:$0xff]   ;;  %v969_v47 = vld [vmem:[%s1409_s0 + $0x4c] ss:$16 sps:$4 sm:$0xff]  }
   0xf   :  { %906 = vmatpush1.bf16.msra.mxu1 %v1072_v11  ;;  %v962_v44 = vld [vmem:[%s1408_s1 + $0xc0] sm:$0xff]   ;;  %v971_v50 = vld [vmem:[%s1409_s0 + $0x48] ss:$16 sps:$4 sm:$0xff]   ;;  %v975_v51 = vld [vmem:[%s1409_s0 + $0x6c] ss:$16 sps:$4 sm:$0xff]  }
  0x10   :  { %825 = vmatpush3.bf16.msra.mxu0 %v931_v12  ;;  %892 = vmatprep.subr.bf16.mxu1 %v1005_v0  ;;  %v966_v45 = vld [vmem:[%s1409_s0 + $0x84] ss:$16 sps:$4 sm:$0xff]   ;;  %v968_v48 = vld [vmem:[%s1409_s0 + $0x80] ss:$16 sps:$4 sm:$0xff]   ;;  %v977_v54 = vld [vmem:[%s1409_s0 + $0x68] ss:$16 sps:$4 sm:$0xff]  }
  0x11   :  { %826 = vmatprep.subr.bf16.mxu0 %v932_v13  ;;  %v972_v49 = vld [vmem:[%s1409_s0 + $0xa4] ss:$16 sps:$4 sm:$0xff]   ;;  %v974_v52 = vld [vmem:[%s1409_s0 + $0xa0] ss:$16 sps:$4 sm:$0xff]   ;;  %v981_v55 = vld [vmem:[%s1409_s0 + $0x8c] ss:$16 sps:$4 sm:$0xff]  }
  0x12   :  { %v978_v53 = vld [vmem:[%s1409_s0 + $0xc4] ss:$16 sps:$4 sm:$0xff]   ;;  %v980_v56 = vld [vmem:[%s1409_s0 + $0xc0] ss:$16 sps:$4 sm:$0xff]   ;;  %v983_v58 = vld [vmem:[%s1409_s0 + $0x88] ss:$16 sps:$4 sm:$0xff]  }
  0x13   :  { %907 = vmatpush1.bf16.msra.mxu1 %v1085_v14  ;;  %v984_v57 = vld [vmem:[%s1409_s0 + $0xe4] ss:$16 sps:$4 sm:$0xff]   ;;  %v987_v59 = vld [vmem:[%s1409_s0 + $0xac] ss:$16 sps:$4 sm:$0xff]   ;;  %v986_v60 = vld [vmem:[%s1409_s0 + $0xe0] ss:$16 sps:$4 sm:$0xff]  }
  0x14   :  { %827 = vmatpush3.bf16.msra.mxu0 %v934_v15  ;;  %893 = vmatprep.subr.bf16.mxu1 %v1005_v0  ;;  %v990_v61 = vld [vmem:[%s1409_s0 + $0x104] ss:$16 sps:$4 sm:$0xff]   ;;  %v989_v62 = vld [vmem:[%s1409_s0 + $0xa8] ss:$16 sps:$4 sm:$0xff]   ;;  %v993_v63 = vld [vmem:[%s1409_s0 + $0xcc] ss:$16 sps:$4 sm:$0xff]  }
  0x15   :  { %828 = vmatprep.subr.bf16.mxu0 %v935_v16  ;;  %v992_v1 = vld [vmem:[%s1409_s0 + $0x100] ss:$16 sps:$4 sm:$0xff]   ;;  %v999_v3 = vld [vmem:[%s1409_s0 + $0xec] ss:$16 sps:$4 sm:$0xff]   ;;  %v996_v4 = vld [vmem:[%s1409_s0 + $0x8] ss:$16 sps:$4 sm:$0xff]  }
  0x16   :  { %v1002_v6 = vld [vmem:[%s1409_s0 + $0x10c] ss:$16 sps:$4 sm:$0xff]   ;;  %v1004_v7 = vld [vmem:[%s1409_s0 + $0x108] ss:$16 sps:$4 sm:$0xff]   ;;  %v1314_v24 = vld [vmem:[%s1410_s2] ss:$0 sm:$0xff] }
  0x17   :  { %908 = vmatpush1.bf16.msra.mxu1 %v1098_v17 }
  0x18   :  { %829 = vmatpush3.bf16.msra.mxu0 %v937_v18  ;;  %894 = vmatprep.subr.bf16.mxu1 %v1005_v0 }
  0x19   :  { %830 = vmatprep.subr.bf16.mxu0 %v938_v19 }
  0x1b   :  { %909 = vmatpush1.bf16.msra.mxu1 %v1110_v20 }
  0x1c   :  { %831 = vmatpush3.bf16.msra.mxu0 %v940_v21  ;;  %895 = vmatprep.subr.bf16.mxu1 %v1005_v0 }
  0x1d   :  { %832 = vmatprep.subr.bf16.mxu0 %v941_v22 }
  0x1f   :  { %910 = vmatpush1.bf16.msra.mxu1 %v1126_v26 }
  0x20   :  { %833 = vmatpush3.bf16.msra.mxu0 %v943_v28  ;;  %896 = vmatprep.subr.bf16.mxu1 %v1005_v0 }
  0x21   :  { %613 = vmatprep.subr.bf16.mxu0 %v1005_v0 }
  0x23   :  { %541 = vmatmul.mubr.bf16.vlgmr.msra.gmra.mxu0 %v944_v30  ;;  %911 = vmatpush2.bf16.msra.mxu1 %v1140_v31 }
  0x24   :  { %897 = vmatprep.subr.bf16.mxu1 %v1005_v0  ;;  %548 = vmatprep.mubr.bf16.mxu0 %v949_v32 }
  0x25   :  { %614 = vmatpush1.bf16.msra.mxu0 %v1034_v2  ;;  %v998_v2 = vld [vmem:[%s1409_s0 + $0xc] ss:$16 sps:$4 sm:$0xff]  }
  0x26   :  { %615 = vmatprep.subr.bf16.mxu0 %v1005_v0 }
  0x27   :  { %912 = vmatpush2.bf16.msra.mxu1 %v1151_v33 }
  0x28   :  { %898 = vmatprep.subr.bf16.mxu1 %v1005_v0 }
  0x29   :  { %616 = vmatpush1.bf16.msra.mxu0 %v1047_v5  ;;  %v1001_v5 = vld [vmem:[%s1409_s0 + $0xe8] ss:$16 sps:$4 sm:$0xff]  }
  0x2a   :  { %617 = vmatprep.subr.bf16.mxu0 %v1005_v0 }
  0x2b   :  { %549 = vmatmul.mubr.bf16.gmra.mxu0 %v951_v35  ;;  %913 = vmatpush2.bf16.msra.mxu1 %v952_v36 }
  0x2c   :  { %899 = vmatprep.subr.bf16.mxu1 %v1005_v0  ;;  %556 = vmatprep.mubr.bf16.mxu0 %v954_v37 }
  0x2d   :  { %618 = vmatpush1.bf16.msra.mxu0 %v1059_v8 }
  0x2e   :  { %619 = vmatprep.subr.bf16.mxu0 %v1005_v0 }
  0x2f   :  { %914 = vmatpush2.bf16.msra.mxu1 %v953_v38 }
  0x30   :  { %900 = vmatprep.subr.bf16.mxu1 %v1005_v0 }
  0x31   :  { %620 = vmatpush1.bf16.msra.mxu0 %v1072_v11 }
  0x32   :  { %621 = vmatprep.subr.bf16.mxu0 %v1005_v0 }
  0x33   :  { %557 = vmatmul.mubr.bf16.gmra.mxu0 %v956_v39  ;;  %915 = vmatpush2.bf16.msra.mxu1 %v957_v40 }
  0x34   :  { %901 = vmatprep.subr.bf16.mxu1 %v1005_v0  ;;  %564 = vmatprep.mubr.bf16.mxu0 %v959_v41 }
  0x35   :  { %622 = vmatpush1.bf16.msra.mxu0 %v1085_v14 }
  0x36   :  { %623 = vmatprep.subr.bf16.mxu0 %v1005_v0 }
  0x37   :  { %916 = vmatpush2.bf16.msra.mxu1 %v958_v42 }
  0x38   :  { %902 = vmatprep.subr.bf16.mxu1 %v1005_v0 }
  0x39   :  { %624 = vmatpush1.bf16.msra.mxu0 %v1098_v17 }
  0x3a   :  { %625 = vmatprep.subr.bf16.mxu0 %v1005_v0 }
  0x3b   :  { %565 = vmatmul.mubr.bf16.gmra.mxu0 %v961_v43  ;;  %917 = vmatpush2.bf16.msra.mxu1 %v962_v44 }
  0x3c   :  { %572 = vmatprep.mubr.bf16.mxu0 %v966_v45 }
  0x3d   :  { %626 = vmatpush1.bf16.msra.mxu0 %v1110_v20 }
  0x3e   :  { %654 = vmatmul.mubr.bf16.vlgmr.msra.gmra.mxu1 %v963_v46  ;;  %627 = vmatprep.subr.bf16.mxu0 %v1005_v0 }
  0x3f   :  { %811 = vmatprep.mubr.msk.bf16.mxu1 %vm473_vm2, %v969_v47 }
  0x41   :  { %628 = vmatpush1.bf16.msra.mxu0 %v1126_v26 }
  0x42   :  { %631 = vmatprep.subr.bf16.mxu0 %v1005_v0 }
  0x43   :  { %573 = vmatmul.mubr.bf16.gmra.mxu0 %v968_v48 }
  0x44   :  { %580 = vmatprep.mubr.bf16.mxu0 %v972_v49 }
  0x45   :  { %632 = vmatpush2.bf16.msra.mxu0 %v1140_v31 }
  0x46   :  { %662 = vmatmul.mubr.bf16.gmra.mxu1 %v971_v50  ;;  %633 = vmatprep.subr.bf16.mxu0 %v1005_v0 }
  0x47   :  { %812 = vmatprep.mubr.msk.bf16.mxu1 %vm473_vm2, %v975_v51 }
  0x49   :  { %634 = vmatpush2.bf16.msra.mxu0 %v1151_v33 }
  0x4a   :  { %635 = vmatprep.subr.bf16.mxu0 %v1005_v0 }
  0x4b   :  { %581 = vmatmul.mubr.bf16.gmra.mxu0 %v974_v52 }
  0x4c   :  { %588 = vmatprep.mubr.bf16.mxu0 %v978_v53 }
  0x4d   :  { %636 = vmatpush2.bf16.msra.mxu0 %v952_v36 }
  0x4e   :  { %670 = vmatmul.mubr.bf16.gmra.mxu1 %v977_v54  ;;  %637 = vmatprep.subr.bf16.mxu0 %v1005_v0 }
  0x4f   :  { %813 = vmatprep.mubr.msk.bf16.mxu1 %vm473_vm2, %v981_v55 }
  0x51   :  { %638 = vmatpush2.bf16.msra.mxu0 %v953_v38 }
  0x52   :  { %639 = vmatprep.subr.bf16.mxu0 %v1005_v0 }
  0x53   :  { %589 = vmatmul.mubr.bf16.gmra.mxu0 %v980_v56 }
  0x54   :  { %596 = vmatprep.mubr.bf16.mxu0 %v984_v57 }
  0x55   :  { %640 = vmatpush2.bf16.msra.mxu0 %v957_v40 }
  0x56   :  { %678 = vmatmul.mubr.bf16.gmra.mxu1 %v983_v58  ;;  %641 = vmatprep.subr.bf16.mxu0 %v1005_v0 }
  0x57   :  { %814 = vmatprep.mubr.msk.bf16.mxu1 %vm473_vm2, %v987_v59 }
  0x59   :  { %642 = vmatpush2.bf16.msra.mxu0 %v958_v42 }
  0x5a   :  { %643 = vmatprep.subr.bf16.mxu0 %v1005_v0  ;;  %v995_v0 = vld [vmem:[%s1409_s0 + $0xc8] ss:$16 sps:$4 sm:$0xff]  }
  0x5b   :  { %597 = vmatmul.mubr.bf16.gmra.mxu0 %v986_v60 }
  0x5c   :  { %604 = vmatprep.mubr.bf16.mxu0 %v990_v61 }
  0x5d   :  { %644 = vmatpush2.bf16.msra.mxu0 %v962_v44 }
  0x5e   :  { %686 = vmatmul.mubr.bf16.gmra.mxu1 %v989_v62 }
  0x5f   :  { %815 = vmatprep.mubr.msk.bf16.mxu1 %vm473_vm2, %v993_v63 }
  0x63   :  { %605 = vmatmul.mubr.bf16.gmra.mxu0 %v992_v1 }
  0x64   :  { %809 = vmatprep.mubr.msk.bf16.mxu0 %vm473_vm2, %v998_v2 }
  0x66   :  { %694 = vmatmul.mubr.bf16.gmra.mxu1 %v995_v0 }
  0x67   :  { %816 = vmatprep.mubr.msk.bf16.mxu1 %vm473_vm2, %v999_v3 }
  0x6b   :  { %646 = vmatmul.mubr.bf16.vlgmr.msra.gmra.mxu0 %v996_v4 }
  0x6e   :  { %702 = vmatmul.mubr.bf16.gmra.mxu1 %v1001_v5 }
  0x6f   :  { %817 = vmatprep.mubr.msk.bf16.mxu1 %vm473_vm2, %v1002_v6 }
  0x76   :  { %710 = vmatmul.mubr.bf16.gmra.mxu1 %v1004_v7 }
  0xe3   :  { %v834_v8 = vpop.f32.mrf.mxu0 }
  0xe5   :  { %v835_v9 = vpop.f32.mrf.mxu0 }
  0xe6   :  { %v1307_v10 = vadd.f32 %v835_v9, %v834_v8 }
  0xe7   :  { %v837_v11 = vpop.f32.mrf.mxu0 }
  0xe9   :  { %v838_v12 = vpop.f32.mrf.mxu0 }
  0xea   :  { %v1309_v13 = vadd.f32 %v838_v12, %v837_v11 }
  0xeb   :  { %v840_v14 = vpop.f32.mrf.mxu0 }
  0xed   :  { %v841_v15 = vpop.f32.mrf.mxu0 }
  0xee   :  { %v842_v21 = vadd.f32 %v841_v15, %v840_v14 }
  0xef   :  { %v843_v16 = vpop.f32.mrf.mxu0 }
  0xf0   :  { %v551_v27 = vadd.f32 %v842_v21, %v1314_v24 }
  0xf1   :  { %v844_v17 = vpop.f32.mrf.mxu0 }
  0xf2   :  { %v845_v25 = vadd.f32 %v844_v17, %v843_v16 }
  0xf3   :  { %v846_v18 = vpop.f32.mrf.mxu0 }
  0xf4   :  { %v554_v34 = vadd.f32 %v845_v25, %v1314_v24 }
  0xf5   :  { %v847_v19 = vpop.f32.mrf.mxu0 }
  0xf6   :  { %v848_v32 = vadd.f32 %v847_v19, %v846_v18 }
  0xf7   :  { %v849_v20 = vpop.f32.mrf.mxu0 }
  0xf8   :  { %v559_v41 = vadd.f32 %v848_v32, %v1314_v24 }
  0xf9   :  { %v850_v22 = vpop.f32.mrf.mxu0 }
  0xfa   :  { %v851_v39 = vadd.f32 %v850_v22, %v849_v20 }
  0xfb   :  { %v852_v23 = vpop.f32.mrf.mxu0 }
  0xfc   :  { %v562_v48 = vadd.f32 %v851_v39, %v1314_v24 }
  0xfd   :  { %v853_v26 = vpop.f32.mrf.mxu0 }
  0xfe   :  { %v655_v28 = vpop.f32.mrf.mxu1  ;;  %v854_v46 = vadd.f32 %v853_v26, %v852_v23 }
  0xff   :  { %v656_v29 = vadd.f32 %v655_v28, %v551_v27  ;;  %v855_v30 = vpop.f32.mrf.mxu0 }
 0x100   :  { %v657_v31 = vpop.f32.mrf.mxu1  ;;  %v567_v55 = vadd.f32 %v854_v46, %v1314_v24 }
 0x101   :  { %721 = vst.msk [vmem:[%s1411_s3 + $0x10] sm:$0xff] %vm718_vm3, %v656_v29  ;;  %v856_v33 = vpop.f32.mrf.mxu0 }
 0x102   :  { %v658_v35 = vpop.f32.mrf.mxu1  ;;  %v857_v53 = vadd.f32 %v856_v33, %v855_v30 }
 0x103   :  { %v659_v36 = vadd.f32 %v658_v35, %v554_v34  ;;  %v858_v37 = vpop.f32.mrf.mxu0 }
 0x104   :  { %v660_v38 = vpop.f32.mrf.mxu1  ;;  %v570_v62 = vadd.f32 %v857_v53, %v1314_v24 }
 0x105   :  { %722 = vst.msk [vmem:[%s1411_s3 + $0x18] sm:$0xff] %vm718_vm3, %v659_v36  ;;  %v859_v40 = vpop.f32.mrf.mxu0 }
 0x106   :  { %v663_v42 = vpop.f32.mrf.mxu1  ;;  %v860_v60 = vadd.f32 %v859_v40, %v858_v37 }
 0x107   :  { %v664_v43 = vadd.f32 %v663_v42, %v559_v41  ;;  %v861_v44 = vpop.f32.mrf.mxu0 }
 0x108   :  { %v665_v45 = vpop.f32.mrf.mxu1  ;;  %v575_v5 = vadd.f32 %v860_v60, %v1314_v24 }
 0x109   :  { %723 = vst.msk [vmem:[%s1411_s3 + $0x20] sm:$0xff] %vm718_vm3, %v664_v43  ;;  %v862_v47 = vpop.f32.mrf.mxu0  ;;  %v543_v45 = vadd.f32 %v1307_v10, %v1314_v24  ;;  %v546_v10 = vadd.f32 %v1309_v13, %v1314_v24 }
 0x10a   :  { %v666_v49 = vpop.f32.mrf.mxu1  ;;  %v863_v3 = vadd.f32 %v862_v47, %v861_v44 }
 0x10b   :  { %v667_v50 = vadd.f32 %v666_v49, %v562_v48  ;;  %v864_v51 = vpop.f32.mrf.mxu0 }
 0x10c   :  { %v668_v52 = vpop.f32.mrf.mxu1  ;;  %v578_v14 = vadd.f32 %v863_v3, %v1314_v24 }
 0x10d   :  { %724 = vst.msk [vmem:[%s1411_s3 + $0x28] sm:$0xff] %vm718_vm3, %v667_v50  ;;  %v865_v54 = vpop.f32.mrf.mxu0 }
 0x10e   :  { %v671_v56 = vpop.f32.mrf.mxu1  ;;  %v866_v11 = vadd.f32 %v865_v54, %v864_v51 }
 0x10f   :  { %v672_v57 = vadd.f32 %v671_v56, %v567_v55  ;;  %v867_v58 = vpop.f32.mrf.mxu0 }
 0x110   :  { %v673_v59 = vpop.f32.mrf.mxu1  ;;  %v583_v21 = vadd.f32 %v866_v11, %v1314_v24 }
 0x111   :  { %725 = vst.msk [vmem:[%s1411_s3 + $0x30] sm:$0xff] %vm718_vm3, %v672_v57  ;;  %v868_v61 = vpop.f32.mrf.mxu0 }
 0x112   :  { %v674_v63 = vpop.f32.mrf.mxu1  ;;  %v869_v19 = vadd.f32 %v868_v61, %v867_v58 }
 0x113   :  { %v675_v1 = vadd.f32 %v674_v63, %v570_v62  ;;  %v870_v2 = vpop.f32.mrf.mxu0 }
 0x114   :  { %v676_v0 = vpop.f32.mrf.mxu1  ;;  %v586_v29 = vadd.f32 %v869_v19, %v1314_v24 }
 0x115   :  { %726 = vst.msk [vmem:[%s1411_s3 + $0x38] sm:$0xff] %vm718_vm3, %v675_v1  ;;  %v871_v4 = vpop.f32.mrf.mxu0 }
 0x116   :  { %v679_v6 = vpop.f32.mrf.mxu1  ;;  %v872_v27 = vadd.f32 %v871_v4, %v870_v2 }
 0x117   :  { %v680_v7 = vadd.f32 %v679_v6, %v575_v5  ;;  %v873_v8 = vpop.f32.mrf.mxu0 }
 0x118   :  { %v681_v9 = vpop.f32.mrf.mxu1  ;;  %v591_v36 = vadd.f32 %v872_v27, %v1314_v24 }
 0x119   :  { %727 = vst.msk [vmem:[%s1411_s3 + $0x40] sm:$0xff] %vm718_vm3, %v680_v7  ;;  %v874_v12 = vpop.f32.mrf.mxu0 }
 0x11a   :  { %v682_v15 = vpop.f32.mrf.mxu1  ;;  %v875_v34 = vadd.f32 %v874_v12, %v873_v8 }
 0x11b   :  { %v683_v16 = vadd.f32 %v682_v15, %v578_v14  ;;  %v876_v17 = vpop.f32.mrf.mxu0 }
 0x11c   :  { %v684_v18 = vpop.f32.mrf.mxu1  ;;  %v594_v43 = vadd.f32 %v875_v34, %v1314_v24 }
 0x11d   :  { %728 = vst.msk [vmem:[%s1411_s3 + $0x48] sm:$0xff] %vm718_vm3, %v683_v16  ;;  %v877_v20 = vpop.f32.mrf.mxu0 }
 0x11e   :  { %v687_v22 = vpop.f32.mrf.mxu1  ;;  %v878_v41 = vadd.f32 %v877_v20, %v876_v17 }
 0x11f   :  { %v688_v23 = vadd.f32 %v687_v22, %v583_v21  ;;  %v879_v25 = vpop.f32.mrf.mxu0 }
 0x120   :  { %v689_v26 = vpop.f32.mrf.mxu1  ;;  %v599_v52 = vadd.f32 %v878_v41, %v1314_v24 }
 0x121   :  { %729 = vst.msk [vmem:[%s1411_s3 + $0x50] sm:$0xff] %vm718_vm3, %v688_v23  ;;  %v880_v28 = vpop.f32.mrf.mxu0 }
 0x122   :  { %v690_v30 = vpop.f32.mrf.mxu1  ;;  %v881_v50 = vadd.f32 %v880_v28, %v879_v25 }
 0x123   :  { %v691_v31 = vadd.f32 %v690_v30, %v586_v29  ;;  %v882_v32 = vpop.f32.mrf.mxu0 }
 0x124   :  { %v692_v33 = vpop.f32.mrf.mxu1  ;;  %v602_v59 = vadd.f32 %v881_v50, %v1314_v24 }
 0x125   :  { %730 = vst.msk [vmem:[%s1411_s3 + $0x58] sm:$0xff] %vm718_vm3, %v691_v31  ;;  %v883_v35 = vpop.f32.mrf.mxu0 }
 0x126   :  { %v695_v37 = vpop.f32.mrf.mxu1  ;;  %v884_v58 = vadd.f32 %v883_v35, %v882_v32 }
 0x127   :  { %v696_v38 = vadd.f32 %v695_v37, %v591_v36  ;;  %v885_v39 = vpop.f32.mrf.mxu0 }
 0x128   :  { %v697_v40 = vpop.f32.mrf.mxu1  ;;  %v607_v1 = vadd.f32 %v884_v58, %v1314_v24 }
 0x129   :  { %731 = vst.msk [vmem:[%s1411_s3 + $0x60] sm:$0xff] %vm718_vm3, %v696_v38  ;;  %v886_v42 = vpop.f32.mrf.mxu0 }
 0x12a   :  { %v698_v44 = vpop.f32.mrf.mxu1  ;;  %v887_v63 = vadd.f32 %v886_v42, %v885_v39 }
 0x12b   :  { %v699_v46 = vadd.f32 %v698_v44, %v594_v43  ;;  %v647_v47 = vpop.f32.mrf.mxu0 }
 0x12c   :  { %v648_v48 = vadd.f32 %v647_v47, %v543_v45  ;;  %v700_v49 = vpop.f32.mrf.mxu1  ;;  %v610_v4 = vadd.f32 %v887_v63, %v1314_v24 }
 0x12d   :  { %732 = vst.msk [vmem:[%s1411_s3 + $0x68] sm:$0xff] %vm718_vm3, %v699_v46  ;;  %v649_v51 = vpop.f32.mrf.mxu0 }
 0x12e   :  { %719 = vst.msk [vmem:[%s1411_s3] sm:$0xff] %vm718_vm3, %v648_v48  ;;  %v703_v53 = vpop.f32.mrf.mxu1 }
 0x12f   :  { %v704_v54 = vadd.f32 %v703_v53, %v599_v52  ;;  %v650_v55 = vpop.f32.mrf.mxu0 }
 0x130   :  { %v651_v56 = vadd.f32 %v650_v55, %v546_v10  ;;  %v705_v57 = vpop.f32.mrf.mxu1 }
 0x131   :  { %733 = vst.msk [vmem:[%s1411_s3 + $0x70] sm:$0xff] %vm718_vm3, %v704_v54  ;;  %v652_v60 = vpop.f32.mrf.mxu0 }
 0x132   :  { %720 = vst.msk [vmem:[%s1411_s3 + $0x8] sm:$0xff] %vm718_vm3, %v651_v56  ;;  %v706_v61 = vpop.f32.mrf.mxu1 }
 0x133   :  { %v707_v13 = vadd.f32 %v706_v61, %v602_v59 }
 0x134   :  { %v708_v62 = vpop.f32.mrf.mxu1 }
 0x135   :  { %734 = vst.msk [vmem:[%s1411_s3 + $0x78] sm:$0xff] %vm718_vm3, %v707_v13 }
 0x136   :  { %v711_v2 = vpop.f32.mrf.mxu1 }
 0x137   :  { %v712_v0 = vadd.f32 %v711_v2, %v607_v1 }
 0x138   :  { %v713_v3 = vpop.f32.mrf.mxu1 }
 0x139   :  { %735 = vst.msk [vmem:[%s1411_s3 + $0x80] sm:$0xff] %vm718_vm3, %v712_v0 }
 0x13a   :  { %v714_v5 = vpop.f32.mrf.mxu1 }
 0x13b   :  { %v715_v6 = vadd.f32 %v714_v5, %v610_v4 }
 0x13c   :  { %v716_v7 = vpop.f32.mrf.mxu1 }
 0x13d   :  { %736 = vst.msk [vmem:[%s1411_s3 + $0x88] sm:$0xff] %vm718_vm3, %v715_v6 }

// kernel: _lambda_.30
= control target key start
LH: loop header
LB: loop body
LE: loop exit
PB: predicated region body
PF: predicated region fallthrough
CT: control target
= control target key end

     0   :  { %vm4473_vm0 = vcmask 302080   ;;  %s8201_s1 = inlined_call_operand.vmem [shape: bf16[3328,37], index: 1, kind: input, shape index: {}]   ;;  %s8202_s0 = inlined_call_operand.vmem [shape: bf16[144,3328], index: 0, kind: input, shape index: {}]   ;;  %s8203_s2 = inlined_call_operand.vmem [shape: f32[1,37], index: 2, kind: input, shape index: {}]   ;;  %s8204_s3 = inlined_call_operand.vmem [shape: f32[144,37], index: 3, kind: output, shape index: {}]  }
   0x1   :  { %v5865_v0 = vld [vmem:[%s8201_s1 + $0x78] sm:$0xff]   ;;  %v5867_v2 = vld [vmem:[%s8201_s1 + $0x70] sm:$0xff]   ;;  %v5869_v4 = vld [vmem:[%s8201_s1 + $0x68] sm:$0xff]  }
   0x2   :  { %v5866_v1 = vld [vmem:[%s8201_s1 + $0x38] sm:$0xff]   ;;  %5849 = vmatprep.subr.bf16.mxu1 %v5865_v0  ;;  %4939 = vmatprep.subr.bf16.mxu0 %v5865_v0  ;;  %v5868_v3 = vld [vmem:[%s8201_s1 + $0x30] sm:$0xff]   ;;  %v5870_v5 = vld [vmem:[%s8201_s1 + $0x28] sm:$0xff]  }
   0x3   :  { %5857 = vmatpush3.bf16.msra.mxu1 %v5866_v1  ;;  %4940 = vmatpush3.bf16.msra.mxu0 %v5866_v1  ;;  %v5871_v6 = vld [vmem:[%s8201_s1 + $0x60] sm:$0xff]   ;;  %v5873_v8 = vld [vmem:[%s8201_s1 + $0x58] sm:$0xff]   ;;  %v5875_v10 = vld [vmem:[%s8201_s1 + $0x50] sm:$0xff]  }
   0x4   :  { %5850 = vmatprep.subr.bf16.mxu1 %v5867_v2  ;;  %4941 = vmatprep.subr.bf16.mxu0 %v5867_v2  ;;  %v5872_v7 = vld [vmem:[%s8201_s1 + $0x20] sm:$0xff]   ;;  %v5874_v9 = vld [vmem:[%s8201_s1 + $0x18] sm:$0xff]   ;;  %v5876_v12 = vld [vmem:[%s8201_s1 + $0x10] sm:$0xff]  }
   0x5   :  { %v5883_v11 = vld [vmem:[%s8202_s0 + $0x344] ss:$104 sps:$4 sm:$0xff]   ;;  %v5884_v18 = vld [vmem:[%s8201_s1 + $0xf8] sm:$0xff]   ;;  %v5881_v19 = vld [vmem:[%s8202_s0 + $0x340] ss:$104 sps:$4 sm:$0xff]  }
   0x6   :  { %v5877_v13 = vld [vmem:[%s8201_s1 + $0x48] sm:$0xff]   ;;  %3154 = vmatprep.mubr.bf16.mxu1 %v5883_v11  ;;  %v5879_v16 = vld [vmem:[%s8201_s1 + $0x40] sm:$0xff]   ;;  %v5890_v20 = vld [vmem:[%s8201_s1 + $0x178] sm:$0xff]  }
   0x7   :  { %5858 = vmatpush3.bf16.msra.mxu1 %v5868_v3  ;;  %4942 = vmatpush3.bf16.msra.mxu0 %v5868_v3  ;;  %v5888_v14 = vld [vmem:[%s8202_s0 + $0x4] ss:$104 sps:$4 sm:$0xff]   ;;  %v5885_v21 = vld [vmem:[%s8201_s1 + $0xb8] sm:$0xff]   ;;  %v5886_v22 = vld [vmem:[%s8202_s0] ss:$104 sps:$4 sm:$0xff]  }
   0x8   :  { %5851 = vmatprep.subr.bf16.mxu1 %v5869_v4  ;;  %4943 = vmatprep.subr.bf16.mxu0 %v5869_v4  ;;  %v5878_v15 = vld [vmem:[%s8201_s1 + $0x8] sm:$0xff]   ;;  %v5880_v17 = vld [vmem:[%s8201_s1] sm:$0xff]   ;;  %v5889_v23 = vld [vmem:[%s8201_s1 + $0xf0] sm:$0xff]  }
   0x9   :  { %3122 = vmatprep.mubr.bf16.mxu0 %v5888_v14  ;;  %v5892_v24 = vld [vmem:[%s8201_s1 + $0x138] sm:$0xff]   ;;  %v5896_v26 = vld [vmem:[%s8201_s1 + $0x170] sm:$0xff]   ;;  %v5897_v29 = vld [vmem:[%s8201_s1 + $0xe8] sm:$0xff]  }
   0xa   :  { %v5893_v25 = vld [vmem:[%s8202_s0 + $0x414] ss:$104 sps:$4 sm:$0xff]   ;;  %v5895_v31 = vld [vmem:[%s8202_s0 + $0x410] ss:$104 sps:$4 sm:$0xff]   ;;  %v5903_v32 = vld [vmem:[%s8201_s1 + $0x168] sm:$0xff]  }
   0xb   :  { %5859 = vmatpush3.bf16.msra.mxu1 %v5870_v5  ;;  %4944 = vmatpush3.bf16.msra.mxu0 %v5870_v5  ;;  %v5900_v27 = vld [vmem:[%s8202_s0 + $0xd4] ss:$104 sps:$4 sm:$0xff]   ;;  %v5899_v33 = vld [vmem:[%s8201_s1 + $0xa8] sm:$0xff]   ;;  %v5902_v34 = vld [vmem:[%s8202_s0 + $0xd0] ss:$104 sps:$4 sm:$0xff]  }
   0xc   :  { %5852 = vmatprep.subr.bf16.mxu1 %v5871_v6  ;;  %4945 = vmatprep.subr.bf16.mxu0 %v5871_v6  ;;  %v5891_v28 = vld [vmem:[%s8201_s1 + $0xb0] sm:$0xff]   ;;  %v5904_v35 = vld [vmem:[%s8201_s1 + $0x128] sm:$0xff]   ;;  %v5907_v37 = vld [vmem:[%s8201_s1 + $0xe0] sm:$0xff]  }
   0xd   :  { %v5898_v30 = vld [vmem:[%s8201_s1 + $0x130] sm:$0xff]   ;;  %v5905_v36 = vld [vmem:[%s8202_s0 + $0x4e4] ss:$104 sps:$4 sm:$0xff]   ;;  %v5914_v42 = vld [vmem:[%s8201_s1 + $0xd8] sm:$0xff]  }
   0xe   :  { %v5910_v38 = vld [vmem:[%s8201_s1 + $0x160] sm:$0xff]   ;;  %v5917_v45 = vld [vmem:[%s8201_s1 + $0x158] sm:$0xff]   ;;  %v5922_v49 = vld [vmem:[%s8201_s1 + $0xd0] sm:$0xff]  }
   0xf   :  { %5860 = vmatpush3.bf16.msra.mxu1 %v5872_v7  ;;  %4946 = vmatpush3.bf16.msra.mxu0 %v5872_v7  ;;  %v5909_v39 = vld [vmem:[%s8201_s1 + $0xa0] sm:$0xff]   ;;  %v5916_v46 = vld [vmem:[%s8201_s1 + $0x98] sm:$0xff]   ;;  %v5923_v50 = vld [vmem:[%s8201_s1 + $0x150] sm:$0xff]  }
  0x10   :  { %5853 = vmatprep.subr.bf16.mxu1 %v5873_v8  ;;  %4947 = vmatprep.subr.bf16.mxu0 %v5873_v8  ;;  %v5912_v40 = vld [vmem:[%s8202_s0 + $0x1a4] ss:$104 sps:$4 sm:$0xff]   ;;  %v5908_v43 = vld [vmem:[%s8202_s0 + $0x4e0] ss:$104 sps:$4 sm:$0xff]   ;;  %v5918_v47 = vld [vmem:[%s8201_s1 + $0x118] sm:$0xff]  }
  0x11   :  { %v5911_v41 = vld [vmem:[%s8201_s1 + $0x120] sm:$0xff]   ;;  %v5919_v48 = vld [vmem:[%s8202_s0 + $0x5b4] ss:$104 sps:$4 sm:$0xff]   ;;  %v5929_v54 = vld [vmem:[%s8201_s1 + $0x148] sm:$0xff]  }
  0x12   :  { %v5915_v44 = vld [vmem:[%s8202_s0 + $0x1a0] ss:$104 sps:$4 sm:$0xff]   ;;  %v5924_v51 = vld [vmem:[%s8201_s1 + $0x90] sm:$0xff]   ;;  %v5932_v59 = vld [vmem:[%s8202_s0 + $0x684] ss:$104 sps:$4 sm:$0xff]  }
  0x13   :  { %5861 = vmatpush3.bf16.msra.mxu1 %v5874_v9  ;;  %4948 = vmatpush3.bf16.msra.mxu0 %v5874_v9  ;;  %v5925_v52 = vld [vmem:[%s8201_s1 + $0x110] sm:$0xff]   ;;  %v5930_v56 = vld [vmem:[%s8201_s1 + $0xc8] sm:$0xff]   ;;  %v5936_v61 = vld [vmem:[%s8201_s1 + $0x140] sm:$0xff]  }
  0x14   :  { %5854 = vmatprep.subr.bf16.mxu1 %v5875_v10  ;;  %4949 = vmatprep.subr.bf16.mxu0 %v5875_v10  ;;  %v5926_v53 = vld [vmem:[%s8202_s0 + $0x274] ss:$104 sps:$4 sm:$0xff]   ;;  %v5921_v55 = vld [vmem:[%s8202_s0 + $0x5b0] ss:$104 sps:$4 sm:$0xff]   ;;  %v5931_v58 = vld [vmem:[%s8201_s1 + $0x108] sm:$0xff]  }
  0x15   :  { %v5928_v57 = vld [vmem:[%s8202_s0 + $0x270] ss:$104 sps:$4 sm:$0xff]   ;;  %v5934_v60 = vld [vmem:[%s8201_s1 + $0x88] sm:$0xff]   ;;  %v5938_v62 = vld [vmem:[%s8201_s1 + $0xc0] sm:$0xff]  }
  0x16   :  { %v5937_v63 = vld [vmem:[%s8201_s1 + $0x100] sm:$0xff]   ;;  %v5942_v2 = vld [vmem:[%s8202_s0 + $0x14] ss:$104 sps:$4 sm:$0xff]   ;;  %v5940_v3 = vld [vmem:[%s8202_s0 + $0x10] ss:$104 sps:$4 sm:$0xff]  }
  0x17   :  { %5862 = vmatpush3.bf16.msra.mxu1 %v5876_v12  ;;  %4950 = vmatpush3.bf16.msra.mxu0 %v5876_v12  ;;  %v5935_v0 = vld [vmem:[%s8202_s0 + $0x680] ss:$104 sps:$4 sm:$0xff]   ;;  %v5945_v4 = vld [vmem:[%s8202_s0 + $0xc] ss:$104 sps:$4 sm:$0xff]   ;;  %v5946_v5 = vld [vmem:[%s8201_s1 + $0x1f8] sm:$0xff]  }
  0x18   :  { %5855 = vmatprep.subr.bf16.mxu1 %v5877_v13  ;;  %4951 = vmatprep.subr.bf16.mxu0 %v5877_v13  ;;  %v5939_v1 = vld [vmem:[%s8201_s1 + $0x80] sm:$0xff]   ;;  %v5948_v6 = vld [vmem:[%s8201_s1 + $0x278] sm:$0xff]   ;;  %v5943_v9 = vld [vmem:[%s8202_s0 + $0x8] ss:$104 sps:$4 sm:$0xff]  }
  0x19   :  { %v5949_v7 = vld [vmem:[%s8201_s1 + $0x238] sm:$0xff]   ;;  %v5950_v8 = vld [vmem:[%s8202_s0 + $0xe4] ss:$104 sps:$4 sm:$0xff]   ;;  %v5952_v11 = vld [vmem:[%s8202_s0 + $0xe0] ss:$104 sps:$4 sm:$0xff]  }
  0x1a   :  { %v5947_v10 = vld [vmem:[%s8201_s1 + $0x1b8] sm:$0xff]   ;;  %v5956_v13 = vld [vmem:[%s8201_s1 + $0x1f0] sm:$0xff]  }
  0x1b   :  { %5863 = vmatpush3.bf16.msra.mxu1 %v5878_v15  ;;  %4952 = vmatpush3.bf16.msra.mxu0 %v5878_v15  ;;  %v5953_v12 = vld [vmem:[%s8202_s0 + $0xdc] ss:$104 sps:$4 sm:$0xff]   ;;  %v5958_v14 = vld [vmem:[%s8201_s1 + $0x270] sm:$0xff]  }
  0x1c   :  { %5856 = vmatprep.subr.bf16.mxu1 %v5879_v16  ;;  %4953 = vmatprep.subr.bf16.mxu0 %v5879_v16  ;;  %v5959_v15 = vld [vmem:[%s8202_s0 + $0x1b4] ss:$104 sps:$4 sm:$0xff]  }
  0x1d   :  { %v5961_v16 = vld [vmem:[%s8201_s1 + $0x230] sm:$0xff]  }
  0x1f   :  { %5864 = vmatpush3.bf16.msra.mxu1 %v5880_v17  ;;  %4954 = vmatpush3.bf16.msra.mxu0 %v5880_v17  ;;  %v5957_v17 = vld [vmem:[%s8201_s1 + $0x1b0] sm:$0xff]  }
  0x20   :  { %5009 = vmatprep.subr.bf16.mxu1 %v5884_v18  ;;  %5079 = vmatprep.subr.bf16.mxu0 %v5890_v20  ;;  %v5955_v18 = vld [vmem:[%s8202_s0 + $0xd8] ss:$104 sps:$4 sm:$0xff]   ;;  %v5966_v20 = vld [vmem:[%s8201_s1 + $0x1e8] sm:$0xff]  }
  0x22   :  { %3155 = vmatmul.mubr.bf16.vlgmr.msra.gmra.mxu1 %v5881_v19  ;;  %3123 = vmatmul.mubr.bf16.vlgmr.msra.gmra.mxu0 %v5886_v22  ;;  %v5962_v19 = vld [vmem:[%s8202_s0 + $0x1b0] ss:$104 sps:$4 sm:$0xff]   ;;  %v5967_v22 = vld [vmem:[%s8201_s1 + $0x1a8] sm:$0xff]  }
  0x23   :  { %5010 = vmatpush3.bf16.msra.mxu1 %v5885_v21  ;;  %5080 = vmatpush3.bf16.msra.mxu0 %v5892_v24  ;;  %v5963_v21 = vld [vmem:[%s8202_s0 + $0x1ac] ss:$104 sps:$4 sm:$0xff]  }
  0x24   :  { %5011 = vmatprep.subr.bf16.mxu1 %v5889_v23  ;;  %3162 = vmatprep.mubr.bf16.mxu1 %v5893_v25  ;;  %v5970_v23 = vld [vmem:[%s8201_s1 + $0x268] sm:$0xff]  }
  0x25   :  { %5081 = vmatprep.subr.bf16.mxu0 %v5896_v26  ;;  %3130 = vmatprep.mubr.bf16.mxu0 %v5900_v27  ;;  %v5968_v24 = vld [vmem:[%s8202_s0 + $0x284] ss:$104 sps:$4 sm:$0xff]   ;;  %v5965_v27 = vld [vmem:[%s8202_s0 + $0x1a8] ss:$104 sps:$4 sm:$0xff]  }
  0x26   :  { %v5972_v25 = vld [vmem:[%s8201_s1 + $0x228] sm:$0xff]   ;;  %v5976_v26 = vld [vmem:[%s8201_s1 + $0x1e0] sm:$0xff]  }
  0x27   :  { %5012 = vmatpush3.bf16.msra.mxu1 %v5891_v28  ;;  %5082 = vmatpush3.bf16.msra.mxu0 %v5898_v30  ;;  %v5971_v28 = vld [vmem:[%s8202_s0 + $0x280] ss:$104 sps:$4 sm:$0xff]   ;;  %v5977_v30 = vld [vmem:[%s8202_s0 + $0x354] ss:$104 sps:$4 sm:$0xff]  }
  0x28   :  { %5013 = vmatprep.subr.bf16.mxu1 %v5897_v29  ;;  %5083 = vmatprep.subr.bf16.mxu0 %v5903_v32  ;;  %v5973_v29 = vld [vmem:[%s8202_s0 + $0x27c] ss:$104 sps:$4 sm:$0xff]  }
  0x29   :  { %v5981_v32 = vld [vmem:[%s8201_s1 + $0x260] sm:$0xff]  }
  0x2a   :  { %3163 = vmatmul.mubr.bf16.gmra.mxu1 %v5895_v31  ;;  %3131 = vmatmul.mubr.bf16.gmra.mxu0 %v5902_v34  ;;  %v5979_v31 = vld [vmem:[%s8201_s1 + $0x1a0] sm:$0xff]   ;;  %v5988_v34 = vld [vmem:[%s8201_s1 + $0x1d8] sm:$0xff]  }
  0x2b   :  { %5014 = vmatpush3.bf16.msra.mxu1 %v5899_v33  ;;  %5084 = vmatpush3.bf16.msra.mxu0 %v5904_v35  ;;  %v5982_v33 = vld [vmem:[%s8201_s1 + $0x220] sm:$0xff]  }
  0x2c   :  { %3170 = vmatprep.mubr.bf16.mxu1 %v5905_v36  ;;  %5015 = vmatprep.subr.bf16.mxu1 %v5907_v37  ;;  %v5975_v35 = vld [vmem:[%s8202_s0 + $0x278] ss:$104 sps:$4 sm:$0xff]  }
  0x2d   :  { %5085 = vmatprep.subr.bf16.mxu0 %v5910_v38  ;;  %3138 = vmatprep.mubr.bf16.mxu0 %v5912_v40  ;;  %v5980_v36 = vld [vmem:[%s8202_s0 + $0x350] ss:$104 sps:$4 sm:$0xff]   ;;  %v5986_v40 = vld [vmem:[%s8202_s0 + $0x424] ss:$104 sps:$4 sm:$0xff]  }
  0x2e   :  { %v5990_v37 = vld [vmem:[%s8201_s1 + $0x198] sm:$0xff]  }
  0x2f   :  { %5016 = vmatpush3.bf16.msra.mxu1 %v5909_v39  ;;  %5086 = vmatpush3.bf16.msra.mxu0 %v5911_v41  ;;  %v5991_v38 = vld [vmem:[%s8201_s1 + $0x258] sm:$0xff]   ;;  %v5983_v39 = vld [vmem:[%s8202_s0 + $0x34c] ss:$104 sps:$4 sm:$0xff]  }
  0x30   :  { %5017 = vmatprep.subr.bf16.mxu1 %v5914_v42  ;;  %5087 = vmatprep.subr.bf16.mxu0 %v5917_v45  ;;  %v5994_v41 = vld [vmem:[%s8201_s1 + $0x218] sm:$0xff]   ;;  %v5999_v42 = vld [vmem:[%s8201_s1 + $0x1d0] sm:$0xff]   ;;  %v5989_v45 = vld [vmem:[%s8202_s0 + $0x420] ss:$104 sps:$4 sm:$0xff]  }
  0x32   :  { %3171 = vmatmul.mubr.bf16.gmra.mxu1 %v5908_v43  ;;  %3139 = vmatmul.mubr.bf16.gmra.mxu0 %v5915_v44  ;;  %v6000_v43 = vld [vmem:[%s8201_s1 + $0x190] sm:$0xff]  }
  0x33   :  { %5018 = vmatpush3.bf16.msra.mxu1 %v5916_v46  ;;  %5088 = vmatpush3.bf16.msra.mxu0 %v5918_v47  ;;  %v5985_v44 = vld [vmem:[%s8202_s0 + $0x348] ss:$104 sps:$4 sm:$0xff]  }
  0x34   :  { %3178 = vmatprep.mubr.bf16.mxu1 %v5919_v48  ;;  %5019 = vmatprep.subr.bf16.mxu1 %v5922_v49  ;;  %v6003_v46 = vld [vmem:[%s8201_s1 + $0x250] sm:$0xff]   ;;  %v5992_v48 = vld [vmem:[%s8202_s0 + $0x41c] ss:$104 sps:$4 sm:$0xff]  }
  0x35   :  { %5089 = vmatprep.subr.bf16.mxu0 %v5923_v50  ;;  %3146 = vmatprep.mubr.bf16.mxu0 %v5926_v53  ;;  %v6005_v47 = vld [vmem:[%s8201_s1 + $0x210] sm:$0xff]   ;;  %v6009_v50 = vld [vmem:[%s8201_s1 + $0x1c8] sm:$0xff]  }
  0x36   :  { %v5996_v49 = vld [vmem:[%s8202_s0 + $0x4f4] ss:$104 sps:$4 sm:$0xff]   ;;  %v6014_v53 = vld [vmem:[%s8201_s1 + $0x248] sm:$0xff]  }
  0x37   :  { %5020 = vmatpush3.bf16.msra.mxu1 %v5924_v51  ;;  %5090 = vmatpush3.bf16.msra.mxu0 %v5925_v52  ;;  %v6012_v51 = vld [vmem:[%s8201_s1 + $0x188] sm:$0xff]   ;;  %v5995_v52 = vld [vmem:[%s8202_s0 + $0x418] ss:$104 sps:$4 sm:$0xff]  }
  0x38   :  { %5091 = vmatprep.subr.bf16.mxu0 %v5929_v54  ;;  %5021 = vmatprep.subr.bf16.mxu1 %v5930_v56  ;;  %v6015_v54 = vld [vmem:[%s8201_s1 + $0x208] sm:$0xff]  }
  0x39   :  { %v6001_v56 = vld [vmem:[%s8202_s0 + $0x4ec] ss:$104 sps:$4 sm:$0xff]  }
  0x3a   :  { %3179 = vmatmul.mubr.bf16.gmra.mxu1 %v5921_v55  ;;  %3147 = vmatmul.mubr.bf16.gmra.mxu0 %v5928_v57  ;;  %v5998_v55 = vld [vmem:[%s8202_s0 + $0x4f0] ss:$104 sps:$4 sm:$0xff]   ;;  %v6006_v57 = vld [vmem:[%s8202_s0 + $0x5c4] ss:$104 sps:$4 sm:$0xff]  }
  0x3b   :  { %5092 = vmatpush3.bf16.msra.mxu0 %v5931_v58  ;;  %3186 = vmatprep.mubr.bf16.mxu1 %v5932_v59  ;;  %v6021_v58 = vld [vmem:[%s8201_s1 + $0x1c0] sm:$0xff]  }
  0x3c   :  { %5022 = vmatpush3.bf16.msra.mxu1 %v5934_v60  ;;  %5093 = vmatprep.subr.bf16.mxu0 %v5936_v61  ;;  %v6023_v59 = vld [vmem:[%s8201_s1 + $0x180] sm:$0xff]  }
  0x3d   :  { %5023 = vmatprep.subr.bf16.mxu1 %v5938_v62  ;;  %3332 = vmatprep.mubr.bf16.mxu0 %v5942_v2  ;;  %v6024_v60 = vld [vmem:[%s8201_s1 + $0x240] sm:$0xff]   ;;  %v6004_v62 = vld [vmem:[%s8202_s0 + $0x4e8] ss:$104 sps:$4 sm:$0xff]   ;;  %v6032_v2 = vld [vmem:[%s8201_s1 + $0x2f8] sm:$0xff]  }
  0x3e   :  { %v6025_v61 = vld [vmem:[%s8201_s1 + $0x200] sm:$0xff]  }
  0x3f   :  { %5094 = vmatpush3.bf16.msra.mxu0 %v5937_v63  ;;  %v6008_v63 = vld [vmem:[%s8202_s0 + $0x5c0] ss:$104 sps:$4 sm:$0xff]  }
  0x40   :  { %5024 = vmatpush3.bf16.msra.mxu1 %v5939_v1  ;;  %5219 = vmatprep.subr.bf16.mxu0 %v5948_v6  ;;  %v6016_v1 = vld [vmem:[%s8202_s0 + $0x694] ss:$104 sps:$4 sm:$0xff]  }
  0x41   :  { %5149 = vmatprep.subr.bf16.mxu1 %v5946_v5  ;;  %v6018_v5 = vld [vmem:[%s8202_s0 + $0x690] ss:$104 sps:$4 sm:$0xff]   ;;  %v6019_v6 = vld [vmem:[%s8202_s0 + $0x68c] ss:$104 sps:$4 sm:$0xff]  }
  0x42   :  { %3187 = vmatmul.mubr.bf16.gmra.mxu1 %v5935_v0  ;;  %3333 = vmatmul.mubr.bf16.vlgmr.msra.gmra.mxu0 %v5940_v3  ;;  %v6010_v0 = vld [vmem:[%s8202_s0 + $0x5bc] ss:$104 sps:$4 sm:$0xff]  }
  0x43   :  { %3227 = vmatprep.mubr.bf16.mxu1 %v5945_v4  ;;  %5220 = vmatpush3.bf16.msra.mxu0 %v5949_v7  ;;  %v6034_v3 = vld [vmem:[%s8201_s1 + $0x378] sm:$0xff]   ;;  %v6028_v7 = vld [vmem:[%s8202_s0 + $0x24] ss:$104 sps:$4 sm:$0xff]  }
  0x44   :  { %3340 = vmatprep.mubr.bf16.mxu0 %v5950_v8  ;;  %5221 = vmatprep.subr.bf16.mxu0 %v5958_v14  ;;  %v6013_v4 = vld [vmem:[%s8202_s0 + $0x5b8] ss:$104 sps:$4 sm:$0xff]   ;;  %v6022_v8 = vld [vmem:[%s8202_s0 + $0x688] ss:$104 sps:$4 sm:$0xff]  }
  0x45   :  { %v6047_v14 = vld [vmem:[%s8201_s1 + $0x330] sm:$0xff]  }
  0x47   :  { %5222 = vmatpush3.bf16.msra.mxu0 %v5961_v16  ;;  %v6056_v16 = vld [vmem:[%s8201_s1 + $0x368] sm:$0xff]  }
  0x48   :  { %5223 = vmatprep.subr.bf16.mxu0 %v5970_v23  ;;  %v6067_v23 = vld [vmem:[%s8201_s1 + $0x360] sm:$0xff]  }
  0x4a   :  { %3228 = vmatmul.mubr.bf16.vlgmr.msra.gmra.mxu1 %v5943_v9  ;;  %3341 = vmatmul.mubr.bf16.gmra.mxu0 %v5952_v11  ;;  %v6026_v9 = vld [vmem:[%s8202_s0 + $0x20] ss:$104 sps:$4 sm:$0xff]   ;;  %v6035_v11 = vld [vmem:[%s8201_s1 + $0x338] sm:$0xff]  }
  0x4b   :  { %5150 = vmatpush3.bf16.msra.mxu1 %v5947_v10  ;;  %3235 = vmatprep.mubr.bf16.mxu1 %v5953_v12  ;;  %v6031_v10 = vld [vmem:[%s8202_s0 + $0x1c] ss:$104 sps:$4 sm:$0xff]  }
  0x4c   :  { %5151 = vmatprep.subr.bf16.mxu1 %v5956_v13  ;;  %3348 = vmatprep.mubr.bf16.mxu0 %v5959_v15  ;;  %v6036_v12 = vld [vmem:[%s8202_s0 + $0xf4] ss:$104 sps:$4 sm:$0xff]   ;;  %v6029_v15 = vld [vmem:[%s8202_s0 + $0x18] ss:$104 sps:$4 sm:$0xff]  }
  0x4d   :  { %5224 = vmatpush3.bf16.msra.mxu0 %v5972_v25  ;;  %v6044_v13 = vld [vmem:[%s8201_s1 + $0x370] sm:$0xff]  }
  0x4e   :  { %5225 = vmatprep.subr.bf16.mxu0 %v5981_v32  ;;  %v6041_v25 = vld [vmem:[%s8202_s0 + $0xe8] ss:$104 sps:$4 sm:$0xff]   ;;  %v6062_v32 = vld [vmem:[%s8201_s1 + $0x2e0] sm:$0xff]  }
  0x4f   :  { %5152 = vmatpush3.bf16.msra.mxu1 %v5957_v17  ;;  %v6033_v17 = vld [vmem:[%s8201_s1 + $0x2b8] sm:$0xff]  }
  0x50   :  { %5153 = vmatprep.subr.bf16.mxu1 %v5966_v20  ;;  %v6042_v20 = vld [vmem:[%s8201_s1 + $0x2f0] sm:$0xff]  }
  0x51   :  { %5226 = vmatpush3.bf16.msra.mxu0 %v5982_v33  ;;  %v6077_v33 = vld [vmem:[%s8201_s1 + $0x358] sm:$0xff]  }
  0x52   :  { %3236 = vmatmul.mubr.bf16.gmra.mxu1 %v5955_v18  ;;  %3349 = vmatmul.mubr.bf16.gmra.mxu0 %v5962_v19  ;;  %v6038_v18 = vld [vmem:[%s8202_s0 + $0xf0] ss:$104 sps:$4 sm:$0xff]   ;;  %v6039_v19 = vld [vmem:[%s8202_s0 + $0xec] ss:$104 sps:$4 sm:$0xff]  }
  0x53   :  { %3243 = vmatprep.mubr.bf16.mxu1 %v5963_v21  ;;  %5154 = vmatpush3.bf16.msra.mxu1 %v5967_v22  ;;  %v6045_v21 = vld [vmem:[%s8202_s0 + $0x1c4] ss:$104 sps:$4 sm:$0xff]  }
  0x54   :  { %3356 = vmatprep.mubr.bf16.mxu0 %v5968_v24  ;;  %5155 = vmatprep.subr.bf16.mxu1 %v5976_v26  ;;  %v6058_v22 = vld [vmem:[%s8201_s1 + $0x328] sm:$0xff]   ;;  %v6043_v24 = vld [vmem:[%s8201_s1 + $0x2b0] sm:$0xff]  }
  0x55   :  { %5227 = vmatprep.subr.bf16.mxu0 %v5991_v38  ;;  %v6048_v26 = vld [vmem:[%s8202_s0 + $0x1c0] ss:$104 sps:$4 sm:$0xff]   ;;  %v6057_v38 = vld [vmem:[%s8202_s0 + $0x290] ss:$104 sps:$4 sm:$0xff]  }
  0x56   :  { %5228 = vmatpush3.bf16.msra.mxu0 %v5994_v41  ;;  %v6063_v41 = vld [vmem:[%s8202_s0 + $0x364] ss:$104 sps:$4 sm:$0xff]  }
  0x57   :  { %5156 = vmatpush3.bf16.msra.mxu1 %v5979_v31  ;;  %5229 = vmatprep.subr.bf16.mxu0 %v6003_v46  ;;  %v6054_v31 = vld [vmem:[%s8202_s0 + $0x294] ss:$104 sps:$4 sm:$0xff]   ;;  %v6095_v46 = vld [vmem:[%s8201_s1 + $0x2c8] sm:$0xff]  }
  0x58   :  { %5157 = vmatprep.subr.bf16.mxu1 %v5988_v34  ;;  %v6080_v34 = vld [vmem:[%s8201_s1 + $0x318] sm:$0xff]  }
  0x5a   :  { %3244 = vmatmul.mubr.bf16.gmra.mxu1 %v5965_v27  ;;  %3357 = vmatmul.mubr.bf16.gmra.mxu0 %v5971_v28  ;;  %v6052_v27 = vld [vmem:[%s8201_s1 + $0x2e8] sm:$0xff]   ;;  %v6068_v28 = vld [vmem:[%s8201_s1 + $0x320] sm:$0xff]  }
  0x5b   :  { %3251 = vmatprep.mubr.bf16.mxu1 %v5973_v29  ;;  %3364 = vmatprep.mubr.bf16.mxu0 %v5977_v30  ;;  %v6049_v29 = vld [vmem:[%s8202_s0 + $0x1bc] ss:$104 sps:$4 sm:$0xff]   ;;  %v6053_v30 = vld [vmem:[%s8201_s1 + $0x2a8] sm:$0xff]  }
  0x5c   :  { %5158 = vmatpush3.bf16.msra.mxu1 %v5990_v37  ;;  %5230 = vmatpush3.bf16.msra.mxu0 %v6005_v47  ;;  %v6074_v37 = vld [vmem:[%s8201_s1 + $0x2d8] sm:$0xff]   ;;  %v6061_v47 = vld [vmem:[%s8202_s0 + $0x288] ss:$104 sps:$4 sm:$0xff]  }
  0x5d   :  { %5159 = vmatprep.subr.bf16.mxu1 %v5999_v42  ;;  %5231 = vmatprep.subr.bf16.mxu0 %v6014_v53  ;;  %v6076_v42 = vld [vmem:[%s8201_s1 + $0x298] sm:$0xff]   ;;  %v6098_v53 = vld [vmem:[%s8201_s1 + $0x288] sm:$0xff]  }
  0x60   :  { %5160 = vmatpush3.bf16.msra.mxu1 %v6000_v43  ;;  %5232 = vmatpush3.bf16.msra.mxu0 %v6015_v54  ;;  %v6091_v43 = vld [vmem:[%s8201_s1 + $0x310] sm:$0xff]   ;;  %v6107_v54 = vld [vmem:[%s8201_s1 + $0x2c0] sm:$0xff]  }
  0x61   :  { %5161 = vmatprep.subr.bf16.mxu1 %v6009_v50  ;;  %5233 = vmatprep.subr.bf16.mxu0 %v6024_v60  ;;  %v6066_v50 = vld [vmem:[%s8202_s0 + $0x360] ss:$104 sps:$4 sm:$0xff]   ;;  %v6078_v60 = vld [vmem:[%s8202_s0 + $0x42c] ss:$104 sps:$4 sm:$0xff]  }
  0x62   :  { %3252 = vmatmul.mubr.bf16.gmra.mxu1 %v5975_v35  ;;  %3365 = vmatmul.mubr.bf16.gmra.mxu0 %v5980_v36  ;;  %v6065_v35 = vld [vmem:[%s8201_s1 + $0x2a0] sm:$0xff]  }
  0x63   :  { %3259 = vmatprep.mubr.bf16.mxu1 %v5983_v39  ;;  %3372 = vmatprep.mubr.bf16.mxu0 %v5986_v40  ;;  %v6051_v36 = vld [vmem:[%s8202_s0 + $0x1b8] ss:$104 sps:$4 sm:$0xff]   ;;  %v6089_v39 = vld [vmem:[%s8201_s1 + $0x350] sm:$0xff]  }
  0x64   :  { %5162 = vmatpush3.bf16.msra.mxu1 %v6012_v51  ;;  %5234 = vmatpush3.bf16.msra.mxu0 %v6025_v61  ;;  %v6059_v40 = vld [vmem:[%s8202_s0 + $0x28c] ss:$104 sps:$4 sm:$0xff]   ;;  %v6069_v51 = vld [vmem:[%s8202_s0 + $0x35c] ss:$104 sps:$4 sm:$0xff]  }
  0x65   :  { %5163 = vmatprep.subr.bf16.mxu1 %v6021_v58  ;;  %5359 = vmatprep.subr.bf16.mxu0 %v6034_v3  ;;  %v6109_v58 = vld [vmem:[%s8201_s1 + $0x280] sm:$0xff]   ;;  %v6092_v3 = vld [vmem:[%s8202_s0 + $0x5d4] ss:$104 sps:$4 sm:$0xff]  }
  0x66   :  { %v6082_v61 = vld [vmem:[%s8202_s0 + $0x504] ss:$104 sps:$4 sm:$0xff]  }
  0x68   :  { %5164 = vmatpush3.bf16.msra.mxu1 %v6023_v59  ;;  %v6075_v59 = vld [vmem:[%s8202_s0 + $0x430] ss:$104 sps:$4 sm:$0xff]  }
  0x69   :  { %5289 = vmatprep.subr.bf16.mxu1 %v6032_v2  ;;  %v6087_v2 = vld [vmem:[%s8202_s0 + $0x4fc] ss:$104 sps:$4 sm:$0xff]  }
  0x6a   :  { %3260 = vmatmul.mubr.bf16.gmra.mxu1 %v5985_v44  ;;  %3373 = vmatmul.mubr.bf16.gmra.mxu0 %v5989_v45  ;;  %v6085_v44 = vld [vmem:[%s8201_s1 + $0x2d0] sm:$0xff]  }
  0x6b   :  { %3267 = vmatprep.mubr.bf16.mxu1 %v5992_v48  ;;  %3380 = vmatprep.mubr.bf16.mxu0 %v5996_v49  ;;  %v6086_v45 = vld [vmem:[%s8201_s1 + $0x290] sm:$0xff]   ;;  %v6100_v48 = vld [vmem:[%s8201_s1 + $0x348] sm:$0xff]  }
  0x6c   :  { %v6101_v49 = vld [vmem:[%s8201_s1 + $0x308] sm:$0xff]  }
  0x72   :  { %3268 = vmatmul.mubr.bf16.gmra.mxu1 %v5995_v52  ;;  %3381 = vmatmul.mubr.bf16.gmra.mxu0 %v5998_v55  ;;  %v6072_v52 = vld [vmem:[%s8202_s0 + $0x434] ss:$104 sps:$4 sm:$0xff]   ;;  %v6110_v55 = vld [vmem:[%s8201_s1 + $0x340] sm:$0xff]  }
  0x73   :  { %3275 = vmatprep.mubr.bf16.mxu1 %v6001_v56  ;;  %3388 = vmatprep.mubr.bf16.mxu0 %v6006_v57  ;;  %v6111_v56 = vld [vmem:[%s8201_s1 + $0x300] sm:$0xff]  }
  0x74   :  { %v6071_v57 = vld [vmem:[%s8202_s0 + $0x358] ss:$104 sps:$4 sm:$0xff]  }
  0x7a   :  { %3276 = vmatmul.mubr.bf16.gmra.mxu1 %v6004_v62  ;;  %3389 = vmatmul.mubr.bf16.gmra.mxu0 %v6008_v63  ;;  %v6118_v62 = vld [vmem:[%s8201_s1 + $0x3f8] sm:$0xff]  }
  0x7b   :  { %3283 = vmatprep.mubr.bf16.mxu1 %v6010_v0  ;;  %3396 = vmatprep.mubr.bf16.mxu0 %v6016_v1  ;;  %v6120_v63 = vld [vmem:[%s8201_s1 + $0x478] sm:$0xff]   ;;  %v6081_v0 = vld [vmem:[%s8202_s0 + $0x428] ss:$104 sps:$4 sm:$0xff]  }
  0x7c   :  { %v6084_v1 = vld [vmem:[%s8202_s0 + $0x500] ss:$104 sps:$4 sm:$0xff]  }
  0x82   :  { %3284 = vmatmul.mubr.bf16.gmra.mxu1 %v6013_v4  ;;  %3397 = vmatmul.mubr.bf16.gmra.mxu0 %v6018_v5  ;;  %v6090_v4 = vld [vmem:[%s8202_s0 + $0x4f8] ss:$104 sps:$4 sm:$0xff]  }
  0x83   :  { %3291 = vmatprep.mubr.bf16.mxu1 %v6019_v6  ;;  %3542 = vmatprep.mubr.bf16.mxu0 %v6028_v7  ;;  %v6094_v5 = vld [vmem:[%s8202_s0 + $0x5d0] ss:$104 sps:$4 sm:$0xff]   ;;  %v6096_v6 = vld [vmem:[%s8202_s0 + $0x5cc] ss:$104 sps:$4 sm:$0xff]  }
  0x84   :  { %v6102_v7 = vld [vmem:[%s8202_s0 + $0x6a4] ss:$104 sps:$4 sm:$0xff]  }
  0x8a   :  { %3292 = vmatmul.mubr.bf16.gmra.mxu1 %v6022_v8  ;;  %3543 = vmatmul.mubr.bf16.vlgmr.msra.gmra.mxu0 %v6026_v9  ;;  %v6099_v8 = vld [vmem:[%s8202_s0 + $0x5c8] ss:$104 sps:$4 sm:$0xff]  }
  0x8b   :  { %3437 = vmatprep.mubr.bf16.mxu1 %v6031_v10  ;;  %5360 = vmatpush3.bf16.msra.mxu0 %v6035_v11  ;;  %v6104_v9 = vld [vmem:[%s8202_s0 + $0x6a0] ss:$104 sps:$4 sm:$0xff]   ;;  %v6105_v10 = vld [vmem:[%s8202_s0 + $0x69c] ss:$104 sps:$4 sm:$0xff]  }
  0x8c   :  { %3550 = vmatprep.mubr.bf16.mxu0 %v6036_v12  ;;  %5361 = vmatprep.subr.bf16.mxu0 %v6044_v13  ;;  %v6114_v11 = vld [vmem:[%s8202_s0 + $0x34] ss:$104 sps:$4 sm:$0xff]   ;;  %v6108_v12 = vld [vmem:[%s8202_s0 + $0x698] ss:$104 sps:$4 sm:$0xff]  }
  0x8d   :  { %v6112_v13 = vld [vmem:[%s8202_s0 + $0x30] ss:$104 sps:$4 sm:$0xff]  }
  0x8f   :  { %5362 = vmatpush3.bf16.msra.mxu0 %v6047_v14  ;;  %v6117_v14 = vld [vmem:[%s8202_s0 + $0x2c] ss:$104 sps:$4 sm:$0xff]  }
  0x90   :  { %5363 = vmatprep.subr.bf16.mxu0 %v6056_v16  ;;  %v6122_v16 = vld [vmem:[%s8202_s0 + $0x104] ss:$104 sps:$4 sm:$0xff]  }
  0x92   :  { %3438 = vmatmul.mubr.bf16.vlgmr.msra.gmra.mxu1 %v6029_v15  ;;  %3551 = vmatmul.mubr.bf16.gmra.mxu0 %v6038_v18  ;;  %v6121_v15 = vld [vmem:[%s8201_s1 + $0x438] sm:$0xff]   ;;  %v6133_v18 = vld [vmem:[%s8201_s1 + $0x430] sm:$0xff]  }
  0x93   :  { %5290 = vmatpush3.bf16.msra.mxu1 %v6033_v17  ;;  %3445 = vmatprep.mubr.bf16.mxu1 %v6039_v19  ;;  %v6130_v17 = vld [vmem:[%s8201_s1 + $0x470] sm:$0xff]  }
  0x94   :  { %5291 = vmatprep.subr.bf16.mxu1 %v6042_v20  ;;  %3558 = vmatprep.mubr.bf16.mxu0 %v6045_v21  ;;  %v6115_v19 = vld [vmem:[%s8202_s0 + $0x28] ss:$104 sps:$4 sm:$0xff]   ;;  %v6119_v21 = vld [vmem:[%s8201_s1 + $0x3b8] sm:$0xff]  }
  0x95   :  { %5364 = vmatpush3.bf16.msra.mxu0 %v6058_v22  ;;  %v6142_v20 = vld [vmem:[%s8201_s1 + $0x468] sm:$0xff]  }
  0x96   :  { %5365 = vmatprep.subr.bf16.mxu0 %v6067_v23  ;;  %v6124_v22 = vld [vmem:[%s8202_s0 + $0x100] ss:$104 sps:$4 sm:$0xff]   ;;  %v6125_v23 = vld [vmem:[%s8202_s0 + $0xfc] ss:$104 sps:$4 sm:$0xff]  }
  0x97   :  { %5292 = vmatpush3.bf16.msra.mxu1 %v6043_v24  ;;  %v6128_v24 = vld [vmem:[%s8201_s1 + $0x3f0] sm:$0xff]  }
  0x98   :  { %5293 = vmatprep.subr.bf16.mxu1 %v6052_v27  ;;  %v6153_v27 = vld [vmem:[%s8201_s1 + $0x460] sm:$0xff]  }
  0x99   :  { %5366 = vmatpush3.bf16.msra.mxu0 %v6068_v28  ;;  %v6129_v28 = vld [vmem:[%s8201_s1 + $0x3b0] sm:$0xff]  }
  0x9a   :  { %3446 = vmatmul.mubr.bf16.gmra.mxu1 %v6041_v25  ;;  %3559 = vmatmul.mubr.bf16.gmra.mxu0 %v6048_v26  ;;  %v6131_v25 = vld [vmem:[%s8202_s0 + $0x1d4] ss:$104 sps:$4 sm:$0xff]   ;;  %v6144_v26 = vld [vmem:[%s8201_s1 + $0x428] sm:$0xff]  }
  0x9b   :  { %3453 = vmatprep.mubr.bf16.mxu1 %v6049_v29  ;;  %5294 = vmatpush3.bf16.msra.mxu1 %v6053_v30  ;;  %v6127_v29 = vld [vmem:[%s8202_s0 + $0xf8] ss:$104 sps:$4 sm:$0xff]  }
  0x9c   :  { %3566 = vmatprep.mubr.bf16.mxu0 %v6054_v31  ;;  %5295 = vmatprep.subr.bf16.mxu1 %v6062_v32  ;;  %v6134_v30 = vld [vmem:[%s8202_s0 + $0x1d0] ss:$104 sps:$4 sm:$0xff]   ;;  %v6138_v31 = vld [vmem:[%s8201_s1 + $0x3e8] sm:$0xff]   ;;  %v6154_v32 = vld [vmem:[%s8201_s1 + $0x420] sm:$0xff]  }
  0x9d   :  { %5367 = vmatprep.subr.bf16.mxu0 %v6077_v33  ;;  %v6135_v33 = vld [vmem:[%s8202_s0 + $0x1cc] ss:$104 sps:$4 sm:$0xff]  }
  0x9e   :  { %5368 = vmatpush3.bf16.msra.mxu0 %v6080_v34  ;;  %v6139_v34 = vld [vmem:[%s8201_s1 + $0x3a8] sm:$0xff]  }
  0x9f   :  { %5296 = vmatpush3.bf16.msra.mxu1 %v6065_v35  ;;  %5369 = vmatprep.subr.bf16.mxu0 %v6089_v39  ;;  %v6140_v35 = vld [vmem:[%s8202_s0 + $0x2a4] ss:$104 sps:$4 sm:$0xff]  }
  0xa0   :  { %5297 = vmatprep.subr.bf16.mxu1 %v6074_v37  ;;  %v6151_v37 = vld [vmem:[%s8201_s1 + $0x3a0] sm:$0xff]  }
  0xa2   :  { %3454 = vmatmul.mubr.bf16.gmra.mxu1 %v6051_v36  ;;  %3567 = vmatmul.mubr.bf16.gmra.mxu0 %v6057_v38  ;;  %v6148_v36 = vld [vmem:[%s8201_s1 + $0x3e0] sm:$0xff]   ;;  %v6163_v38 = vld [vmem:[%s8201_s1 + $0x458] sm:$0xff]  }
  0xa3   :  { %3461 = vmatprep.mubr.bf16.mxu1 %v6059_v40  ;;  %3574 = vmatprep.mubr.bf16.mxu0 %v6063_v41  ;;  %v6167_v41 = vld [vmem:[%s8201_s1 + $0x418] sm:$0xff]  }
  0xa4   :  { %5298 = vmatpush3.bf16.msra.mxu1 %v6076_v42  ;;  %5370 = vmatpush3.bf16.msra.mxu0 %v6091_v43  ;;  %v6176_v42 = vld [vmem:[%s8201_s1 + $0x450] sm:$0xff]  }
  0xa5   :  { %5299 = vmatprep.subr.bf16.mxu1 %v6085_v44  ;;  %5371 = vmatprep.subr.bf16.mxu0 %v6100_v48 }
  0xa8   :  { %5300 = vmatpush3.bf16.msra.mxu1 %v6086_v45  ;;  %5372 = vmatpush3.bf16.msra.mxu0 %v6101_v49  ;;  %v6137_v45 = vld [vmem:[%s8202_s0 + $0x1c8] ss:$104 sps:$4 sm:$0xff]  }
  0xa9   :  { %5301 = vmatprep.subr.bf16.mxu1 %v6095_v46  ;;  %5373 = vmatprep.subr.bf16.mxu0 %v6110_v55  ;;  %v6160_v46 = vld [vmem:[%s8201_s1 + $0x3d8] sm:$0xff]   ;;  %v6143_v49 = vld [vmem:[%s8202_s0 + $0x2a0] ss:$104 sps:$4 sm:$0xff]   ;;  %v6171_v55 = vld [vmem:[%s8201_s1 + $0x3d0] sm:$0xff]  }
  0xaa   :  { %3462 = vmatmul.mubr.bf16.gmra.mxu1 %v6061_v47  ;;  %3575 = vmatmul.mubr.bf16.gmra.mxu0 %v6066_v50  ;;  %v6145_v50 = vld [vmem:[%s8202_s0 + $0x29c] ss:$104 sps:$4 sm:$0xff]  }
  0xab   :  { %3469 = vmatprep.mubr.bf16.mxu1 %v6069_v51  ;;  %3582 = vmatprep.mubr.bf16.mxu0 %v6072_v52 }
  0xac   :  { %5302 = vmatpush3.bf16.msra.mxu1 %v6098_v53  ;;  %5374 = vmatpush3.bf16.msra.mxu0 %v6111_v56  ;;  %v6149_v53 = vld [vmem:[%s8202_s0 + $0x374] ss:$104 sps:$4 sm:$0xff]  }
  0xad   :  { %5303 = vmatprep.subr.bf16.mxu1 %v6107_v54  ;;  %5499 = vmatprep.subr.bf16.mxu0 %v6120_v63  ;;  %v6162_v54 = vld [vmem:[%s8201_s1 + $0x398] sm:$0xff]  }
  0xb0   :  { %5304 = vmatpush3.bf16.msra.mxu1 %v6109_v58  ;;  %v6177_v58 = vld [vmem:[%s8201_s1 + $0x410] sm:$0xff]  }
  0xb1   :  { %5429 = vmatprep.subr.bf16.mxu1 %v6118_v62 }
  0xb2   :  { %3470 = vmatmul.mubr.bf16.gmra.mxu1 %v6071_v57  ;;  %3583 = vmatmul.mubr.bf16.gmra.mxu0 %v6075_v59 }
  0xb3   :  { %3477 = vmatprep.mubr.bf16.mxu1 %v6078_v60  ;;  %3590 = vmatprep.mubr.bf16.mxu0 %v6082_v61  ;;  %v6186_v61 = vld [vmem:[%s8201_s1 + $0x448] sm:$0xff]  }
  0xba   :  { %3478 = vmatmul.mubr.bf16.gmra.mxu1 %v6081_v0  ;;  %3591 = vmatmul.mubr.bf16.gmra.mxu0 %v6084_v1  ;;  %v6172_v0 = vld [vmem:[%s8201_s1 + $0x390] sm:$0xff]  }
  0xbb   :  { %3485 = vmatprep.mubr.bf16.mxu1 %v6087_v2  ;;  %3598 = vmatprep.mubr.bf16.mxu0 %v6092_v3  ;;  %v6147_v3 = vld [vmem:[%s8202_s0 + $0x298] ss:$104 sps:$4 sm:$0xff]  }
  0xc2   :  { %3486 = vmatmul.mubr.bf16.gmra.mxu1 %v6090_v4  ;;  %3599 = vmatmul.mubr.bf16.gmra.mxu0 %v6094_v5  ;;  %v6152_v4 = vld [vmem:[%s8202_s0 + $0x370] ss:$104 sps:$4 sm:$0xff]   ;;  %v6187_v5 = vld [vmem:[%s8201_s1 + $0x408] sm:$0xff]  }
  0xc3   :  { %3493 = vmatprep.mubr.bf16.mxu1 %v6096_v6  ;;  %3606 = vmatprep.mubr.bf16.mxu0 %v6102_v7 }
  0xca   :  { %3494 = vmatmul.mubr.bf16.gmra.mxu1 %v6099_v8  ;;  %3607 = vmatmul.mubr.bf16.gmra.mxu0 %v6104_v9  ;;  %v6155_v8 = vld [vmem:[%s8202_s0 + $0x36c] ss:$104 sps:$4 sm:$0xff]  }
  0xcb   :  { %3501 = vmatprep.mubr.bf16.mxu1 %v6105_v10  ;;  %3752 = vmatprep.mubr.bf16.mxu0 %v6114_v11  ;;  %v6181_v9 = vld [vmem:[%s8201_s1 + $0x3c8] sm:$0xff]   ;;  %v6196_v10 = vld [vmem:[%s8201_s1 + $0x440] sm:$0xff]  }
  0xd2   :  { %3502 = vmatmul.mubr.bf16.gmra.mxu1 %v6108_v12  ;;  %3753 = vmatmul.mubr.bf16.vlgmr.msra.gmra.mxu0 %v6112_v13  ;;  %v6158_v13 = vld [vmem:[%s8202_s0 + $0x444] ss:$104 sps:$4 sm:$0xff]  }
  0xd3   :  { %3647 = vmatprep.mubr.bf16.mxu1 %v6117_v14  ;;  %5500 = vmatpush3.bf16.msra.mxu0 %v6121_v15  ;;  %v6185_v14 = vld [vmem:[%s8201_s1 + $0x388] sm:$0xff]  }
  0xd4   :  { %3760 = vmatprep.mubr.bf16.mxu0 %v6122_v16  ;;  %5501 = vmatprep.subr.bf16.mxu0 %v6130_v17  ;;  %v6197_v17 = vld [vmem:[%s8201_s1 + $0x400] sm:$0xff]  }
  0xd7   :  { %5502 = vmatpush3.bf16.msra.mxu0 %v6133_v18 }
  0xd8   :  { %5503 = vmatprep.subr.bf16.mxu0 %v6142_v20  ;;  %v6194_v20 = vld [vmem:[%s8201_s1 + $0x3c0] sm:$0xff]  }
  0xda   :  { %3648 = vmatmul.mubr.bf16.vlgmr.msra.gmra.mxu1 %v6115_v19  ;;  %3761 = vmatmul.mubr.bf16.gmra.mxu0 %v6124_v22 }
  0xdb   :  { %5430 = vmatpush3.bf16.msra.mxu1 %v6119_v21  ;;  %3655 = vmatprep.mubr.bf16.mxu1 %v6125_v23  ;;  %v6206_v21 = vld [vmem:[%s8201_s1 + $0x578] sm:$0xff]  }
  0xdc   :  { %5431 = vmatprep.subr.bf16.mxu1 %v6128_v24  ;;  %3768 = vmatprep.mubr.bf16.mxu0 %v6131_v25 }
  0xdd   :  { %5504 = vmatpush3.bf16.msra.mxu0 %v6144_v26  ;;  %v6157_v26 = vld [vmem:[%s8202_s0 + $0x368] ss:$104 sps:$4 sm:$0xff]  }
  0xde   :  { %5505 = vmatprep.subr.bf16.mxu0 %v6153_v27  ;;  %v6195_v27 = vld [vmem:[%s8201_s1 + $0x380] sm:$0xff]  }
  0xdf   :  { %5432 = vmatpush3.bf16.msra.mxu1 %v6129_v28 }
  0xe0   :  { %5433 = vmatprep.subr.bf16.mxu1 %v6138_v31 }
  0xe1   :  { %5506 = vmatpush3.bf16.msra.mxu0 %v6154_v32 }
  0xe2   :  { %v4979_v39 = vpop.f32.mrf.mxu1  ;;  %3656 = vmatmul.mubr.bf16.gmra.mxu1 %v6127_v29  ;;  %v4955_v40 = vpop.f32.mrf.mxu0  ;;  %3769 = vmatmul.mubr.bf16.gmra.mxu0 %v6134_v30  ;;  %v6204_v30 = vld [vmem:[%s8201_s1 + $0x4f8] sm:$0xff]  }
  0xe3   :  { %3663 = vmatprep.mubr.bf16.mxu1 %v6135_v33  ;;  %5434 = vmatpush3.bf16.msra.mxu1 %v6139_v34  ;;  %v6161_v33 = vld [vmem:[%s8202_s0 + $0x440] ss:$104 sps:$4 sm:$0xff]   ;;  %v6166_v34 = vld [vmem:[%s8202_s0 + $0x43c] ss:$104 sps:$4 sm:$0xff]  }
  0xe4   :  { %v4980_v43 = vpop.f32.mrf.mxu1  ;;  %v4956_v44 = vpop.f32.mrf.mxu0  ;;  %3776 = vmatprep.mubr.bf16.mxu0 %v6140_v35  ;;  %5435 = vmatprep.subr.bf16.mxu1 %v6148_v36  ;;  %v6170_v35 = vld [vmem:[%s8202_s0 + $0x514] ss:$104 sps:$4 sm:$0xff]  }
  0xe5   :  { %v7149_v47 = vadd.f32 %v4980_v43, %v4979_v39  ;;  %v7151_v48 = vadd.f32 %v4956_v44, %v4955_v40  ;;  %5507 = vmatprep.subr.bf16.mxu0 %v6163_v38  ;;  %v6164_v44 = vld [vmem:[%s8202_s0 + $0x438] ss:$104 sps:$4 sm:$0xff]  }
  0xe6   :  { %v4982_v51 = vpop.f32.mrf.mxu1  ;;  %v4958_v52 = vpop.f32.mrf.mxu0  ;;  %5508 = vmatpush3.bf16.msra.mxu0 %v6167_v41 }
  0xe7   :  { %5436 = vmatpush3.bf16.msra.mxu1 %v6151_v37  ;;  %5509 = vmatprep.subr.bf16.mxu0 %v6176_v42 }
  0xe8   :  { %v4983_v56 = vpop.f32.mrf.mxu1  ;;  %v4959_v57 = vpop.f32.mrf.mxu0  ;;  %5437 = vmatprep.subr.bf16.mxu1 %v6160_v46 }
  0xe9   :  { %v7171_v59 = vadd.f32 %v4983_v56, %v4982_v51  ;;  %v7173_v60 = vadd.f32 %v4959_v57, %v4958_v52  ;;  %v6175_v52 = vld [vmem:[%s8202_s0 + $0x50c] ss:$104 sps:$4 sm:$0xff]  }
  0xea   :  { %v4985_v62 = vpop.f32.mrf.mxu1  ;;  %3664 = vmatmul.mubr.bf16.gmra.mxu1 %v6137_v45  ;;  %v4961_v63 = vpop.f32.mrf.mxu0  ;;  %3777 = vmatmul.mubr.bf16.gmra.mxu0 %v6143_v49  ;;  %v6168_v49 = vld [vmem:[%s8202_s0 + $0x510] ss:$104 sps:$4 sm:$0xff]  }
  0xeb   :  { %3671 = vmatprep.mubr.bf16.mxu1 %v6145_v50  ;;  %3784 = vmatprep.mubr.bf16.mxu0 %v6149_v53  ;;  %v6180_v53 = vld [vmem:[%s8202_s0 + $0x5e4] ss:$104 sps:$4 sm:$0xff]  }
  0xec   :  { %v4986_v1 = vpop.f32.mrf.mxu1  ;;  %v4962_v2 = vpop.f32.mrf.mxu0  ;;  %5438 = vmatpush3.bf16.msra.mxu1 %v6162_v54  ;;  %5510 = vmatpush3.bf16.msra.mxu0 %v6177_v58 }
  0xed   :  { %v7190_v6 = vadd.f32 %v4986_v1, %v4985_v62  ;;  %v7192_v7 = vadd.f32 %v4962_v2, %v4961_v63  ;;  %5439 = vmatprep.subr.bf16.mxu1 %v6171_v55  ;;  %5511 = vmatprep.subr.bf16.mxu0 %v6186_v61  ;;  %v7271_v62 = vld [vmem:[%s8203_s2] ss:$0 sm:$0xff]  ;;  %v6173_v1 = vld [vmem:[%s8202_s0 + $0x508] ss:$104 sps:$4 sm:$0xff]  }
  0xee   :  { %v4988_v11 = vpop.f32.mrf.mxu1  ;;  %v4964_v12 = vpop.f32.mrf.mxu0 }
  0xf0   :  { %v4989_v15 = vpop.f32.mrf.mxu1  ;;  %v4965_v16 = vpop.f32.mrf.mxu0  ;;  %5440 = vmatpush3.bf16.msra.mxu1 %v6172_v0  ;;  %5512 = vmatpush3.bf16.msra.mxu0 %v6187_v5 }
  0xf1   :  { %v7212_v18 = vadd.f32 %v4989_v15, %v4988_v11  ;;  %v7214_v19 = vadd.f32 %v4965_v16, %v4964_v12  ;;  %5441 = vmatprep.subr.bf16.mxu1 %v6181_v9  ;;  %5513 = vmatprep.subr.bf16.mxu0 %v6196_v10  ;;  %v6184_v9 = vld [vmem:[%s8202_s0 + $0x5dc] ss:$104 sps:$4 sm:$0xff]  }
  0xf2   :  { %v4991_v22 = vpop.f32.mrf.mxu1  ;;  %3672 = vmatmul.mubr.bf16.gmra.mxu1 %v6147_v3  ;;  %v4967_v23 = vpop.f32.mrf.mxu0  ;;  %3785 = vmatmul.mubr.bf16.gmra.mxu0 %v6152_v4  ;;  %v6178_v4 = vld [vmem:[%s8202_s0 + $0x5e0] ss:$104 sps:$4 sm:$0xff]   ;;  %v6190_v11 = vld [vmem:[%s8202_s0 + $0x6b4] ss:$104 sps:$4 sm:$0xff]  }
  0xf3   :  { %3679 = vmatprep.mubr.bf16.mxu1 %v6155_v8  ;;  %3792 = vmatprep.mubr.bf16.mxu0 %v6158_v13 }
  0xf4   :  { %v4992_v24 = vpop.f32.mrf.mxu1  ;;  %v4968_v25 = vpop.f32.mrf.mxu0  ;;  %5442 = vmatpush3.bf16.msra.mxu1 %v6185_v14  ;;  %5514 = vmatpush3.bf16.msra.mxu0 %v6197_v17 }
  0xf5   :  { %v7228_v28 = vadd.f32 %v4992_v24, %v4991_v22  ;;  %v7230_v29 = vadd.f32 %v4968_v25, %v4967_v23  ;;  %5443 = vmatprep.subr.bf16.mxu1 %v6194_v20  ;;  %5639 = vmatprep.subr.bf16.mxu0 %v6206_v21  ;;  %v6182_v23 = vld [vmem:[%s8202_s0 + $0x5d8] ss:$104 sps:$4 sm:$0xff]   ;;  %v3125_v24 = vadd.f32 %v7151_v48, %v7271_v62 }
  0xf6   :  { %v4994_v31 = vpop.f32.mrf.mxu1  ;;  %v4970_v32 = vpop.f32.mrf.mxu0  ;;  %v3128_v48 = vadd.f32 %v7173_v60, %v7271_v62  ;;  %v3133_v60 = vadd.f32 %v7192_v7, %v7271_v62  ;;  %v6210_v7 = vld [vmem:[%s8202_s0 + $0x114] ss:$104 sps:$4 sm:$0xff]  }
  0xf8   :  { %v4995_v36 = vpop.f32.mrf.mxu1  ;;  %v4971_v37 = vpop.f32.mrf.mxu0  ;;  %5444 = vmatpush3.bf16.msra.mxu1 %v6195_v27  ;;  %v6188_v27 = vld [vmem:[%s8202_s0 + $0x6b0] ss:$104 sps:$4 sm:$0xff]  }
  0xf9   :  { %v7244_v38 = vadd.f32 %v4995_v36, %v4994_v31  ;;  %v7246_v39 = vadd.f32 %v4971_v37, %v4970_v32  ;;  %5569 = vmatprep.subr.bf16.mxu1 %v6204_v30  ;;  %v6193_v32 = vld [vmem:[%s8202_s0 + $0x6ac] ss:$104 sps:$4 sm:$0xff]  }
  0xfa   :  { %v4997_v40 = vpop.f32.mrf.mxu1  ;;  %3680 = vmatmul.mubr.bf16.gmra.mxu1 %v6157_v26  ;;  %v4973_v41 = vpop.f32.mrf.mxu0  ;;  %3793 = vmatmul.mubr.bf16.gmra.mxu0 %v6161_v33 }
  0xfb   :  { %3687 = vmatprep.mubr.bf16.mxu1 %v6166_v34  ;;  %3800 = vmatprep.mubr.bf16.mxu0 %v6170_v35  ;;  %v6200_v34 = vld [vmem:[%s8202_s0 + $0x44] ss:$104 sps:$4 sm:$0xff]  }
  0xfc   :  { %v4998_v42 = vpop.f32.mrf.mxu1  ;;  %v4974_v43 = vpop.f32.mrf.mxu0 }
  0xfd   :  { %v7251_v45 = vadd.f32 %v4998_v42, %v4997_v40  ;;  %v7253_v46 = vadd.f32 %v4974_v43, %v4973_v41 }
  0xfe   :  { %v5000_v50 = vpop.f32.mrf.mxu1  ;;  %v4976_v51 = vpop.f32.mrf.mxu0 }
 0x100   :  { %v5001_v54 = vpop.f32.mrf.mxu1  ;;  %v4977_v55 = vpop.f32.mrf.mxu0 }
 0x101   :  { %v7264_v56 = vadd.f32 %v5001_v54, %v5000_v50  ;;  %v7266_v57 = vadd.f32 %v4977_v55, %v4976_v51  ;;  %v6191_v51 = vld [vmem:[%s8202_s0 + $0x6a8] ss:$104 sps:$4 sm:$0xff]  }
 0x102   :  { %v5003_v58 = vpop.f32.mrf.mxu1  ;;  %3688 = vmatmul.mubr.bf16.gmra.mxu1 %v6164_v44  ;;  %v5095_v61 = vpop.f32.mrf.mxu0  ;;  %3801 = vmatmul.mubr.bf16.gmra.mxu0 %v6168_v49  ;;  %v6198_v54 = vld [vmem:[%s8202_s0 + $0x40] ss:$104 sps:$4 sm:$0xff]  }
 0x103   :  { %3695 = vmatprep.mubr.bf16.mxu1 %v6175_v52  ;;  %3808 = vmatprep.mubr.bf16.mxu0 %v6180_v53 }
 0x104   :  { %v5004_v63 = vpop.f32.mrf.mxu1  ;;  %v5096_v0 = vpop.f32.mrf.mxu0 }
 0x105   :  { %v5005_v2 = vadd.f32 %v5004_v63, %v5003_v58  ;;  %v5097_v3 = vadd.f32 %v5096_v0, %v5095_v61  ;;  %v6203_v63 = vld [vmem:[%s8202_s0 + $0x3c] ss:$104 sps:$4 sm:$0xff]  }
 0x106   :  { %v5006_v5 = vpop.f32.mrf.mxu1  ;;  %v5098_v8 = vpop.f32.mrf.mxu0  ;;  %v6207_v0 = vld [vmem:[%s8201_s1 + $0x538] sm:$0xff]  }
 0x107   :  { %v7283_v10 = vadd.f32 %v5005_v2, %v7271_v62 }
 0x108   :  { %v5007_v12 = vpop.f32.mrf.mxu1  ;;  %v5099_v13 = vpop.f32.mrf.mxu0 }
 0x109   :  { %v5008_v14 = vadd.f32 %v5007_v12, %v5006_v5  ;;  %v5100_v15 = vadd.f32 %v5099_v13, %v5098_v8  ;;  %v3136_v5 = vadd.f32 %v7214_v19, %v7271_v62  ;;  %v6229_v19 = vld [vmem:[%s8201_s1 + $0x568] sm:$0xff]  }
 0x10a   :  { %v5025_v16 = vpop.f32.mrf.mxu1  ;;  %3696 = vmatmul.mubr.bf16.gmra.mxu1 %v6173_v1  ;;  %v5101_v17 = vpop.f32.mrf.mxu0  ;;  %3809 = vmatmul.mubr.bf16.gmra.mxu0 %v6178_v4  ;;  %v6216_v4 = vld [vmem:[%s8201_s1 + $0x570] sm:$0xff]  }
 0x10b   :  { %v7289_v20 = vadd.f32 %v5008_v14, %v7271_v62  ;;  %3703 = vmatprep.mubr.bf16.mxu1 %v6184_v9  ;;  %3816 = vmatprep.mubr.bf16.mxu0 %v6190_v11 }
 0x10c   :  { %v5026_v21 = vpop.f32.mrf.mxu1  ;;  %v5102_v22 = vpop.f32.mrf.mxu0 }
 0x10d   :  { %v5027_v25 = vadd.f32 %v5026_v21, %v5025_v16  ;;  %v5103_v26 = vadd.f32 %v5102_v22, %v5101_v17  ;;  %v3141_v21 = vadd.f32 %v7230_v29, %v7271_v62  ;;  %v6213_v29 = vld [vmem:[%s8202_s0 + $0x10c] ss:$104 sps:$4 sm:$0xff]  }
 0x10e   :  { %v5028_v30 = vpop.f32.mrf.mxu1  ;;  %v5104_v31 = vpop.f32.mrf.mxu0 }
 0x10f   :  { %v3230_v33 = vadd.f32 %v5027_v25, %v3125_v24  ;;  %v6201_v24 = vld [vmem:[%s8202_s0 + $0x38] ss:$104 sps:$4 sm:$0xff]  }
 0x110   :  { %v5029_v35 = vpop.f32.mrf.mxu1  ;;  %v5105_v36 = vpop.f32.mrf.mxu0  ;;  %v6205_v25 = vld [vmem:[%s8201_s1 + $0x4b8] sm:$0xff]  }
 0x111   :  { %v5030_v37 = vadd.f32 %v5029_v35, %v5028_v30  ;;  %v5106_v40 = vadd.f32 %v5105_v36, %v5104_v31  ;;  %v7307_v41 = vadd.f32 %v5097_v3, %v3230_v33  ;;  %v6208_v31 = vld [vmem:[%s8202_s0 + $0x110] ss:$104 sps:$4 sm:$0xff]   ;;  %v6219_v36 = vld [vmem:[%s8202_s0 + $0x1e4] ss:$104 sps:$4 sm:$0xff]  }
 0x112   :  { %v5031_v42 = vpop.f32.mrf.mxu1  ;;  %3704 = vmatmul.mubr.bf16.gmra.mxu1 %v6182_v23  ;;  %v5107_v43 = vpop.f32.mrf.mxu0  ;;  %3817 = vmatmul.mubr.bf16.gmra.mxu0 %v6188_v27  ;;  %v6214_v33 = vld [vmem:[%s8201_s1 + $0x4f0] sm:$0xff]  }
 0x113   :  { %v3233_v44 = vadd.f32 %v5030_v37, %v3128_v48  ;;  %3711 = vmatprep.mubr.bf16.mxu1 %v6193_v32  ;;  %3962 = vmatprep.mubr.bf16.mxu0 %v6200_v34  ;;  %v3144_v48 = vadd.f32 %v7246_v39, %v7271_v62  ;;  %v6215_v39 = vld [vmem:[%s8201_s1 + $0x4b0] sm:$0xff]  }
 0x114   :  { %v5032_v49 = vpop.f32.mrf.mxu1  ;;  %v5108_v50 = vpop.f32.mrf.mxu0 }
 0x115   :  { %v5033_v52 = vadd.f32 %v5032_v49, %v5031_v42  ;;  %v5109_v53 = vadd.f32 %v5108_v50, %v5107_v43  ;;  %v7317_v55 = vadd.f32 %v5100_v15, %v3233_v44  ;;  %v6220_v15 = vld [vmem:[%s8201_s1 + $0x530] sm:$0xff]   ;;  %v6230_v42 = vld [vmem:[%s8201_s1 + $0x528] sm:$0xff]   ;;  %v6239_v50 = vld [vmem:[%s8201_s1 + $0x560] sm:$0xff]  }
 0x116   :  { %v5034_v58 = vpop.f32.mrf.mxu1  ;;  %v5110_v61 = vpop.f32.mrf.mxu0 }
 0x117   :  { %v3238_v1 = vadd.f32 %v5033_v52, %v3133_v60 }
 0x118   :  { %v5035_v2 = vpop.f32.mrf.mxu1  ;;  %v5111_v3 = vpop.f32.mrf.mxu0 }
 0x119   :  { %v5036_v8 = vadd.f32 %v5035_v2, %v5034_v58  ;;  %v5112_v9 = vadd.f32 %v5111_v3, %v5110_v61  ;;  %v7333_v11 = vadd.f32 %v5103_v26, %v3238_v1  ;;  %v6224_v58 = vld [vmem:[%s8201_s1 + $0x4e8] sm:$0xff]   ;;  %v3149_v61 = vadd.f32 %v7253_v46, %v7271_v62  ;;  %v6223_v1 = vld [vmem:[%s8202_s0 + $0x1dc] ss:$104 sps:$4 sm:$0xff]  }
 0x11a   :  { %v5037_v12 = vpop.f32.mrf.mxu1  ;;  %3712 = vmatmul.mubr.bf16.gmra.mxu1 %v6191_v51  ;;  %v5113_v13 = vpop.f32.mrf.mxu0  ;;  %3963 = vmatmul.mubr.bf16.vlgmr.msra.gmra.mxu0 %v6198_v54  ;;  %v6217_v54 = vld [vmem:[%s8202_s0 + $0x1e0] ss:$104 sps:$4 sm:$0xff]  }
 0x11b   :  { %v3241_v14 = vadd.f32 %v5036_v8, %v3136_v5  ;;  %3857 = vmatprep.mubr.bf16.mxu1 %v6203_v63  ;;  %5640 = vmatpush3.bf16.msra.mxu0 %v6207_v0  ;;  %v6225_v5 = vld [vmem:[%s8201_s1 + $0x4a8] sm:$0xff]   ;;  %v6228_v8 = vld [vmem:[%s8202_s0 + $0x2b4] ss:$104 sps:$4 sm:$0xff]  }
 0x11c   :  { %v5038_v16 = vpop.f32.mrf.mxu1  ;;  %v5114_v17 = vpop.f32.mrf.mxu0  ;;  %3970 = vmatprep.mubr.bf16.mxu0 %v6210_v7  ;;  %5641 = vmatprep.subr.bf16.mxu0 %v6216_v4  ;;  %v6240_v7 = vld [vmem:[%s8201_s1 + $0x520] sm:$0xff]  }
 0x11d   :  { %v5039_v22 = vadd.f32 %v5038_v16, %v5037_v12  ;;  %v5115_v23 = vadd.f32 %v5114_v17, %v5113_v13  ;;  %v7349_v26 = vadd.f32 %v5106_v40, %v3241_v14  ;;  %v3152_v14 = vadd.f32 %v7266_v57, %v7271_v62  ;;  %v6238_v17 = vld [vmem:[%s8201_s1 + $0x4a0] sm:$0xff]   ;;  %v6253_v57 = vld [vmem:[%s8201_s1 + $0x518] sm:$0xff]  }
 0x11e   :  { %v5040_v27 = vpop.f32.mrf.mxu1  ;;  %v5116_v30 = vpop.f32.mrf.mxu0 }
 0x11f   :  { %v3246_v32 = vadd.f32 %v5039_v22, %v3141_v21  ;;  %5642 = vmatpush3.bf16.msra.mxu0 %v6220_v15 }
 0x120   :  { %v5041_v34 = vpop.f32.mrf.mxu1  ;;  %v5117_v35 = vpop.f32.mrf.mxu0  ;;  %5643 = vmatprep.subr.bf16.mxu0 %v6229_v19  ;;  %v6249_v19 = vld [vmem:[%s8201_s1 + $0x558] sm:$0xff]  }
 0x121   :  { %v5042_v37 = vadd.f32 %v5041_v34, %v5040_v27  ;;  %v7365_v40 = vadd.f32 %v5117_v35, %v5116_v30  ;;  %v7370_v43 = vadd.f32 %v5109_v53, %v3246_v32  ;;  %v6211_v53 = vld [vmem:[%s8202_s0 + $0x108] ss:$104 sps:$4 sm:$0xff]   ;;  %v6247_v32 = vld [vmem:[%s8201_s1 + $0x4d8] sm:$0xff]  }
 0x122   :  { %v5043_v44 = vpop.f32.mrf.mxu1  ;;  %3858 = vmatmul.mubr.bf16.vlgmr.msra.gmra.mxu1 %v6201_v24  ;;  %v5119_v49 = vpop.f32.mrf.mxu0  ;;  %3971 = vmatmul.mubr.bf16.gmra.mxu0 %v6208_v31  ;;  %v6262_v27 = vld [vmem:[%s8201_s1 + $0x550] sm:$0xff]  }
 0x123   :  { %v3249_v51 = vadd.f32 %v5042_v37, %v3144_v48  ;;  %5570 = vmatpush3.bf16.msra.mxu1 %v6205_v25  ;;  %3865 = vmatprep.mubr.bf16.mxu1 %v6213_v29  ;;  %v6226_v29 = vld [vmem:[%s8202_s0 + $0x2b0] ss:$104 sps:$4 sm:$0xff]  }
 0x124   :  { %v5044_v60 = vpop.f32.mrf.mxu1  ;;  %v5120_v52 = vpop.f32.mrf.mxu0  ;;  %5571 = vmatprep.subr.bf16.mxu1 %v6214_v33  ;;  %3978 = vmatprep.mubr.bf16.mxu0 %v6219_v36  ;;  %v3157_v33 = vadd.f32 %v7149_v47, %v7271_v62  ;;  %v6233_v36 = vld [vmem:[%s8202_s0 + $0x2ac] ss:$104 sps:$4 sm:$0xff]   ;;  %v6248_v47 = vld [vmem:[%s8201_s1 + $0x498] sm:$0xff]  }
 0x125   :  { %v5045_v63 = vadd.f32 %v5044_v60, %v5043_v44  ;;  %v5121_v0 = vadd.f32 %v5120_v52, %v5119_v49  ;;  %5644 = vmatpush3.bf16.msra.mxu0 %v6230_v42  ;;  %v7395_v2 = vadd.f32 %v5112_v9, %v3249_v51  ;;  %v6234_v9 = vld [vmem:[%s8201_s1 + $0x4e0] sm:$0xff]   ;;  %v3160_v60 = vadd.f32 %v7171_v59, %v7271_v62  ;;  %v6267_v59 = vld [vmem:[%s8201_s1 + $0x4c8] sm:$0xff]  }
 0x126   :  { %v5046_v3 = vpop.f32.mrf.mxu1  ;;  %v5122_v4 = vpop.f32.mrf.mxu0  ;;  %5645 = vmatprep.subr.bf16.mxu0 %v6239_v50  ;;  %v6237_v44 = vld [vmem:[%s8202_s0 + $0x384] ss:$104 sps:$4 sm:$0xff]   ;;  %v6257_v50 = vld [vmem:[%s8201_s1 + $0x4d0] sm:$0xff]  }
 0x127   :  { %v3254_v46 = vadd.f32 %v5045_v63, %v3149_v61  ;;  %5572 = vmatpush3.bf16.msra.mxu1 %v6215_v39  ;;  %v6263_v39 = vld [vmem:[%s8201_s1 + $0x510] sm:$0xff]  }
 0x128   :  { %v5047_v12 = vpop.f32.mrf.mxu1  ;;  %v5123_v13 = vpop.f32.mrf.mxu0  ;;  %5573 = vmatprep.subr.bf16.mxu1 %v6224_v58 }
 0x129   :  { %v5048_v15 = vadd.f32 %v5047_v12, %v5046_v3  ;;  %v7408_v16 = vadd.f32 %v5123_v13, %v5122_v4  ;;  %5646 = vmatpush3.bf16.msra.mxu0 %v6240_v7  ;;  %v7416_v21 = vadd.f32 %v5115_v23, %v3254_v46  ;;  %v6221_v23 = vld [vmem:[%s8202_s0 + $0x1d8] ss:$104 sps:$4 sm:$0xff]   ;;  %v3165_v3 = vadd.f32 %v7190_v6, %v7271_v62  ;;  %v6243_v6 = vld [vmem:[%s8202_s0 + $0x37c] ss:$104 sps:$4 sm:$0xff]  }
 0x12a   :  { %v5049_v22 = vpop.f32.mrf.mxu1  ;;  %3866 = vmatmul.mubr.bf16.gmra.mxu1 %v6211_v53  ;;  %v5125_v24 = vpop.f32.mrf.mxu0  ;;  %3979 = vmatmul.mubr.bf16.gmra.mxu0 %v6217_v54  ;;  %v6272_v54 = vld [vmem:[%s8201_s1 + $0x548] sm:$0xff]  }
 0x12b   :  { %v3257_v25 = vadd.f32 %v5048_v15, %v3152_v14  ;;  %3873 = vmatprep.mubr.bf16.mxu1 %v6223_v1  ;;  %5574 = vmatpush3.bf16.msra.mxu1 %v6225_v5  ;;  %v6258_v1 = vld [vmem:[%s8201_s1 + $0x490] sm:$0xff]   ;;  %v6235_v46 = vld [vmem:[%s8202_s0 + $0x380] ss:$104 sps:$4 sm:$0xff]  }
 0x12c   :  { %v5050_v30 = vpop.f32.mrf.mxu1  ;;  %v5126_v31 = vpop.f32.mrf.mxu0  ;;  %3986 = vmatprep.mubr.bf16.mxu0 %v6228_v8  ;;  %5575 = vmatprep.subr.bf16.mxu1 %v6234_v9  ;;  %v6231_v5 = vld [vmem:[%s8202_s0 + $0x2a8] ss:$104 sps:$4 sm:$0xff]   ;;  %v6282_v9 = vld [vmem:[%s8201_s1 + $0x540] sm:$0xff]  }
 0x12d   :  { %v5051_v34 = vadd.f32 %v5050_v30, %v5049_v22  ;;  %v7435_v35 = vadd.f32 %v5126_v31, %v5125_v24  ;;  %5647 = vmatprep.subr.bf16.mxu0 %v6249_v19  ;;  %v7441_v48 = vadd.f32 %v7365_v40, %v3257_v25  ;;  %v6273_v8 = vld [vmem:[%s8201_s1 + $0x508] sm:$0xff]   ;;  %v6246_v19 = vld [vmem:[%s8202_s0 + $0x454] ss:$104 sps:$4 sm:$0xff]  }
 0x12e   :  { %v5052_v37 = vpop.f32.mrf.mxu1  ;;  %v5128_v42 = vpop.f32.mrf.mxu0  ;;  %5648 = vmatpush3.bf16.msra.mxu0 %v6253_v57  ;;  %v6271_v24 = vld [vmem:[%s8201_s1 + $0x488] sm:$0xff]   ;;  %v3168_v57 = vadd.f32 %v7212_v18, %v7271_v62  ;;  %v6292_v18 = vld [vmem:[%s8201_s1 + $0x678] sm:$0xff]  }
 0x12f   :  { %v3262_v49 = vadd.f32 %v5051_v34, %v3157_v33  ;;  %5576 = vmatpush3.bf16.msra.mxu1 %v6238_v17  ;;  %5649 = vmatprep.subr.bf16.mxu0 %v6262_v27 }
 0x130   :  { %v5053_v40 = vpop.f32.mrf.mxu1  ;;  %v5129_v51 = vpop.f32.mrf.mxu0  ;;  %5577 = vmatprep.subr.bf16.mxu1 %v6247_v32 }
 0x131   :  { %v5054_v52 = vadd.f32 %v5053_v40, %v5052_v37  ;;  %v7457_v53 = vadd.f32 %v5129_v51, %v5128_v42  ;;  %v7462_v58 = vadd.f32 %v5121_v0, %v3262_v49  ;;  %v6281_v49 = vld [vmem:[%s8201_s1 + $0x480] sm:$0xff]  }
 0x132   :  { %v5055_v61 = vpop.f32.mrf.mxu1  ;;  %3874 = vmatmul.mubr.bf16.gmra.mxu1 %v6221_v23  ;;  %v5131_v63 = vpop.f32.mrf.mxu0  ;;  %3987 = vmatmul.mubr.bf16.gmra.mxu0 %v6226_v29  ;;  %v6280_v23 = vld [vmem:[%s8201_s1 + $0x4c0] sm:$0xff]  }
 0x133   :  { %v3265_v7 = vadd.f32 %v5054_v52, %v3160_v60  ;;  %3881 = vmatprep.mubr.bf16.mxu1 %v6233_v36  ;;  %3994 = vmatprep.mubr.bf16.mxu0 %v6237_v44  ;;  %v3173_v36 = vadd.f32 %v7228_v28, %v7271_v62  ;;  %v6241_v44 = vld [vmem:[%s8202_s0 + $0x378] ss:$104 sps:$4 sm:$0xff]   ;;  %v6252_v60 = vld [vmem:[%s8202_s0 + $0x44c] ss:$104 sps:$4 sm:$0xff]  }
 0x134   :  { %v5056_v0 = vpop.f32.mrf.mxu1  ;;  %v5132_v4 = vpop.f32.mrf.mxu0  ;;  %5578 = vmatpush3.bf16.msra.mxu1 %v6248_v47  ;;  %5650 = vmatpush3.bf16.msra.mxu0 %v6263_v39  ;;  %v6290_v28 = vld [vmem:[%s8201_s1 + $0x5f8] sm:$0xff]  }
 0x135   :  { %v5057_v12 = vadd.f32 %v5056_v0, %v5055_v61  ;;  %v5133_v13 = vadd.f32 %v5132_v4, %v5131_v63  ;;  %5579 = vmatprep.subr.bf16.mxu1 %v6257_v50  ;;  %5651 = vmatprep.subr.bf16.mxu0 %v6272_v54  ;;  %v7488_v14 = vadd.f32 %v7408_v16, %v3265_v7  ;;  %v6283_v16 = vld [vmem:[%s8201_s1 + $0x500] sm:$0xff]  }
 0x136   :  { %v5058_v15 = vpop.f32.mrf.mxu1  ;;  %v5134_v17 = vpop.f32.mrf.mxu0  ;;  %v6256_v54 = vld [vmem:[%s8202_s0 + $0x524] ss:$104 sps:$4 sm:$0xff]  }
 0x137   :  { %v3270_v22 = vadd.f32 %v5057_v12, %v3165_v3 }
 0x138   :  { %v5059_v25 = vpop.f32.mrf.mxu1  ;;  %v5135_v27 = vpop.f32.mrf.mxu0  ;;  %5580 = vmatpush3.bf16.msra.mxu1 %v6258_v1  ;;  %5652 = vmatpush3.bf16.msra.mxu0 %v6273_v8  ;;  %v3176_v1 = vadd.f32 %v7244_v38, %v7271_v62  ;;  %v6250_v8 = vld [vmem:[%s8202_s0 + $0x448] ss:$104 sps:$4 sm:$0xff]   ;;  %v3181_v38 = vadd.f32 %v7251_v45, %v7271_v62 }
 0x139   :  { %v5060_v30 = vadd.f32 %v5059_v25, %v5058_v15  ;;  %v5136_v31 = vadd.f32 %v5135_v27, %v5134_v17  ;;  %5581 = vmatprep.subr.bf16.mxu1 %v6267_v59  ;;  %5653 = vmatprep.subr.bf16.mxu0 %v6282_v9  ;;  %v7508_v29 = vadd.f32 %v7435_v35, %v3270_v22  ;;  %v6244_v35 = vld [vmem:[%s8202_s0 + $0x450] ss:$104 sps:$4 sm:$0xff]  }
 0x13a   :  { %v5061_v32 = vpop.f32.mrf.mxu1  ;;  %3882 = vmatmul.mubr.bf16.gmra.mxu1 %v6231_v5  ;;  %v5137_v33 = vpop.f32.mrf.mxu0  ;;  %3995 = vmatmul.mubr.bf16.gmra.mxu0 %v6235_v46  ;;  %v3184_v25 = vadd.f32 %v7264_v56, %v7271_v62 }
 0x13b   :  { %v3273_v34 = vadd.f32 %v5060_v30, %v3168_v57  ;;  %3889 = vmatprep.mubr.bf16.mxu1 %v6243_v6  ;;  %4002 = vmatprep.mubr.bf16.mxu0 %v6246_v19  ;;  %v6261_v19 = vld [vmem:[%s8202_s0 + $0x51c] ss:$104 sps:$4 sm:$0xff]  }
 0x13c   :  { %v5062_v37 = vpop.f32.mrf.mxu1  ;;  %v5138_v42 = vpop.f32.mrf.mxu0  ;;  %5582 = vmatpush3.bf16.msra.mxu1 %v6271_v24  ;;  %5654 = vmatpush3.bf16.msra.mxu0 %v6283_v16  ;;  %v6266_v24 = vld [vmem:[%s8202_s0 + $0x5f4] ss:$104 sps:$4 sm:$0xff]  }
 0x13d   :  { %v5063_v47 = vadd.f32 %v5062_v37, %v5061_v32  ;;  %v5139_v50 = vadd.f32 %v5138_v42, %v5137_v33  ;;  %5583 = vmatprep.subr.bf16.mxu1 %v6280_v23  ;;  %5779 = vmatprep.subr.bf16.mxu0 %v6292_v18  ;;  %v7525_v40 = vadd.f32 %v7457_v53, %v3273_v34  ;;  %v6259_v37 = vld [vmem:[%s8202_s0 + $0x518] ss:$104 sps:$4 sm:$0xff]  }
 0x13e   :  { %v5064_v51 = vpop.f32.mrf.mxu1  ;;  %v5140_v39 = vpop.f32.mrf.mxu0 }
 0x13f   :  { %v3278_v52 = vadd.f32 %v5063_v47, %v3173_v36  ;;  %v6276_v47 = vld [vmem:[%s8202_s0 + $0x6c4] ss:$104 sps:$4 sm:$0xff]  }
 0x140   :  { %v5065_v61 = vpop.f32.mrf.mxu1  ;;  %v5141_v63 = vpop.f32.mrf.mxu0  ;;  %5584 = vmatpush3.bf16.msra.mxu1 %v6281_v49 }
 0x141   :  { %v5066_v7 = vadd.f32 %v5065_v61, %v5064_v51  ;;  %v5142_v53 = vadd.f32 %v5141_v63, %v5140_v39  ;;  %5709 = vmatprep.subr.bf16.mxu1 %v6290_v28  ;;  %v7535_v59 = vadd.f32 %v5133_v13, %v3278_v52  ;;  %v6254_v13 = vld [vmem:[%s8202_s0 + $0x520] ss:$104 sps:$4 sm:$0xff]  }
 0x142   :  { %v5067_v3 = vpop.f32.mrf.mxu1  ;;  %3890 = vmatmul.mubr.bf16.gmra.mxu1 %v6241_v44  ;;  %v5143_v0 = vpop.f32.mrf.mxu0  ;;  %4003 = vmatmul.mubr.bf16.gmra.mxu0 %v6244_v35  ;;  %v6264_v44 = vld [vmem:[%s8202_s0 + $0x5f0] ss:$104 sps:$4 sm:$0xff]   ;;  %v6270_v35 = vld [vmem:[%s8202_s0 + $0x5ec] ss:$104 sps:$4 sm:$0xff]  }
 0x143   :  { %v3281_v4 = vadd.f32 %v5066_v7, %v3176_v1  ;;  %3897 = vmatprep.mubr.bf16.mxu1 %v6252_v60  ;;  %4010 = vmatprep.mubr.bf16.mxu0 %v6256_v54 }
 0x144   :  { %v5068_v5 = vpop.f32.mrf.mxu1  ;;  %v5144_v46 = vpop.f32.mrf.mxu0 }
 0x145   :  { %v5069_v12 = vadd.f32 %v5068_v5, %v5067_v3  ;;  %v5145_v6 = vadd.f32 %v5144_v46, %v5143_v0  ;;  %v7545_v9 = vadd.f32 %v5136_v31, %v3281_v4  ;;  %v6274_v5 = vld [vmem:[%s8202_s0 + $0x6c0] ss:$104 sps:$4 sm:$0xff]  }
 0x146   :  { %v5070_v15 = vpop.f32.mrf.mxu1  ;;  %v5146_v17 = vpop.f32.mrf.mxu0 }
 0x147   :  { %v3286_v22 = vadd.f32 %v5069_v12, %v3181_v38 }
 0x148   :  { %v5071_v45 = vpop.f32.mrf.mxu1  ;;  %v5147_v57 = vpop.f32.mrf.mxu0 }
 0x149   :  { %v5072_v27 = vadd.f32 %v5071_v45, %v5070_v15  ;;  %v5148_v16 = vadd.f32 %v5147_v57, %v5146_v17  ;;  %v7555_v30 = vadd.f32 %v5139_v50, %v3286_v22 }
 0x14a   :  { %v5073_v31 = vpop.f32.mrf.mxu1  ;;  %3898 = vmatmul.mubr.bf16.gmra.mxu1 %v6250_v8  ;;  %v5235_v23 = vpop.f32.mrf.mxu0  ;;  %4011 = vmatmul.mubr.bf16.gmra.mxu0 %v6254_v13  ;;  %v6286_v8 = vld [vmem:[%s8202_s0 + $0x54] ss:$104 sps:$4 sm:$0xff]  }
 0x14b   :  { %v3289_v18 = vadd.f32 %v5072_v27, %v3184_v25  ;;  %3905 = vmatprep.mubr.bf16.mxu1 %v6261_v19  ;;  %4018 = vmatprep.mubr.bf16.mxu0 %v6266_v24  ;;  %v6277_v25 = vld [vmem:[%s8202_s0 + $0x6b8] ss:$104 sps:$4 sm:$0xff]  }
 0x14c   :  { %v5074_v32 = vpop.f32.mrf.mxu1  ;;  %v5236_v33 = vpop.f32.mrf.mxu0  ;;  %v6284_v27 = vld [vmem:[%s8202_s0 + $0x50] ss:$104 sps:$4 sm:$0xff]  }
 0x14d   :  { %v5075_v34 = vadd.f32 %v5074_v32, %v5073_v31  ;;  %v5237_v36 = vadd.f32 %v5236_v33, %v5235_v23  ;;  %v7560_v56 = vadd.f32 %v5142_v53, %v3289_v18  ;;  %v6268_v53 = vld [vmem:[%s8202_s0 + $0x5e8] ss:$104 sps:$4 sm:$0xff]   ;;  %v6293_v18 = vld [vmem:[%s8201_s1 + $0x638] sm:$0xff]   ;;  %v6296_v33 = vld [vmem:[%s8202_s0 + $0x124] ss:$104 sps:$4 sm:$0xff]  }
 0x14e   :  { %v5076_v62 = vpop.f32.mrf.mxu1  ;;  %v5238_v42 = vpop.f32.mrf.mxu0 }
 0x14f   :  { %v3294_v49 = vadd.f32 %v5075_v34, %v7283_v10 }
 0x150   :  { %v5077_v50 = vpop.f32.mrf.mxu1  ;;  %v5239_v28 = vpop.f32.mrf.mxu0 }
 0x151   :  { %v5078_v51 = vadd.f32 %v5077_v50, %v5076_v62  ;;  %v5240_v39 = vadd.f32 %v5239_v28, %v5238_v42  ;;  %v7572_v60 = vadd.f32 %v5145_v6, %v3294_v49 }
 0x152   :  { %v5165_v52 = vpop.f32.mrf.mxu1  ;;  %3906 = vmatmul.mubr.bf16.gmra.mxu1 %v6259_v37  ;;  %v5241_v54 = vpop.f32.mrf.mxu0  ;;  %4019 = vmatmul.mubr.bf16.gmra.mxu0 %v6264_v44  ;;  %v6302_v37 = vld [vmem:[%s8201_s1 + $0x670] sm:$0xff]  }
 0x153   :  { %v3297_v61 = vadd.f32 %v5078_v51, %v7289_v20  ;;  %3913 = vmatprep.mubr.bf16.mxu1 %v6270_v35  ;;  %4026 = vmatprep.mubr.bf16.mxu0 %v6276_v47  ;;  %v6279_v20 = vld [vmem:[%s8202_s0 + $0x6bc] ss:$104 sps:$4 sm:$0xff]   ;;  %v6306_v47 = vld [vmem:[%s8201_s1 + $0x630] sm:$0xff]   ;;  %v6315_v51 = vld [vmem:[%s8201_s1 + $0x668] sm:$0xff]  }
 0x154   :  { %v5166_v63 = vpop.f32.mrf.mxu1  ;;  %v5242_v10 = vpop.f32.mrf.mxu0 }
 0x155   :  { %v5167_v1 = vadd.f32 %v5166_v63, %v5165_v52  ;;  %v5243_v7 = vadd.f32 %v5242_v10, %v5241_v54  ;;  %v7578_v3 = vadd.f32 %v5148_v16, %v3297_v61  ;;  %v6291_v54 = vld [vmem:[%s8201_s1 + $0x5b8] sm:$0xff]  }
 0x156   :  { %v5168_v0 = vpop.f32.mrf.mxu1  ;;  %v5244_v4 = vpop.f32.mrf.mxu0 }
 0x157   :  { %v3440_v46 = vadd.f32 %v5167_v1, %v7307_v41  ;;  %v6294_v1 = vld [vmem:[%s8202_s0 + $0x120] ss:$104 sps:$4 sm:$0xff]  }
 0x158   :  { %v5169_v38 = vpop.f32.mrf.mxu1  ;;  %v5245_v12 = vpop.f32.mrf.mxu0 }
 0x159   :  { %v5170_v6 = vadd.f32 %v5169_v38, %v5168_v0  ;;  %v5246_v13 = vadd.f32 %v5245_v12, %v5244_v4  ;;  %v7590_v15 = vadd.f32 %v5237_v36, %v3440_v46  ;;  %v6300_v0 = vld [vmem:[%s8201_s1 + $0x5f0] sm:$0xff]   ;;  %v6316_v38 = vld [vmem:[%s8201_s1 + $0x628] sm:$0xff]  }
 0x15a   :  { %v5171_v17 = vpop.f32.mrf.mxu1  ;;  %3914 = vmatmul.mubr.bf16.gmra.mxu1 %v6268_v53  ;;  %v5247_v19 = vpop.f32.mrf.mxu0  ;;  %4027 = vmatmul.mubr.bf16.gmra.mxu0 %v6274_v5 }
 0x15b   :  { %v3443_v22 = vadd.f32 %v5170_v6, %v7317_v55  ;;  %3921 = vmatprep.mubr.bf16.mxu1 %v6279_v20  ;;  %4172 = vmatprep.mubr.bf16.mxu0 %v6286_v8  ;;  %v6289_v55 = vld [vmem:[%s8202_s0 + $0x4c] ss:$104 sps:$4 sm:$0xff]  }
 0x15c   :  { %v5172_v24 = vpop.f32.mrf.mxu1  ;;  %v5248_v41 = vpop.f32.mrf.mxu0  ;;  %v6305_v20 = vld [vmem:[%s8202_s0 + $0x1f4] ss:$104 sps:$4 sm:$0xff]  }
 0x15d   :  { %v5173_v45 = vadd.f32 %v5172_v24, %v5171_v17  ;;  %v5249_v57 = vadd.f32 %v5248_v41, %v5247_v19  ;;  %v7599_v16 = vadd.f32 %v5240_v39, %v3443_v22  ;;  %v6301_v19 = vld [vmem:[%s8201_s1 + $0x5b0] sm:$0xff]   ;;  %v6310_v41 = vld [vmem:[%s8201_s1 + $0x5e8] sm:$0xff]  }
 0x15e   :  { %v5174_v31 = vpop.f32.mrf.mxu1  ;;  %v5250_v23 = vpop.f32.mrf.mxu0 }
 0x15f   :  { %v3448_v32 = vadd.f32 %v5173_v45, %v7333_v11 }
 0x160   :  { %v5175_v34 = vpop.f32.mrf.mxu1  ;;  %v5251_v36 = vpop.f32.mrf.mxu0 }
 0x161   :  { %v5176_v62 = vadd.f32 %v5175_v34, %v5174_v31  ;;  %v5252_v42 = vadd.f32 %v5251_v36, %v5250_v23  ;;  %v7614_v44 = vadd.f32 %v5243_v7, %v3448_v32  ;;  %v6299_v7 = vld [vmem:[%s8202_s0 + $0x11c] ss:$104 sps:$4 sm:$0xff]   ;;  %v6297_v31 = vld [vmem:[%s8202_s0 + $0x118] ss:$104 sps:$4 sm:$0xff]   ;;  %v6309_v32 = vld [vmem:[%s8202_s0 + $0x1ec] ss:$104 sps:$4 sm:$0xff]  }
 0x162   :  { %v5177_v35 = vpop.f32.mrf.mxu1  ;;  %3922 = vmatmul.mubr.bf16.gmra.mxu1 %v6277_v25  ;;  %v5253_v49 = vpop.f32.mrf.mxu0  ;;  %4173 = vmatmul.mubr.bf16.vlgmr.msra.gmra.mxu0 %v6284_v27 }
 0x163   :  { %v3451_v11 = vadd.f32 %v5176_v62, %v7349_v26  ;;  %4067 = vmatprep.mubr.bf16.mxu1 %v6289_v55  ;;  %5780 = vmatpush3.bf16.msra.mxu0 %v6293_v18  ;;  %v6287_v26 = vld [vmem:[%s8202_s0 + $0x48] ss:$104 sps:$4 sm:$0xff]  }
 0x164   :  { %v5178_v50 = vpop.f32.mrf.mxu1  ;;  %v5254_v28 = vpop.f32.mrf.mxu0  ;;  %4180 = vmatprep.mubr.bf16.mxu0 %v6296_v33  ;;  %5781 = vmatprep.subr.bf16.mxu0 %v6302_v37  ;;  %v6303_v55 = vld [vmem:[%s8202_s0 + $0x1f0] ss:$104 sps:$4 sm:$0xff]   ;;  %v6311_v33 = vld [vmem:[%s8201_s1 + $0x5a8] sm:$0xff]  }
 0x165   :  { %v5179_v39 = vadd.f32 %v5178_v50, %v5177_v35  ;;  %v5255_v52 = vadd.f32 %v5254_v28, %v5253_v49  ;;  %v7629_v61 = vadd.f32 %v5246_v13, %v3451_v11  ;;  %v6314_v37 = vld [vmem:[%s8202_s0 + $0x2c4] ss:$104 sps:$4 sm:$0xff]   ;;  %v6335_v35 = vld [vmem:[%s8201_s1 + $0x658] sm:$0xff]  }
 0x166   :  { %v5180_v63 = vpop.f32.mrf.mxu1  ;;  %v5256_v10 = vpop.f32.mrf.mxu0  ;;  %v6339_v50 = vld [vmem:[%s8201_s1 + $0x618] sm:$0xff]  }
 0x167   :  { %v3456_v53 = vadd.f32 %v5179_v39, %v7370_v43  ;;  %5782 = vmatpush3.bf16.msra.mxu0 %v6306_v47  ;;  %v6325_v43 = vld [vmem:[%s8201_s1 + $0x660] sm:$0xff]   ;;  %v6348_v39 = vld [vmem:[%s8201_s1 + $0x650] sm:$0xff]  }
 0x168   :  { %v5181_v4 = vpop.f32.mrf.mxu1  ;;  %v5257_v5 = vpop.f32.mrf.mxu0  ;;  %5783 = vmatprep.subr.bf16.mxu0 %v6315_v51  ;;  %v6324_v51 = vld [vmem:[%s8201_s1 + $0x5a0] sm:$0xff]  }
 0x169   :  { %v5182_v46 = vadd.f32 %v5181_v4, %v5180_v63  ;;  %v5258_v8 = vadd.f32 %v5257_v5, %v5256_v10  ;;  %v7650_v12 = vadd.f32 %v5249_v57, %v3456_v53  ;;  %v6319_v5 = vld [vmem:[%s8202_s0 + $0x2bc] ss:$104 sps:$4 sm:$0xff]  }
 0x16a   :  { %v5183_v6 = vpop.f32.mrf.mxu1  ;;  %4068 = vmatmul.mubr.bf16.vlgmr.msra.gmra.mxu1 %v6287_v26  ;;  %v5259_v13 = vpop.f32.mrf.mxu0  ;;  %4181 = vmatmul.mubr.bf16.gmra.mxu0 %v6294_v1 }
 0x16b   :  { %v3459_v17 = vadd.f32 %v5182_v46, %v7395_v2  ;;  %5710 = vmatpush3.bf16.msra.mxu1 %v6291_v54  ;;  %4075 = vmatprep.mubr.bf16.mxu1 %v6299_v7  ;;  %v6326_v2 = vld [vmem:[%s8201_s1 + $0x620] sm:$0xff]   ;;  %v6333_v54 = vld [vmem:[%s8201_s1 + $0x5d8] sm:$0xff]   ;;  %v6307_v7 = vld [vmem:[%s8202_s0 + $0x1e8] ss:$104 sps:$4 sm:$0xff]  }
 0x16c   :  { %v5184_v22 = vpop.f32.mrf.mxu1  ;;  %v5260_v24 = vpop.f32.mrf.mxu0  ;;  %5711 = vmatprep.subr.bf16.mxu1 %v6300_v0  ;;  %4188 = vmatprep.mubr.bf16.mxu0 %v6305_v20  ;;  %v6312_v0 = vld [vmem:[%s8202_s0 + $0x2c0] ss:$104 sps:$4 sm:$0xff]   ;;  %v6323_v20 = vld [vmem:[%s8202_s0 + $0x394] ss:$104 sps:$4 sm:$0xff]  }
 0x16d   :  { %v5185_v45 = vadd.f32 %v5184_v22, %v5183_v6  ;;  %v5261_v57 = vadd.f32 %v5260_v24, %v5259_v13  ;;  %5784 = vmatpush3.bf16.msra.mxu0 %v6316_v38  ;;  %v7662_v25 = vadd.f32 %v5252_v42, %v3459_v17  ;;  %v6334_v38 = vld [vmem:[%s8201_s1 + $0x598] sm:$0xff]   ;;  %v6343_v13 = vld [vmem:[%s8201_s1 + $0x5d0] sm:$0xff]   ;;  %v6358_v17 = vld [vmem:[%s8201_s1 + $0x648] sm:$0xff]  }
 0x16e   :  { %v5186_v27 = vpop.f32.mrf.mxu1  ;;  %v5262_v23 = vpop.f32.mrf.mxu0  ;;  %5785 = vmatprep.subr.bf16.mxu0 %v6325_v43 }
 0x16f   :  { %v3464_v18 = vadd.f32 %v5185_v45, %v7416_v21  ;;  %5712 = vmatpush3.bf16.msra.mxu1 %v6301_v19  ;;  %v6320_v21 = vld [vmem:[%s8201_s1 + $0x5e0] sm:$0xff]  }
 0x170   :  { %v5187_v34 = vpop.f32.mrf.mxu1  ;;  %v5263_v36 = vpop.f32.mrf.mxu0  ;;  %5713 = vmatprep.subr.bf16.mxu1 %v6310_v41 }
 0x171   :  { %v5188_v62 = vadd.f32 %v5187_v34, %v5186_v27  ;;  %v5264_v42 = vadd.f32 %v5263_v36, %v5262_v23  ;;  %5786 = vmatpush3.bf16.msra.mxu0 %v6326_v2  ;;  %v7686_v49 = vadd.f32 %v5255_v52, %v3464_v18  ;;  %v6344_v27 = vld [vmem:[%s8201_s1 + $0x590] sm:$0xff]  }
 0x172   :  { %v5189_v11 = vpop.f32.mrf.mxu1  ;;  %4076 = vmatmul.mubr.bf16.gmra.mxu1 %v6297_v31  ;;  %v5265_v47 = vpop.f32.mrf.mxu0  ;;  %4189 = vmatmul.mubr.bf16.gmra.mxu0 %v6303_v55  ;;  %v6368_v55 = vld [vmem:[%s8201_s1 + $0x640] sm:$0xff]   ;;  %v6321_v36 = vld [vmem:[%s8202_s0 + $0x390] ss:$104 sps:$4 sm:$0xff]  }
 0x173   :  { %v3467_v28 = vadd.f32 %v5188_v62, %v7441_v48  ;;  %4083 = vmatprep.mubr.bf16.mxu1 %v6309_v32  ;;  %5714 = vmatpush3.bf16.msra.mxu1 %v6311_v33  ;;  %v6317_v33 = vld [vmem:[%s8202_s0 + $0x2b8] ss:$104 sps:$4 sm:$0xff]   ;;  %v6332_v62 = vld [vmem:[%s8202_s0 + $0x464] ss:$104 sps:$4 sm:$0xff]  }
 0x174   :  { %v5190_v52 = vpop.f32.mrf.mxu1  ;;  %v5266_v26 = vpop.f32.mrf.mxu0  ;;  %4196 = vmatprep.mubr.bf16.mxu0 %v6314_v37  ;;  %5715 = vmatprep.subr.bf16.mxu1 %v6320_v21  ;;  %v6329_v21 = vld [vmem:[%s8202_s0 + $0x38c] ss:$104 sps:$4 sm:$0xff]  }
 0x175   :  { %v5191_v63 = vadd.f32 %v5190_v52, %v5189_v11  ;;  %v5267_v48 = vadd.f32 %v5266_v26, %v5265_v47  ;;  %5787 = vmatprep.subr.bf16.mxu0 %v6335_v35  ;;  %v7701_v10 = vadd.f32 %v5258_v8, %v3467_v28  ;;  %v6357_v11 = vld [vmem:[%s8201_s1 + $0x588] sm:$0xff]   ;;  %v6366_v28 = vld [vmem:[%s8201_s1 + $0x5c0] sm:$0xff]  }
 0x176   :  { %v5192_v1 = vpop.f32.mrf.mxu1  ;;  %v5268_v53 = vpop.f32.mrf.mxu0  ;;  %5788 = vmatpush3.bf16.msra.mxu0 %v6339_v50 }
 0x177   :  { %v3472_v4 = vadd.f32 %v5191_v63, %v7462_v58  ;;  %5716 = vmatpush3.bf16.msra.mxu1 %v6324_v51  ;;  %5789 = vmatprep.subr.bf16.mxu0 %v6348_v39  ;;  %v6349_v58 = vld [vmem:[%s8201_s1 + $0x610] sm:$0xff]  }
 0x178   :  { %v5193_v46 = vpop.f32.mrf.mxu1  ;;  %v5269_v8 = vpop.f32.mrf.mxu0  ;;  %5717 = vmatprep.subr.bf16.mxu1 %v6333_v54 }
 0x179   :  { %v5194_v43 = vadd.f32 %v5193_v46, %v5192_v1  ;;  %v5270_v6 = vadd.f32 %v5269_v8, %v5268_v53  ;;  %v7728_v19 = vadd.f32 %v5261_v57, %v3472_v4  ;;  %v6359_v57 = vld [vmem:[%s8201_s1 + $0x608] sm:$0xff]   ;;  %v6367_v1 = vld [vmem:[%s8201_s1 + $0x580] sm:$0xff]   ;;  %v6342_v8 = vld [vmem:[%s8202_s0 + $0x534] ss:$104 sps:$4 sm:$0xff]  }
 0x17a   :  { %v5195_v22 = vpop.f32.mrf.mxu1  ;;  %4084 = vmatmul.mubr.bf16.gmra.mxu1 %v6307_v7  ;;  %v5271_v24 = vpop.f32.mrf.mxu0  ;;  %4197 = vmatmul.mubr.bf16.gmra.mxu0 %v6312_v0  ;;  %v6338_v46 = vld [vmem:[%s8202_s0 + $0x45c] ss:$104 sps:$4 sm:$0xff]  }
 0x17b   :  { %v3475_v41 = vadd.f32 %v5194_v43, %v7488_v14  ;;  %4091 = vmatprep.mubr.bf16.mxu1 %v6319_v5  ;;  %4204 = vmatprep.mubr.bf16.mxu0 %v6323_v20  ;;  %v6353_v14 = vld [vmem:[%s8201_s1 + $0x5c8] sm:$0xff]  }
 0x17c   :  { %v5196_v45 = vpop.f32.mrf.mxu1  ;;  %v5272_v2 = vpop.f32.mrf.mxu0  ;;  %5718 = vmatpush3.bf16.msra.mxu1 %v6334_v38  ;;  %5790 = vmatpush3.bf16.msra.mxu0 %v6349_v58  ;;  %v6330_v5 = vld [vmem:[%s8202_s0 + $0x460] ss:$104 sps:$4 sm:$0xff]  }
 0x17d   :  { %v5197_v31 = vadd.f32 %v5196_v45, %v5195_v22  ;;  %v5273_v23 = vadd.f32 %v5272_v2, %v5271_v24  ;;  %5719 = vmatprep.subr.bf16.mxu1 %v6343_v13  ;;  %5791 = vmatprep.subr.bf16.mxu0 %v6358_v17  ;;  %v7743_v18 = vadd.f32 %v5264_v42, %v3475_v41 }
 0x17e   :  { %v5198_v32 = vpop.f32.mrf.mxu1  ;;  %v5274_v34 = vpop.f32.mrf.mxu0 }
 0x17f   :  { %v3480_v37 = vadd.f32 %v5197_v31, %v7508_v29  ;;  %v6369_v29 = vld [vmem:[%s8201_s1 + $0x600] sm:$0xff]  }
 0x180   :  { %v5199_v42 = vpop.f32.mrf.mxu1  ;;  %v5275_v35 = vpop.f32.mrf.mxu0  ;;  %5720 = vmatpush3.bf16.msra.mxu1 %v6344_v27  ;;  %5792 = vmatpush3.bf16.msra.mxu0 %v6359_v57  ;;  %v6336_v31 = vld [vmem:[%s8202_s0 + $0x458] ss:$104 sps:$4 sm:$0xff]  }
 0x181   :  { %v5200_v47 = vadd.f32 %v5199_v42, %v5198_v32  ;;  %v5276_v50 = vadd.f32 %v5275_v35, %v5274_v34  ;;  %5721 = vmatprep.subr.bf16.mxu1 %v6353_v14  ;;  %5793 = vmatprep.subr.bf16.mxu0 %v6368_v55  ;;  %v7767_v51 = vadd.f32 %v5267_v48, %v3480_v37  ;;  %v6340_v14 = vld [vmem:[%s8202_s0 + $0x530] ss:$104 sps:$4 sm:$0xff]   ;;  %v6347_v55 = vld [vmem:[%s8202_s0 + $0x52c] ss:$104 sps:$4 sm:$0xff]  }
 0x182   :  { %v5201_v39 = vpop.f32.mrf.mxu1  ;;  %4092 = vmatmul.mubr.bf16.gmra.mxu1 %v6317_v33  ;;  %v5277_v52 = vpop.f32.mrf.mxu0  ;;  %4205 = vmatmul.mubr.bf16.gmra.mxu0 %v6321_v36  ;;  %v6352_v32 = vld [vmem:[%s8202_s0 + $0x604] ss:$104 sps:$4 sm:$0xff]  }
 0x183   :  { %v3483_v26 = vadd.f32 %v5200_v47, %v7525_v40  ;;  %4099 = vmatprep.mubr.bf16.mxu1 %v6329_v21  ;;  %4212 = vmatprep.mubr.bf16.mxu0 %v6332_v62  ;;  %v6327_v40 = vld [vmem:[%s8202_s0 + $0x388] ss:$104 sps:$4 sm:$0xff]  }
 0x184   :  { %v5202_v54 = vpop.f32.mrf.mxu1  ;;  %v5278_v63 = vpop.f32.mrf.mxu0  ;;  %5722 = vmatpush3.bf16.msra.mxu1 %v6357_v11  ;;  %5794 = vmatpush3.bf16.msra.mxu0 %v6369_v29 }
 0x185   :  { %v5203_v7 = vadd.f32 %v5202_v54, %v5201_v39  ;;  %v5279_v53 = vadd.f32 %v5278_v63, %v5277_v52  ;;  %5723 = vmatprep.subr.bf16.mxu1 %v6366_v28  ;;  %v7773_v48 = vadd.f32 %v5270_v6, %v3483_v26  ;;  %v6345_v39 = vld [vmem:[%s8202_s0 + $0x528] ss:$104 sps:$4 sm:$0xff]   ;;  %v6356_v54 = vld [vmem:[%s8202_s0 + $0x5fc] ss:$104 sps:$4 sm:$0xff]  }
 0x186   :  { %v5204_v0 = vpop.f32.mrf.mxu1  ;;  %v5280_v4 = vpop.f32.mrf.mxu0  ;;  %v6350_v26 = vld [vmem:[%s8202_s0 + $0x600] ss:$104 sps:$4 sm:$0xff]   ;;  %v6362_v63 = vld [vmem:[%s8202_s0 + $0x6d4] ss:$104 sps:$4 sm:$0xff]  }
 0x187   :  { %v3488_v20 = vadd.f32 %v5203_v7, %v7535_v59 }
 0x188   :  { %v5205_v38 = vpop.f32.mrf.mxu1  ;;  %v5281_v58 = vpop.f32.mrf.mxu0  ;;  %5724 = vmatpush3.bf16.msra.mxu1 %v6367_v1 }
 0x189   :  { %v5206_v43 = vadd.f32 %v5205_v38, %v5204_v0  ;;  %v5282_v6 = vadd.f32 %v5281_v58, %v5280_v4  ;;  %v7788_v13 = vadd.f32 %v5273_v23, %v3488_v20 }
 0x18a   :  { %v5207_v17 = vpop.f32.mrf.mxu1  ;;  %4100 = vmatmul.mubr.bf16.gmra.mxu1 %v6327_v40  ;;  %v5283_v22 = vpop.f32.mrf.mxu0  ;;  %4213 = vmatmul.mubr.bf16.gmra.mxu0 %v6330_v5 }
 0x18b   :  { %v3491_v59 = vadd.f32 %v5206_v43, %v7545_v9  ;;  %4107 = vmatprep.mubr.bf16.mxu1 %v6338_v46  ;;  %4220 = vmatprep.mubr.bf16.mxu0 %v6342_v8 }
 0x18c   :  { %v5208_v24 = vpop.f32.mrf.mxu1  ;;  %v5284_v41 = vpop.f32.mrf.mxu0 }
 0x18d   :  { %v5209_v45 = vadd.f32 %v5208_v24, %v5207_v17  ;;  %v5285_v2 = vadd.f32 %v5284_v41, %v5283_v22  ;;  %v7791_v27 = vadd.f32 %v5276_v50, %v3491_v59  ;;  %v6360_v22 = vld [vmem:[%s8202_s0 + $0x6d0] ss:$104 sps:$4 sm:$0xff]   ;;  %v6365_v59 = vld [vmem:[%s8202_s0 + $0x6cc] ss:$104 sps:$4 sm:$0xff]  }
 0x18e   :  { %v5210_v57 = vpop.f32.mrf.mxu1  ;;  %v5286_v23 = vpop.f32.mrf.mxu0  ;;  %v6372_v24 = vld [vmem:[%s8202_s0 + $0x64] ss:$104 sps:$4 sm:$0xff]  }
 0x18f   :  { %v3496_v9 = vadd.f32 %v5209_v45, %v7555_v30 }
 0x190   :  { %v5211_v33 = vpop.f32.mrf.mxu1  ;;  %v5287_v34 = vpop.f32.mrf.mxu0 }
 0x191   :  { %v5212_v36 = vadd.f32 %v5211_v33, %v5210_v57  ;;  %v5288_v37 = vadd.f32 %v5287_v34, %v5286_v23  ;;  %v7806_v21 = vadd.f32 %v5279_v53, %v3496_v9 }
 0x192   :  { %v5213_v62 = vpop.f32.mrf.mxu1  ;;  %4108 = vmatmul.mubr.bf16.gmra.mxu1 %v6336_v31  ;;  %v5375_v42 = vpop.f32.mrf.mxu0  ;;  %4221 = vmatmul.mubr.bf16.gmra.mxu0 %v6340_v14 }
 0x193   :  { %v3499_v30 = vadd.f32 %v5212_v36, %v7560_v56  ;;  %4115 = vmatprep.mubr.bf16.mxu1 %v6347_v55  ;;  %4228 = vmatprep.mubr.bf16.mxu0 %v6352_v32 }
 0x194   :  { %v5214_v35 = vpop.f32.mrf.mxu1  ;;  %v5376_v11 = vpop.f32.mrf.mxu0 }
 0x195   :  { %v5215_v29 = vadd.f32 %v5214_v35, %v5213_v62  ;;  %v5377_v47 = vadd.f32 %v5376_v11, %v5375_v42  ;;  %v7809_v50 = vadd.f32 %v5282_v6, %v3499_v30  ;;  %v6354_v6 = vld [vmem:[%s8202_s0 + $0x5f8] ss:$104 sps:$4 sm:$0xff]   ;;  %v6375_v30 = vld [vmem:[%s8202_s0 + $0x5c] ss:$104 sps:$4 sm:$0xff]  }
 0x196   :  { %v5216_v28 = vpop.f32.mrf.mxu1  ;;  %v5378_v52 = vpop.f32.mrf.mxu0  ;;  %v6370_v42 = vld [vmem:[%s8202_s0 + $0x60] ss:$104 sps:$4 sm:$0xff]   ;;  %v6378_v35 = vld [vmem:[%s8202_s0 + $0x134] ss:$104 sps:$4 sm:$0xff]  }
 0x197   :  { %v3504_v56 = vadd.f32 %v5215_v29, %v7572_v60 }
 0x198   :  { %v5217_v1 = vpop.f32.mrf.mxu1  ;;  %v5379_v7 = vpop.f32.mrf.mxu0 }
 0x199   :  { %v5218_v53 = vadd.f32 %v5217_v1, %v5216_v28  ;;  %v5380_v0 = vadd.f32 %v5379_v7, %v5378_v52  ;;  %v7824_v40 = vadd.f32 %v5285_v2, %v3504_v56 }
 0x19a   :  { %v5305_v4 = vpop.f32.mrf.mxu1  ;;  %4116 = vmatmul.mubr.bf16.gmra.mxu1 %v6345_v39  ;;  %v5381_v5 = vpop.f32.mrf.mxu0  ;;  %4229 = vmatmul.mubr.bf16.gmra.mxu0 %v6350_v26 }
 0x19b   :  { %v3507_v60 = vadd.f32 %v5218_v53, %v7578_v3  ;;  %4123 = vmatprep.mubr.bf16.mxu1 %v6356_v54  ;;  %4236 = vmatprep.mubr.bf16.mxu0 %v6362_v63 }
 0x19c   :  { %v5306_v20 = vpop.f32.mrf.mxu1  ;;  %v5382_v46 = vpop.f32.mrf.mxu0 }
 0x19d   :  { %v5307_v8 = vadd.f32 %v5306_v20, %v5305_v4  ;;  %v5383_v38 = vadd.f32 %v5382_v46, %v5381_v5  ;;  %v7827_v58 = vadd.f32 %v5288_v37, %v3507_v60  ;;  %v6363_v37 = vld [vmem:[%s8202_s0 + $0x6c8] ss:$104 sps:$4 sm:$0xff]   ;;  %v6381_v60 = vld [vmem:[%s8202_s0 + $0x12c] ss:$104 sps:$4 sm:$0xff]  }
 0x19e   :  { %v5308_v43 = vpop.f32.mrf.mxu1  ;;  %v5384_v17 = vpop.f32.mrf.mxu0  ;;  %v6376_v5 = vld [vmem:[%s8202_s0 + $0x130] ss:$104 sps:$4 sm:$0xff]   ;;  %v6384_v20 = vld [vmem:[%s8202_s0 + $0x204] ss:$104 sps:$4 sm:$0xff]  }
 0x19f   :  { %v3650_v3 = vadd.f32 %v5307_v8, %v7590_v15 }
 0x1a0   :  { %v5309_v41 = vpop.f32.mrf.mxu1  ;;  %v5385_v45 = vpop.f32.mrf.mxu0 }
 0x1a1   :  { %v5310_v2 = vadd.f32 %v5309_v41, %v5308_v43  ;;  %v5386_v57 = vadd.f32 %v5385_v45, %v5384_v17  ;;  %v7842_v31 = vadd.f32 %v5377_v47, %v3650_v3 }
 0x1a2   :  { %v5311_v23 = vpop.f32.mrf.mxu1  ;;  %4124 = vmatmul.mubr.bf16.gmra.mxu1 %v6354_v6  ;;  %v5387_v14 = vpop.f32.mrf.mxu0  ;;  %4237 = vmatmul.mubr.bf16.gmra.mxu0 %v6360_v22 }
 0x1a3   :  { %v3653_v15 = vadd.f32 %v5310_v2, %v7599_v16  ;;  %4131 = vmatprep.mubr.bf16.mxu1 %v6365_v59  ;;  %4382 = vmatprep.mubr.bf16.mxu0 %v6372_v24 }
 0x1a4   :  { %v5312_v9 = vpop.f32.mrf.mxu1  ;;  %v5388_v55 = vpop.f32.mrf.mxu0 }
 0x1a5   :  { %v5313_v32 = vadd.f32 %v5312_v9, %v5311_v23  ;;  %v5389_v33 = vadd.f32 %v5388_v55, %v5387_v14  ;;  %v7845_v34 = vadd.f32 %v5380_v0, %v3653_v15  ;;  %v6373_v0 = vld [vmem:[%s8202_s0 + $0x58] ss:$104 sps:$4 sm:$0xff]   ;;  %v6387_v15 = vld [vmem:[%s8202_s0 + $0x1fc] ss:$104 sps:$4 sm:$0xff]  }
 0x1a6   :  { %v5314_v36 = vpop.f32.mrf.mxu1  ;;  %v5390_v62 = vpop.f32.mrf.mxu0  ;;  %v6382_v14 = vld [vmem:[%s8202_s0 + $0x200] ss:$104 sps:$4 sm:$0xff]   ;;  %v6390_v9 = vld [vmem:[%s8202_s0 + $0x2d4] ss:$104 sps:$4 sm:$0xff]  }
 0x1a7   :  { %v3658_v16 = vadd.f32 %v5313_v32, %v7614_v44 }
 0x1a8   :  { %v5315_v11 = vpop.f32.mrf.mxu1  ;;  %v5391_v29 = vpop.f32.mrf.mxu0 }
 0x1a9   :  { %v5316_v47 = vadd.f32 %v5315_v11, %v5314_v36  ;;  %v5392_v28 = vadd.f32 %v5391_v29, %v5390_v62  ;;  %v7860_v39 = vadd.f32 %v5383_v38, %v3658_v16 }
 0x1aa   :  { %v5317_v52 = vpop.f32.mrf.mxu1  ;;  %4132 = vmatmul.mubr.bf16.gmra.mxu1 %v6363_v37  ;;  %v5393_v26 = vpop.f32.mrf.mxu0  ;;  %4383 = vmatmul.mubr.bf16.vlgmr.msra.gmra.mxu0 %v6370_v42 }
 0x1ab   :  { %v3661_v44 = vadd.f32 %v5316_v47, %v7629_v61  ;;  %4277 = vmatprep.mubr.bf16.mxu1 %v6375_v30  ;;  %4390 = vmatprep.mubr.bf16.mxu0 %v6378_v35 }
 0x1ac   :  { %v5318_v56 = vpop.f32.mrf.mxu1  ;;  %v5394_v54 = vpop.f32.mrf.mxu0 }
 0x1ad   :  { %v5319_v63 = vadd.f32 %v5318_v56, %v5317_v52  ;;  %v5395_v1 = vadd.f32 %v5394_v54, %v5393_v26  ;;  %v7863_v7 = vadd.f32 %v5386_v57, %v3661_v44  ;;  %v6379_v57 = vld [vmem:[%s8202_s0 + $0x128] ss:$104 sps:$4 sm:$0xff]   ;;  %v6393_v44 = vld [vmem:[%s8202_s0 + $0x2cc] ss:$104 sps:$4 sm:$0xff]  }
 0x1ae   :  { %v5320_v53 = vpop.f32.mrf.mxu1  ;;  %v5396_v4 = vpop.f32.mrf.mxu0  ;;  %v6388_v26 = vld [vmem:[%s8202_s0 + $0x2d0] ss:$104 sps:$4 sm:$0xff]   ;;  %v6396_v56 = vld [vmem:[%s8202_s0 + $0x3a4] ss:$104 sps:$4 sm:$0xff]  }
 0x1af   :  { %v3666_v61 = vadd.f32 %v5319_v63, %v7650_v12 }
 0x1b0   :  { %v5321_v46 = vpop.f32.mrf.mxu1  ;;  %v5397_v8 = vpop.f32.mrf.mxu0 }
 0x1b1   :  { %v5322_v38 = vadd.f32 %v5321_v46, %v5320_v53  ;;  %v5398_v43 = vadd.f32 %v5397_v8, %v5396_v4  ;;  %v7878_v6 = vadd.f32 %v5389_v33, %v3666_v61 }
 0x1b2   :  { %v5323_v17 = vpop.f32.mrf.mxu1  ;;  %4278 = vmatmul.mubr.bf16.vlgmr.msra.gmra.mxu1 %v6373_v0  ;;  %v5399_v22 = vpop.f32.mrf.mxu0  ;;  %4391 = vmatmul.mubr.bf16.gmra.mxu0 %v6376_v5 }
 0x1b3   :  { %v3669_v12 = vadd.f32 %v5322_v38, %v7662_v25  ;;  %4285 = vmatprep.mubr.bf16.mxu1 %v6381_v60  ;;  %4398 = vmatprep.mubr.bf16.mxu0 %v6384_v20 }
 0x1b4   :  { %v5324_v3 = vpop.f32.mrf.mxu1  ;;  %v5400_v59 = vpop.f32.mrf.mxu0 }
 0x1b5   :  { %v5325_v24 = vadd.f32 %v5324_v3, %v5323_v17  ;;  %v5401_v41 = vadd.f32 %v5400_v59, %v5399_v22  ;;  %v7881_v45 = vadd.f32 %v5392_v28, %v3669_v12  ;;  %v6385_v28 = vld [vmem:[%s8202_s0 + $0x1f8] ss:$104 sps:$4 sm:$0xff]   ;;  %v6399_v12 = vld [vmem:[%s8202_s0 + $0x39c] ss:$104 sps:$4 sm:$0xff]  }
 0x1b6   :  { %v5326_v2 = vpop.f32.mrf.mxu1  ;;  %v5402_v23 = vpop.f32.mrf.mxu0  ;;  %v6394_v22 = vld [vmem:[%s8202_s0 + $0x3a0] ss:$104 sps:$4 sm:$0xff]   ;;  %v6402_v3 = vld [vmem:[%s8202_s0 + $0x474] ss:$104 sps:$4 sm:$0xff]  }
 0x1b7   :  { %v3674_v25 = vadd.f32 %v5325_v24, %v7686_v49 }
 0x1b8   :  { %v5327_v55 = vpop.f32.mrf.mxu1  ;;  %v5403_v32 = vpop.f32.mrf.mxu0 }
 0x1b9   :  { %v5328_v33 = vadd.f32 %v5327_v55, %v5326_v2  ;;  %v5404_v36 = vadd.f32 %v5403_v32, %v5402_v23  ;;  %v7896_v37 = vadd.f32 %v5395_v1, %v3674_v25 }
 0x1ba   :  { %v5329_v62 = vpop.f32.mrf.mxu1  ;;  %4286 = vmatmul.mubr.bf16.gmra.mxu1 %v6379_v57  ;;  %v5405_v42 = vpop.f32.mrf.mxu0  ;;  %4399 = vmatmul.mubr.bf16.gmra.mxu0 %v6382_v14 }
 0x1bb   :  { %v3677_v49 = vadd.f32 %v5328_v33, %v7701_v10  ;;  %4293 = vmatprep.mubr.bf16.mxu1 %v6387_v15  ;;  %4406 = vmatprep.mubr.bf16.mxu0 %v6390_v9 }
 0x1bc   :  { %v5330_v16 = vpop.f32.mrf.mxu1  ;;  %v5406_v30 = vpop.f32.mrf.mxu0 }
 0x1bd   :  { %v5331_v35 = vadd.f32 %v5330_v16, %v5329_v62  ;;  %v5407_v11 = vadd.f32 %v5406_v30, %v5405_v42  ;;  %v7899_v29 = vadd.f32 %v5398_v43, %v3677_v49  ;;  %v6391_v43 = vld [vmem:[%s8202_s0 + $0x2c8] ss:$104 sps:$4 sm:$0xff]   ;;  %v6405_v49 = vld [vmem:[%s8202_s0 + $0x46c] ss:$104 sps:$4 sm:$0xff]  }
 0x1be   :  { %v5332_v47 = vpop.f32.mrf.mxu1  ;;  %v5408_v52 = vpop.f32.mrf.mxu0  ;;  %v6400_v42 = vld [vmem:[%s8202_s0 + $0x470] ss:$104 sps:$4 sm:$0xff]   ;;  %v6408_v16 = vld [vmem:[%s8202_s0 + $0x544] ss:$104 sps:$4 sm:$0xff]  }
 0x1bf   :  { %v3682_v10 = vadd.f32 %v5331_v35, %v7728_v19 }
 0x1c0   :  { %v5333_v54 = vpop.f32.mrf.mxu1  ;;  %v5409_v63 = vpop.f32.mrf.mxu0 }
 0x1c1   :  { %v5334_v1 = vadd.f32 %v5333_v54, %v5332_v47  ;;  %v5410_v53 = vadd.f32 %v5409_v63, %v5408_v52  ;;  %v7914_v0 = vadd.f32 %v5401_v41, %v3682_v10 }
 0x1c2   :  { %v5335_v4 = vpop.f32.mrf.mxu1  ;;  %4294 = vmatmul.mubr.bf16.gmra.mxu1 %v6385_v28  ;;  %v5411_v5 = vpop.f32.mrf.mxu0  ;;  %4407 = vmatmul.mubr.bf16.gmra.mxu0 %v6388_v26 }
 0x1c3   :  { %v3685_v19 = vadd.f32 %v5334_v1, %v7743_v18  ;;  %4301 = vmatprep.mubr.bf16.mxu1 %v6393_v44  ;;  %4414 = vmatprep.mubr.bf16.mxu0 %v6396_v56 }
 0x1c4   :  { %v5336_v61 = vpop.f32.mrf.mxu1  ;;  %v5412_v60 = vpop.f32.mrf.mxu0 }
 0x1c5   :  { %v5337_v20 = vadd.f32 %v5336_v61, %v5335_v4  ;;  %v5413_v46 = vadd.f32 %v5412_v60, %v5411_v5  ;;  %v7917_v8 = vadd.f32 %v5404_v36, %v3685_v19  ;;  %v6397_v36 = vld [vmem:[%s8202_s0 + $0x398] ss:$104 sps:$4 sm:$0xff]   ;;  %v6411_v19 = vld [vmem:[%s8202_s0 + $0x53c] ss:$104 sps:$4 sm:$0xff]  }
 0x1c6   :  { %v5338_v38 = vpop.f32.mrf.mxu1  ;;  %v5414_v17 = vpop.f32.mrf.mxu0  ;;  %v6406_v5 = vld [vmem:[%s8202_s0 + $0x540] ss:$104 sps:$4 sm:$0xff]   ;;  %v6414_v61 = vld [vmem:[%s8202_s0 + $0x614] ss:$104 sps:$4 sm:$0xff]  }
 0x1c7   :  { %v3690_v18 = vadd.f32 %v5337_v20, %v7767_v51 }
 0x1c8   :  { %v5339_v59 = vpop.f32.mrf.mxu1  ;;  %v5415_v24 = vpop.f32.mrf.mxu0 }
 0x1c9   :  { %v5340_v41 = vadd.f32 %v5339_v59, %v5338_v38  ;;  %v5416_v2 = vadd.f32 %v5415_v24, %v5414_v17  ;;  %v7932_v57 = vadd.f32 %v5407_v11, %v3690_v18 }
 0x1ca   :  { %v5341_v23 = vpop.f32.mrf.mxu1  ;;  %4302 = vmatmul.mubr.bf16.gmra.mxu1 %v6391_v43  ;;  %v5417_v14 = vpop.f32.mrf.mxu0  ;;  %4415 = vmatmul.mubr.bf16.gmra.mxu0 %v6394_v22 }
 0x1cb   :  { %v3693_v51 = vadd.f32 %v5340_v41, %v7773_v48  ;;  %4309 = vmatprep.mubr.bf16.mxu1 %v6399_v12  ;;  %4422 = vmatprep.mubr.bf16.mxu0 %v6402_v3 }
 0x1cc   :  { %v5342_v25 = vpop.f32.mrf.mxu1  ;;  %v5418_v15 = vpop.f32.mrf.mxu0 }
 0x1cd   :  { %v5343_v9 = vadd.f32 %v5342_v25, %v5341_v23  ;;  %v5419_v55 = vadd.f32 %v5418_v15, %v5417_v14  ;;  %v7935_v32 = vadd.f32 %v5410_v53, %v3693_v51  ;;  %v6403_v53 = vld [vmem:[%s8202_s0 + $0x468] ss:$104 sps:$4 sm:$0xff]   ;;  %v6417_v51 = vld [vmem:[%s8202_s0 + $0x60c] ss:$104 sps:$4 sm:$0xff]  }
 0x1ce   :  { %v5344_v33 = vpop.f32.mrf.mxu1  ;;  %v5420_v62 = vpop.f32.mrf.mxu0  ;;  %v6412_v14 = vld [vmem:[%s8202_s0 + $0x610] ss:$104 sps:$4 sm:$0xff]   ;;  %v6420_v25 = vld [vmem:[%s8202_s0 + $0x6e4] ss:$104 sps:$4 sm:$0xff]  }
 0x1cf   :  { %v3698_v48 = vadd.f32 %v5343_v9, %v7788_v13 }
 0x1d0   :  { %v5345_v30 = vpop.f32.mrf.mxu1  ;;  %v5421_v35 = vpop.f32.mrf.mxu0 }
 0x1d1   :  { %v5346_v11 = vadd.f32 %v5345_v30, %v5344_v33  ;;  %v5422_v47 = vadd.f32 %v5421_v35, %v5420_v62  ;;  %v7950_v28 = vadd.f32 %v5413_v46, %v3698_v48 }
 0x1d2   :  { %v5347_v52 = vpop.f32.mrf.mxu1  ;;  %4310 = vmatmul.mubr.bf16.gmra.mxu1 %v6397_v36  ;;  %v5423_v26 = vpop.f32.mrf.mxu0  ;;  %4423 = vmatmul.mubr.bf16.gmra.mxu0 %v6400_v42 }
 0x1d3   :  { %v3701_v13 = vadd.f32 %v5346_v11, %v7791_v27  ;;  %4317 = vmatprep.mubr.bf16.mxu1 %v6405_v49  ;;  %4430 = vmatprep.mubr.bf16.mxu0 %v6408_v16 }
 0x1d4   :  { %v5348_v10 = vpop.f32.mrf.mxu1  ;;  %v5424_v44 = vpop.f32.mrf.mxu0 }
 0x1d5   :  { %v5349_v56 = vadd.f32 %v5348_v10, %v5347_v52  ;;  %v5425_v54 = vadd.f32 %v5424_v44, %v5423_v26  ;;  %v7953_v63 = vadd.f32 %v5416_v2, %v3701_v13  ;;  %v6409_v2 = vld [vmem:[%s8202_s0 + $0x538] ss:$104 sps:$4 sm:$0xff]   ;;  %v6423_v13 = vld [vmem:[%s8202_s0 + $0x6dc] ss:$104 sps:$4 sm:$0xff]  }
 0x1d6   :  { %v5350_v1 = vpop.f32.mrf.mxu1  ;;  %v5426_v4 = vpop.f32.mrf.mxu0  ;;  %v6418_v26 = vld [vmem:[%s8202_s0 + $0x6e0] ss:$104 sps:$4 sm:$0xff]  }
 0x1d7   :  { %v3706_v27 = vadd.f32 %v5349_v56, %v7806_v21 }
 0x1d8   :  { %v5351_v60 = vpop.f32.mrf.mxu1  ;;  %v5427_v20 = vpop.f32.mrf.mxu0 }
 0x1d9   :  { %v5352_v46 = vadd.f32 %v5351_v60, %v5350_v1  ;;  %v5428_v38 = vadd.f32 %v5427_v20, %v5426_v4  ;;  %v7968_v43 = vadd.f32 %v5419_v55, %v3706_v27 }
 0x1da   :  { %v5353_v17 = vpop.f32.mrf.mxu1  ;;  %4318 = vmatmul.mubr.bf16.gmra.mxu1 %v6403_v53  ;;  %v5515_v22 = vpop.f32.mrf.mxu0  ;;  %4431 = vmatmul.mubr.bf16.gmra.mxu0 %v6406_v5 }
 0x1db   :  { %v3709_v21 = vadd.f32 %v5352_v46, %v7809_v50  ;;  %4325 = vmatprep.mubr.bf16.mxu1 %v6411_v19  ;;  %4438 = vmatprep.mubr.bf16.mxu0 %v6414_v61  ;;  %v6421_v46 = vld [vmem:[%s8202_s0 + $0x6d8] ss:$104 sps:$4 sm:$0xff]  }
 0x1dc   :  { %v5354_v18 = vpop.f32.mrf.mxu1  ;;  %v5516_v12 = vpop.f32.mrf.mxu0 }
 0x1dd   :  { %v5355_v3 = vadd.f32 %v5354_v18, %v5353_v17  ;;  %v5517_v59 = vadd.f32 %v5516_v12, %v5515_v22  ;;  %v7971_v24 = vadd.f32 %v5422_v47, %v3709_v21  ;;  %v6415_v47 = vld [vmem:[%s8202_s0 + $0x608] ss:$104 sps:$4 sm:$0xff]  }
 0x1de   :  { %v5356_v41 = vpop.f32.mrf.mxu1  ;;  %v5518_v23 = vpop.f32.mrf.mxu0 }
 0x1df   :  { %v3714_v50 = vadd.f32 %v5355_v3, %v7824_v40 }
 0x1e0   :  { %v5357_v15 = vpop.f32.mrf.mxu1  ;;  %v5519_v9 = vpop.f32.mrf.mxu0 }
 0x1e1   :  { %v5358_v55 = vadd.f32 %v5357_v15, %v5356_v41  ;;  %v5520_v33 = vadd.f32 %v5519_v9, %v5518_v23  ;;  %v7986_v36 = vadd.f32 %v5425_v54, %v3714_v50 }
 0x1e2   :  { %v5445_v62 = vpop.f32.mrf.mxu1  ;;  %4326 = vmatmul.mubr.bf16.gmra.mxu1 %v6409_v2  ;;  %v5521_v42 = vpop.f32.mrf.mxu0  ;;  %4439 = vmatmul.mubr.bf16.gmra.mxu0 %v6412_v14 }
 0x1e3   :  { %v3717_v40 = vadd.f32 %v5358_v55, %v7827_v58  ;;  %4333 = vmatprep.mubr.bf16.mxu1 %v6417_v51  ;;  %4446 = vmatprep.mubr.bf16.mxu0 %v6420_v25 }
 0x1e4   :  { %v5446_v48 = vpop.f32.mrf.mxu1  ;;  %v5522_v49 = vpop.f32.mrf.mxu0 }
 0x1e5   :  { %v5447_v16 = vadd.f32 %v5446_v48, %v5445_v62  ;;  %v5523_v30 = vadd.f32 %v5522_v49, %v5521_v42  ;;  %v7989_v35 = vadd.f32 %v5428_v38, %v3717_v40 }
 0x1e6   :  { %v5448_v11 = vpop.f32.mrf.mxu1  ;;  %v5524_v52 = vpop.f32.mrf.mxu0 }
 0x1e7   :  { %v3860_v58 = vadd.f32 %v5447_v16, %v7842_v31 }
 0x1e8   :  { %v5449_v10 = vpop.f32.mrf.mxu1  ;;  %v5525_v44 = vpop.f32.mrf.mxu0 }
 0x1e9   :  { %v5450_v56 = vadd.f32 %v5449_v10, %v5448_v11  ;;  %v5526_v54 = vadd.f32 %v5525_v44, %v5524_v52  ;;  %v8001_v1 = vadd.f32 %v5517_v59, %v3860_v58 }
 0x1ea   :  { %v5451_v53 = vpop.f32.mrf.mxu1  ;;  %4334 = vmatmul.mubr.bf16.gmra.mxu1 %v6415_v47  ;;  %v5527_v4 = vpop.f32.mrf.mxu0  ;;  %4447 = vmatmul.mubr.bf16.gmra.mxu0 %v6418_v26 }
 0x1eb   :  { %v3863_v5 = vadd.f32 %v5450_v56, %v7845_v34  ;;  %4341 = vmatprep.mubr.bf16.mxu1 %v6423_v13 }
 0x1ec   :  { %v5452_v27 = vpop.f32.mrf.mxu1  ;;  %v5528_v19 = vpop.f32.mrf.mxu0 }
 0x1ed   :  { %v5453_v31 = vadd.f32 %v5452_v27, %v5451_v53  ;;  %v5529_v61 = vadd.f32 %v5528_v19, %v5527_v4  ;;  %v8004_v60 = vadd.f32 %v5520_v33, %v3863_v5 }
 0x1ee   :  { %v5454_v20 = vpop.f32.mrf.mxu1  ;;  %v5530_v38 = vpop.f32.mrf.mxu0 }
 0x1ef   :  { %v3868_v17 = vadd.f32 %v5453_v31, %v7860_v39 }
 0x1f0   :  { %v5455_v22 = vpop.f32.mrf.mxu1  ;;  %v5531_v21 = vpop.f32.mrf.mxu0 }
 0x1f1   :  { %v5456_v18 = vadd.f32 %v5455_v22, %v5454_v20  ;;  %v5532_v12 = vadd.f32 %v5531_v21, %v5530_v38  ;;  %v8010_v34 = vadd.f32 %v5523_v30, %v3868_v17 }
 0x1f2   :  { %v5457_v3 = vpop.f32.mrf.mxu1  ;;  %4342 = vmatmul.mubr.bf16.gmra.mxu1 %v6421_v46  ;;  %v5533_v59 = vpop.f32.mrf.mxu0 }
 0x1f3   :  { %v3871_v41 = vadd.f32 %v5456_v18, %v7863_v7 }
 0x1f4   :  { %v5458_v2 = vpop.f32.mrf.mxu1  ;;  %v5534_v23 = vpop.f32.mrf.mxu0 }
 0x1f5   :  { %v5459_v14 = vadd.f32 %v5458_v2, %v5457_v3  ;;  %v5535_v50 = vadd.f32 %v5534_v23, %v5533_v59  ;;  %v8013_v51 = vadd.f32 %v5526_v54, %v3871_v41 }
 0x1f6   :  { %v5460_v25 = vpop.f32.mrf.mxu1  ;;  %v5536_v15 = vpop.f32.mrf.mxu0 }
 0x1f7   :  { %v3876_v39 = vadd.f32 %v5459_v14, %v7878_v6 }
 0x1f8   :  { %v5461_v9 = vpop.f32.mrf.mxu1  ;;  %v5537_v55 = vpop.f32.mrf.mxu0 }
 0x1f9   :  { %v5462_v33 = vadd.f32 %v5461_v9, %v5460_v25  ;;  %v5538_v62 = vadd.f32 %v5537_v55, %v5536_v15  ;;  %v8016_v42 = vadd.f32 %v5529_v61, %v3876_v39 }
 0x1fa   :  { %v5463_v40 = vpop.f32.mrf.mxu1  ;;  %v5539_v48 = vpop.f32.mrf.mxu0 }
 0x1fb   :  { %v3879_v7 = vadd.f32 %v5462_v33, %v7881_v45 }
 0x1fc   :  { %v5464_v49 = vpop.f32.mrf.mxu1  ;;  %v5540_v16 = vpop.f32.mrf.mxu0 }
 0x1fd   :  { %v5465_v30 = vadd.f32 %v5464_v49, %v5463_v40  ;;  %v5541_v11 = vadd.f32 %v5540_v16, %v5539_v48  ;;  %v8019_v47 = vadd.f32 %v5532_v12, %v3879_v7 }
 0x1fe   :  { %v5466_v52 = vpop.f32.mrf.mxu1  ;;  %v5542_v26 = vpop.f32.mrf.mxu0 }
 0x1ff   :  { %v3884_v6 = vadd.f32 %v5465_v30, %v7896_v37 }
 0x200   :  { %v5467_v58 = vpop.f32.mrf.mxu1  ;;  %v5543_v13 = vpop.f32.mrf.mxu0 }
 0x201   :  { %v5468_v10 = vadd.f32 %v5467_v58, %v5466_v52  ;;  %v5544_v44 = vadd.f32 %v5543_v13, %v5542_v26  ;;  %v8022_v56 = vadd.f32 %v5535_v50, %v3884_v6 }
 0x202   :  { %v5469_v54 = vpop.f32.mrf.mxu1  ;;  %v5545_v53 = vpop.f32.mrf.mxu0 }
 0x203   :  { %v3887_v45 = vadd.f32 %v5468_v10, %v7899_v29 }
 0x204   :  { %v5470_v4 = vpop.f32.mrf.mxu1  ;;  %v5546_v5 = vpop.f32.mrf.mxu0 }
 0x205   :  { %v5471_v27 = vadd.f32 %v5470_v4, %v5469_v54  ;;  %v5547_v19 = vadd.f32 %v5546_v5, %v5545_v53  ;;  %v8025_v31 = vadd.f32 %v5538_v62, %v3887_v45 }
 0x206   :  { %v5472_v61 = vpop.f32.mrf.mxu1  ;;  %v5548_v20 = vpop.f32.mrf.mxu0 }
 0x207   :  { %v3892_v37 = vadd.f32 %v5471_v27, %v7914_v0 }
 0x208   :  { %v5473_v46 = vpop.f32.mrf.mxu1  ;;  %v5549_v38 = vpop.f32.mrf.mxu0 }
 0x209   :  { %v5474_v17 = vadd.f32 %v5473_v46, %v5472_v61  ;;  %v5550_v22 = vadd.f32 %v5549_v38, %v5548_v20  ;;  %v8028_v21 = vadd.f32 %v5541_v11, %v3892_v37 }
 0x20a   :  { %v5475_v18 = vpop.f32.mrf.mxu1  ;;  %v5551_v12 = vpop.f32.mrf.mxu0 }
 0x20b   :  { %v3895_v29 = vadd.f32 %v5474_v17, %v7917_v8 }
 0x20c   :  { %v5476_v3 = vpop.f32.mrf.mxu1  ;;  %v5552_v59 = vpop.f32.mrf.mxu0 }
 0x20d   :  { %v5477_v41 = vadd.f32 %v5476_v3, %v5475_v18  ;;  %v5553_v2 = vadd.f32 %v5552_v59, %v5551_v12  ;;  %v8031_v23 = vadd.f32 %v5544_v44, %v3895_v29 }
 0x20e   :  { %v5478_v14 = vpop.f32.mrf.mxu1  ;;  %v5554_v50 = vpop.f32.mrf.mxu0 }
 0x20f   :  { %v3900_v0 = vadd.f32 %v5477_v41, %v7932_v57 }
 0x210   :  { %v5479_v25 = vpop.f32.mrf.mxu1  ;;  %v5555_v15 = vpop.f32.mrf.mxu0 }
 0x211   :  { %v5480_v39 = vadd.f32 %v5479_v25, %v5478_v14  ;;  %v5556_v9 = vadd.f32 %v5555_v15, %v5554_v50  ;;  %v8034_v55 = vadd.f32 %v5547_v19, %v3900_v0 }
 0x212   :  { %v5481_v33 = vpop.f32.mrf.mxu1  ;;  %v5557_v62 = vpop.f32.mrf.mxu0 }
 0x213   :  { %v3903_v8 = vadd.f32 %v5480_v39, %v7935_v32 }
 0x214   :  { %v5482_v40 = vpop.f32.mrf.mxu1  ;;  %v5558_v48 = vpop.f32.mrf.mxu0 }
 0x215   :  { %v5483_v7 = vadd.f32 %v5482_v40, %v5481_v33  ;;  %v5559_v49 = vadd.f32 %v5558_v48, %v5557_v62  ;;  %v8037_v16 = vadd.f32 %v5550_v22, %v3903_v8 }
 0x216   :  { %v5484_v30 = vpop.f32.mrf.mxu1  ;;  %v5560_v11 = vpop.f32.mrf.mxu0 }
 0x217   :  { %v3908_v57 = vadd.f32 %v5483_v7, %v7950_v28 }
 0x218   :  { %v5485_v52 = vpop.f32.mrf.mxu1  ;;  %v5561_v26 = vpop.f32.mrf.mxu0 }
 0x219   :  { %v5486_v6 = vadd.f32 %v5485_v52, %v5484_v30  ;;  %v5562_v58 = vadd.f32 %v5561_v26, %v5560_v11  ;;  %v8040_v13 = vadd.f32 %v5553_v2, %v3908_v57 }
 0x21a   :  { %v5487_v10 = vpop.f32.mrf.mxu1  ;;  %v5563_v44 = vpop.f32.mrf.mxu0 }
 0x21b   :  { %v3911_v32 = vadd.f32 %v5486_v6, %v7953_v63 }
 0x21c   :  { %v5488_v54 = vpop.f32.mrf.mxu1  ;;  %v5564_v53 = vpop.f32.mrf.mxu0 }
 0x21d   :  { %v5489_v45 = vadd.f32 %v5488_v54, %v5487_v10  ;;  %v5565_v4 = vadd.f32 %v5564_v53, %v5563_v44  ;;  %v8043_v5 = vadd.f32 %v5556_v9, %v3911_v32 }
 0x21e   :  { %v5490_v27 = vpop.f32.mrf.mxu1  ;;  %v5566_v19 = vpop.f32.mrf.mxu0 }
 0x21f   :  { %v3916_v28 = vadd.f32 %v5489_v45, %v7968_v43 }
 0x220   :  { %v5491_v61 = vpop.f32.mrf.mxu1  ;;  %v5567_v20 = vpop.f32.mrf.mxu0 }
 0x221   :  { %v5492_v37 = vadd.f32 %v5491_v61, %v5490_v27  ;;  %v5568_v46 = vadd.f32 %v5567_v20, %v5566_v19  ;;  %v8046_v38 = vadd.f32 %v5559_v49, %v3916_v28 }
 0x222   :  { %v5493_v17 = vpop.f32.mrf.mxu1  ;;  %v5655_v22 = vpop.f32.mrf.mxu0 }
 0x223   :  { %v3919_v63 = vadd.f32 %v5492_v37, %v7971_v24 }
 0x224   :  { %v5494_v18 = vpop.f32.mrf.mxu1  ;;  %v5656_v12 = vpop.f32.mrf.mxu0 }
 0x225   :  { %v5495_v29 = vadd.f32 %v5494_v18, %v5493_v17  ;;  %v5657_v3 = vadd.f32 %v5656_v12, %v5655_v22  ;;  %v8049_v59 = vadd.f32 %v5562_v58, %v3919_v63 }
 0x226   :  { %v5496_v41 = vpop.f32.mrf.mxu1  ;;  %v5658_v2 = vpop.f32.mrf.mxu0 }
 0x227   :  { %v3924_v43 = vadd.f32 %v5495_v29, %v7986_v36 }
 0x228   :  { %v5497_v14 = vpop.f32.mrf.mxu1  ;;  %v5659_v50 = vpop.f32.mrf.mxu0 }
 0x229   :  { %v5498_v0 = vadd.f32 %v5497_v14, %v5496_v41  ;;  %v5660_v25 = vadd.f32 %v5659_v50, %v5658_v2  ;;  %v8052_v15 = vadd.f32 %v5565_v4, %v3924_v43 }
 0x22a   :  { %v5585_v39 = vpop.f32.mrf.mxu1  ;;  %v5661_v9 = vpop.f32.mrf.mxu0 }
 0x22b   :  { %v3927_v24 = vadd.f32 %v5498_v0, %v7989_v35 }
 0x22c   :  { %v5586_v33 = vpop.f32.mrf.mxu1  ;;  %v5662_v62 = vpop.f32.mrf.mxu0 }
 0x22d   :  { %v5587_v8 = vadd.f32 %v5586_v33, %v5585_v39  ;;  %v5663_v40 = vadd.f32 %v5662_v62, %v5661_v9  ;;  %v8055_v48 = vadd.f32 %v5568_v46, %v3927_v24 }
 0x22e   :  { %v5588_v7 = vpop.f32.mrf.mxu1  ;;  %v5664_v49 = vpop.f32.mrf.mxu0 }
 0x22f   :  { %v4070_v36 = vadd.f32 %v5587_v8, %v8001_v1 }
 0x230   :  { %v5589_v30 = vpop.f32.mrf.mxu1  ;;  %v5665_v11 = vpop.f32.mrf.mxu0 }
 0x231   :  { %v5590_v57 = vadd.f32 %v5589_v30, %v5588_v7  ;;  %v5666_v52 = vadd.f32 %v5665_v11, %v5664_v49  ;;  %v8058_v26 = vadd.f32 %v5657_v3, %v4070_v36 }
 0x232   :  { %v5591_v6 = vpop.f32.mrf.mxu1  ;;  %v5667_v58 = vpop.f32.mrf.mxu0 }
 0x233   :  { %v4073_v35 = vadd.f32 %v5590_v57, %v8004_v60 }
 0x234   :  { %v5592_v10 = vpop.f32.mrf.mxu1  ;;  %v5668_v44 = vpop.f32.mrf.mxu0 }
 0x235   :  { %v5593_v32 = vadd.f32 %v5592_v10, %v5591_v6  ;;  %v5669_v54 = vadd.f32 %v5668_v44, %v5667_v58  ;;  %v8061_v53 = vadd.f32 %v5660_v25, %v4073_v35 }
 0x236   :  { %v5594_v45 = vpop.f32.mrf.mxu1  ;;  %v5670_v4 = vpop.f32.mrf.mxu0 }
 0x237   :  { %v4078_v1 = vadd.f32 %v5593_v32, %v8010_v34 }
 0x238   :  { %v5595_v27 = vpop.f32.mrf.mxu1  ;;  %v5671_v19 = vpop.f32.mrf.mxu0 }
 0x239   :  { %v5596_v28 = vadd.f32 %v5595_v27, %v5594_v45  ;;  %v5672_v61 = vadd.f32 %v5671_v19, %v5670_v4  ;;  %v8064_v20 = vadd.f32 %v5663_v40, %v4078_v1 }
 0x23a   :  { %v5597_v37 = vpop.f32.mrf.mxu1  ;;  %v5673_v46 = vpop.f32.mrf.mxu0 }
 0x23b   :  { %v4081_v60 = vadd.f32 %v5596_v28, %v8013_v51 }
 0x23c   :  { %v5598_v17 = vpop.f32.mrf.mxu1  ;;  %v5674_v22 = vpop.f32.mrf.mxu0 }
 0x23d   :  { %v5599_v63 = vadd.f32 %v5598_v17, %v5597_v37  ;;  %v5675_v18 = vadd.f32 %v5674_v22, %v5673_v46  ;;  %v8067_v12 = vadd.f32 %v5666_v52, %v4081_v60 }
 0x23e   :  { %v5600_v29 = vpop.f32.mrf.mxu1  ;;  %v5676_v3 = vpop.f32.mrf.mxu0 }
 0x23f   :  { %v4086_v34 = vadd.f32 %v5599_v63, %v8016_v42 }
 0x240   :  { %v5601_v41 = vpop.f32.mrf.mxu1  ;;  %v5677_v2 = vpop.f32.mrf.mxu0 }
 0x241   :  { %v5602_v43 = vadd.f32 %v5601_v41, %v5600_v29  ;;  %v5678_v14 = vadd.f32 %v5677_v2, %v5676_v3  ;;  %v8070_v50 = vadd.f32 %v5669_v54, %v4086_v34 }
 0x242   :  { %v5603_v0 = vpop.f32.mrf.mxu1  ;;  %v5679_v25 = vpop.f32.mrf.mxu0 }
 0x243   :  { %v4089_v51 = vadd.f32 %v5602_v43, %v8019_v47 }
 0x244   :  { %v5604_v39 = vpop.f32.mrf.mxu1  ;;  %v5680_v9 = vpop.f32.mrf.mxu0 }
 0x245   :  { %v5605_v24 = vadd.f32 %v5604_v39, %v5603_v0  ;;  %v5681_v33 = vadd.f32 %v5680_v9, %v5679_v25  ;;  %v8073_v62 = vadd.f32 %v5672_v61, %v4089_v51 }
 0x246   :  { %v5606_v8 = vpop.f32.mrf.mxu1  ;;  %v5682_v40 = vpop.f32.mrf.mxu0 }
 0x247   :  { %v4094_v42 = vadd.f32 %v5605_v24, %v8022_v56 }
 0x248   :  { %v5607_v7 = vpop.f32.mrf.mxu1  ;;  %v5683_v49 = vpop.f32.mrf.mxu0 }
 0x249   :  { %v5608_v36 = vadd.f32 %v5607_v7, %v5606_v8  ;;  %v5684_v30 = vadd.f32 %v5683_v49, %v5682_v40  ;;  %v8076_v11 = vadd.f32 %v5675_v18, %v4094_v42 }
 0x24a   :  { %v5609_v57 = vpop.f32.mrf.mxu1  ;;  %v5685_v52 = vpop.f32.mrf.mxu0 }
 0x24b   :  { %v4097_v47 = vadd.f32 %v5608_v36, %v8025_v31 }
 0x24c   :  { %v5610_v6 = vpop.f32.mrf.mxu1  ;;  %v5686_v58 = vpop.f32.mrf.mxu0 }
 0x24d   :  { %v5611_v35 = vadd.f32 %v5610_v6, %v5609_v57  ;;  %v5687_v10 = vadd.f32 %v5686_v58, %v5685_v52  ;;  %v8079_v44 = vadd.f32 %v5678_v14, %v4097_v47 }
 0x24e   :  { %v5612_v32 = vpop.f32.mrf.mxu1  ;;  %v5688_v54 = vpop.f32.mrf.mxu0 }
 0x24f   :  { %v4102_v56 = vadd.f32 %v5611_v35, %v8028_v21 }
 0x250   :  { %v5613_v45 = vpop.f32.mrf.mxu1  ;;  %v5689_v4 = vpop.f32.mrf.mxu0 }
 0x251   :  { %v5614_v1 = vadd.f32 %v5613_v45, %v5612_v32  ;;  %v5690_v27 = vadd.f32 %v5689_v4, %v5688_v54  ;;  %v8082_v19 = vadd.f32 %v5681_v33, %v4102_v56 }
 0x252   :  { %v5615_v28 = vpop.f32.mrf.mxu1  ;;  %v5691_v61 = vpop.f32.mrf.mxu0 }
 0x253   :  { %v4105_v31 = vadd.f32 %v5614_v1, %v8031_v23 }
 0x254   :  { %v5616_v37 = vpop.f32.mrf.mxu1  ;;  %v5692_v46 = vpop.f32.mrf.mxu0 }
 0x255   :  { %v5617_v60 = vadd.f32 %v5616_v37, %v5615_v28  ;;  %v5693_v17 = vadd.f32 %v5692_v46, %v5691_v61  ;;  %v8085_v22 = vadd.f32 %v5684_v30, %v4105_v31 }
 0x256   :  { %v5618_v63 = vpop.f32.mrf.mxu1  ;;  %v5694_v18 = vpop.f32.mrf.mxu0 }
 0x257   :  { %v4110_v21 = vadd.f32 %v5617_v60, %v8034_v55 }
 0x258   :  { %v5619_v29 = vpop.f32.mrf.mxu1  ;;  %v5695_v3 = vpop.f32.mrf.mxu0 }
 0x259   :  { %v5620_v34 = vadd.f32 %v5619_v29, %v5618_v63  ;;  %v5696_v41 = vadd.f32 %v5695_v3, %v5694_v18  ;;  %v8088_v2 = vadd.f32 %v5687_v10, %v4110_v21 }
 0x25a   :  { %v5621_v43 = vpop.f32.mrf.mxu1  ;;  %v5697_v14 = vpop.f32.mrf.mxu0 }
 0x25b   :  { %v4113_v23 = vadd.f32 %v5620_v34, %v8037_v16 }
 0x25c   :  { %v5622_v0 = vpop.f32.mrf.mxu1  ;;  %v5698_v25 = vpop.f32.mrf.mxu0 }
 0x25d   :  { %v5623_v51 = vadd.f32 %v5622_v0, %v5621_v43  ;;  %v5699_v39 = vadd.f32 %v5698_v25, %v5697_v14  ;;  %v8091_v9 = vadd.f32 %v5690_v27, %v4113_v23 }
 0x25e   :  { %v5624_v24 = vpop.f32.mrf.mxu1  ;;  %v5700_v33 = vpop.f32.mrf.mxu0 }
 0x25f   :  { %v4118_v55 = vadd.f32 %v5623_v51, %v8040_v13 }
 0x260   :  { %v5625_v8 = vpop.f32.mrf.mxu1  ;;  %v5701_v40 = vpop.f32.mrf.mxu0 }
 0x261   :  { %v5626_v42 = vadd.f32 %v5625_v8, %v5624_v24  ;;  %v5702_v7 = vadd.f32 %v5701_v40, %v5700_v33  ;;  %v8094_v49 = vadd.f32 %v5693_v17, %v4118_v55 }
 0x262   :  { %v5627_v36 = vpop.f32.mrf.mxu1  ;;  %v5703_v30 = vpop.f32.mrf.mxu0 }
 0x263   :  { %v4121_v16 = vadd.f32 %v5626_v42, %v8043_v5 }
 0x264   :  { %v5628_v57 = vpop.f32.mrf.mxu1  ;;  %v5704_v52 = vpop.f32.mrf.mxu0 }
 0x265   :  { %v5629_v47 = vadd.f32 %v5628_v57, %v5627_v36  ;;  %v5705_v6 = vadd.f32 %v5704_v52, %v5703_v30  ;;  %v8097_v58 = vadd.f32 %v5696_v41, %v4121_v16 }
 0x266   :  { %v5630_v35 = vpop.f32.mrf.mxu1  ;;  %v5706_v10 = vpop.f32.mrf.mxu0 }
 0x267   :  { %v4126_v13 = vadd.f32 %v5629_v47, %v8046_v38 }
 0x268   :  { %v5631_v32 = vpop.f32.mrf.mxu1  ;;  %v5707_v54 = vpop.f32.mrf.mxu0 }
 0x269   :  { %v5632_v56 = vadd.f32 %v5631_v32, %v5630_v35  ;;  %v5708_v45 = vadd.f32 %v5707_v54, %v5706_v10  ;;  %v8100_v4 = vadd.f32 %v5699_v39, %v4126_v13 }
 0x26a   :  { %v5633_v1 = vpop.f32.mrf.mxu1  ;;  %v5795_v27 = vpop.f32.mrf.mxu0 }
 0x26b   :  { %v4129_v5 = vadd.f32 %v5632_v56, %v8049_v59 }
 0x26c   :  { %v5634_v28 = vpop.f32.mrf.mxu1  ;;  %v5796_v61 = vpop.f32.mrf.mxu0 }
 0x26d   :  { %v5635_v31 = vadd.f32 %v5634_v28, %v5633_v1  ;;  %v8103_v37 = vadd.f32 %v5702_v7, %v4129_v5  ;;  %v5797_v25 = vadd.f32 %v5796_v61, %v5795_v27 }
 0x26e   :  { %v5636_v46 = vpop.f32.mrf.mxu1  ;;  %v5798_v60 = vpop.f32.mrf.mxu0 }
 0x26f   :  { %v4134_v17 = vadd.f32 %v5635_v31, %v8052_v15 }
 0x270   :  { %v5637_v38 = vpop.f32.mrf.mxu1  ;;  %v5799_v63 = vpop.f32.mrf.mxu0 }
 0x271   :  { %v5638_v18 = vadd.f32 %v5637_v38, %v5636_v46  ;;  %v8106_v21 = vadd.f32 %v5705_v6, %v4134_v17  ;;  %v5800_v42 = vadd.f32 %v5799_v63, %v5798_v60 }
 0x272   :  { %v5725_v29 = vpop.f32.mrf.mxu1  ;;  %v5801_v3 = vpop.f32.mrf.mxu0 }
 0x273   :  { %v4137_v34 = vadd.f32 %v5638_v18, %v8055_v48 }
 0x274   :  { %v5726_v41 = vpop.f32.mrf.mxu1  ;;  %v5802_v59 = vpop.f32.mrf.mxu0 }
 0x275   :  { %v5727_v43 = vadd.f32 %v5726_v41, %v5725_v29  ;;  %v8109_v14 = vadd.f32 %v5708_v45, %v4137_v34  ;;  %v5803_v47 = vadd.f32 %v5802_v59, %v5801_v3 }
 0x276   :  { %v5728_v23 = vpop.f32.mrf.mxu1  ;;  %v5804_v0 = vpop.f32.mrf.mxu0 }
 0x277   :  { %v4280_v51 = vadd.f32 %v5727_v43, %v8058_v26 }
 0x278   :  { %v5729_v15 = vpop.f32.mrf.mxu1  ;;  %v5805_v39 = vpop.f32.mrf.mxu0 }
 0x279   :  { %v4385_v24 = vadd.f32 %v5797_v25, %v4280_v51  ;;  %v5730_v33 = vadd.f32 %v5729_v15, %v5728_v23  ;;  %v5806_v45 = vadd.f32 %v5805_v39, %v5804_v0 }
 0x27a   :  { %v5731_v55 = vpop.f32.mrf.mxu1  ;;  %v5807_v8 = vpop.f32.mrf.mxu0 }
 0x27b   :  { %v4455_v40 = vmax.f32 %v4385_v24, 0.0  ;;  %v4283_v48 = vadd.f32 %v5730_v33, %v8061_v53 }
 0x27c   :  { %v5732_v7 = vpop.f32.mrf.mxu1  ;;  %v5808_v36 = vpop.f32.mrf.mxu0 }
 0x27d   :  { %4474 = vst.msk [vmem:[%s8204_s3] sm:$0xff] %vm4473_vm0, %v4455_v40  ;;  %v4388_v30 = vadd.f32 %v5800_v42, %v4283_v48  ;;  %v5733_v26 = vadd.f32 %v5732_v7, %v5731_v55  ;;  %v5809_v60 = vadd.f32 %v5808_v36, %v5807_v8 }
 0x27e   :  { %v5734_v16 = vpop.f32.mrf.mxu1  ;;  %v5810_v57 = vpop.f32.mrf.mxu0 }
 0x27f   :  { %v4456_v52 = vmax.f32 %v4388_v30, 0.0  ;;  %v4288_v6 = vadd.f32 %v5733_v26, %v8064_v20 }
 0x280   :  { %v5735_v35 = vpop.f32.mrf.mxu1  ;;  %v5811_v10 = vpop.f32.mrf.mxu0 }
 0x281   :  { %4475 = vst.msk [vmem:[%s8204_s3 + $0x8] sm:$0xff] %vm4473_vm0, %v4456_v52  ;;  %v4393_v53 = vadd.f32 %v5803_v47, %v4288_v6  ;;  %v5736_v13 = vadd.f32 %v5735_v35, %v5734_v16  ;;  %v5812_v41 = vadd.f32 %v5811_v10, %v5810_v57 }
 0x282   :  { %v5737_v32 = vpop.f32.mrf.mxu1  ;;  %v5813_v54 = vpop.f32.mrf.mxu0 }
 0x283   :  { %v4457_v56 = vmax.f32 %v4393_v53, 0.0  ;;  %v4291_v1 = vadd.f32 %v5736_v13, %v8067_v12 }
 0x284   :  { %v5738_v27 = vpop.f32.mrf.mxu1  ;;  %v5814_v5 = vpop.f32.mrf.mxu0 }
 0x285   :  { %4476 = vst.msk [vmem:[%s8204_s3 + $0x10] sm:$0xff] %vm4473_vm0, %v4457_v56  ;;  %v4396_v20 = vadd.f32 %v5806_v45, %v4291_v1  ;;  %v5739_v28 = vadd.f32 %v5738_v27, %v5737_v32  ;;  %v5815_v39 = vadd.f32 %v5814_v5, %v5813_v54 }
 0x286   :  { %v5740_v61 = vpop.f32.mrf.mxu1  ;;  %v5816_v31 = vpop.f32.mrf.mxu0 }
 0x287   :  { %v4458_v46 = vmax.f32 %v4396_v20, 0.0  ;;  %v4296_v17 = vadd.f32 %v5739_v28, %v8070_v50 }
 0x288   :  { %v5741_v38 = vpop.f32.mrf.mxu1  ;;  %v5817_v63 = vpop.f32.mrf.mxu0 }
 0x289   :  { %4477 = vst.msk [vmem:[%s8204_s3 + $0x18] sm:$0xff] %vm4473_vm0, %v4458_v46  ;;  %v4401_v12 = vadd.f32 %v5809_v60, %v4296_v17  ;;  %v5742_v18 = vadd.f32 %v5741_v38, %v5740_v61  ;;  %v5818_v7 = vadd.f32 %v5817_v63, %v5816_v31 }
 0x28a   :  { %v5743_v29 = vpop.f32.mrf.mxu1  ;;  %v5819_v3 = vpop.f32.mrf.mxu0 }
 0x28b   :  { %v4459_v34 = vmax.f32 %v4401_v12, 0.0  ;;  %v4299_v59 = vadd.f32 %v5742_v18, %v8073_v62 }
 0x28c   :  { %v5744_v43 = vpop.f32.mrf.mxu1  ;;  %v5820_v23 = vpop.f32.mrf.mxu0 }
 0x28d   :  { %4478 = vst.msk [vmem:[%s8204_s3 + $0x20] sm:$0xff] %vm4473_vm0, %v4459_v34  ;;  %v4404_v50 = vadd.f32 %v5812_v41, %v4299_v59  ;;  %v5745_v0 = vadd.f32 %v5744_v43, %v5743_v29  ;;  %v5821_v6 = vadd.f32 %v5820_v23, %v5819_v3 }
 0x28e   :  { %v5746_v25 = vpop.f32.mrf.mxu1  ;;  %v5822_v51 = vpop.f32.mrf.mxu0 }
 0x28f   :  { %v4460_v15 = vmax.f32 %v4404_v50, 0.0  ;;  %v4304_v24 = vadd.f32 %v5745_v0, %v8076_v11 }
 0x290   :  { %v5747_v33 = vpop.f32.mrf.mxu1  ;;  %v5823_v55 = vpop.f32.mrf.mxu0 }
 0x291   :  { %4479 = vst.msk [vmem:[%s8204_s3 + $0x28] sm:$0xff] %vm4473_vm0, %v4460_v15  ;;  %v4409_v62 = vadd.f32 %v5815_v39, %v4304_v24  ;;  %v5748_v8 = vadd.f32 %v5747_v33, %v5746_v25  ;;  %v5824_v45 = vadd.f32 %v5823_v55, %v5822_v51 }
 0x292   :  { %v5749_v40 = vpop.f32.mrf.mxu1  ;;  %v5825_v42 = vpop.f32.mrf.mxu0 }
 0x293   :  { %v4461_v48 = vmax.f32 %v4409_v62, 0.0  ;;  %v4307_v36 = vadd.f32 %v5748_v8, %v8079_v44 }
 0x294   :  { %v5750_v30 = vpop.f32.mrf.mxu1  ;;  %v5826_v26 = vpop.f32.mrf.mxu0 }
 0x295   :  { %4480 = vst.msk [vmem:[%s8204_s3 + $0x30] sm:$0xff] %vm4473_vm0, %v4461_v48  ;;  %v4412_v11 = vadd.f32 %v5818_v7, %v4307_v36  ;;  %v5751_v16 = vadd.f32 %v5750_v30, %v5749_v40  ;;  %v5827_v46 = vadd.f32 %v5826_v26, %v5825_v42 }
 0x296   :  { %v5752_v57 = vpop.f32.mrf.mxu1  ;;  %v5828_v52 = vpop.f32.mrf.mxu0 }
 0x297   :  { %v4462_v47 = vmax.f32 %v4412_v11, 0.0  ;;  %v4312_v35 = vadd.f32 %v5751_v16, %v8082_v19 }
 0x298   :  { %v5753_v10 = vpop.f32.mrf.mxu1  ;;  %v5829_v53 = vpop.f32.mrf.mxu0 }
 0x299   :  { %4481 = vst.msk [vmem:[%s8204_s3 + $0x38] sm:$0xff] %vm4473_vm0, %v4462_v47  ;;  %v4417_v44 = vadd.f32 %v5821_v6, %v4312_v35  ;;  %v5754_v13 = vadd.f32 %v5753_v10, %v5752_v57  ;;  %v5830_v3 = vadd.f32 %v5829_v53, %v5828_v52 }
 0x29a   :  { %v5755_v32 = vpop.f32.mrf.mxu1  ;;  %v5831_v54 = vpop.f32.mrf.mxu0 }
 0x29b   :  { %v4463_v56 = vmax.f32 %v4417_v44, 0.0  ;;  %v4315_v1 = vadd.f32 %v5754_v13, %v8085_v22 }
 0x29c   :  { %v5756_v27 = vpop.f32.mrf.mxu1  ;;  %v5832_v5 = vpop.f32.mrf.mxu0 }
 0x29d   :  { %4482 = vst.msk [vmem:[%s8204_s3 + $0x40] sm:$0xff] %vm4473_vm0, %v4463_v56  ;;  %v4420_v19 = vadd.f32 %v5824_v45, %v4315_v1  ;;  %v5757_v20 = vadd.f32 %v5756_v27, %v5755_v32  ;;  %v5833_v25 = vadd.f32 %v5832_v5, %v5831_v54 }
 0x29e   :  { %v5758_v28 = vpop.f32.mrf.mxu1  ;;  %v5834_v61 = vpop.f32.mrf.mxu0 }
 0x29f   :  { %v4464_v31 = vmax.f32 %v4420_v19, 0.0  ;;  %v4320_v60 = vadd.f32 %v5757_v20, %v8088_v2 }
 0x2a0   :  { %v5759_v17 = vpop.f32.mrf.mxu1  ;;  %v5835_v38 = vpop.f32.mrf.mxu0 }
 0x2a1   :  { %4483 = vst.msk [vmem:[%s8204_s3 + $0x48] sm:$0xff] %vm4473_vm0, %v4464_v31  ;;  %v4425_v22 = vadd.f32 %v5827_v46, %v4320_v60  ;;  %v5760_v63 = vadd.f32 %v5759_v17, %v5758_v28  ;;  %v5836_v62 = vadd.f32 %v5835_v38, %v5834_v61 }
 0x2a2   :  { %v5761_v12 = vpop.f32.mrf.mxu1  ;;  %v5837_v18 = vpop.f32.mrf.mxu0 }
 0x2a3   :  { %v4465_v29 = vmax.f32 %v4425_v22, 0.0  ;;  %v4323_v34 = vadd.f32 %v5760_v63, %v8091_v9 }
 0x2a4   :  { %v5762_v41 = vpop.f32.mrf.mxu1  ;;  %v5838_v59 = vpop.f32.mrf.mxu0 }
 0x2a5   :  { %4484 = vst.msk [vmem:[%s8204_s3 + $0x50] sm:$0xff] %vm4473_vm0, %v4465_v29  ;;  %v4428_v2 = vadd.f32 %v5830_v3, %v4323_v34  ;;  %v5763_v43 = vadd.f32 %v5762_v41, %v5761_v12  ;;  %v5839_v30 = vadd.f32 %v5838_v59, %v5837_v18 }
 0x2a6   :  { %v5764_v23 = vpop.f32.mrf.mxu1  ;;  %v5840_v50 = vpop.f32.mrf.mxu0 }
 0x2a7   :  { %v4466_v0 = vmax.f32 %v4428_v2, 0.0  ;;  %v4328_v51 = vadd.f32 %v5763_v43, %v8094_v49 }
 0x2a8   :  { %v5765_v15 = vpop.f32.mrf.mxu1  ;;  %v5841_v39 = vpop.f32.mrf.mxu0 }
 0x2a9   :  { %4485 = vst.msk [vmem:[%s8204_s3 + $0x58] sm:$0xff] %vm4473_vm0, %v4466_v0  ;;  %v4433_v9 = vadd.f32 %v5833_v25, %v4328_v51  ;;  %v5766_v24 = vadd.f32 %v5765_v15, %v5764_v23  ;;  %v5842_v6 = vadd.f32 %v5841_v39, %v5840_v50 }
 0x2aa   :  { %v5767_v33 = vpop.f32.mrf.mxu1  ;;  %v5843_v42 = vpop.f32.mrf.mxu0 }
 0x2ab   :  { %v4467_v55 = vmax.f32 %v4433_v9, 0.0  ;;  %v4331_v8 = vadd.f32 %v5766_v24, %v8097_v58 }
 0x2ac   :  { %v5768_v40 = vpop.f32.mrf.mxu1  ;;  %v5844_v16 = vpop.f32.mrf.mxu0 }
 0x2ad   :  { %4486 = vst.msk [vmem:[%s8204_s3 + $0x60] sm:$0xff] %vm4473_vm0, %v4467_v55  ;;  %v4436_v49 = vadd.f32 %v5836_v62, %v4331_v8  ;;  %v5769_v48 = vadd.f32 %v5768_v40, %v5767_v33  ;;  %v5845_v54 = vadd.f32 %v5844_v16, %v5843_v42 }
 0x2ae   :  { %v5770_v7 = vpop.f32.mrf.mxu1  ;;  %v5846_v10 = vpop.f32.mrf.mxu0 }
 0x2af   :  { %v4468_v36 = vmax.f32 %v4436_v49, 0.0  ;;  %v4336_v26 = vadd.f32 %v5769_v48, %v8100_v4 }
 0x2b0   :  { %v5771_v11 = vpop.f32.mrf.mxu1  ;;  %v5847_v45 = vpop.f32.mrf.mxu0 }
 0x2b1   :  { %4487 = vst.msk [vmem:[%s8204_s3 + $0x68] sm:$0xff] %vm4473_vm0, %v4468_v36  ;;  %v4441_v58 = vadd.f32 %v5839_v30, %v4336_v26  ;;  %v5772_v57 = vadd.f32 %v5771_v11, %v5770_v7  ;;  %v5848_v19 = vadd.f32 %v5847_v45, %v5846_v10 }
 0x2b2   :  { %v5773_v52 = vpop.f32.mrf.mxu1 }
 0x2b3   :  { %v4469_v47 = vmax.f32 %v4441_v58, 0.0  ;;  %v4339_v35 = vadd.f32 %v5772_v57, %v8103_v37 }
 0x2b4   :  { %v5774_v53 = vpop.f32.mrf.mxu1 }
 0x2b5   :  { %4488 = vst.msk [vmem:[%s8204_s3 + $0x70] sm:$0xff] %vm4473_vm0, %v4469_v47  ;;  %v4444_v4 = vadd.f32 %v5842_v6, %v4339_v35  ;;  %v5775_v44 = vadd.f32 %v5774_v53, %v5773_v52 }
 0x2b6   :  { %v5776_v13 = vpop.f32.mrf.mxu1 }
 0x2b7   :  { %v4470_v32 = vmax.f32 %v4444_v4, 0.0  ;;  %v4344_v56 = vadd.f32 %v5775_v44, %v8106_v21 }
 0x2b8   :  { %v5777_v1 = vpop.f32.mrf.mxu1 }
 0x2b9   :  { %4489 = vst.msk [vmem:[%s8204_s3 + $0x78] sm:$0xff] %vm4473_vm0, %v4470_v32  ;;  %v4449_v37 = vadd.f32 %v5845_v54, %v4344_v56  ;;  %v5778_v27 = vadd.f32 %v5777_v1, %v5776_v13 }
 0x2bb   :  { %v4471_v5 = vmax.f32 %v4449_v37, 0.0  ;;  %v4347_v20 = vadd.f32 %v5778_v27, %v8109_v14 }
 0x2bd   :  { %4490 = vst.msk [vmem:[%s8204_s3 + $0x80] sm:$0xff] %vm4473_vm0, %v4471_v5  ;;  %v4452_v28 = vadd.f32 %v5848_v19, %v4347_v20 }
 0x2bf   :  { %v4472_v21 = vmax.f32 %v4452_v28, 0.0 }
 0x2c1   :  { %4491 = vst.msk [vmem:[%s8204_s3 + $0x88] sm:$0xff] %vm4473_vm0, %v4472_v21 }

</bundles_post_ra>
